<compile_context>
chip_gen: v6e
topology: v6e:2x2x1
jax: 0.10.0
libtpu: 0.0.40
codegen_flags: <defaults>
</compile_context>

<pallas_src>
import numpy as np
import jax
import jax.numpy as jnp
from jax.experimental import pallas as pl
from jax.experimental.pallas import tpu as pltpu

HIDDEN = 1000           # fixed by the module
NEG_SLOPE = 0.2
BN_EPS = 1e-5


def _round_up(x, m):
    return (x + m - 1) // m * m


def _disc_kernel(x_ref,
                 w1_ref, b1_ref,
                 w2_ref, b2_ref,
                 w3_ref, b3_ref,
                 w4_ref, b4_ref,
                 out_ref):
    """One batch tile through the whole MLP: 3 bf16 MXU matmuls + VPU/XLU tail."""

    def leaky(h):
        # LeakyReLU(0.2): max(h, 0.2*h) is exact for slope < 1.
        return jnp.maximum(h, NEG_SLOPE * h)

    def dense(h_f32, w_ref, b_ref):
        # bf16 x bf16 matmul with f32 accumulation (native MXU path);
        # bias add + activation stay in f32.
        return jnp.dot(h_f32.astype(jnp.bfloat16), w_ref[...],
                       preferred_element_type=jnp.float32) + b_ref[...]

    x = x_ref[...]

    # Layer 1: Linear (+ folded BatchNorm) -> LeakyReLU   (Dropout eval = id)
    h = leaky(dense(x, w1_ref, b1_ref))

    # Layer 2: Linear (+ folded BatchNorm) -> LeakyReLU
    h = leaky(dense(h, w2_ref, b2_ref))

    # Layer 3: Linear -> LeakyReLU
    h = leaky(dense(h, w3_ref, b3_ref))

    # Layer 4: Linear(1000, 1) as broadcast multiply + lane reduction (XLU).
    out = jnp.sum(h * w4_ref[...].astype(jnp.float32),
                  axis=-1, keepdims=True) + b4_ref[...]
    out_ref[...] = out


def prepare_params(params):
    """One-time parameter prep (do NOT call per forward):
    fold eval-mode BatchNorm into the Linear weights/biases, zero-pad to
    TPU-friendly shapes and cast the weight matrices to bf16."""
    f32 = jnp.float32
    bf16 = jnp.bfloat16

    in_dim = params["w1"].shape[0]
    in_pad = _round_up(in_dim, 128)
    hid_pad = _round_up(HIDDEN, 128)     # 1024

    def fold_bn(w, b, gamma, beta, mean, var):
        # y = x@W + b ; z = (y-mean)/sqrt(var+eps)*gamma + beta
        #   = x @ (W*s) + (b*s + (beta - mean*s)),  s = gamma/sqrt(var+eps)
        s = gamma / jnp.sqrt(var + BN_EPS)
        return w * s[None, :], b * s + (beta - mean * s)

    w1, b1 = fold_bn(params["w1"], params["b1"], params["bn1_gamma"],
                     params["bn1_beta"], params["bn1_mean"], params["bn1_var"])
    w2, b2 = fold_bn(params["w2"], params["b2"], params["bn2_gamma"],
                     params["bn2_beta"], params["bn2_mean"], params["bn2_var"])
    w3, b3 = params["w3"], params["b3"]

    def pad_w(w, rows, cols):
        out = jnp.zeros((rows, cols), bf16)
        return out.at[:w.shape[0], :w.shape[1]].set(w.astype(bf16))

    def pad_row(v, cols, dtype):
        out = jnp.zeros((1, cols), dtype)
        return out.at[0, :v.shape[0]].set(v.astype(dtype))

    return {
        "in_dim": in_dim,
        "w1": pad_w(w1, in_pad, hid_pad), "b1": pad_row(b1, hid_pad, f32),
        "w2": pad_w(w2, hid_pad, hid_pad), "b2": pad_row(b2, hid_pad, f32),
        "w3": pad_w(w3, hid_pad, hid_pad), "b3": pad_row(b3, hid_pad, f32),
        # Final layer as a bf16 row vector -> broadcast-mul + lane reduction.
        "w4t": pad_row(params["w4"][:, 0], hid_pad, bf16),
        "b4": params["b4"].reshape(1, 1).astype(f32),
    }


def discriminator_forward(returns, condition, prepared):
    """returns: (B, C, H, W) f32, condition: (B, cond_dim) f32 -> (B, 1) f32."""
    B = returns.shape[0]
    x = jnp.concatenate([returns.reshape(B, -1), condition],
                        axis=1).astype(jnp.float32)
    in_dim = x.shape[1]
    assert in_dim == prepared["in_dim"]

    in_pad = prepared["w1"].shape[0]
    hid_pad = prepared["w2"].shape[0]

    # Batch tiling: small batches -> single tile; large batches -> 256-row
    # tiles (fills the MXU, weights DMA'd once and reused across tiles,
    # parallel axis lets multi-TensorCore chips split the batch).
    bm = min(256, _round_up(B, 8))
    b_pad = _round_up(B, bm)
    grid = (b_pad // bm,)

    xp = jnp.pad(x, ((0, b_pad - B), (0, in_pad - in_dim)))

    def resident(shape):
        # Constant block index -> no re-DMA across batch tiles.
        return pl.BlockSpec(shape, lambda i: (0, 0))

    out = pl.pallas_call(
        _disc_kernel,
        out_shape=jax.ShapeDtypeStruct((b_pad, 1), jnp.float32),
        grid=grid,
        in_specs=[
            pl.BlockSpec((bm, in_pad), lambda i: (i, 0)),           # x tile
            resident((in_pad, hid_pad)), resident((1, hid_pad)),    # w1, b1
            resident((hid_pad, hid_pad)), resident((1, hid_pad)),   # w2, b2
            resident((hid_pad, hid_pad)), resident((1, hid_pad)),   # w3, b3
            resident((1, hid_pad)), resident((1, 1)),               # w4t, b4
        ],
        out_specs=pl.BlockSpec((bm, 1), lambda i: (i, 0)),
        compiler_params=pltpu.CompilerParams(
            dimension_semantics=("parallel",),
            vmem_limit_bytes=40 << 20,
        ),
    )(xp,
      prepared["w1"], prepared["b1"],
      prepared["w2"], prepared["b2"],
      prepared["w3"], prepared["b3"],
      prepared["w4t"], prepared["b4"])

    return out[:B, :]


def init_params(key, input_dim):
    """Deterministic init, PyTorch-Linear-style uniform bounds."""
    dims = [(input_dim, HIDDEN), (HIDDEN, HIDDEN), (HIDDEN, HIDDEN), (HIDDEN, 1)]
    params = {}
    keys = jax.random.split(key, 2 * len(dims) + 4)
    for i, (fan_in, fan_out) in enumerate(dims):
        bound = 1.0 / np.sqrt(fan_in)
        params[f"w{i+1}"] = jax.random.uniform(
            keys[2 * i], (fan_in, fan_out), jnp.float32, -bound, bound)
        params[f"b{i+1}"] = jax.random.uniform(
            keys[2 * i + 1], (fan_out,), jnp.float32, -bound, bound)
    params["bn1_gamma"] = 1.0 + 0.1 * jax.random.normal(keys[-4], (HIDDEN,), jnp.float32)
    params["bn1_beta"] = 0.05 * jax.random.normal(keys[-3], (HIDDEN,), jnp.float32)
    params["bn1_mean"] = jnp.zeros((HIDDEN,), jnp.float32)
    params["bn1_var"] = jnp.ones((HIDDEN,), jnp.float32)
    params["bn2_gamma"] = 1.0 + 0.1 * jax.random.normal(keys[-2], (HIDDEN,), jnp.float32)
    params["bn2_beta"] = 0.05 * jax.random.normal(keys[-1], (HIDDEN,), jnp.float32)
    params["bn2_mean"] = jnp.zeros((HIDDEN,), jnp.float32)
    params["bn2_var"] = jnp.ones((HIDDEN,), jnp.float32)
    return params


def reference_forward(returns, condition, params):
    """Pure-JAX reference of the original f32 module (eval mode)."""
    B = returns.shape[0]
    x = jnp.concatenate([returns.reshape(B, -1), condition], axis=1).astype(jnp.float32)

    def leaky(h):
        return jnp.where(h > 0, h, NEG_SLOPE * h)

    def bn(h, g, b, m, v):
        return (h - m) / jnp.sqrt(v + BN_EPS) * g + b

    h = x @ params["w1"] + params["b1"]
    h = leaky(bn(h, params["bn1_gamma"], params["bn1_beta"],
                 params["bn1_mean"], params["bn1_var"]))
    h = h @ params["w2"] + params["b2"]
    h = leaky(bn(h, params["bn2_gamma"], params["bn2_beta"],
                 params["bn2_mean"], params["bn2_var"]))
    h = leaky(h @ params["w3"] + params["b3"])
    return h @ params["w4"] + params["b4"]


def reference_forward_prepared(returns, condition, prepared):
    """Pure-JAX reference replicating the exact kernel arithmetic
    (same folded/padded bf16 weights, bf16 x bf16 matmuls, f32 accumulate)."""
    B = returns.shape[0]
    x = jnp.concatenate([returns.reshape(B, -1), condition], axis=1).astype(jnp.float32)
    in_pad = prepared["w1"].shape[0]
    xp = jnp.pad(x, ((0, 0), (0, in_pad - x.shape[1])))

    def leaky(h):
        return jnp.maximum(h, NEG_SLOPE * h)

    def dense(h, w, b):
        return jnp.dot(h.astype(jnp.bfloat16), w,
                       preferred_element_type=jnp.float32) + b

    h = leaky(dense(xp, prepared["w1"], prepared["b1"]))
    h = leaky(dense(h, prepared["w2"], prepared["b2"]))
    h = leaky(dense(h, prepared["w3"], prepared["b3"]))
    return jnp.sum(h * prepared["w4t"].astype(jnp.float32),
                   axis=-1, keepdims=True) + prepared["b4"]


if __name__ == "__main__":
    key = jax.random.PRNGKey(0)
    k_ret, k_cond, k_par = jax.random.split(key, 3)

    # Small shapes: input_shape = (C, H, W) = (4, 8, 8), cond_dim = 16, batch = 2.
    B, C, H, W = 2, 4, 8, 8
    cond_dim = 16
    input_dim = C * H * W + cond_dim

    returns = jax.random.normal(k_ret, (B, C, H, W), jnp.float32)
    condition = jax.random.normal(k_cond, (B, cond_dim), jnp.float32)
    params = init_params(k_par, input_dim)

    # Parameter prep happens once, outside the forward path.
    prepared = prepare_params(params)

    validity = discriminator_forward(returns, condition, prepared)
    validity = jax.block_until_ready(validity)
    assert validity.shape == (B, 1)

    # 1) Tight check against a reference using the exact same folded bf16
    #    weights and bf16 matmul arithmetic.
    ref_same = reference_forward_prepared(returns, condition, prepared)
    np.testing.assert_allclose(np.asarray(validity), np.asarray(ref_same),
                               rtol=1e-3, atol=1e-3)

    # 2) Looser check against the original f32 module (bf16 weight storage
    #    and bf16 MXU inputs => ~1% expected deviation).
    ref_f32 = reference_forward(returns, condition, params)
    np.testing.assert_allclose(np.asarray(validity), np.asarray(ref_f32),
                               rtol=1e-1, atol=1e-1)

    print("KERNEL_OK")
</pallas_src>

<mosaic_0001>
module attributes {stable_mosaic.version = 11 : i64} {
  func.func @_disc_kernel(%arg0: i32, %arg1: memref<8x384xf32, #tpu.memory_space<vmem>>, %arg2: memref<384x1024xbf16, #tpu.memory_space<vmem>>, %arg3: memref<1x1024xf32, #tpu.memory_space<vmem>>, %arg4: memref<1024x1024xbf16, #tpu.memory_space<vmem>>, %arg5: memref<1x1024xf32, #tpu.memory_space<vmem>>, %arg6: memref<1024x1024xbf16, #tpu.memory_space<vmem>>, %arg7: memref<1x1024xf32, #tpu.memory_space<vmem>>, %arg8: memref<1x1024xbf16, #tpu.memory_space<vmem>>, %arg9: memref<1x1xf32, #tpu.memory_space<vmem>>, %arg10: memref<8x1xf32, #tpu.memory_space<vmem>>) attributes {dimension_semantics = [#tpu.dimension_semantics<parallel>], iteration_bounds = array<i64: 1>, scalar_prefetch = 0 : i64, scratch_operands = 0 : i64, tpu.core_type = #tpu.core_type<tc>, window_params = [{transform_indices = @transform_0, window_bounds = array<i64: 8, 384>}, {pipeline_mode = #tpu.pipeline_mode<synchronous>, transform_indices = @transform_1, window_bounds = array<i64: 384, 1024>}, {pipeline_mode = #tpu.pipeline_mode<synchronous>, transform_indices = @transform_2, window_bounds = array<i64: 1, 1024>}, {pipeline_mode = #tpu.pipeline_mode<synchronous>, transform_indices = @transform_3, window_bounds = array<i64: 1024, 1024>}, {pipeline_mode = #tpu.pipeline_mode<synchronous>, transform_indices = @transform_4, window_bounds = array<i64: 1, 1024>}, {pipeline_mode = #tpu.pipeline_mode<synchronous>, transform_indices = @transform_5, window_bounds = array<i64: 1024, 1024>}, {pipeline_mode = #tpu.pipeline_mode<synchronous>, transform_indices = @transform_6, window_bounds = array<i64: 1, 1024>}, {pipeline_mode = #tpu.pipeline_mode<synchronous>, transform_indices = @transform_7, window_bounds = array<i64: 1, 1024>}, {pipeline_mode = #tpu.pipeline_mode<synchronous>, transform_indices = @transform_8, window_bounds = array<i64: 1, 1>}, {transform_indices = @transform_9, window_bounds = array<i64: 8, 1>}]} {
    %c0 = arith.constant 0 : index
    %c0_0 = arith.constant 0 : index
    %0 = vector.load %arg1[%c0, %c0_0] : memref<8x384xf32, #tpu.memory_space<vmem>>, vector<8x384xf32>
    %1 = arith.truncf %0 : vector<8x384xf32> to vector<8x384xbf16>
    %c0_1 = arith.constant 0 : index
    %c0_2 = arith.constant 0 : index
    %2 = vector.load %arg2[%c0_1, %c0_2] : memref<384x1024xbf16, #tpu.memory_space<vmem>>, vector<384x1024xbf16>
    %cst = arith.constant dense<0.000000e+00> : vector<8x1024xf32>
    %3 = tpu.matmul %1, %2, %cst {dimension_numbers = #tpu.dot_dimension_numbers<[1], [0], [0], [1], [0, 0, 1, 1], [], []>} : vector<8x384xbf16>, vector<384x1024xbf16>, vector<8x1024xf32> -> vector<8x1024xf32>
    %c0_3 = arith.constant 0 : index
    %c0_4 = arith.constant 0 : index
    %4 = vector.load %arg3[%c0_3, %c0_4] : memref<1x1024xf32, #tpu.memory_space<vmem>>, vector<1x1024xf32>
    %5 = vector.broadcast %4 : vector<1x1024xf32> to vector<8x1024xf32>
    %6 = arith.addf %3, %5 : vector<8x1024xf32>
    %cst_5 = arith.constant 2.000000e-01 : f32
    %7 = vector.broadcast %cst_5 : f32 to vector<8x1024xf32>
    %8 = arith.mulf %7, %6 : vector<8x1024xf32>
    %9 = arith.maximumf %6, %8 : vector<8x1024xf32>
    %10 = arith.truncf %9 : vector<8x1024xf32> to vector<8x1024xbf16>
    %c0_6 = arith.constant 0 : index
    %c0_7 = arith.constant 0 : index
    %11 = vector.load %arg4[%c0_6, %c0_7] : memref<1024x1024xbf16, #tpu.memory_space<vmem>>, vector<1024x1024xbf16>
    %cst_8 = arith.constant dense<0.000000e+00> : vector<8x1024xf32>
    %12 = tpu.matmul %10, %11, %cst_8 {dimension_numbers = #tpu.dot_dimension_numbers<[1], [0], [0], [1], [0, 0, 1, 1], [], []>} : vector<8x1024xbf16>, vector<1024x1024xbf16>, vector<8x1024xf32> -> vector<8x1024xf32>
    %c0_9 = arith.constant 0 : index
    %c0_10 = arith.constant 0 : index
    %13 = vector.load %arg5[%c0_9, %c0_10] : memref<1x1024xf32, #tpu.memory_space<vmem>>, vector<1x1024xf32>
    %14 = vector.broadcast %13 : vector<1x1024xf32> to vector<8x1024xf32>
    %15 = arith.addf %12, %14 : vector<8x1024xf32>
    %cst_11 = arith.constant 2.000000e-01 : f32
    %16 = vector.broadcast %cst_11 : f32 to vector<8x1024xf32>
    %17 = arith.mulf %16, %15 : vector<8x1024xf32>
    %18 = arith.maximumf %15, %17 : vector<8x1024xf32>
    %19 = arith.truncf %18 : vector<8x1024xf32> to vector<8x1024xbf16>
    %c0_12 = arith.constant 0 : index
    %c0_13 = arith.constant 0 : index
    %20 = vector.load %arg6[%c0_12, %c0_13] : memref<1024x1024xbf16, #tpu.memory_space<vmem>>, vector<1024x1024xbf16>
    %cst_14 = arith.constant dense<0.000000e+00> : vector<8x1024xf32>
    %21 = tpu.matmul %19, %20, %cst_14 {dimension_numbers = #tpu.dot_dimension_numbers<[1], [0], [0], [1], [0, 0, 1, 1], [], []>} : vector<8x1024xbf16>, vector<1024x1024xbf16>, vector<8x1024xf32> -> vector<8x1024xf32>
    %c0_15 = arith.constant 0 : index
    %c0_16 = arith.constant 0 : index
    %22 = vector.load %arg7[%c0_15, %c0_16] : memref<1x1024xf32, #tpu.memory_space<vmem>>, vector<1x1024xf32>
    %23 = vector.broadcast %22 : vector<1x1024xf32> to vector<8x1024xf32>
    %24 = arith.addf %21, %23 : vector<8x1024xf32>
    %cst_17 = arith.constant 2.000000e-01 : f32
    %25 = vector.broadcast %cst_17 : f32 to vector<8x1024xf32>
    %26 = arith.mulf %25, %24 : vector<8x1024xf32>
    %27 = arith.maximumf %24, %26 : vector<8x1024xf32>
    %c0_18 = arith.constant 0 : index
    %c0_19 = arith.constant 0 : index
    %28 = vector.load %arg8[%c0_18, %c0_19] : memref<1x1024xbf16, #tpu.memory_space<vmem>>, vector<1x1024xbf16>
    %29 = arith.extf %28 : vector<1x1024xbf16> to vector<1x1024xf32>
    %30 = vector.broadcast %29 : vector<1x1024xf32> to vector<8x1024xf32>
    %31 = arith.mulf %27, %30 : vector<8x1024xf32>
    %cst_20 = arith.constant dense<0.000000e+00> : vector<8xf32>
    %32 = vector.multi_reduction <add>, %31, %cst_20 [1] : vector<8x1024xf32> to vector<8xf32>
    %33 = vector.shape_cast %32 : vector<8xf32> to vector<8x1xf32>
    %c0_21 = arith.constant 0 : index
    %c0_22 = arith.constant 0 : index
    %34 = vector.load %arg9[%c0_21, %c0_22] : memref<1x1xf32, #tpu.memory_space<vmem>>, vector<1x1xf32>
    %35 = vector.broadcast %34 : vector<1x1xf32> to vector<8x1xf32>
    %36 = arith.addf %33, %35 : vector<8x1xf32>
    %c0_23 = arith.constant 0 : index
    %c0_24 = arith.constant 0 : index
    %37 = vector.load %arg10[%c0_23, %c0_24] : memref<8x1xf32, #tpu.memory_space<vmem>>, vector<8x1xf32>
    tpu.vector_store %arg10[%c0_23, %c0_24], %36 {strides = array<i32>} : memref<8x1xf32, #tpu.memory_space<vmem>>, vector<8x1xf32>,
    return
  }
  func.func @transform_0(%arg0: i32) -> (i32, i32) {
    %c0_i32 = arith.constant 0 : i32
    %c0_i32_0 = arith.constant 0 : i32
    return %arg0, %c0_i32 : i32, i32
  }
  func.func @transform_1(%arg0: i32) -> (i32, i32) {
    %c0_i32 = arith.constant 0 : i32
    %c0_i32_0 = arith.constant 0 : i32
    %c0_i32_1 = arith.constant 0 : i32
    return %c0_i32, %c0_i32_0 : i32, i32
  }
  func.func @transform_2(%arg0: i32) -> (i32, i32) {
    %c0_i32 = arith.constant 0 : i32
    %c0_i32_0 = arith.constant 0 : i32
    %c0_i32_1 = arith.constant 0 : i32
    return %c0_i32, %c0_i32_0 : i32, i32
  }
  func.func @transform_3(%arg0: i32) -> (i32, i32) {
    %c0_i32 = arith.constant 0 : i32
    %c0_i32_0 = arith.constant 0 : i32
    %c0_i32_1 = arith.constant 0 : i32
    return %c0_i32, %c0_i32_0 : i32, i32
  }
  func.func @transform_4(%arg0: i32) -> (i32, i32) {
    %c0_i32 = arith.constant 0 : i32
    %c0_i32_0 = arith.constant 0 : i32
    %c0_i32_1 = arith.constant 0 : i32
    return %c0_i32, %c0_i32_0 : i32, i32
  }
  func.func @transform_5(%arg0: i32) -> (i32, i32) {
    %c0_i32 = arith.constant 0 : i32
    %c0_i32_0 = arith.constant 0 : i32
    %c0_i32_1 = arith.constant 0 : i32
    return %c0_i32, %c0_i32_0 : i32, i32
  }
  func.func @transform_6(%arg0: i32) -> (i32, i32) {
    %c0_i32 = arith.constant 0 : i32
    %c0_i32_0 = arith.constant 0 : i32
    %c0_i32_1 = arith.constant 0 : i32
    return %c0_i32, %c0_i32_0 : i32, i32
  }
  func.func @transform_7(%arg0: i32) -> (i32, i32) {
    %c0_i32 = arith.constant 0 : i32
    %c0_i32_0 = arith.constant 0 : i32
    %c0_i32_1 = arith.constant 0 : i32
    return %c0_i32, %c0_i32_0 : i32, i32
  }
  func.func @transform_8(%arg0: i32) -> (i32, i32) {
    %c0_i32 = arith.constant 0 : i32
    %c0_i32_0 = arith.constant 0 : i32
    %c0_i32_1 = arith.constant 0 : i32
    return %c0_i32, %c0_i32_0 : i32, i32
  }
  func.func @transform_9(%arg0: i32) -> (i32, i32) {
    %c0_i32 = arith.constant 0 : i32
    %c0_i32_0 = arith.constant 0 : i32
    return %arg0, %c0_i32 : i32, i32
  }
}

</mosaic_0001>

<bundles_post_ra>
// kernel: tpu_custom_call.1
= control target key start
LH: loop header
LB: loop body
LE: loop exit
PB: predicated region body
PF: predicated region fallthrough
CT: control target
= control target key end

     0   :  { %s11278_s0 = inlined_call_operand.hbm [shape: f32[8,384], index: 0, kind: input, shape index: {}]   ;;  %s11279_s1 = inlined_call_operand.hbm [shape: bf16[384,1024], index: 1, kind: input, shape index: {}]   ;;  %s11280_s2 = inlined_call_operand.hbm [shape: f32[1,1024], index: 2, kind: input, shape index: {}]   ;;  %s11281_s3 = inlined_call_operand.hbm [shape: bf16[1024,1024], index: 3, kind: input, shape index: {}]   ;;  %s11282_s4 = inlined_call_operand.hbm [shape: f32[1,1024], index: 4, kind: input, shape index: {}]   ;;  %s11283_s5 = inlined_call_operand.hbm [shape: bf16[1024,1024], index: 5, kind: input, shape index: {}]   ;;  %s11284_s6 = inlined_call_operand.hbm [shape: f32[1,1024], index: 6, kind: input, shape index: {}]   ;;  %s11285_s7 = inlined_call_operand.hbm [shape: bf16[1,1024], index: 7, kind: input, shape index: {}]   ;;  %s11286_s8 = inlined_call_operand.<no memory space> [shape: f32[1,1], index: 8, kind: input, shape index: {}]   ;;  %s11287_s9 = inlined_call_operand.vmem [shape: f32[8,1], index: 9, kind: output, shape index: {}]  }
   0x1   :  { %v14_v0 = vstv %s11286_s8 }
   0x2   :  { %15 = vst [vmem:[#allocation2] sm:$0x1] %v14_v0 }
   0x3   :  { %16 = vsyncpa [#allocation4], 0 }
   0x4   :  { %17 = vsyncpa [#allocation6], 0 }
   0x5   :  { %18 = vsyncpa [#allocation9], 0 }
   0x6   :  { %19 = vsyncpa [#allocation12], 0 }
   0x7   :  { %20 = vsyncpa [#allocation15], 0  ;;  %s10780_s11 = smov [#allocation5]  }
   0x8   :  { %s36_s12 = sshll.u32 %s10780_s11, 4  ;;  %s37_s12 = int_to_ptr.vmem [resolvable:$true] %s36_s12 }
   0x9   :  { %s10618_s13 = scalar_lea.vmem %s37_s12, 24576  ;;  %p10623_p1 = scmp.lt.s32.totalorder %s37_s12, %s37_s12 }
   0xa   :  { %p10619_p0 = scmp.ne.s32.totalorder %s37_s12, %s10618_s13  ;;  %p10624_p2 = scmp.lt.s32.totalorder %s10618_s13, %s10618_s13 }
   0xc   :  { %p10625_p3 = por %p10624_p2, %p10623_p1 }
   0xe   :  { %p10626_p4 = pnand %p10625_p3, %p10619_p0 }
  0x10   :  { %10629 = shalt.err (!%p10626_p4)
}
  0x11   :  { %s10781_s14 = smov 512   ;;  %s10782_s15 = smov 32  }
  0x12   :  { %42 = dma.hbm_to_vmem [thread:$0]  %s11279_s1, 24576, %s37_s12, [#allocation6], %s10781_s14, %s10781_s14, %s10782_s15  }
  0x13   :  { %s10783_s17 = smov [#allocation8]   ;;  %s10784_s19 = smov [#allocation11]  }
  0x14   :  { %s58_s18 = sshll.u32 %s10783_s17, 4  ;;  %s80_s20 = sshll.u32 %s10784_s19, 4  ;;  %s59_s18 = int_to_ptr.vmem [resolvable:$true] %s58_s18  ;;  %s81_s20 = int_to_ptr.vmem [resolvable:$true] %s80_s20 }
  0x15   :  { %s10638_s21 = scalar_lea.vmem %s59_s18, 65536  ;;  %p10643_p6 = scmp.lt.s32.totalorder %s59_s18, %s59_s18 }
  0x16   :  { %p10639_p5 = scmp.ne.s32.totalorder %s59_s18, %s10638_s21  ;;  %p10644_p7 = scmp.lt.s32.totalorder %s10638_s21, %s10638_s21 }
  0x18   :  { %p10645_p8 = por %p10644_p7, %p10643_p6 }
  0x1a   :  { %p10646_p9 = pnand %p10645_p8, %p10639_p5 }
  0x1c   :  { %10649 = shalt.err (!%p10646_p9)
}
  0x1d   :  { %64 = dma.hbm_to_vmem [thread:$0]  %s11281_s3, 65536, %s59_s18, [#allocation9], %s10781_s14, %s10781_s14, %s10782_s15  }
  0x1e   :  { %s10658_s24 = scalar_lea.vmem %s81_s20, 65536  ;;  %p10663_p11 = scmp.lt.s32.totalorder %s81_s20, %s81_s20 }
  0x1f   :  { %p10659_p10 = scmp.ne.s32.totalorder %s81_s20, %s10658_s24  ;;  %p10664_p12 = scmp.lt.s32.totalorder %s10658_s24, %s10658_s24 }
  0x21   :  { %p10665_p13 = por %p10664_p12, %p10663_p11 }
  0x23   :  { %p10666_p0 = pnand %p10665_p13, %p10659_p10 }
  0x25   :  { %10669 = shalt.err (!%p10666_p0)
}
  0x26   :  { %86 = dma.hbm_to_vmem [thread:$0]  %s11283_s5, 65536, %s81_s20, [#allocation12], %s10781_s14, %s10781_s14, %s10782_s15  }
  0x27   :  { %s10785_s26 = smov [#allocation3]   ;;  %s10786_s28 = smov [#allocation7]  }
  0x28   :  { %s27_s27 = sshll.u32 %s10785_s26, 4  ;;  %s49_s29 = sshll.u32 %s10786_s28, 4  ;;  %s28_s27 = int_to_ptr.vmem [resolvable:$true] %s27_s27  ;;  %s50_s29 = int_to_ptr.vmem [resolvable:$true] %s49_s29 }
  0x29   :  { %s10678_s30 = scalar_lea.vmem %s28_s27, 384  ;;  %p10683_p2 = scmp.lt.s32.totalorder %s28_s27, %s28_s27 }
  0x2a   :  { %p10679_p1 = scmp.ne.s32.totalorder %s28_s27, %s10678_s30  ;;  %p10684_p3 = scmp.lt.s32.totalorder %s10678_s30, %s10678_s30 }
  0x2c   :  { %p10685_p4 = por %p10684_p3, %p10683_p2 }
  0x2e   :  { %p10686_p5 = pnand %p10685_p4, %p10679_p1 }
  0x30   :  { %10689 = shalt.err (!%p10686_p5)
}
  0x31   :  { %30 = dma.hbm_to_vmem [thread:$0]  %s11278_s0, 384, %s28_s27, [#allocation4]  }
  0x32   :  { %s10698_s11 = scalar_lea.vmem %s50_s29, 128  ;;  %p10703_p7 = scmp.lt.s32.totalorder %s50_s29, %s50_s29 }
  0x33   :  { %p10699_p6 = scmp.ne.s32.totalorder %s50_s29, %s10698_s11  ;;  %p10704_p8 = scmp.lt.s32.totalorder %s10698_s11, %s10698_s11 }
  0x35   :  { %p10705_p9 = por %p10704_p8, %p10703_p7 }
  0x37   :  { %p10706_p10 = pnand %p10705_p9, %p10699_p6 }
  0x39   :  { %10709 = shalt.err (!%p10706_p10)
}
  0x3a   :  { %52 = dma.hbm_to_vmem [thread:$0]  %s11280_s2, 128, %s50_s29, [#allocation6]  }
  0x3b   :  { %s10787_s13 = smov [#allocation10]   ;;  %s10788_s15 = smov [#allocation13]  }
  0x3c   :  { %s71_s14 = sshll.u32 %s10787_s13, 4  ;;  %s93_s16 = sshll.u32 %s10788_s15, 4  ;;  %s72_s14 = int_to_ptr.vmem [resolvable:$true] %s71_s14  ;;  %s94_s16 = int_to_ptr.vmem [resolvable:$true] %s93_s16 }
  0x3d   :  { %s10718_s8 = scalar_lea.vmem %s72_s14, 128  ;;  %p10723_p12 = scmp.lt.s32.totalorder %s72_s14, %s72_s14 }
  0x3e   :  { %p10719_p11 = scmp.ne.s32.totalorder %s72_s14, %s10718_s8  ;;  %p10724_p13 = scmp.lt.s32.totalorder %s10718_s8, %s10718_s8 }
  0x40   :  { %p10725_p0 = por %p10724_p13, %p10723_p12 }
  0x42   :  { %p10726_p1 = pnand %p10725_p0, %p10719_p11 }
  0x44   :  { %10729 = shalt.err (!%p10726_p1)
}
  0x45   :  { %74 = dma.hbm_to_vmem [thread:$0]  %s11282_s4, 128, %s72_s14, [#allocation9]  }
  0x46   :  { %s10738_s18 = scalar_lea.vmem %s94_s16, 128  ;;  %p10743_p3 = scmp.lt.s32.totalorder %s94_s16, %s94_s16 }
  0x47   :  { %p10739_p2 = scmp.ne.s32.totalorder %s94_s16, %s10738_s18  ;;  %p10744_p4 = scmp.lt.s32.totalorder %s10738_s18, %s10738_s18 }
  0x49   :  { %p10745_p5 = por %p10744_p4, %p10743_p3 }
  0x4b   :  { %p10746_p6 = pnand %p10745_p5, %p10739_p2 }
  0x4d   :  { %10749 = shalt.err (!%p10746_p6)
}
  0x4e   :  { %96 = dma.hbm_to_vmem [thread:$0]  %s11284_s6, 128, %s94_s16, [#allocation12]  }
  0x4f   :  { %s10789_s20 = smov [#allocation14]  }
  0x50   :  { %s103_s21 = sshll.u32 %s10789_s20, 4  ;;  %s104_s21 = int_to_ptr.vmem [resolvable:$true] %s103_s21 }
  0x51   :  { %s10758_s22 = scalar_lea.vmem %s104_s21, 128  ;;  %p10763_p8 = scmp.lt.s32.totalorder %s104_s21, %s104_s21 }
  0x52   :  { %p10759_p7 = scmp.ne.s32.totalorder %s104_s21, %s10758_s22  ;;  %p10764_p9 = scmp.lt.s32.totalorder %s10758_s22, %s10758_s22 }
  0x54   :  { %p10765_p10 = por %p10764_p9, %p10763_p8 }
  0x56   :  { %p10766_p11 = pnand %p10765_p10, %p10759_p7 }
  0x58   :  { %10769 = shalt.err (!%p10766_p11)
}
  0x59   :  { %106 = dma.hbm_to_vmem [thread:$0]  %s11285_s7, 128, %s104_s21, [#allocation15]  }
  0x5a   :  { %10770 = dma.done.wait [#allocation4], 384  }
  0x5b   :  { %10771 = vsyncadd [#allocation4], 4294966912 }
  0x5c   :  { %10772 = dma.done.wait [#allocation6], 24704  }
  0x5d   :  { %10773 = vsyncadd [#allocation6], 4294942592 }
  0x5e   :  { %10774 = dma.done.wait [#allocation9], 65664  }
  0x5f   :  { %10775 = vsyncadd [#allocation9], 4294901632 }
  0x60   :  { %10776 = dma.done.wait [#allocation12], 65664  }
  0x61   :  { %10777 = vsyncadd [#allocation12], 4294901632 }
  0x62   :  { %10778 = dma.done.wait [#allocation15], 128  }
  0x63   :  { %10779 = vsyncadd [#allocation15], 4294967168  ;;  %v10790_v1 = vmov 0   ;;  %v196_v2 = vld [vmem:[#allocation5 + $0x1c0] sm:$0xff]  ;;  %v135_v55 = vld [vmem:[#allocation3 + $0x8] sm:$0xff]  ;;  %vm9368_vm0 = vcmask 7168  }
  0x64   :  { %1407 = vmatprep.mubr.bf16.mxu1 %v10790_v1  ;;  %v200_v3 = vld [vmem:[#allocation5 + $0x1e0] sm:$0xff]  ;;  %v10869_v59 = vpack.c.bf16 %v135_v55, %v135_v55  ;;  %v149_v55 = vld [vmem:[#allocation5 + $0x48] sm:$0xff] }
  0x65   :  { %v324_v4 = vld [vmem:[#allocation5 + $0x5c0] sm:$0xff]  ;;  %v9436_v5 = vcombine.high %v196_v2, %v200_v3  ;;  %v9435_v7 = vcombine.low %v196_v2, %v200_v3 }
  0x66   :  { %v328_v6 = vld [vmem:[#allocation5 + $0x5e0] sm:$0xff]  ;;  %1366 = vmatprep.mubr.bf16.mxu0 %v10869_v59 }
  0x67   :  { %v188_v8 = vld [vmem:[#allocation5 + $0x180] sm:$0xff]  ;;  %v9564_v10 = vcombine.high %v324_v4, %v328_v6  ;;  %v9563_v11 = vcombine.low %v324_v4, %v328_v6  ;;  %1334 = vmatprep.subr.bf16.mxu0 %v9436_v5  ;;  %v197_v5 = vld [vmem:[#allocation5 + $0x1c8] sm:$0xff] }
  0x68   :  { %v192_v9 = vld [vmem:[#allocation5 + $0x1a0] sm:$0xff]  ;;  %1335 = vmatpush1.bf16.msra.mxu0 %v9435_v7  ;;  %v201_v6 = vld [vmem:[#allocation5 + $0x1e8] sm:$0xff] }
  0x69   :  { %v9428_v12 = vcombine.high %v188_v8, %v192_v9  ;;  %v316_v13 = vld [vmem:[#allocation5 + $0x580] sm:$0xff]  ;;  %1375 = vmatprep.subr.bf16.mxu1 %v9564_v10  ;;  %v9427_v20 = vcombine.low %v188_v8, %v192_v9  ;;  %v136_v10 = vld [vmem:[#allocation3 + $0x10] sm:$0xff] }
  0x6a   :  { %v320_v14 = vld [vmem:[#allocation5 + $0x5a0] sm:$0xff]  ;;  %1376 = vmatpush1.bf16.msra.mxu1 %v9563_v11  ;;  %v9438_v11 = vcombine.high %v197_v5, %v201_v6 }
  0x6b   :  { %v180_v15 = vld [vmem:[#allocation5 + $0x140] sm:$0xff]  ;;  %v9556_v16 = vcombine.high %v316_v13, %v320_v14  ;;  %1336 = vmatprep.subr.bf16.mxu0 %v9428_v12  ;;  %v9555_v21 = vcombine.low %v316_v13, %v320_v14  ;;  %v189_v14 = vld [vmem:[#allocation5 + $0x188] sm:$0xff] }
  0x6c   :  { %v184_v17 = vld [vmem:[#allocation5 + $0x160] sm:$0xff]  ;;  %1337 = vmatpush1.bf16.msra.mxu0 %v9427_v20 }
  0x6d   :  { %v308_v18 = vld [vmem:[#allocation5 + $0x540] sm:$0xff]  ;;  %v9420_v22 = vcombine.high %v180_v15, %v184_v17  ;;  %1377 = vmatprep.subr.bf16.mxu1 %v9556_v16  ;;  %v9419_v28 = vcombine.low %v180_v15, %v184_v17  ;;  %v193_v15 = vld [vmem:[#allocation5 + $0x1a8] sm:$0xff]  ;;  %v10872_v16 = vpack.c.bf16 %v136_v10, %v136_v10 }
  0x6e   :  { %v312_v19 = vld [vmem:[#allocation5 + $0x560] sm:$0xff]  ;;  %1378 = vmatpush1.bf16.msra.mxu1 %v9555_v21  ;;  %v9430_v20 = vcombine.high %v189_v14, %v193_v15  ;;  %v265_v10 = vld [vmem:[#allocation5 + $0x3e8] sm:$0xff] }
  0x6f   :  { %v9548_v23 = vcombine.high %v308_v18, %v312_v19  ;;  %v172_v24 = vld [vmem:[#allocation5 + $0x100] sm:$0xff]  ;;  %1338 = vmatprep.subr.bf16.mxu0 %v9420_v22  ;;  %v9547_v29 = vcombine.low %v308_v18, %v312_v19  ;;  %v9437_v18 = vcombine.low %v197_v5, %v201_v6 }
  0x70   :  { %v176_v25 = vld [vmem:[#allocation5 + $0x120] sm:$0xff]  ;;  %1339 = vmatpush1.bf16.msra.mxu0 %v9419_v28 }
  0x71   :  { %v300_v26 = vld [vmem:[#allocation5 + $0x500] sm:$0xff]  ;;  %v9412_v30 = vcombine.high %v172_v24, %v176_v25  ;;  %1379 = vmatprep.subr.bf16.mxu1 %v9548_v23  ;;  %v9411_v36 = vcombine.low %v172_v24, %v176_v25  ;;  %v181_v23 = vld [vmem:[#allocation5 + $0x148] sm:$0xff] }
  0x72   :  { %v304_v27 = vld [vmem:[#allocation5 + $0x520] sm:$0xff]  ;;  %1380 = vmatpush1.bf16.msra.mxu1 %v9547_v29  ;;  %v185_v24 = vld [vmem:[#allocation5 + $0x168] sm:$0xff] }
  0x73   :  { %v9540_v31 = vcombine.high %v300_v26, %v304_v27  ;;  %v164_v32 = vld [vmem:[#allocation5 + $0xc0] sm:$0xff]  ;;  %1340 = vmatprep.subr.bf16.mxu0 %v9412_v30  ;;  %v9539_v37 = vcombine.low %v300_v26, %v304_v27  ;;  %v9429_v26 = vcombine.low %v189_v14, %v193_v15  ;;  %v9422_v28 = vcombine.high %v181_v23, %v185_v24 }
  0x74   :  { %v168_v33 = vld [vmem:[#allocation5 + $0xe0] sm:$0xff]  ;;  %1341 = vmatpush1.bf16.msra.mxu0 %v9411_v36 }
  0x75   :  { %v292_v34 = vld [vmem:[#allocation5 + $0x4c0] sm:$0xff]  ;;  %v9404_v38 = vcombine.high %v164_v32, %v168_v33  ;;  %1381 = vmatprep.subr.bf16.mxu1 %v9540_v31  ;;  %v9403_v44 = vcombine.low %v164_v32, %v168_v33  ;;  %v173_v31 = vld [vmem:[#allocation5 + $0x108] sm:$0xff] }
  0x76   :  { %v296_v35 = vld [vmem:[#allocation5 + $0x4e0] sm:$0xff]  ;;  %1382 = vmatpush1.bf16.msra.mxu1 %v9539_v37  ;;  %v177_v32 = vld [vmem:[#allocation5 + $0x128] sm:$0xff] }
  0x77   :  { %v9532_v39 = vcombine.high %v292_v34, %v296_v35  ;;  %v156_v40 = vld [vmem:[#allocation5 + $0x80] sm:$0xff]  ;;  %1342 = vmatprep.subr.bf16.mxu0 %v9404_v38  ;;  %v9531_v45 = vcombine.low %v292_v34, %v296_v35  ;;  %v9421_v34 = vcombine.low %v181_v23, %v185_v24  ;;  %v9414_v36 = vcombine.high %v173_v31, %v177_v32 }
  0x78   :  { %v160_v41 = vld [vmem:[#allocation5 + $0xa0] sm:$0xff]  ;;  %1343 = vmatpush1.bf16.msra.mxu0 %v9403_v44 }
  0x79   :  { %v284_v42 = vld [vmem:[#allocation5 + $0x480] sm:$0xff]  ;;  %v9396_v46 = vcombine.high %v156_v40, %v160_v41  ;;  %1383 = vmatprep.subr.bf16.mxu1 %v9532_v39  ;;  %v9395_v52 = vcombine.low %v156_v40, %v160_v41  ;;  %v165_v39 = vld [vmem:[#allocation5 + $0xc8] sm:$0xff] }
  0x7a   :  { %v288_v43 = vld [vmem:[#allocation5 + $0x4a0] sm:$0xff]  ;;  %1384 = vmatpush1.bf16.msra.mxu1 %v9531_v45  ;;  %v169_v40 = vld [vmem:[#allocation5 + $0xe8] sm:$0xff] }
  0x7b   :  { %v9524_v47 = vcombine.high %v284_v42, %v288_v43  ;;  %v148_v48 = vld [vmem:[#allocation5 + $0x40] sm:$0xff]  ;;  %1344 = vmatprep.subr.bf16.mxu0 %v9396_v46  ;;  %v9523_v53 = vcombine.low %v284_v42, %v288_v43  ;;  %v9413_v42 = vcombine.low %v173_v31, %v177_v32  ;;  %v9406_v44 = vcombine.high %v165_v39, %v169_v40 }
  0x7c   :  { %v152_v49 = vld [vmem:[#allocation5 + $0x60] sm:$0xff]  ;;  %1345 = vmatpush1.bf16.msra.mxu0 %v9395_v52 }
  0x7d   :  { %v276_v50 = vld [vmem:[#allocation5 + $0x440] sm:$0xff]  ;;  %v9388_v54 = vcombine.high %v148_v48, %v152_v49  ;;  %1385 = vmatprep.subr.bf16.mxu1 %v9524_v47  ;;  %v9387_v62 = vcombine.low %v148_v48, %v152_v49  ;;  %v157_v47 = vld [vmem:[#allocation5 + $0x88] sm:$0xff] }
  0x7e   :  { %v280_v51 = vld [vmem:[#allocation5 + $0x460] sm:$0xff]  ;;  %1386 = vmatpush1.bf16.msra.mxu1 %v9523_v53  ;;  %v161_v48 = vld [vmem:[#allocation5 + $0xa8] sm:$0xff] }
  0x7f   :  { %v9516_v56 = vcombine.high %v276_v50, %v280_v51  ;;  %v140_v57 = vld [vmem:[#allocation5] sm:$0xff]  ;;  %1346 = vmatprep.subr.bf16.mxu0 %v9388_v54  ;;  %v9515_v63 = vcombine.low %v276_v50, %v280_v51  ;;  %v9405_v50 = vcombine.low %v165_v39, %v169_v40  ;;  %v9398_v52 = vcombine.high %v157_v47, %v161_v48 }
  0x80   :  { %v144_v58 = vld [vmem:[#allocation5 + $0x20] sm:$0xff]  ;;  %1347 = vmatpush1.bf16.msra.mxu0 %v9387_v62 }
  0x81   :  { %v268_v60 = vld [vmem:[#allocation5 + $0x400] sm:$0xff]  ;;  %v9380_v0 = vcombine.high %v140_v57, %v144_v58  ;;  %1387 = vmatprep.subr.bf16.mxu1 %v9516_v56  ;;  %v9379_v7 = vcombine.low %v140_v57, %v144_v58  ;;  %v153_v56 = vld [vmem:[#allocation5 + $0x68] sm:$0xff]  ;;  %v9397_v58 = vcombine.low %v157_v47, %v161_v48 }
  0x82   :  { %v272_v61 = vld [vmem:[#allocation5 + $0x420] sm:$0xff]  ;;  %1388 = vmatpush1.bf16.msra.mxu1 %v9515_v63 }
  0x83   :  { %v9508_v2 = vcombine.high %v268_v60, %v272_v61  ;;  %v260_v3 = vld [vmem:[#allocation5 + $0x3c0] sm:$0xff]  ;;  %1348 = vmatprep.subr.bf16.mxu0 %v9380_v0  ;;  %v9507_v8 = vcombine.low %v268_v60, %v272_v61  ;;  %v9390_v61 = vcombine.high %v149_v55, %v153_v56  ;;  %v141_v0 = vld [vmem:[#allocation5 + $0x8] sm:$0xff] }
  0x84   :  { %v264_v4 = vld [vmem:[#allocation5 + $0x3e0] sm:$0xff]  ;;  %1349 = vmatpush1.bf16.msra.mxu0 %v9379_v7  ;;  %v325_v7 = vld [vmem:[#allocation5 + $0x5c8] sm:$0xff] }
  0x85   :  { %v9500_v9 = vcombine.high %v260_v3, %v264_v4  ;;  %1389 = vmatprep.subr.bf16.mxu1 %v9508_v2  ;;  %v252_v12 = vld [vmem:[#allocation5 + $0x380] sm:$0xff]  ;;  %v9499_v17 = vcombine.low %v260_v3, %v264_v4  ;;  %v145_v2 = vld [vmem:[#allocation5 + $0x28] sm:$0xff]  ;;  %v9389_v4 = vcombine.low %v149_v55, %v153_v56 }
  0x86   :  { %v256_v13 = vld [vmem:[#allocation5 + $0x3a0] sm:$0xff]  ;;  %1390 = vmatpush1.bf16.msra.mxu1 %v9507_v8  ;;  %v9382_v6 = vcombine.high %v141_v0, %v145_v2  ;;  %v329_v8 = vld [vmem:[#allocation5 + $0x5e8] sm:$0xff] }
  0x87   :  { %1350 = vmatprep.subr.bf16.mxu0 %v9500_v9  ;;  %v9492_v19 = vcombine.high %v252_v12, %v256_v13  ;;  %1416 = vmatprep.subr.bf16.mxu1 %v9438_v11  ;;  %v244_v21 = vld [vmem:[#allocation5 + $0x340] sm:$0xff]  ;;  %v9491_v25 = vcombine.low %v252_v12, %v256_v13  ;;  %v261_v9 = vld [vmem:[#allocation5 + $0x3c8] sm:$0xff]  ;;  %v9381_v13 = vcombine.low %v141_v0, %v145_v2 }
  0x88   :  { %v248_v22 = vld [vmem:[#allocation5 + $0x360] sm:$0xff]  ;;  %1351 = vmatpush2.bf16.msra.mxu0 %v9499_v17  ;;  %v134_v12 = vld [vmem:[#allocation3] sm:$0xff]  ;;  %v9566_v14 = vcombine.high %v325_v7, %v329_v8  ;;  %v9502_v15 = vcombine.high %v261_v9, %v265_v10  ;;  %v9501_v23 = vcombine.low %v261_v9, %v265_v10 }
  0x89   :  { %1408 = vmatmul.mubr.bf16.vlgmr.msra.gmra.mxu1 %v10872_v16  ;;  %1352 = vmatprep.subr.bf16.mxu0 %v9492_v19  ;;  %v9484_v27 = vcombine.high %v244_v21, %v248_v22  ;;  %v236_v29 = vld [vmem:[#allocation5 + $0x300] sm:$0xff]  ;;  %v9483_v33 = vcombine.low %v244_v21, %v248_v22  ;;  %v317_v17 = vld [vmem:[#allocation5 + $0x588] sm:$0xff]  ;;  %v10876_v19 = vpack.c.bf16 %v134_v12, %v134_v12  ;;  %v198_v12 = vld [vmem:[#allocation5 + $0x1d0] sm:$0xff] }
  0x8a   :  { %1417 = vmatpush1.bf16.msra.mxu1 %v9437_v18  ;;  %v240_v30 = vld [vmem:[#allocation5 + $0x320] sm:$0xff]  ;;  %1448 = vmatprep.mubr.bf16.mxu1 %v10869_v59  ;;  %v321_v18 = vld [vmem:[#allocation5 + $0x5a8] sm:$0xff]  ;;  %v9565_v22 = vcombine.low %v325_v7, %v329_v8 }
  0x8b   :  { %1418 = vmatprep.subr.bf16.mxu1 %v9430_v20  ;;  %v9476_v35 = vcombine.high %v236_v29, %v240_v30  ;;  %v228_v37 = vld [vmem:[#allocation5 + $0x2c0] sm:$0xff]  ;;  %v9475_v41 = vcombine.low %v236_v29, %v240_v30  ;;  %v253_v20 = vld [vmem:[#allocation5 + $0x388] sm:$0xff]  ;;  %v9558_v24 = vcombine.high %v317_v17, %v321_v18  ;;  %v9557_v30 = vcombine.low %v317_v17, %v321_v18 }
  0x8c   :  { %1353 = vmatpush2.bf16.msra.mxu0 %v9491_v25  ;;  %v232_v38 = vld [vmem:[#allocation5 + $0x2e0] sm:$0xff]  ;;  %v257_v21 = vld [vmem:[#allocation5 + $0x3a8] sm:$0xff] }
  0x8d   :  { %1354 = vmatprep.subr.bf16.mxu0 %v9484_v27  ;;  %v9468_v43 = vcombine.high %v228_v37, %v232_v38  ;;  %v220_v45 = vld [vmem:[#allocation5 + $0x280] sm:$0xff]  ;;  %v9467_v49 = vcombine.low %v228_v37, %v232_v38  ;;  %v9494_v25 = vcombine.high %v253_v20, %v257_v21  ;;  %v313_v27 = vld [vmem:[#allocation5 + $0x568] sm:$0xff]  ;;  %v9493_v31 = vcombine.low %v253_v20, %v257_v21 }
  0x8e   :  { %1419 = vmatpush1.bf16.msra.mxu1 %v9429_v26  ;;  %v224_v46 = vld [vmem:[#allocation5 + $0x2a0] sm:$0xff]  ;;  %v309_v26 = vld [vmem:[#allocation5 + $0x548] sm:$0xff] }
  0x8f   :  { %1420 = vmatprep.subr.bf16.mxu1 %v9422_v28  ;;  %v9460_v51 = vcombine.high %v220_v45, %v224_v46  ;;  %v212_v53 = vld [vmem:[#allocation5 + $0x240] sm:$0xff]  ;;  %v9459_v57 = vcombine.low %v220_v45, %v224_v46  ;;  %v245_v28 = vld [vmem:[#allocation5 + $0x348] sm:$0xff]  ;;  %v9550_v32 = vcombine.high %v309_v26, %v313_v27  ;;  %v9549_v38 = vcombine.low %v309_v26, %v313_v27 }
  0x90   :  { %1355 = vmatpush2.bf16.msra.mxu0 %v9483_v33  ;;  %v216_v54 = vld [vmem:[#allocation5 + $0x260] sm:$0xff]  ;;  %v249_v29 = vld [vmem:[#allocation5 + $0x368] sm:$0xff] }
  0x91   :  { %1356 = vmatprep.subr.bf16.mxu0 %v9476_v35  ;;  %v9452_v60 = vcombine.high %v212_v53, %v216_v54  ;;  %v204_v62 = vld [vmem:[#allocation5 + $0x200] sm:$0xff]  ;;  %v9451_v3 = vcombine.low %v212_v53, %v216_v54  ;;  %v9486_v33 = vcombine.high %v245_v28, %v249_v29  ;;  %v305_v35 = vld [vmem:[#allocation5 + $0x528] sm:$0xff]  ;;  %v9485_v39 = vcombine.low %v245_v28, %v249_v29 }
  0x92   :  { %1421 = vmatpush1.bf16.msra.mxu1 %v9421_v34  ;;  %v208_v63 = vld [vmem:[#allocation5 + $0x220] sm:$0xff]  ;;  %v301_v34 = vld [vmem:[#allocation5 + $0x508] sm:$0xff] }
  0x93   :  { %1422 = vmatprep.subr.bf16.mxu1 %v9414_v36  ;;  %v9444_v5 = vcombine.high %v204_v62, %v208_v63  ;;  %v9443_v11 = vcombine.low %v204_v62, %v208_v63  ;;  %v237_v36 = vld [vmem:[#allocation5 + $0x308] sm:$0xff]  ;;  %v9542_v40 = vcombine.high %v301_v34, %v305_v35  ;;  %v9541_v46 = vcombine.low %v301_v34, %v305_v35 }
  0x94   :  { %1357 = vmatpush2.bf16.msra.mxu0 %v9475_v41  ;;  %v241_v37 = vld [vmem:[#allocation5 + $0x328] sm:$0xff] }
  0x95   :  { %1358 = vmatprep.subr.bf16.mxu0 %v9468_v43  ;;  %v9478_v41 = vcombine.high %v237_v36, %v241_v37  ;;  %v297_v43 = vld [vmem:[#allocation5 + $0x4e8] sm:$0xff]  ;;  %v9477_v47 = vcombine.low %v237_v36, %v241_v37 }
  0x96   :  { %1423 = vmatpush1.bf16.msra.mxu1 %v9413_v42  ;;  %v293_v42 = vld [vmem:[#allocation5 + $0x4c8] sm:$0xff] }
  0x97   :  { %1424 = vmatprep.subr.bf16.mxu1 %v9406_v44  ;;  %v229_v44 = vld [vmem:[#allocation5 + $0x2c8] sm:$0xff]  ;;  %v9534_v48 = vcombine.high %v293_v42, %v297_v43  ;;  %v9533_v54 = vcombine.low %v293_v42, %v297_v43 }
  0x98   :  { %1359 = vmatpush2.bf16.msra.mxu0 %v9467_v49  ;;  %v233_v45 = vld [vmem:[#allocation5 + $0x2e8] sm:$0xff] }
  0x99   :  { %1360 = vmatprep.subr.bf16.mxu0 %v9460_v51  ;;  %v9470_v49 = vcombine.high %v229_v44, %v233_v45  ;;  %v289_v51 = vld [vmem:[#allocation5 + $0x4a8] sm:$0xff]  ;;  %v9469_v55 = vcombine.low %v229_v44, %v233_v45 }
  0x9a   :  { %1425 = vmatpush1.bf16.msra.mxu1 %v9405_v50  ;;  %v285_v50 = vld [vmem:[#allocation5 + $0x488] sm:$0xff] }
  0x9b   :  { %1426 = vmatprep.subr.bf16.mxu1 %v9398_v52  ;;  %v221_v52 = vld [vmem:[#allocation5 + $0x288] sm:$0xff]  ;;  %v9526_v56 = vcombine.high %v285_v50, %v289_v51  ;;  %v9525_v63 = vcombine.low %v285_v50, %v289_v51 }
  0x9c   :  { %1361 = vmatpush2.bf16.msra.mxu0 %v9459_v57  ;;  %v225_v53 = vld [vmem:[#allocation5 + $0x2a8] sm:$0xff] }
  0x9d   :  { %1362 = vmatprep.subr.bf16.mxu0 %v9452_v60  ;;  %v9462_v57 = vcombine.high %v221_v52, %v225_v53  ;;  %v281_v60 = vld [vmem:[#allocation5 + $0x468] sm:$0xff]  ;;  %v9461_v0 = vcombine.low %v221_v52, %v225_v53 }
  0x9e   :  { %1427 = vmatpush1.bf16.msra.mxu1 %v9397_v58  ;;  %v277_v58 = vld [vmem:[#allocation5 + $0x448] sm:$0xff] }
  0x9f   :  { %1428 = vmatprep.subr.bf16.mxu1 %v9390_v61  ;;  %v213_v61 = vld [vmem:[#allocation5 + $0x248] sm:$0xff]  ;;  %v9518_v2 = vcombine.high %v277_v58, %v281_v60  ;;  %v9517_v8 = vcombine.low %v277_v58, %v281_v60 }
  0xa0   :  { %1363 = vmatpush2.bf16.msra.mxu0 %v9451_v3  ;;  %v217_v62 = vld [vmem:[#allocation5 + $0x268] sm:$0xff] }
  0xa1   :  { %1364 = vmatprep.subr.bf16.mxu0 %v9444_v5  ;;  %v9454_v3 = vcombine.high %v213_v61, %v217_v62  ;;  %v273_v5 = vld [vmem:[#allocation5 + $0x428] sm:$0xff]  ;;  %v9453_v9 = vcombine.low %v213_v61, %v217_v62 }
  0xa2   :  { %1429 = vmatpush1.bf16.msra.mxu1 %v9389_v4  ;;  %v269_v4 = vld [vmem:[#allocation5 + $0x408] sm:$0xff] }
  0xa3   :  { %1430 = vmatprep.subr.bf16.mxu1 %v9382_v6  ;;  %v205_v6 = vld [vmem:[#allocation5 + $0x208] sm:$0xff]  ;;  %v9510_v10 = vcombine.high %v269_v4, %v273_v5  ;;  %v9509_v17 = vcombine.low %v269_v4, %v273_v5 }
  0xa4   :  { %1365 = vmatpush2.bf16.msra.mxu0 %v9443_v11  ;;  %v209_v7 = vld [vmem:[#allocation5 + $0x228] sm:$0xff] }
  0xa5   :  { %1457 = vmatprep.subr.bf16.mxu0 %v9566_v14  ;;  %v9446_v11 = vcombine.high %v205_v6, %v209_v7  ;;  %v326_v14 = vld [vmem:[#allocation5 + $0x5d0] sm:$0xff]  ;;  %v9445_v18 = vcombine.low %v205_v6, %v209_v7 }
  0xa6   :  { %1431 = vmatpush1.bf16.msra.mxu1 %v9381_v13  ;;  %v202_v13 = vld [vmem:[#allocation5 + $0x1f0] sm:$0xff] }
  0xa7   :  { %1432 = vmatprep.subr.bf16.mxu1 %v9502_v15  ;;  %1367 = vmatmul.mubr.bf16.vlgmr.msra.gmra.mxu0 %v10876_v19  ;;  %v330_v15 = vld [vmem:[#allocation5 + $0x5f0] sm:$0xff]  ;;  %v9440_v20 = vcombine.high %v198_v12, %v202_v13  ;;  %v9439_v26 = vcombine.low %v198_v12, %v202_v13 }
  0xa8   :  { %1458 = vmatpush1.bf16.msra.mxu0 %v9565_v22  ;;  %1489 = vmatprep.mubr.bf16.mxu0 %v10790_v1  ;;  %v9568_v21 = vcombine.high %v326_v14, %v330_v15  ;;  %v190_v22 = vld [vmem:[#allocation5 + $0x190] sm:$0xff]  ;;  %v9567_v27 = vcombine.low %v326_v14, %v330_v15 }
  0xa9   :  { %1459 = vmatprep.subr.bf16.mxu0 %v9558_v24  ;;  %v318_v24 = vld [vmem:[#allocation5 + $0x590] sm:$0xff] }
  0xaa   :  { %1433 = vmatpush2.bf16.msra.mxu1 %v9501_v23  ;;  %v194_v23 = vld [vmem:[#allocation5 + $0x1b0] sm:$0xff] }
  0xab   :  { %1434 = vmatprep.subr.bf16.mxu1 %v9494_v25  ;;  %v322_v25 = vld [vmem:[#allocation5 + $0x5b0] sm:$0xff]  ;;  %v9432_v28 = vcombine.high %v190_v22, %v194_v23  ;;  %v9431_v34 = vcombine.low %v190_v22, %v194_v23 }
  0xac   :  { %1460 = vmatpush1.bf16.msra.mxu0 %v9557_v30  ;;  %v9560_v29 = vcombine.high %v318_v24, %v322_v25  ;;  %v182_v30 = vld [vmem:[#allocation5 + $0x150] sm:$0xff]  ;;  %v9559_v35 = vcombine.low %v318_v24, %v322_v25 }
  0xad   :  { %1461 = vmatprep.subr.bf16.mxu0 %v9550_v32  ;;  %v310_v32 = vld [vmem:[#allocation5 + $0x550] sm:$0xff] }
  0xae   :  { %1435 = vmatpush2.bf16.msra.mxu1 %v9493_v31  ;;  %v186_v31 = vld [vmem:[#allocation5 + $0x170] sm:$0xff] }
  0xaf   :  { %1436 = vmatprep.subr.bf16.mxu1 %v9486_v33  ;;  %v314_v33 = vld [vmem:[#allocation5 + $0x570] sm:$0xff]  ;;  %v9424_v36 = vcombine.high %v182_v30, %v186_v31  ;;  %v9423_v42 = vcombine.low %v182_v30, %v186_v31 }
  0xb0   :  { %1462 = vmatpush1.bf16.msra.mxu0 %v9549_v38  ;;  %v9552_v37 = vcombine.high %v310_v32, %v314_v33  ;;  %v174_v38 = vld [vmem:[#allocation5 + $0x110] sm:$0xff]  ;;  %v9551_v43 = vcombine.low %v310_v32, %v314_v33 }
  0xb1   :  { %1463 = vmatprep.subr.bf16.mxu0 %v9542_v40  ;;  %v302_v40 = vld [vmem:[#allocation5 + $0x510] sm:$0xff] }
  0xb2   :  { %1437 = vmatpush2.bf16.msra.mxu1 %v9485_v39  ;;  %v178_v39 = vld [vmem:[#allocation5 + $0x130] sm:$0xff] }
  0xb3   :  { %1438 = vmatprep.subr.bf16.mxu1 %v9478_v41  ;;  %v306_v41 = vld [vmem:[#allocation5 + $0x530] sm:$0xff]  ;;  %v9416_v44 = vcombine.high %v174_v38, %v178_v39  ;;  %v9415_v50 = vcombine.low %v174_v38, %v178_v39 }
  0xb4   :  { %1464 = vmatpush1.bf16.msra.mxu0 %v9541_v46  ;;  %v9544_v45 = vcombine.high %v302_v40, %v306_v41  ;;  %v166_v46 = vld [vmem:[#allocation5 + $0xd0] sm:$0xff]  ;;  %v9543_v51 = vcombine.low %v302_v40, %v306_v41 }
  0xb5   :  { %1465 = vmatprep.subr.bf16.mxu0 %v9534_v48  ;;  %v294_v48 = vld [vmem:[#allocation5 + $0x4d0] sm:$0xff] }
  0xb6   :  { %1439 = vmatpush2.bf16.msra.mxu1 %v9477_v47  ;;  %v170_v47 = vld [vmem:[#allocation5 + $0xf0] sm:$0xff] }
  0xb7   :  { %1440 = vmatprep.subr.bf16.mxu1 %v9470_v49  ;;  %v298_v49 = vld [vmem:[#allocation5 + $0x4f0] sm:$0xff]  ;;  %v9408_v52 = vcombine.high %v166_v46, %v170_v47  ;;  %v9407_v58 = vcombine.low %v166_v46, %v170_v47 }
  0xb8   :  { %1466 = vmatpush1.bf16.msra.mxu0 %v9533_v54  ;;  %v9536_v53 = vcombine.high %v294_v48, %v298_v49  ;;  %v158_v54 = vld [vmem:[#allocation5 + $0x90] sm:$0xff]  ;;  %v9535_v60 = vcombine.low %v294_v48, %v298_v49 }
  0xb9   :  { %1467 = vmatprep.subr.bf16.mxu0 %v9526_v56  ;;  %v286_v56 = vld [vmem:[#allocation5 + $0x490] sm:$0xff] }
  0xba   :  { %1441 = vmatpush2.bf16.msra.mxu1 %v9469_v55  ;;  %v162_v55 = vld [vmem:[#allocation5 + $0xb0] sm:$0xff] }
  0xbb   :  { %1442 = vmatprep.subr.bf16.mxu1 %v9462_v57  ;;  %v290_v57 = vld [vmem:[#allocation5 + $0x4b0] sm:$0xff]  ;;  %v9400_v61 = vcombine.high %v158_v54, %v162_v55  ;;  %v9399_v4 = vcombine.low %v158_v54, %v162_v55 }
  0xbc   :  { %1468 = vmatpush1.bf16.msra.mxu0 %v9525_v63  ;;  %v9528_v62 = vcombine.high %v286_v56, %v290_v57  ;;  %v150_v63 = vld [vmem:[#allocation5 + $0x50] sm:$0xff]  ;;  %v9527_v5 = vcombine.low %v286_v56, %v290_v57 }
  0xbd   :  { %1469 = vmatprep.subr.bf16.mxu0 %v9518_v2  ;;  %v278_v2 = vld [vmem:[#allocation5 + $0x450] sm:$0xff] }
  0xbe   :  { %1443 = vmatpush2.bf16.msra.mxu1 %v9461_v0  ;;  %v154_v0 = vld [vmem:[#allocation5 + $0x70] sm:$0xff] }
  0xbf   :  { %1444 = vmatprep.subr.bf16.mxu1 %v9454_v3  ;;  %v282_v3 = vld [vmem:[#allocation5 + $0x470] sm:$0xff]  ;;  %v9392_v6 = vcombine.high %v150_v63, %v154_v0  ;;  %v9391_v12 = vcombine.low %v150_v63, %v154_v0 }
  0xc0   :  { %1470 = vmatpush1.bf16.msra.mxu0 %v9517_v8  ;;  %v9520_v7 = vcombine.high %v278_v2, %v282_v3  ;;  %v142_v8 = vld [vmem:[#allocation5 + $0x10] sm:$0xff]  ;;  %v9519_v13 = vcombine.low %v278_v2, %v282_v3 }
  0xc1   :  { %1471 = vmatprep.subr.bf16.mxu0 %v9510_v10  ;;  %v270_v10 = vld [vmem:[#allocation5 + $0x410] sm:$0xff] }
  0xc2   :  { %1445 = vmatpush2.bf16.msra.mxu1 %v9453_v9  ;;  %v146_v9 = vld [vmem:[#allocation5 + $0x30] sm:$0xff] }
  0xc3   :  { %1446 = vmatprep.subr.bf16.mxu1 %v9446_v11  ;;  %v274_v11 = vld [vmem:[#allocation5 + $0x430] sm:$0xff]  ;;  %v9384_v14 = vcombine.high %v142_v8, %v146_v9  ;;  %v9383_v22 = vcombine.low %v142_v8, %v146_v9 }
  0xc4   :  { %1472 = vmatpush1.bf16.msra.mxu0 %v9509_v17  ;;  %v9512_v15 = vcombine.high %v270_v10, %v274_v11  ;;  %v262_v17 = vld [vmem:[#allocation5 + $0x3d0] sm:$0xff]  ;;  %v9511_v23 = vcombine.low %v270_v10, %v274_v11 }
  0xc5   :  { %1498 = vmatprep.subr.bf16.mxu0 %v9440_v20  ;;  %v199_v20 = vld [vmem:[#allocation5 + $0x1d8] sm:$0xff]  ;;  %v222_v57 = vld [vmem:[#allocation5 + $0x290] sm:$0xff] }
  0xc6   :  { %1447 = vmatpush2.bf16.msra.mxu1 %v9445_v18  ;;  %v266_v18 = vld [vmem:[#allocation5 + $0x3f0] sm:$0xff] }
  0xc7   :  { %1539 = vmatprep.subr.bf16.mxu1 %v9568_v21  ;;  %1490 = vmatmul.mubr.bf16.vlgmr.msra.gmra.mxu0 %v10872_v16  ;;  %v203_v21 = vld [vmem:[#allocation5 + $0x1f8] sm:$0xff]  ;;  %v9504_v24 = vcombine.high %v262_v17, %v266_v18  ;;  %v9503_v30 = vcombine.low %v262_v17, %v266_v18  ;;  %v214_v3 = vld [vmem:[#allocation5 + $0x250] sm:$0xff] }
  0xc8   :  { %1499 = vmatpush1.bf16.msra.mxu0 %v9439_v26  ;;  %1530 = vmatprep.mubr.bf16.mxu0 %v10869_v59  ;;  %v9442_v25 = vcombine.high %v199_v20, %v203_v21  ;;  %v254_v26 = vld [vmem:[#allocation5 + $0x390] sm:$0xff]  ;;  %v9441_v31 = vcombine.low %v199_v20, %v203_v21  ;;  %v327_v21 = vld [vmem:[#allocation5 + $0x5d8] sm:$0xff] }
  0xc9   :  { %1449 = vmatmul.mubr.bf16.vlgmr.msra.gmra.mxu1 %v10876_v19  ;;  %1500 = vmatprep.subr.bf16.mxu0 %v9432_v28  ;;  %v191_v28 = vld [vmem:[#allocation5 + $0x198] sm:$0xff]  ;;  %v206_v11 = vld [vmem:[#allocation5 + $0x210] sm:$0xff] }
  0xca   :  { %1540 = vmatpush1.bf16.msra.mxu1 %v9567_v27  ;;  %1571 = vmatprep.mubr.bf16.mxu1 %v10790_v1  ;;  %v258_v27 = vld [vmem:[#allocation5 + $0x3b0] sm:$0xff] }
  0xcb   :  { %1541 = vmatprep.subr.bf16.mxu1 %v9560_v29  ;;  %v195_v29 = vld [vmem:[#allocation5 + $0x1b8] sm:$0xff]  ;;  %v9496_v32 = vcombine.high %v254_v26, %v258_v27  ;;  %v9495_v38 = vcombine.low %v254_v26, %v258_v27 }
  0xcc   :  { %1501 = vmatpush1.bf16.msra.mxu0 %v9431_v34  ;;  %v9434_v33 = vcombine.high %v191_v28, %v195_v29  ;;  %v246_v34 = vld [vmem:[#allocation5 + $0x350] sm:$0xff]  ;;  %v9433_v39 = vcombine.low %v191_v28, %v195_v29  ;;  %v319_v29 = vld [vmem:[#allocation5 + $0x598] sm:$0xff] }
  0xcd   :  { %1502 = vmatprep.subr.bf16.mxu0 %v9424_v36  ;;  %v183_v36 = vld [vmem:[#allocation5 + $0x158] sm:$0xff] }
  0xce   :  { %1542 = vmatpush1.bf16.msra.mxu1 %v9559_v35  ;;  %v250_v35 = vld [vmem:[#allocation5 + $0x370] sm:$0xff] }
  0xcf   :  { %1543 = vmatprep.subr.bf16.mxu1 %v9552_v37  ;;  %v187_v37 = vld [vmem:[#allocation5 + $0x178] sm:$0xff]  ;;  %v9488_v40 = vcombine.high %v246_v34, %v250_v35  ;;  %v9487_v46 = vcombine.low %v246_v34, %v250_v35 }
  0xd0   :  { %1503 = vmatpush1.bf16.msra.mxu0 %v9423_v42  ;;  %v9426_v41 = vcombine.high %v183_v36, %v187_v37  ;;  %v238_v42 = vld [vmem:[#allocation5 + $0x310] sm:$0xff]  ;;  %v9425_v47 = vcombine.low %v183_v36, %v187_v37  ;;  %v311_v37 = vld [vmem:[#allocation5 + $0x558] sm:$0xff] }
  0xd1   :  { %1504 = vmatprep.subr.bf16.mxu0 %v9416_v44  ;;  %v175_v44 = vld [vmem:[#allocation5 + $0x118] sm:$0xff] }
  0xd2   :  { %1544 = vmatpush1.bf16.msra.mxu1 %v9551_v43  ;;  %v242_v43 = vld [vmem:[#allocation5 + $0x330] sm:$0xff] }
  0xd3   :  { %1545 = vmatprep.subr.bf16.mxu1 %v9544_v45  ;;  %v179_v45 = vld [vmem:[#allocation5 + $0x138] sm:$0xff]  ;;  %v9480_v48 = vcombine.high %v238_v42, %v242_v43  ;;  %v9479_v54 = vcombine.low %v238_v42, %v242_v43 }
  0xd4   :  { %1505 = vmatpush1.bf16.msra.mxu0 %v9415_v50  ;;  %v9418_v49 = vcombine.high %v175_v44, %v179_v45  ;;  %v230_v50 = vld [vmem:[#allocation5 + $0x2d0] sm:$0xff]  ;;  %v9417_v55 = vcombine.low %v175_v44, %v179_v45  ;;  %v303_v45 = vld [vmem:[#allocation5 + $0x518] sm:$0xff] }
  0xd5   :  { %1506 = vmatprep.subr.bf16.mxu0 %v9408_v52  ;;  %v167_v52 = vld [vmem:[#allocation5 + $0xd8] sm:$0xff] }
  0xd6   :  { %1546 = vmatpush1.bf16.msra.mxu1 %v9543_v51  ;;  %v234_v51 = vld [vmem:[#allocation5 + $0x2f0] sm:$0xff] }
  0xd7   :  { %1547 = vmatprep.subr.bf16.mxu1 %v9536_v53  ;;  %v171_v53 = vld [vmem:[#allocation5 + $0xf8] sm:$0xff] }
  0xd8   :  { %1507 = vmatpush1.bf16.msra.mxu0 %v9407_v58  ;;  %v9410_v56 = vcombine.high %v167_v52, %v171_v53  ;;  %v226_v58 = vld [vmem:[#allocation5 + $0x2b0] sm:$0xff]  ;;  %v9409_v63 = vcombine.low %v167_v52, %v171_v53  ;;  %v295_v53 = vld [vmem:[#allocation5 + $0x4d8] sm:$0xff] }
  0xd9   :  { %1508 = vmatprep.subr.bf16.mxu0 %v9400_v61  ;;  %v163_v61 = vld [vmem:[#allocation5 + $0xb8] sm:$0xff]  ;;  %v9464_v0 = vcombine.high %v222_v57, %v226_v58 }
  0xda   :  { %1548 = vmatpush1.bf16.msra.mxu1 %v9535_v60  ;;  %v159_v60 = vld [vmem:[#allocation5 + $0x98] sm:$0xff] }
  0xdb   :  { %1549 = vmatprep.subr.bf16.mxu1 %v9528_v62  ;;  %v9471_v62 = vcombine.low %v230_v50, %v234_v51  ;;  %v9402_v2 = vcombine.high %v159_v60, %v163_v61  ;;  %v9401_v8 = vcombine.low %v159_v60, %v163_v61  ;;  %v287_v60 = vld [vmem:[#allocation5 + $0x498] sm:$0xff] }
  0xdc   :  { %1509 = vmatpush1.bf16.msra.mxu0 %v9399_v4  ;;  %v218_v4 = vld [vmem:[#allocation5 + $0x270] sm:$0xff]  ;;  %v291_v61 = vld [vmem:[#allocation5 + $0x4b8] sm:$0xff] }
  0xdd   :  { %1510 = vmatprep.subr.bf16.mxu0 %v9392_v6  ;;  %v155_v6 = vld [vmem:[#allocation5 + $0x78] sm:$0xff]  ;;  %v9456_v9 = vcombine.high %v214_v3, %v218_v4 }
  0xde   :  { %1550 = vmatpush1.bf16.msra.mxu1 %v9527_v5  ;;  %v151_v5 = vld [vmem:[#allocation5 + $0x58] sm:$0xff] }
  0xdf   :  { %1551 = vmatprep.subr.bf16.mxu1 %v9520_v7  ;;  %v9463_v7 = vcombine.low %v222_v57, %v226_v58  ;;  %v9394_v10 = vcombine.high %v151_v5, %v155_v6  ;;  %v9393_v17 = vcombine.low %v151_v5, %v155_v6  ;;  %v279_v5 = vld [vmem:[#allocation5 + $0x458] sm:$0xff] }
  0xe0   :  { %1511 = vmatpush1.bf16.msra.mxu0 %v9391_v12  ;;  %v210_v12 = vld [vmem:[#allocation5 + $0x230] sm:$0xff]  ;;  %v283_v6 = vld [vmem:[#allocation5 + $0x478] sm:$0xff] }
  0xe1   :  { %1512 = vmatprep.subr.bf16.mxu0 %v9384_v14  ;;  %v147_v14 = vld [vmem:[#allocation5 + $0x38] sm:$0xff]  ;;  %v9448_v18 = vcombine.high %v206_v11, %v210_v12 }
  0xe2   :  { %1552 = vmatpush1.bf16.msra.mxu1 %v9519_v13  ;;  %v143_v13 = vld [vmem:[#allocation5 + $0x18] sm:$0xff] }
  0xe3   :  { %1553 = vmatprep.subr.bf16.mxu1 %v9512_v15  ;;  %v9455_v15 = vcombine.low %v214_v3, %v218_v4  ;;  %v9386_v20 = vcombine.high %v143_v13, %v147_v14  ;;  %v9385_v26 = vcombine.low %v143_v13, %v147_v14  ;;  %v9530_v3 = vcombine.high %v287_v60, %v291_v61  ;;  %v271_v13 = vld [vmem:[#allocation5 + $0x418] sm:$0xff] }
  0xe4   :  { %1513 = vmatpush1.bf16.msra.mxu0 %v9383_v22  ;;  %v331_v22 = vld [vmem:[#allocation5 + $0x5f8] sm:$0xff] }
  0xe5   :  { %1514 = vmatprep.subr.bf16.mxu0 %v9504_v24  ;;  %v267_v24 = vld [vmem:[#allocation5 + $0x3f8] sm:$0xff]  ;;  %v9570_v27 = vcombine.high %v327_v21, %v331_v22 }
  0xe6   :  { %1554 = vmatpush1.bf16.msra.mxu1 %v9511_v23  ;;  %v263_v23 = vld [vmem:[#allocation5 + $0x3d8] sm:$0xff] }
  0xe7   :  { %1580 = vmatprep.subr.bf16.mxu1 %v9442_v25  ;;  %v9447_v25 = vcombine.low %v206_v11, %v210_v12  ;;  %v9506_v28 = vcombine.high %v263_v23, %v267_v24  ;;  %v9505_v34 = vcombine.low %v263_v23, %v267_v24  ;;  %v9522_v11 = vcombine.high %v279_v5, %v283_v6  ;;  %v275_v14 = vld [vmem:[#allocation5 + $0x438] sm:$0xff]  ;;  %v1742_v23 = vld [vmem:[#allocation8 + $0x1c0] sm:$0xff] }
  0xe8   :  { %1515 = vmatpush2.bf16.msra.mxu0 %v9503_v30  ;;  %v323_v30 = vld [vmem:[#allocation5 + $0x5b8] sm:$0xff]  ;;  %v1746_v24 = vld [vmem:[#allocation8 + $0x1e0] sm:$0xff] }
  0xe9   :  { %1572 = vmatmul.mubr.bf16.vlgmr.msra.gmra.mxu1 %v10872_v16  ;;  %1516 = vmatprep.subr.bf16.mxu0 %v9496_v32  ;;  %v259_v32 = vld [vmem:[#allocation5 + $0x3b8] sm:$0xff]  ;;  %v9562_v35 = vcombine.high %v319_v29, %v323_v30 }
  0xea   :  { %1581 = vmatpush1.bf16.msra.mxu1 %v9441_v31  ;;  %1612 = vmatprep.mubr.bf16.mxu1 %v10869_v59  ;;  %v9472_v59 = vcombine.high %v230_v50, %v234_v51  ;;  %v255_v31 = vld [vmem:[#allocation5 + $0x398] sm:$0xff] }
  0xeb   :  { %1582 = vmatprep.subr.bf16.mxu1 %v9434_v33  ;;  %v9569_v33 = vcombine.low %v327_v21, %v331_v22  ;;  %v9498_v36 = vcombine.high %v255_v31, %v259_v32  ;;  %v9497_v42 = vcombine.low %v255_v31, %v259_v32  ;;  %v9514_v21 = vcombine.high %v271_v13, %v275_v14  ;;  %v1738_v31 = vld [vmem:[#allocation8 + $0x1a0] sm:$0xff] }
  0xec   :  { %1517 = vmatpush2.bf16.msra.mxu0 %v9495_v38  ;;  %v315_v38 = vld [vmem:[#allocation5 + $0x578] sm:$0xff] }
  0xed   :  { %1518 = vmatprep.subr.bf16.mxu0 %v9488_v40  ;;  %v251_v40 = vld [vmem:[#allocation5 + $0x378] sm:$0xff]  ;;  %v9554_v43 = vcombine.high %v311_v37, %v315_v38 }
  0xee   :  { %1583 = vmatpush1.bf16.msra.mxu1 %v9433_v39  ;;  %v247_v39 = vld [vmem:[#allocation5 + $0x358] sm:$0xff] }
  0xef   :  { %1584 = vmatprep.subr.bf16.mxu1 %v9426_v41  ;;  %v9561_v41 = vcombine.low %v319_v29, %v323_v30  ;;  %v9490_v44 = vcombine.high %v247_v39, %v251_v40  ;;  %v9489_v50 = vcombine.low %v247_v39, %v251_v40  ;;  %v9628_v29 = vcombine.high %v1742_v23, %v1746_v24  ;;  %v1734_v30 = vld [vmem:[#allocation8 + $0x180] sm:$0xff] }
  0xf0   :  { %1519 = vmatpush2.bf16.msra.mxu0 %v9487_v46  ;;  %v307_v46 = vld [vmem:[#allocation5 + $0x538] sm:$0xff]  ;;  %v1730_v39 = vld [vmem:[#allocation8 + $0x160] sm:$0xff] }
  0xf1   :  { %1520 = vmatprep.subr.bf16.mxu0 %v9480_v48  ;;  %v243_v48 = vld [vmem:[#allocation5 + $0x338] sm:$0xff]  ;;  %v9546_v51 = vcombine.high %v303_v45, %v307_v46 }
  0xf2   :  { %1585 = vmatpush1.bf16.msra.mxu1 %v9425_v47  ;;  %v239_v47 = vld [vmem:[#allocation5 + $0x318] sm:$0xff] }
  0xf3   :  { %1586 = vmatprep.subr.bf16.mxu1 %v9418_v49  ;;  %v9553_v49 = vcombine.low %v311_v37, %v315_v38  ;;  %v9482_v52 = vcombine.high %v239_v47, %v243_v48  ;;  %v1726_v38 = vld [vmem:[#allocation8 + $0x140] sm:$0xff] }
  0xf4   :  { %1521 = vmatpush2.bf16.msra.mxu0 %v9479_v54  ;;  %v231_v54 = vld [vmem:[#allocation5 + $0x2d8] sm:$0xff] }
  0xf5   :  { %1522 = vmatprep.subr.bf16.mxu0 %v9472_v59  ;;  %v9545_v59 = vcombine.low %v303_v45, %v307_v46  ;;  %v1718_v46 = vld [vmem:[#allocation8 + $0x100] sm:$0xff] }
  0xf6   :  { %1587 = vmatpush1.bf16.msra.mxu1 %v9417_v55  ;;  %v235_v55 = vld [vmem:[#allocation5 + $0x2f8] sm:$0xff] }
  0xf7   :  { %1588 = vmatprep.subr.bf16.mxu1 %v9410_v56  ;;  %v9481_v56 = vcombine.low %v239_v47, %v243_v48  ;;  %v9474_v58 = vcombine.high %v231_v54, %v235_v55  ;;  %v1722_v47 = vld [vmem:[#allocation8 + $0x120] sm:$0xff] }
  0xf8   :  { %1523 = vmatpush2.bf16.msra.mxu0 %v9471_v62  ;;  %v223_v62 = vld [vmem:[#allocation5 + $0x298] sm:$0xff] }
  0xf9   :  { %1524 = vmatprep.subr.bf16.mxu0 %v9464_v0 }
  0xfa   :  { %1589 = vmatpush1.bf16.msra.mxu1 %v9409_v63  ;;  %v227_v63 = vld [vmem:[#allocation5 + $0x2b8] sm:$0xff] }
  0xfb   :  { %1590 = vmatprep.subr.bf16.mxu1 %v9402_v2  ;;  %v9473_v2 = vcombine.low %v231_v54, %v235_v55  ;;  %v9466_v4 = vcombine.high %v223_v62, %v227_v63  ;;  %v1838_v54 = vld [vmem:[#allocation8 + $0x4c0] sm:$0xff] }
  0xfc   :  { %1525 = vmatpush2.bf16.msra.mxu0 %v9463_v7  ;;  %v215_v7 = vld [vmem:[#allocation5 + $0x258] sm:$0xff]  ;;  %v1842_v55 = vld [vmem:[#allocation8 + $0x4e0] sm:$0xff] }
  0xfd   :  { %1526 = vmatprep.subr.bf16.mxu0 %v9456_v9  ;;  %v9529_v9 = vcombine.low %v287_v60, %v291_v61  ;;  %v1706_v60 = vld [vmem:[#allocation8 + $0xa0] sm:$0xff]  ;;  %v9724_v61 = vcombine.high %v1838_v54, %v1842_v55 }
  0xfe   :  { %1591 = vmatpush1.bf16.msra.mxu1 %v9401_v8  ;;  %v219_v8 = vld [vmem:[#allocation5 + $0x278] sm:$0xff] }
  0xff   :  { %1592 = vmatprep.subr.bf16.mxu1 %v9394_v10  ;;  %v9465_v10 = vcombine.low %v223_v62, %v227_v63  ;;  %v9458_v12 = vcombine.high %v215_v7, %v219_v8  ;;  %v1830_v62 = vld [vmem:[#allocation8 + $0x480] sm:$0xff] }
 0x100   :  { %1527 = vmatpush2.bf16.msra.mxu0 %v9455_v15  ;;  %v207_v15 = vld [vmem:[#allocation5 + $0x218] sm:$0xff]  ;;  %v1834_v63 = vld [vmem:[#allocation8 + $0x4a0] sm:$0xff] }
 0x101   :  { %1528 = vmatprep.subr.bf16.mxu0 %v9448_v18  ;;  %v9521_v18 = vcombine.low %v279_v5, %v283_v6  ;;  %v1698_v5 = vld [vmem:[#allocation8 + $0x60] sm:$0xff]  ;;  %v9716_v6 = vcombine.high %v1830_v62, %v1834_v63 }
 0x102   :  { %1593 = vmatpush1.bf16.msra.mxu1 %v9393_v17  ;;  %v211_v17 = vld [vmem:[#allocation5 + $0x238] sm:$0xff] }
 0x103   :  { %1594 = vmatprep.subr.bf16.mxu1 %v9386_v20  ;;  %v9457_v20 = vcombine.low %v215_v7, %v219_v8  ;;  %v9450_v22 = vcombine.high %v207_v15, %v211_v17  ;;  %v1822_v7 = vld [vmem:[#allocation8 + $0x440] sm:$0xff] }
 0x104   :  { %1529 = vmatpush2.bf16.msra.mxu0 %v9447_v25  ;;  %v1870_v25 = vld [vmem:[#allocation8 + $0x5c0] sm:$0xff] }
 0x105   :  { %1621 = vmatprep.subr.bf16.mxu0 %v9570_v27  ;;  %v9513_v27 = vcombine.low %v271_v13, %v275_v14  ;;  %v1826_v8 = vld [vmem:[#allocation8 + $0x460] sm:$0xff] }
 0x106   :  { %1595 = vmatpush1.bf16.msra.mxu1 %v9385_v26  ;;  %v1874_v26 = vld [vmem:[#allocation8 + $0x5e0] sm:$0xff]  ;;  %v9708_v14 = vcombine.high %v1822_v7, %v1826_v8 }
 0x107   :  { %1596 = vmatprep.subr.bf16.mxu1 %v9506_v28  ;;  %1531 = vmatmul.mubr.bf16.vlgmr.msra.gmra.mxu0 %v10876_v19  ;;  %v9449_v28 = vcombine.low %v207_v15, %v211_v17  ;;  %v9756_v32 = vcombine.high %v1870_v25, %v1874_v26  ;;  %v9755_v37 = vcombine.low %v1870_v25, %v1874_v26  ;;  %v1690_v13 = vld [vmem:[#allocation8 + $0x20] sm:$0xff] }
 0x108   :  { %1622 = vmatpush1.bf16.msra.mxu0 %v9569_v33  ;;  %1653 = vmatprep.mubr.bf16.mxu0 %v10790_v1  ;;  %v299_v1 = vld [vmem:[#allocation5 + $0x4f8] sm:$0xff]  ;;  %v1862_v33 = vld [vmem:[#allocation8 + $0x580] sm:$0xff] }
 0x109   :  { %1623 = vmatprep.subr.bf16.mxu0 %v9562_v35  ;;  %v9538_v57 = vcombine.high %v295_v53, %v299_v1  ;;  %v9537_v0 = vcombine.low %v295_v53, %v299_v1  ;;  %v9627_v35 = vcombine.low %v1742_v23, %v1746_v24  ;;  %v1710_v53 = vld [vmem:[#allocation8 + $0xc0] sm:$0xff] }
 0x10a   :  { %1597 = vmatpush2.bf16.msra.mxu1 %v9505_v34  ;;  %v1866_v34 = vld [vmem:[#allocation8 + $0x5a0] sm:$0xff] }
 0x10b   :  { %1598 = vmatprep.subr.bf16.mxu1 %v9498_v36  ;;  %v9620_v36 = vcombine.high %v1734_v30, %v1738_v31  ;;  %v9748_v40 = vcombine.high %v1862_v33, %v1866_v34  ;;  %v9747_v45 = vcombine.low %v1862_v33, %v1866_v34  ;;  %v1814_v15 = vld [vmem:[#allocation8 + $0x400] sm:$0xff] }
 0x10c   :  { %1624 = vmatpush1.bf16.msra.mxu0 %v9561_v41  ;;  %v1854_v41 = vld [vmem:[#allocation8 + $0x540] sm:$0xff] }
 0x10d   :  { %1625 = vmatprep.subr.bf16.mxu0 %v9554_v43  ;;  %v9619_v43 = vcombine.low %v1734_v30, %v1738_v31  ;;  %v1818_v17 = vld [vmem:[#allocation8 + $0x420] sm:$0xff] }
 0x10e   :  { %1599 = vmatpush2.bf16.msra.mxu1 %v9497_v42  ;;  %v1858_v42 = vld [vmem:[#allocation8 + $0x560] sm:$0xff]  ;;  %v9700_v24 = vcombine.high %v1814_v15, %v1818_v17 }
 0x10f   :  { %1600 = vmatprep.subr.bf16.mxu1 %v9490_v44  ;;  %v9612_v44 = vcombine.high %v1726_v38, %v1730_v39  ;;  %v9740_v48 = vcombine.high %v1854_v41, %v1858_v42  ;;  %v1810_v23 = vld [vmem:[#allocation8 + $0x3e0] sm:$0xff] }
 0x110   :  { %1626 = vmatpush1.bf16.msra.mxu0 %v9553_v49  ;;  %v1846_v49 = vld [vmem:[#allocation8 + $0x500] sm:$0xff] }
 0x111   :  { %1627 = vmatprep.subr.bf16.mxu0 %v9546_v51  ;;  %v9611_v51 = vcombine.low %v1726_v38, %v1730_v39  ;;  %v1934_v25 = vld [vmem:[#allocation8 + $0x7c0] sm:$0xff] }
 0x112   :  { %1601 = vmatpush2.bf16.msra.mxu1 %v9489_v50  ;;  %v1850_v50 = vld [vmem:[#allocation8 + $0x520] sm:$0xff] }
 0x113   :  { %1602 = vmatprep.subr.bf16.mxu1 %v9482_v52  ;;  %v9739_v52 = vcombine.low %v1854_v41, %v1858_v42  ;;  %v9732_v1 = vcombine.high %v1846_v49, %v1850_v50  ;;  %v1938_v26 = vld [vmem:[#allocation8 + $0x7e0] sm:$0xff] }
 0x114   :  { %1628 = vmatpush1.bf16.msra.mxu0 %v9545_v59  ;;  %v9603_v59 = vcombine.low %v1718_v46, %v1722_v47  ;;  %v1798_v30 = vld [vmem:[#allocation8 + $0x380] sm:$0xff] }
 0x115   :  { %1629 = vmatprep.subr.bf16.mxu0 %v9538_v57  ;;  %v9731_v57 = vcombine.low %v1846_v49, %v1850_v50  ;;  %v1802_v31 = vld [vmem:[#allocation8 + $0x3a0] sm:$0xff] }
 0x116   :  { %1603 = vmatpush2.bf16.msra.mxu1 %v9481_v56  ;;  %v1926_v33 = vld [vmem:[#allocation8 + $0x780] sm:$0xff] }
 0x117   :  { %1604 = vmatprep.subr.bf16.mxu1 %v9474_v58  ;;  %v1702_v58 = vld [vmem:[#allocation8 + $0x80] sm:$0xff] }
 0x118   :  { %1630 = vmatpush1.bf16.msra.mxu0 %v9537_v0  ;;  %v1930_v34 = vld [vmem:[#allocation8 + $0x7a0] sm:$0xff] }
 0x119   :  { %1631 = vmatprep.subr.bf16.mxu0 %v9530_v3  ;;  %v9723_v3 = vcombine.low %v1838_v54, %v1842_v55  ;;  %v1790_v38 = vld [vmem:[#allocation8 + $0x340] sm:$0xff] }
 0x11a   :  { %1605 = vmatpush2.bf16.msra.mxu1 %v9473_v2  ;;  %v9588_v2 = vcombine.high %v1702_v58, %v1706_v60  ;;  %v1794_v39 = vld [vmem:[#allocation8 + $0x360] sm:$0xff] }
 0x11b   :  { %1606 = vmatprep.subr.bf16.mxu1 %v9466_v4  ;;  %v1694_v4 = vld [vmem:[#allocation8 + $0x40] sm:$0xff] }
 0x11c   :  { %1632 = vmatpush1.bf16.msra.mxu0 %v9529_v9  ;;  %v9587_v9 = vcombine.low %v1702_v58, %v1706_v60  ;;  %v1918_v41 = vld [vmem:[#allocation8 + $0x740] sm:$0xff] }
 0x11d   :  { %1633 = vmatprep.subr.bf16.mxu0 %v9522_v11  ;;  %v9715_v11 = vcombine.low %v1830_v62, %v1834_v63  ;;  %v1922_v42 = vld [vmem:[#allocation8 + $0x760] sm:$0xff] }
 0x11e   :  { %1607 = vmatpush2.bf16.msra.mxu1 %v9465_v10  ;;  %v9580_v10 = vcombine.high %v1694_v4, %v1698_v5  ;;  %v1786_v49 = vld [vmem:[#allocation8 + $0x320] sm:$0xff]  ;;  %v9804_v50 = vcombine.high %v1918_v41, %v1922_v42 }
 0x11f   :  { %1608 = vmatprep.subr.bf16.mxu1 %v9458_v12  ;;  %v1686_v12 = vld [vmem:[#allocation8] sm:$0xff] }
 0x120   :  { %1634 = vmatpush1.bf16.msra.mxu0 %v9521_v18  ;;  %v9579_v18 = vcombine.low %v1694_v4, %v1698_v5  ;;  %v1774_v55 = vld [vmem:[#allocation8 + $0x2c0] sm:$0xff] }
 0x121   :  { %1635 = vmatprep.subr.bf16.mxu0 %v9514_v21  ;;  %v9707_v21 = vcombine.low %v1822_v7, %v1826_v8  ;;  %v1906_v58 = vld [vmem:[#allocation8 + $0x6e0] sm:$0xff] }
 0x122   :  { %1609 = vmatpush2.bf16.msra.mxu1 %v9457_v20  ;;  %v9572_v20 = vcombine.high %v1686_v12, %v1690_v13  ;;  %v1766_v63 = vld [vmem:[#allocation8 + $0x280] sm:$0xff] }
 0x123   :  { %1610 = vmatprep.subr.bf16.mxu1 %v9450_v22  ;;  %v1806_v22 = vld [vmem:[#allocation8 + $0x3c0] sm:$0xff] }
 0x124   :  { %1636 = vmatpush1.bf16.msra.mxu0 %v9513_v27  ;;  %v9571_v27 = vcombine.low %v1686_v12, %v1690_v13  ;;  %v1898_v4 = vld [vmem:[#allocation8 + $0x6a0] sm:$0xff]  ;;  %v334_v13 = vlaneseq }
 0x125   :  { %4800 = vmatprep.subr.bf16.mxu0 %v9628_v29  ;;  %v9699_v29 = vcombine.low %v1814_v15, %v1818_v17  ;;  %v1758_v8 = vld [vmem:[#allocation8 + $0x240] sm:$0xff] }
 0x126   :  { %1611 = vmatpush2.bf16.msra.mxu1 %v9449_v28  ;;  %v9692_v28 = vcombine.high %v1806_v22, %v1810_v23  ;;  %v1890_v12 = vld [vmem:[#allocation8 + $0x660] sm:$0xff] }
 0x127   :  { %4841 = vmatprep.subr.bf16.mxu1 %v9756_v32  ;;  %1654 = vmatmul.mubr.bf16.vlgmr.msra.gmra.mxu0 %v10872_v16  ;;  %v9604_v16 = vcombine.high %v1718_v46, %v1722_v47  ;;  %v9820_v32 = vcombine.high %v1934_v25, %v1938_v26  ;;  %v9811_v46 = vcombine.low %v1926_v33, %v1930_v34 }
 0x128   :  { %4801 = vmatpush1.bf16.msra.mxu0 %v9627_v35  ;;  %v9691_v35 = vcombine.low %v1806_v22, %v1810_v23  ;;  %v1878_v22 = vld [vmem:[#allocation8 + $0x600] sm:$0xff] }
 0x129   :  { %1613 = vmatmul.mubr.bf16.vlgmr.msra.gmra.mxu1 %v10876_v19  ;;  %4802 = vmatprep.subr.bf16.mxu0 %v9620_v36  ;;  %v1714_v19 = vld [vmem:[#allocation8 + $0xe0] sm:$0xff]  ;;  %v9684_v36 = vcombine.high %v1798_v30, %v1802_v31 }
 0x12a   :  { %4842 = vmatpush1.bf16.msra.mxu1 %v9755_v37  ;;  %v9596_v56 = vcombine.high %v1710_v53, %v1714_v19  ;;  %v9595_v0 = vcombine.low %v1710_v53, %v1714_v19  ;;  %v9819_v37 = vcombine.low %v1934_v25, %v1938_v26  ;;  %v9675_v53 = vcombine.low %v1790_v38, %v1794_v39  ;;  %v1882_v23 = vld [vmem:[#allocation8 + $0x620] sm:$0xff] }
 0x12b   :  { %4843 = vmatprep.subr.bf16.mxu1 %v9748_v40  ;;  %v9812_v40 = vcombine.high %v1926_v33, %v1930_v34 }
 0x12c   :  { %4803 = vmatpush1.bf16.msra.mxu0 %v9619_v43 }
 0x12d   :  { %4804 = vmatprep.subr.bf16.mxu0 %v9612_v44  ;;  %v9683_v44 = vcombine.low %v1798_v30, %v1802_v31  ;;  %v2002_v30 = vld [vmem:[#allocation8 + $0x9e0] sm:$0xff] }
 0x12e   :  { %4844 = vmatpush1.bf16.msra.mxu1 %v9747_v45  ;;  %v9676_v45 = vcombine.high %v1790_v38, %v1794_v39  ;;  %v10896_v31 = vld [vmem:[#allocation8 + $0xdc0] sm:$0xff] }
 0x12f   :  { %4845 = vmatprep.subr.bf16.mxu1 %v9740_v48  ;;  %v1782_v48 = vld [vmem:[#allocation8 + $0x300] sm:$0xff] }
 0x130   :  { %4805 = vmatpush1.bf16.msra.mxu0 %v9611_v51  ;;  %v1910_v51 = vld [vmem:[#allocation8 + $0x700] sm:$0xff]  ;;  %v9668_v19 = vcombine.high %v1782_v48, %v1786_v49  ;;  %v9667_v60 = vcombine.low %v1782_v48, %v1786_v49 }
 0x131   :  { %4806 = vmatprep.subr.bf16.mxu0 %v9604_v16  ;;  %v1914_v16 = vld [vmem:[#allocation8 + $0x720] sm:$0xff] }
 0x132   :  { %4846 = vmatpush1.bf16.msra.mxu1 %v9739_v52  ;;  %v9795_v62 = vcombine.low %v1910_v51, %v1914_v16 }
 0x133   :  { %4847 = vmatprep.subr.bf16.mxu1 %v9732_v1  ;;  %v9803_v1 = vcombine.low %v1918_v41, %v1922_v42 }
 0x134   :  { %4807 = vmatpush1.bf16.msra.mxu0 %v9603_v59  ;;  %v1778_v59 = vld [vmem:[#allocation8 + $0x2e0] sm:$0xff] }
 0x135   :  { %4808 = vmatprep.subr.bf16.mxu0 %v9596_v56  ;;  %v9796_v56 = vcombine.high %v1910_v51, %v1914_v16  ;;  %v9659_v5 = vcombine.low %v1774_v55, %v1778_v59 }
 0x136   :  { %4848 = vmatpush1.bf16.msra.mxu1 %v9731_v57  ;;  %v1902_v57 = vld [vmem:[#allocation8 + $0x6c0] sm:$0xff] }
 0x137   :  { %4849 = vmatprep.subr.bf16.mxu1 %v9724_v61  ;;  %v9660_v61 = vcombine.high %v1774_v55, %v1778_v59  ;;  %v9787_v7 = vcombine.low %v1902_v57, %v1906_v58 }
 0x138   :  { %4809 = vmatpush1.bf16.msra.mxu0 %v9595_v0  ;;  %v1770_v0 = vld [vmem:[#allocation8 + $0x2a0] sm:$0xff] }
 0x139   :  { %4810 = vmatprep.subr.bf16.mxu0 %v9588_v2  ;;  %v9788_v2 = vcombine.high %v1902_v57, %v1906_v58  ;;  %v1986_v58 = vld [vmem:[#allocation8 + $0x960] sm:$0xff] }
 0x13a   :  { %4850 = vmatpush1.bf16.msra.mxu1 %v9723_v3  ;;  %v1894_v3 = vld [vmem:[#allocation8 + $0x680] sm:$0xff] }
 0x13b   :  { %4851 = vmatprep.subr.bf16.mxu1 %v9716_v6  ;;  %v9652_v6 = vcombine.high %v1766_v63, %v1770_v0  ;;  %v9779_v17 = vcombine.low %v1894_v3, %v1898_v4 }
 0x13c   :  { %4811 = vmatpush1.bf16.msra.mxu0 %v9587_v9  ;;  %v1762_v9 = vld [vmem:[#allocation8 + $0x260] sm:$0xff] }
 0x13d   :  { %4812 = vmatprep.subr.bf16.mxu0 %v9580_v10  ;;  %v9780_v10 = vcombine.high %v1894_v3, %v1898_v4  ;;  %v9644_v15 = vcombine.high %v1758_v8, %v1762_v9  ;;  %v9643_v25 = vcombine.low %v1758_v8, %v1762_v9  ;;  %v1970_v3 = vld [vmem:[#allocation8 + $0x8e0] sm:$0xff] }
 0x13e   :  { %4852 = vmatpush1.bf16.msra.mxu1 %v9715_v11  ;;  %v1886_v11 = vld [vmem:[#allocation8 + $0x640] sm:$0xff] }
 0x13f   :  { %4853 = vmatprep.subr.bf16.mxu1 %v9708_v14  ;;  %v9651_v14 = vcombine.low %v1766_v63, %v1770_v0 }
 0x140   :  { %4813 = vmatpush1.bf16.msra.mxu0 %v9579_v18  ;;  %v1750_v18 = vld [vmem:[#allocation8 + $0x200] sm:$0xff] }
 0x141   :  { %4814 = vmatprep.subr.bf16.mxu0 %v9572_v20  ;;  %v1754_v20 = vld [vmem:[#allocation8 + $0x220] sm:$0xff] }
 0x142   :  { %4854 = vmatpush1.bf16.msra.mxu1 %v9707_v21  ;;  %v9772_v21 = vcombine.high %v1886_v11, %v1890_v12  ;;  %v9636_v26 = vcombine.high %v1750_v18, %v1754_v20  ;;  %v9635_v34 = vcombine.low %v1750_v18, %v1754_v20 }
 0x143   :  { %4855 = vmatprep.subr.bf16.mxu1 %v9700_v24  ;;  %v10894_v24 = vshrl.u32 %v334_v13, 7  ;;  %v1954_v13 = vld [vmem:[#allocation8 + $0x860] sm:$0xff] }
 0x144   :  { %4815 = vmatpush1.bf16.msra.mxu0 %v9571_v27  ;;  %v9771_v27 = vcombine.low %v1886_v11, %v1890_v12  ;;  %v1950_v12 = vld [vmem:[#allocation8 + $0x840] sm:$0xff] }
 0x145   :  { %4816 = vmatprep.subr.bf16.mxu0 %v9692_v28  ;;  %v9764_v28 = vcombine.high %v1878_v22, %v1882_v23  ;;  %v10901_v33 = vsub.s32 0, %v10894_v24  ;;  %v10906_v38 = vsub.s32 1, %v10894_v24  ;;  %v10923_v8 = vsub.s32 2, %v10894_v24 }
 0x146   :  { %4856 = vmatpush1.bf16.msra.mxu1 %v9699_v29  ;;  %v1998_v29 = vld [vmem:[#allocation8 + $0x9c0] sm:$0xff]  ;;  %v9836_v20 = vcombine.high %v1950_v12, %v1954_v13 }
 0x147   :  { %4857 = vmatprep.subr.bf16.mxu1 %v9820_v32  ;;  %v10898_v32 = vld [vmem:[#allocation8 + $0xde0] sm:$0xff]  ;;  %v9883_v59 = vcombine.low %v1998_v29, %v2002_v30 }
 0x148   :  { %4817 = vmatpush2.bf16.msra.mxu0 %v9691_v35  ;;  %v10903_v35 = vld [vmem:[#allocation7] sm:$0xff]  ;;  %v10012_v39 = vcombine.high %v10896_v31, %v10898_v32 }
 0x149   :  { %v10890_v43 = vpop.f32.mrf.mxu1  ;;  %4818 = vmatprep.subr.bf16.mxu0 %v9684_v36  ;;  %v9763_v36 = vcombine.low %v1878_v22, %v1882_v23  ;;  %v341_v41 = vrot.slane %v10903_v35, %v10906_v38  ;;  %v1942_v22 = vld [vmem:[#allocation8 + $0x800] sm:$0xff] }
 0x14a   :  { %4858 = vmatpush2.bf16.msra.mxu1 %v9819_v37  ;;  %v9884_v37 = vcombine.high %v1998_v29, %v2002_v30  ;;  %v1946_v23 = vld [vmem:[#allocation8 + $0x820] sm:$0xff] }
 0x14b   :  { %v10892_v47 = vpop.f32.mrf.mxu1  ;;  %4859 = vmatprep.subr.bf16.mxu1 %v9812_v40  ;;  %v337_v40 = vrot.slane %v10903_v35, %v10901_v33 }
 0x14c   :  { %4819 = vmatpush2.bf16.msra.mxu0 %v9683_v44 }
 0x14d   :  { %v1413_v52 = vpop.f32.mrf.mxu1  ;;  %4820 = vmatprep.subr.bf16.mxu0 %v9676_v45 }
 0x14e   :  { %4860 = vmatpush2.bf16.msra.mxu1 %v9811_v46 }
 0x14f   :  { %v1414_v54 = vpop.f32.mrf.mxu1  ;;  %4861 = vmatprep.subr.bf16.mxu1 %v9804_v50 }
 0x150   :  { %4821 = vmatpush2.bf16.msra.mxu0 %v9675_v53  ;;  %v1994_v54 = vld [vmem:[#allocation8 + $0x9a0] sm:$0xff] }
 0x151   :  { %4822 = vmatprep.subr.bf16.mxu0 %v9668_v19 }
 0x152   :  { %4862 = vmatpush2.bf16.msra.mxu1 %v9803_v1  ;;  %v1990_v1 = vld [vmem:[#allocation8 + $0x980] sm:$0xff] }
 0x153   :  { %4863 = vmatprep.subr.bf16.mxu1 %v9796_v56  ;;  %v9876_v57 = vcombine.high %v1990_v1, %v1994_v54 }
 0x154   :  { %4823 = vmatpush2.bf16.msra.mxu0 %v9667_v60 }
 0x155   :  { %4824 = vmatprep.subr.bf16.mxu0 %v9660_v61  ;;  %v1974_v61 = vld [vmem:[#allocation8 + $0x900] sm:$0xff] }
 0x156   :  { %4864 = vmatpush2.bf16.msra.mxu1 %v9795_v62  ;;  %v1978_v62 = vld [vmem:[#allocation8 + $0x920] sm:$0xff] }
 0x157   :  { %4865 = vmatprep.subr.bf16.mxu1 %v9788_v2  ;;  %v9860_v0 = vcombine.high %v1974_v61, %v1978_v62  ;;  %v1966_v2 = vld [vmem:[#allocation8 + $0x8c0] sm:$0xff]  ;;  %v9859_v4 = vcombine.low %v1974_v61, %v1978_v62 }
 0x158   :  { %4825 = vmatpush2.bf16.msra.mxu0 %v9659_v5  ;;  %v9852_v5 = vcombine.high %v1966_v2, %v1970_v3  ;;  %v9851_v9 = vcombine.low %v1966_v2, %v1970_v3  ;;  %v2110_v61 = vld [vmem:[#allocation8 + $0xd40] sm:$0xff] }
 0x159   :  { %4826 = vmatprep.subr.bf16.mxu0 %v9652_v6  ;;  %v1958_v6 = vld [vmem:[#allocation8 + $0x880] sm:$0xff] }
 0x15a   :  { %4866 = vmatpush2.bf16.msra.mxu1 %v9787_v7  ;;  %v1962_v7 = vld [vmem:[#allocation8 + $0x8a0] sm:$0xff] }
 0x15b   :  { %4867 = vmatprep.subr.bf16.mxu1 %v9780_v10  ;;  %v10926_v10 = vsub.s32 3, %v10894_v24  ;;  %v9844_v11 = vcombine.high %v1958_v6, %v1962_v7  ;;  %v2114_v62 = vld [vmem:[#allocation8 + $0xd60] sm:$0xff] }
 0x15c   :  { %4827 = vmatpush2.bf16.msra.mxu0 %v9651_v14  ;;  %v345_v14 = vrot.slane %v10903_v35, %v10923_v8  ;;  %v2042_v3 = vld [vmem:[#allocation8 + $0xb20] sm:$0xff] }
 0x15d   :  { %4828 = vmatprep.subr.bf16.mxu0 %v9644_v15  ;;  %v9843_v15 = vcombine.low %v1958_v6, %v1962_v7  ;;  %v349_v18 = vrot.slane %v10903_v35, %v10926_v10  ;;  %v9995_v7 = vcombine.low %v2110_v61, %v2114_v62 }
 0x15e   :  { %4868 = vmatpush2.bf16.msra.mxu1 %v9779_v17 }
 0x15f   :  { %4869 = vmatprep.subr.bf16.mxu1 %v9772_v21 }
 0x160   :  { %4829 = vmatpush2.bf16.msra.mxu0 %v9643_v25 }
 0x161   :  { %4830 = vmatprep.subr.bf16.mxu0 %v9636_v26 }
 0x162   :  { %4870 = vmatpush2.bf16.msra.mxu1 %v9771_v27 }
 0x163   :  { %4871 = vmatprep.subr.bf16.mxu1 %v9764_v28  ;;  %v9835_v28 = vcombine.low %v1950_v12, %v1954_v13  ;;  %v2030_v12 = vld [vmem:[#allocation8 + $0xac0] sm:$0xff] }
 0x164   :  { %4831 = vmatpush2.bf16.msra.mxu0 %v9635_v34  ;;  %v2034_v13 = vld [vmem:[#allocation8 + $0xae0] sm:$0xff] }
 0x165   :  { %4882 = vmatprep.subr.bf16.mxu0 %v9884_v37 }
 0x166   :  { %4872 = vmatpush2.bf16.msra.mxu1 %v9763_v36  ;;  %v9828_v36 = vcombine.high %v1942_v22, %v1946_v23 }
 0x167   :  { %4923 = vmatprep.subr.bf16.mxu1 %v10012_v39  ;;  %v1368_v42 = vpop.f32.mrf.mxu0  ;;  %v2062_v39 = vld [vmem:[#allocation8 + $0xbc0] sm:$0xff] }
 0x168   :  { %v1369_v44 = vadd.f32 %v1368_v42, %v337_v40  ;;  %v2066_v40 = vld [vmem:[#allocation8 + $0xbe0] sm:$0xff] }
 0x169   :  { %v1370_v45 = vpop.f32.mrf.mxu0 }
 0x16a   :  { %v1410_v46 = vadd.f32 %v10890_v43, %v1369_v44  ;;  %v1371_v48 = vadd.f32 %v1370_v45, %v341_v41  ;;  %v1982_v43 = vld [vmem:[#allocation8 + $0x940] sm:$0xff] }
 0x16b   :  { %v1372_v49 = vpop.f32.mrf.mxu0  ;;  %v9868_v60 = vcombine.high %v1982_v43, %v1986_v58  ;;  %v9867_v63 = vcombine.low %v1982_v43, %v1986_v58 }
 0x16c   :  { %v1662_v50 = vmul.f32 0.2, %v1410_v46  ;;  %v1412_v51 = vadd.f32 %v10892_v47, %v1371_v48  ;;  %v9875_v47 = vcombine.low %v1990_v1, %v1994_v54  ;;  %v9948_v49 = vcombine.high %v2062_v39, %v2066_v40 }
 0x16d   :  { %v1373_v16 = vpop.f32.mrf.mxu0  ;;  %v9947_v1 = vcombine.low %v2062_v39, %v2066_v40  ;;  %v2082_v39 = vld [vmem:[#allocation8 + $0xc60] sm:$0xff] }
 0x16e   :  { %v1663_v52 = vmul.f32 0.2, %v1412_v51  ;;  %v1670_v53 = vmax.f32 %v1410_v46, %v1662_v50  ;;  %v9827_v46 = vcombine.low %v1942_v22, %v1946_v23  ;;  %v2058_v16 = vld [vmem:[#allocation8 + $0xba0] sm:$0xff] }
 0x16f   :  { %v2022_v22 = vld [vmem:[#allocation8 + $0xa80] sm:$0xff] }
 0x170   :  { %v1671_v19 = vmax.f32 %v1412_v51, %v1663_v52  ;;  %v10918_v56 = vpack.c.bf16 %v1670_v53, %v1670_v53  ;;  %v2054_v51 = vld [vmem:[#allocation8 + $0xb80] sm:$0xff] }
 0x171   :  { %v2118_v53 = vld [vmem:[#allocation8 + $0xd80] sm:$0xff] }
 0x172   :  { %v10916_v55 = vpack.c.bf16 %v1671_v19, %v1671_v19  ;;  %v2122_v19 = vld [vmem:[#allocation8 + $0xda0] sm:$0xff] }
 0x173   :  { %v10004_v58 = vcombine.high %v2118_v53, %v2122_v19  ;;  %v2026_v23 = vld [vmem:[#allocation8 + $0xaa0] sm:$0xff] }
 0x174   :  { %4832 = vmatprep.mubr.bf16.mxu0 %v10916_v55  ;;  %v9907_v40 = vcombine.low %v2022_v22, %v2026_v23 }
 0x175   :  { %4833 = vmatmul.mubr.bf16.vlgmr.msra.gmra.mxu0 %v10918_v56 }
 0x176   :  { %4883 = vmatpush1.bf16.msra.mxu0 %v9883_v59  ;;  %v10011_v59 = vcombine.low %v10896_v31, %v10898_v32  ;;  %v9996_v31 = vcombine.high %v2110_v61, %v2114_v62  ;;  %v2038_v32 = vld [vmem:[#allocation8 + $0xb00] sm:$0xff] }
 0x177   :  { %4884 = vmatprep.subr.bf16.mxu0 %v9876_v57  ;;  %v9940_v57 = vcombine.high %v2054_v51, %v2058_v16 }
 0x17a   :  { %4885 = vmatpush1.bf16.msra.mxu0 %v9875_v47  ;;  %v2046_v47 = vld [vmem:[#allocation8 + $0xb40] sm:$0xff] }
 0x17b   :  { %4886 = vmatprep.subr.bf16.mxu0 %v9868_v60  ;;  %v2050_v60 = vld [vmem:[#allocation8 + $0xb60] sm:$0xff] }
 0x17c   :  { %v9932_v2 = vcombine.high %v2046_v47, %v2050_v60  ;;  %v9931_v6 = vcombine.low %v2046_v47, %v2050_v60  ;;  %v2194_v47 = vld [vmem:[#allocation8 + $0xfe0] sm:$0xff] }
 0x17e   :  { %4887 = vmatpush1.bf16.msra.mxu0 %v9867_v63  ;;  %v9939_v63 = vcombine.low %v2054_v51, %v2058_v16 }
 0x17f   :  { %4888 = vmatprep.subr.bf16.mxu0 %v9860_v0  ;;  %v10003_v0 = vcombine.low %v2118_v53, %v2122_v19 }
 0x182   :  { %4889 = vmatpush1.bf16.msra.mxu0 %v9859_v4  ;;  %v2102_v4 = vld [vmem:[#allocation8 + $0xd00] sm:$0xff] }
 0x183   :  { %4890 = vmatprep.subr.bf16.mxu0 %v9852_v5  ;;  %v2106_v5 = vld [vmem:[#allocation8 + $0xd20] sm:$0xff] }
 0x186   :  { %4891 = vmatpush1.bf16.msra.mxu0 %v9851_v9  ;;  %v9924_v9 = vcombine.high %v2038_v32, %v2042_v3 }
 0x187   :  { %v1491_v17 = vpop.f32.mrf.mxu0  ;;  %4892 = vmatprep.subr.bf16.mxu0 %v9844_v11  ;;  %v9988_v11 = vcombine.high %v2102_v4, %v2106_v5 }
 0x189   :  { %v1450_v21 = vpop.f32.mrf.mxu1  ;;  %v1493_v26 = vpop.f32.mrf.mxu0 }
 0x18a   :  { %v1451_v25 = vadd.f32 %v1450_v21, %v345_v14  ;;  %4893 = vmatpush1.bf16.msra.mxu0 %v9843_v15  ;;  %v2094_v14 = vld [vmem:[#allocation8 + $0xcc0] sm:$0xff] }
 0x18b   :  { %v1452_v27 = vpop.f32.mrf.mxu1  ;;  %v1495_v34 = vpop.f32.mrf.mxu0  ;;  %4894 = vmatprep.subr.bf16.mxu0 %v9836_v20  ;;  %v2098_v15 = vld [vmem:[#allocation8 + $0xce0] sm:$0xff]  ;;  %v9916_v20 = vcombine.high %v2030_v12, %v2034_v13 }
 0x18c   :  { %v1492_v29 = vadd.f32 %v1491_v17, %v1451_v25  ;;  %v1453_v30 = vadd.f32 %v1452_v27, %v349_v18  ;;  %v9923_v17 = vcombine.low %v2038_v32, %v2042_v3  ;;  %v9987_v18 = vcombine.low %v2102_v4, %v2106_v5  ;;  %v2086_v25 = vld [vmem:[#allocation8 + $0xc80] sm:$0xff] }
 0x18d   :  { %v1454_v37 = vpop.f32.mrf.mxu1  ;;  %v1496_v44 = vpop.f32.mrf.mxu0  ;;  %v9980_v21 = vcombine.high %v2094_v14, %v2098_v15  ;;  %v9915_v27 = vcombine.low %v2030_v12, %v2034_v13  ;;  %v2014_v34 = vld [vmem:[#allocation8 + $0xa40] sm:$0xff] }
 0x18e   :  { %v1664_v41 = vmul.f32 0.2, %v1492_v29  ;;  %v1494_v42 = vadd.f32 %v1493_v26, %v1453_v30  ;;  %4895 = vmatpush1.bf16.msra.mxu0 %v9835_v28  ;;  %v2090_v26 = vld [vmem:[#allocation8 + $0xca0] sm:$0xff]  ;;  %v9979_v28 = vcombine.low %v2094_v14, %v2098_v15 }
 0x18f   :  { %v1455_v45 = vpop.f32.mrf.mxu1  ;;  %4896 = vmatprep.subr.bf16.mxu0 %v9828_v36  ;;  %v9972_v30 = vcombine.high %v2086_v25, %v2090_v26  ;;  %v2018_v36 = vld [vmem:[#allocation8 + $0xa60] sm:$0xff] }
 0x190   :  { %v1665_v48 = vmul.f32 0.2, %v1494_v42  ;;  %v1672_v50 = vmax.f32 %v1492_v29, %v1664_v41  ;;  %v9908_v29 = vcombine.high %v2022_v22, %v2026_v23  ;;  %v2078_v37 = vld [vmem:[#allocation8 + $0xc40] sm:$0xff]  ;;  %v9971_v41 = vcombine.low %v2086_v25, %v2090_v26 }
 0x191   :  { %v9964_v45 = vcombine.high %v2078_v37, %v2082_v39  ;;  %v9899_v16 = vcombine.low %v2014_v34, %v2018_v36  ;;  %v2174_v4 = vld [vmem:[#allocation8 + $0xf40] sm:$0xff]  ;;  %v10954_v23 = vsub.s32 5, %v10894_v24 }
 0x192   :  { %v1673_v52 = vmax.f32 %v1494_v42, %v1665_v48  ;;  %4897 = vmatpush1.bf16.msra.mxu0 %v9827_v46  ;;  %v10936_v43 = vpack.c.bf16 %v1672_v50, %v1672_v50  ;;  %v9900_v42 = vcombine.high %v2014_v34, %v2018_v36  ;;  %v2006_v46 = vld [vmem:[#allocation8 + $0xa00] sm:$0xff] }
 0x193   :  { %4898 = vmatprep.subr.bf16.mxu0 %v9948_v49  ;;  %v2010_v48 = vld [vmem:[#allocation8 + $0xa20] sm:$0xff] }
 0x194   :  { %v10932_v54 = vpack.c.bf16 %v1673_v52, %v1673_v52  ;;  %v2070_v49 = vld [vmem:[#allocation8 + $0xc00] sm:$0xff]  ;;  %v9963_v52 = vcombine.low %v2078_v37, %v2082_v39  ;;  %v9892_v53 = vcombine.high %v2006_v46, %v2010_v48  ;;  %v9891_v61 = vcombine.low %v2006_v46, %v2010_v48 }
 0x195   :  { %v2074_v50 = vld [vmem:[#allocation8 + $0xc20] sm:$0xff] }
 0x196   :  { %4873 = vmatprep.mubr.bf16.mxu1 %v10932_v54  ;;  %4899 = vmatpush2.bf16.msra.mxu0 %v9947_v1  ;;  %v9956_v1 = vcombine.high %v2070_v49, %v2074_v50  ;;  %v9955_v62 = vcombine.low %v2070_v49, %v2074_v50  ;;  %v2178_v5 = vld [vmem:[#allocation8 + $0xf60] sm:$0xff] }
 0x197   :  { %4874 = vmatmul.mubr.bf16.vlgmr.msra.gmra.mxu1 %v10936_v43  ;;  %4900 = vmatprep.subr.bf16.mxu0 %v9940_v57  ;;  %v10946_v57 = vld [vmem:[#allocation8 + $0x1e8] sm:$0xff]  ;;  %v10059_v12 = vcombine.low %v2174_v4, %v2178_v5  ;;  %v2158_v14 = vld [vmem:[#allocation8 + $0xec0] sm:$0xff] }
 0x198   :  { %4924 = vmatpush1.bf16.msra.mxu1 %v10011_v59  ;;  %v10944_v59 = vld [vmem:[#allocation8 + $0x1c8] sm:$0xff]  ;;  %v2162_v15 = vld [vmem:[#allocation8 + $0xee0] sm:$0xff] }
 0x199   :  { %4925 = vmatprep.subr.bf16.mxu1 %v10004_v58  ;;  %v2190_v58 = vld [vmem:[#allocation8 + $0xfc0] sm:$0xff]  ;;  %v10043_v25 = vcombine.low %v2158_v14, %v2162_v15 }
 0x19a   :  { %4901 = vmatpush2.bf16.msra.mxu0 %v9939_v63  ;;  %v9630_v63 = vcombine.high %v10944_v59, %v10946_v57  ;;  %v10075_v32 = vcombine.low %v2190_v58, %v2194_v47  ;;  %v2154_v22 = vld [vmem:[#allocation8 + $0xea0] sm:$0xff] }
 0x19b   :  { %4902 = vmatprep.subr.bf16.mxu0 %v9932_v2  ;;  %v2182_v2 = vld [vmem:[#allocation8 + $0xf80] sm:$0xff] }
 0x19c   :  { %4926 = vmatpush1.bf16.msra.mxu1 %v10003_v0  ;;  %v10076_v0 = vcombine.high %v2190_v58, %v2194_v47 }
 0x19d   :  { %4927 = vmatprep.subr.bf16.mxu1 %v9996_v31  ;;  %v2186_v31 = vld [vmem:[#allocation8 + $0xfa0] sm:$0xff] }
 0x19e   :  { %4903 = vmatpush2.bf16.msra.mxu0 %v9931_v6  ;;  %v10068_v3 = vcombine.high %v2182_v2, %v2186_v31  ;;  %v10067_v6 = vcombine.low %v2182_v2, %v2186_v31 }
 0x19f   :  { %4904 = vmatprep.subr.bf16.mxu0 %v9924_v9  ;;  %v2166_v9 = vld [vmem:[#allocation8 + $0xf00] sm:$0xff] }
 0x1a0   :  { %4928 = vmatpush1.bf16.msra.mxu1 %v9995_v7  ;;  %v10060_v7 = vcombine.high %v2174_v4, %v2178_v5 }
 0x1a1   :  { %4929 = vmatprep.subr.bf16.mxu1 %v9988_v11  ;;  %v2170_v11 = vld [vmem:[#allocation8 + $0xf20] sm:$0xff] }
 0x1a2   :  { %4905 = vmatpush2.bf16.msra.mxu0 %v9923_v17  ;;  %v10052_v13 = vcombine.high %v2166_v9, %v2170_v11  ;;  %v10051_v17 = vcombine.low %v2166_v9, %v2170_v11  ;;  %v1711_v9 = vld [vmem:[#allocation8 + $0xc8] sm:$0xff] }
 0x1a3   :  { %4906 = vmatprep.subr.bf16.mxu0 %v9916_v20  ;;  %v10044_v20 = vcombine.high %v2158_v14, %v2162_v15  ;;  %v1715_v11 = vld [vmem:[#allocation8 + $0xe8] sm:$0xff] }
 0x1a4   :  { %4930 = vmatpush1.bf16.msra.mxu1 %v9987_v18  ;;  %v10951_v18 = vsub.s32 4, %v10894_v24  ;;  %v1703_v14 = vld [vmem:[#allocation8 + $0x88] sm:$0xff] }
 0x1a5   :  { %4931 = vmatprep.subr.bf16.mxu1 %v9980_v21  ;;  %v2150_v21 = vld [vmem:[#allocation8 + $0xe80] sm:$0xff]  ;;  %v1707_v15 = vld [vmem:[#allocation8 + $0xa8] sm:$0xff] }
 0x1a6   :  { %4907 = vmatpush2.bf16.msra.mxu0 %v9915_v27  ;;  %v353_v26 = vrot.slane %v10903_v35, %v10951_v18  ;;  %v10036_v27 = vcombine.high %v2150_v21, %v2154_v22  ;;  %v10035_v36 = vcombine.low %v2150_v21, %v2154_v22  ;;  %v9590_v21 = vcombine.high %v1703_v14, %v1707_v15 }
 0x1a7   :  { %4908 = vmatprep.subr.bf16.mxu0 %v9908_v29  ;;  %v2146_v29 = vld [vmem:[#allocation8 + $0xe60] sm:$0xff]  ;;  %v10981_v22 = vsub.s32 7, %v10894_v24 }
 0x1a8   :  { %4932 = vmatpush1.bf16.msra.mxu1 %v9979_v28  ;;  %v2142_v28 = vld [vmem:[#allocation8 + $0xe40] sm:$0xff] }
 0x1a9   :  { %v10940_v44 = vpop.f32.mrf.mxu1  ;;  %4933 = vmatprep.subr.bf16.mxu1 %v9972_v30  ;;  %v357_v30 = vrot.slane %v10903_v35, %v10954_v23  ;;  %v10028_v39 = vcombine.high %v2142_v28, %v2146_v29  ;;  %v10027_v49 = vcombine.low %v2142_v28, %v2146_v29  ;;  %v9589_v28 = vcombine.low %v1703_v14, %v1707_v15 }
 0x1aa   :  { %4909 = vmatpush2.bf16.msra.mxu0 %v9907_v40 }
 0x1ab   :  { %v10942_v51 = vpop.f32.mrf.mxu1  ;;  %4910 = vmatprep.subr.bf16.mxu0 %v9900_v42  ;;  %v2138_v42 = vld [vmem:[#allocation8 + $0xe20] sm:$0xff] }
 0x1ac   :  { %4934 = vmatpush1.bf16.msra.mxu1 %v9971_v41  ;;  %v2134_v41 = vld [vmem:[#allocation8 + $0xe00] sm:$0xff] }
 0x1ad   :  { %v1577_v19 = vpop.f32.mrf.mxu1  ;;  %4935 = vmatprep.subr.bf16.mxu1 %v9964_v45 }
 0x1ae   :  { %4911 = vmatpush2.bf16.msra.mxu0 %v9899_v16  ;;  %v10962_v19 = vld [vmem:[#allocation8 + $0x5c8] sm:$0xff] }
 0x1af   :  { %v1578_v60 = vpop.f32.mrf.mxu1  ;;  %4912 = vmatprep.subr.bf16.mxu0 %v9892_v53 }
 0x1b0   :  { %4936 = vmatpush1.bf16.msra.mxu1 %v9963_v52  ;;  %v10020_v52 = vcombine.high %v2134_v41, %v2138_v42  ;;  %v10019_v60 = vcombine.low %v2134_v41, %v2138_v42 }
 0x1b1   :  { %4937 = vmatprep.subr.bf16.mxu1 %v9956_v1  ;;  %v10964_v1 = vld [vmem:[#allocation8 + $0x5e8] sm:$0xff] }
 0x1b2   :  { %4913 = vmatpush2.bf16.msra.mxu0 %v9891_v61 }
 0x1b3   :  { %4964 = vmatprep.subr.bf16.mxu0 %v9630_v63  ;;  %v9758_v63 = vcombine.high %v10962_v19, %v10964_v1 }
 0x1b4   :  { %4938 = vmatpush1.bf16.msra.mxu1 %v9955_v62  ;;  %v1739_v62 = vld [vmem:[#allocation8 + $0x1a8] sm:$0xff] }
 0x1b5   :  { %4939 = vmatprep.subr.bf16.mxu1 %v10076_v0 }
 0x1b8   :  { %4940 = vmatpush2.bf16.msra.mxu1 %v10075_v32  ;;  %v1727_v32 = vld [vmem:[#allocation8 + $0x148] sm:$0xff] }
 0x1b9   :  { %4941 = vmatprep.subr.bf16.mxu1 %v10068_v3  ;;  %v1731_v3 = vld [vmem:[#allocation8 + $0x168] sm:$0xff] }
 0x1ba   :  { %v9614_v5 = vcombine.high %v1727_v32, %v1731_v3 }
 0x1bc   :  { %4942 = vmatpush2.bf16.msra.mxu1 %v10067_v6  ;;  %v1719_v6 = vld [vmem:[#allocation8 + $0x108] sm:$0xff] }
 0x1bd   :  { %4943 = vmatprep.subr.bf16.mxu1 %v10060_v7  ;;  %v1723_v7 = vld [vmem:[#allocation8 + $0x128] sm:$0xff] }
 0x1c0   :  { %4944 = vmatpush2.bf16.msra.mxu1 %v10059_v12  ;;  %v9605_v12 = vcombine.low %v1719_v6, %v1723_v7 }
 0x1c1   :  { %4945 = vmatprep.subr.bf16.mxu1 %v10052_v13  ;;  %v9598_v13 = vcombine.high %v1711_v9, %v1715_v11 }
 0x1c4   :  { %4946 = vmatpush2.bf16.msra.mxu1 %v10051_v17  ;;  %v10978_v17 = vsub.s32 6, %v10894_v24 }
 0x1c5   :  { %4947 = vmatprep.subr.bf16.mxu1 %v10044_v20  ;;  %v9597_v20 = vcombine.low %v1711_v9, %v1715_v11  ;;  %v1791_v9 = vld [vmem:[#allocation8 + $0x348] sm:$0xff] }
 0x1c6   :  { %v1795_v11 = vld [vmem:[#allocation8 + $0x368] sm:$0xff] }
 0x1c7   :  { %v1532_v34 = vpop.f32.mrf.mxu0 }
 0x1c8   :  { %4948 = vmatpush2.bf16.msra.mxu1 %v10043_v25  ;;  %v1533_v37 = vadd.f32 %v1532_v34, %v353_v26  ;;  %v1695_v25 = vld [vmem:[#allocation8 + $0x48] sm:$0xff] }
 0x1c9   :  { %4949 = vmatprep.subr.bf16.mxu1 %v10036_v27  ;;  %v1534_v40 = vpop.f32.mrf.mxu0  ;;  %v1699_v26 = vld [vmem:[#allocation8 + $0x68] sm:$0xff]  ;;  %v361_v27 = vrot.slane %v10903_v35, %v10978_v17 }
 0x1ca   :  { %v1574_v45 = vadd.f32 %v10940_v44, %v1533_v37  ;;  %v1535_v46 = vadd.f32 %v1534_v40, %v357_v30  ;;  %v1735_v44 = vld [vmem:[#allocation8 + $0x188] sm:$0xff]  ;;  %v365_v30 = vrot.slane %v10903_v35, %v10981_v22  ;;  %v9582_v34 = vcombine.high %v1695_v25, %v1699_v26 }
 0x1cb   :  { %v1536_v48 = vpop.f32.mrf.mxu0  ;;  %v9622_v31 = vcombine.high %v1735_v44, %v1739_v62  ;;  %v9621_v4 = vcombine.low %v1735_v44, %v1739_v62  ;;  %v1687_v37 = vld [vmem:[#allocation8 + $0x8] sm:$0xff]  ;;  %v9581_v42 = vcombine.low %v1695_v25, %v1699_v26 }
 0x1cc   :  { %4950 = vmatpush2.bf16.msra.mxu1 %v10035_v36  ;;  %v1666_v50 = vmul.f32 0.2, %v1574_v45  ;;  %v1576_v16 = vadd.f32 %v10942_v51, %v1535_v46  ;;  %v9629_v51 = vcombine.low %v10944_v59, %v10946_v57  ;;  %v9613_v59 = vcombine.low %v1727_v32, %v1731_v3  ;;  %v1863_v32 = vld [vmem:[#allocation8 + $0x588] sm:$0xff] }
 0x1cd   :  { %4951 = vmatprep.subr.bf16.mxu1 %v10028_v39  ;;  %v1537_v53 = vpop.f32.mrf.mxu0  ;;  %v9606_v57 = vcombine.high %v1719_v6, %v1723_v7  ;;  %v1691_v39 = vld [vmem:[#allocation8 + $0x28] sm:$0xff]  ;;  %v9757_v6 = vcombine.low %v10962_v19, %v10964_v1 }
 0x1ce   :  { %v1667_v58 = vmul.f32 0.2, %v1576_v16  ;;  %v1674_v47 = vmax.f32 %v1574_v45, %v1666_v50  ;;  %v1867_v3 = vld [vmem:[#allocation8 + $0x5a8] sm:$0xff] }
 0x1cf   :  { %v9749_v15 = vcombine.low %v1863_v32, %v1867_v3  ;;  %v1783_v1 = vld [vmem:[#allocation8 + $0x308] sm:$0xff] }
 0x1d0   :  { %4952 = vmatpush2.bf16.msra.mxu1 %v10027_v49  ;;  %v1675_v61 = vmax.f32 %v1576_v16, %v1667_v58  ;;  %v10972_v2 = vpack.c.bf16 %v1674_v47, %v1674_v47  ;;  %v9574_v49 = vcombine.high %v1687_v37, %v1691_v39  ;;  %v1807_v16 = vld [vmem:[#allocation8 + $0x3c8] sm:$0xff] }
 0x1d1   :  { %4953 = vmatprep.subr.bf16.mxu1 %v10020_v52  ;;  %v1811_v52 = vld [vmem:[#allocation8 + $0x3e8] sm:$0xff] }
 0x1d2   :  { %v10968_v0 = vpack.c.bf16 %v1675_v61, %v1675_v61  ;;  %v9694_v44 = vcombine.high %v1807_v16, %v1811_v52  ;;  %v1847_v25 = vld [vmem:[#allocation8 + $0x508] sm:$0xff] }
 0x1d3   :  { %v1851_v26 = vld [vmem:[#allocation8 + $0x528] sm:$0xff] }
 0x1d4   :  { %4954 = vmatpush2.bf16.msra.mxu1 %v10019_v60  ;;  %4914 = vmatprep.mubr.bf16.mxu0 %v10968_v0  ;;  %v9573_v60 = vcombine.low %v1687_v37, %v1691_v39  ;;  %v1839_v37 = vld [vmem:[#allocation8 + $0x4c8] sm:$0xff] }
 0x1d5   :  { %5005 = vmatprep.subr.bf16.mxu1 %v9758_v63  ;;  %4915 = vmatmul.mubr.bf16.vlgmr.msra.gmra.mxu0 %v10972_v2  ;;  %v1799_v63 = vld [vmem:[#allocation8 + $0x388] sm:$0xff] }
 0x1d6   :  { %4965 = vmatpush1.bf16.msra.mxu0 %v9629_v51  ;;  %4996 = vmatprep.mubr.bf16.mxu0 %v10916_v55  ;;  %v1843_v39 = vld [vmem:[#allocation8 + $0x4e8] sm:$0xff] }
 0x1d7   :  { %4966 = vmatprep.subr.bf16.mxu0 %v9622_v31  ;;  %v1803_v31 = vld [vmem:[#allocation8 + $0x3a8] sm:$0xff] }
 0x1d8   :  { %v9685_v14 = vcombine.low %v1799_v63, %v1803_v31 }
 0x1da   :  { %4967 = vmatpush1.bf16.msra.mxu0 %v9621_v4  ;;  %v9693_v4 = vcombine.low %v1807_v16, %v1811_v52  ;;  %v9725_v16 = vcombine.low %v1839_v37, %v1843_v39 }
 0x1db   :  { %4968 = vmatprep.subr.bf16.mxu0 %v9614_v5 }
 0x1de   :  { %4969 = vmatpush1.bf16.msra.mxu0 %v9613_v59  ;;  %v9686_v59 = vcombine.high %v1799_v63, %v1803_v31  ;;  %v1755_v31 = vld [vmem:[#allocation8 + $0x228] sm:$0xff] }
 0x1df   :  { %4970 = vmatprep.subr.bf16.mxu0 %v9606_v57  ;;  %v9750_v57 = vcombine.high %v1863_v32, %v1867_v3  ;;  %v1815_v32 = vld [vmem:[#allocation8 + $0x408] sm:$0xff] }
 0x1e0   :  { %v1819_v3 = vld [vmem:[#allocation8 + $0x428] sm:$0xff] }
 0x1e2   :  { %4971 = vmatpush1.bf16.msra.mxu0 %v9605_v12  ;;  %v1855_v12 = vld [vmem:[#allocation8 + $0x548] sm:$0xff] }
 0x1e3   :  { %4972 = vmatprep.subr.bf16.mxu0 %v9598_v13  ;;  %v1859_v13 = vld [vmem:[#allocation8 + $0x568] sm:$0xff] }
 0x1e4   :  { %v9742_v19 = vcombine.high %v1855_v12, %v1859_v13 }
 0x1e6   :  { %4973 = vmatpush1.bf16.msra.mxu0 %v9597_v20  ;;  %v9678_v20 = vcombine.high %v1791_v9, %v1795_v11 }
 0x1e7   :  { %v1655_v29 = vpop.f32.mrf.mxu0  ;;  %4974 = vmatprep.subr.bf16.mxu0 %v9590_v21  ;;  %v1787_v21 = vld [vmem:[#allocation8 + $0x328] sm:$0xff] }
 0x1e9   :  { %v1614_v36 = vpop.f32.mrf.mxu1  ;;  %v1657_v41 = vpop.f32.mrf.mxu0 }
 0x1ea   :  { %v1615_v40 = vadd.f32 %v1614_v36, %v361_v27  ;;  %4975 = vmatpush1.bf16.msra.mxu0 %v9589_v28  ;;  %v9677_v27 = vcombine.low %v1791_v9, %v1795_v11  ;;  %v9741_v28 = vcombine.low %v1855_v12, %v1859_v13  ;;  %v1779_v36 = vld [vmem:[#allocation8 + $0x2e8] sm:$0xff] }
 0x1eb   :  { %v1616_v24 = vpop.f32.mrf.mxu1  ;;  %v1659_v48 = vpop.f32.mrf.mxu0  ;;  %4976 = vmatprep.subr.bf16.mxu0 %v9582_v34  ;;  %v1775_v34 = vld [vmem:[#allocation8 + $0x2c8] sm:$0xff] }
 0x1ec   :  { %v1656_v45 = vadd.f32 %v1655_v29, %v1615_v40  ;;  %v1617_v46 = vadd.f32 %v1616_v24, %v365_v30  ;;  %v9670_v29 = vcombine.high %v1783_v1, %v1787_v21  ;;  %v9734_v30 = vcombine.high %v1847_v25, %v1851_v26  ;;  %v1831_v48 = vld [vmem:[#allocation8 + $0x488] sm:$0xff] }
 0x1ed   :  { %v1618_v50 = vpop.f32.mrf.mxu1  ;;  %v1660_v35 = vpop.f32.mrf.mxu0  ;;  %v9669_v40 = vcombine.low %v1783_v1, %v1787_v21  ;;  %v9662_v24 = vcombine.high %v1775_v34, %v1779_v36  ;;  %v1999_v9 = vld [vmem:[#allocation8 + $0x9c8] sm:$0xff] }
 0x1ee   :  { %v1668_v53 = vmul.f32 0.2, %v1656_v45  ;;  %v1658_v58 = vadd.f32 %v1657_v41, %v1617_v46  ;;  %4977 = vmatpush1.bf16.msra.mxu0 %v9581_v42  ;;  %v9733_v41 = vcombine.low %v1847_v25, %v1851_v26  ;;  %v9726_v42 = vcombine.high %v1839_v37, %v1843_v39  ;;  %v1771_v46 = vld [vmem:[#allocation8 + $0x2a8] sm:$0xff] }
 0x1ef   :  { %v1619_v47 = vpop.f32.mrf.mxu1  ;;  %4978 = vmatprep.subr.bf16.mxu0 %v9574_v49  ;;  %v1835_v49 = vld [vmem:[#allocation8 + $0x4a8] sm:$0xff]  ;;  %v9661_v50 = vcombine.low %v1775_v34, %v1779_v36 }
 0x1f0   :  { %v1669_v61 = vmul.f32 0.2, %v1658_v58  ;;  %v1676_v62 = vmax.f32 %v1656_v45, %v1668_v53  ;;  %v1767_v45 = vld [vmem:[#allocation8 + $0x288] sm:$0xff]  ;;  %v9718_v53 = vcombine.high %v1831_v48, %v1835_v49 }
 0x1f1   :  { %v9654_v52 = vcombine.high %v1767_v45, %v1771_v46  ;;  %v1763_v35 = vld [vmem:[#allocation8 + $0x268] sm:$0xff] }
 0x1f2   :  { %v1677_v51 = vmax.f32 %v1658_v58, %v1669_v61  ;;  %4979 = vmatpush1.bf16.msra.mxu0 %v9573_v60  ;;  %v10991_v7 = vpack.c.bf16 %v1676_v62, %v1676_v62  ;;  %v1759_v58 = vld [vmem:[#allocation8 + $0x248] sm:$0xff]  ;;  %v9653_v61 = vcombine.low %v1767_v45, %v1771_v46 }
 0x1f3   :  { %4980 = vmatprep.subr.bf16.mxu0 %v9694_v44  ;;  %v1823_v47 = vld [vmem:[#allocation8 + $0x448] sm:$0xff]  ;;  %v9717_v44 = vcombine.low %v1831_v48, %v1835_v49  ;;  %v9646_v62 = vcombine.high %v1759_v58, %v1763_v35 }
 0x1f4   :  { %v10987_v5 = vpack.c.bf16 %v1677_v51, %v1677_v51  ;;  %v1827_v60 = vld [vmem:[#allocation8 + $0x468] sm:$0xff] }
 0x1f5   :  { %v9710_v63 = vcombine.high %v1823_v47, %v1827_v60  ;;  %v1751_v51 = vld [vmem:[#allocation8 + $0x208] sm:$0xff] }
 0x1f6   :  { %4955 = vmatprep.mubr.bf16.mxu1 %v10987_v5  ;;  %4981 = vmatpush2.bf16.msra.mxu0 %v9693_v4  ;;  %v9645_v4 = vcombine.low %v1759_v58, %v1763_v35  ;;  %v2003_v11 = vld [vmem:[#allocation8 + $0x9e8] sm:$0xff] }
 0x1f7   :  { %4956 = vmatmul.mubr.bf16.vlgmr.msra.gmra.mxu1 %v10991_v7  ;;  %4982 = vmatprep.subr.bf16.mxu0 %v9686_v59  ;;  %v9638_v59 = vcombine.high %v1751_v51, %v1755_v31  ;;  %v1935_v12 = vld [vmem:[#allocation8 + $0x7c8] sm:$0xff] }
 0x1f8   :  { %5006 = vmatpush1.bf16.msra.mxu1 %v9757_v6  ;;  %5037 = vmatprep.mubr.bf16.mxu1 %v10932_v54  ;;  %v9709_v6 = vcombine.low %v1823_v47, %v1827_v60  ;;  %v1939_v13 = vld [vmem:[#allocation8 + $0x7e8] sm:$0xff] }
 0x1f9   :  { %5007 = vmatprep.subr.bf16.mxu1 %v9750_v57  ;;  %v9702_v57 = vcombine.high %v1815_v32, %v1819_v3  ;;  %v1991_v1 = vld [vmem:[#allocation8 + $0x988] sm:$0xff] }
 0x1fa   :  { %4983 = vmatpush2.bf16.msra.mxu0 %v9685_v14  ;;  %v9637_v14 = vcombine.low %v1751_v51, %v1755_v31  ;;  %v1995_v21 = vld [vmem:[#allocation8 + $0x9a8] sm:$0xff] }
 0x1fb   :  { %4984 = vmatprep.subr.bf16.mxu0 %v9678_v20  ;;  %v9886_v20 = vcombine.high %v1999_v9, %v2003_v11  ;;  %v1927_v25 = vld [vmem:[#allocation8 + $0x788] sm:$0xff] }
 0x1fc   :  { %5008 = vmatpush1.bf16.msra.mxu1 %v9749_v15  ;;  %v9701_v15 = vcombine.low %v1815_v32, %v1819_v3  ;;  %v1931_v26 = vld [vmem:[#allocation8 + $0x7a8] sm:$0xff] }
 0x1fd   :  { %5009 = vmatprep.subr.bf16.mxu1 %v9742_v19  ;;  %v9822_v19 = vcombine.high %v1935_v12, %v1939_v13  ;;  %v1983_v34 = vld [vmem:[#allocation8 + $0x948] sm:$0xff] }
 0x1fe   :  { %4985 = vmatpush2.bf16.msra.mxu0 %v9677_v27  ;;  %v9885_v27 = vcombine.low %v1999_v9, %v2003_v11  ;;  %v1987_v36 = vld [vmem:[#allocation8 + $0x968] sm:$0xff] }
 0x1ff   :  { %4986 = vmatprep.subr.bf16.mxu0 %v9670_v29  ;;  %v9878_v29 = vcombine.high %v1991_v1, %v1995_v21  ;;  %v1919_v37 = vld [vmem:[#allocation8 + $0x748] sm:$0xff] }
 0x200   :  { %5010 = vmatpush1.bf16.msra.mxu1 %v9741_v28  ;;  %v9821_v28 = vcombine.low %v1935_v12, %v1939_v13  ;;  %v1923_v39 = vld [vmem:[#allocation8 + $0x768] sm:$0xff] }
 0x201   :  { %5011 = vmatprep.subr.bf16.mxu1 %v9734_v30  ;;  %v9814_v30 = vcombine.high %v1927_v25, %v1931_v26  ;;  %v1975_v45 = vld [vmem:[#allocation8 + $0x908] sm:$0xff] }
 0x202   :  { %4987 = vmatpush2.bf16.msra.mxu0 %v9669_v40  ;;  %v9877_v40 = vcombine.low %v1991_v1, %v1995_v21  ;;  %v1979_v46 = vld [vmem:[#allocation8 + $0x928] sm:$0xff] }
 0x203   :  { %4988 = vmatprep.subr.bf16.mxu0 %v9662_v24  ;;  %v9870_v24 = vcombine.high %v1983_v34, %v1987_v36  ;;  %v1911_v48 = vld [vmem:[#allocation8 + $0x708] sm:$0xff] }
 0x204   :  { %5012 = vmatpush1.bf16.msra.mxu1 %v9733_v41  ;;  %v9813_v41 = vcombine.low %v1927_v25, %v1931_v26  ;;  %v1915_v49 = vld [vmem:[#allocation8 + $0x728] sm:$0xff] }
 0x205   :  { %5013 = vmatprep.subr.bf16.mxu1 %v9726_v42  ;;  %v9806_v42 = vcombine.high %v1919_v37, %v1923_v39  ;;  %v1967_v58 = vld [vmem:[#allocation8 + $0x8c8] sm:$0xff] }
 0x206   :  { %4989 = vmatpush2.bf16.msra.mxu0 %v9661_v50  ;;  %v9869_v50 = vcombine.low %v1983_v34, %v1987_v36  ;;  %v1971_v35 = vld [vmem:[#allocation8 + $0x8e8] sm:$0xff] }
 0x207   :  { %4990 = vmatprep.subr.bf16.mxu0 %v9654_v52  ;;  %v9862_v52 = vcombine.high %v1975_v45, %v1979_v46  ;;  %v1903_v47 = vld [vmem:[#allocation8 + $0x6c8] sm:$0xff] }
 0x208   :  { %5014 = vmatpush1.bf16.msra.mxu1 %v9725_v16  ;;  %v9805_v16 = vcombine.low %v1919_v37, %v1923_v39  ;;  %v1907_v60 = vld [vmem:[#allocation8 + $0x6e8] sm:$0xff] }
 0x209   :  { %5015 = vmatprep.subr.bf16.mxu1 %v9718_v53  ;;  %v9798_v53 = vcombine.high %v1911_v48, %v1915_v49  ;;  %v1959_v51 = vld [vmem:[#allocation8 + $0x888] sm:$0xff] }
 0x20a   :  { %4991 = vmatpush2.bf16.msra.mxu0 %v9653_v61  ;;  %v9861_v61 = vcombine.low %v1975_v45, %v1979_v46  ;;  %v1963_v31 = vld [vmem:[#allocation8 + $0x8a8] sm:$0xff] }
 0x20b   :  { %4992 = vmatprep.subr.bf16.mxu0 %v9646_v62  ;;  %v9854_v62 = vcombine.high %v1967_v58, %v1971_v35  ;;  %v1895_v32 = vld [vmem:[#allocation8 + $0x688] sm:$0xff] }
 0x20c   :  { %5016 = vmatpush1.bf16.msra.mxu1 %v9717_v44  ;;  %v9797_v44 = vcombine.low %v1911_v48, %v1915_v49  ;;  %v1899_v3 = vld [vmem:[#allocation8 + $0x6a8] sm:$0xff] }
 0x20d   :  { %5017 = vmatprep.subr.bf16.mxu1 %v9710_v63  ;;  %v9790_v63 = vcombine.high %v1903_v47, %v1907_v60  ;;  %v1951_v9 = vld [vmem:[#allocation8 + $0x848] sm:$0xff] }
 0x20e   :  { %4993 = vmatpush2.bf16.msra.mxu0 %v9645_v4  ;;  %v9853_v4 = vcombine.low %v1967_v58, %v1971_v35  ;;  %v1955_v11 = vld [vmem:[#allocation8 + $0x868] sm:$0xff] }
 0x20f   :  { %4994 = vmatprep.subr.bf16.mxu0 %v9638_v59  ;;  %v9846_v59 = vcombine.high %v1959_v51, %v1963_v31  ;;  %v1887_v12 = vld [vmem:[#allocation8 + $0x648] sm:$0xff] }
 0x210   :  { %5018 = vmatpush1.bf16.msra.mxu1 %v9709_v6  ;;  %v9789_v6 = vcombine.low %v1903_v47, %v1907_v60  ;;  %v1891_v13 = vld [vmem:[#allocation8 + $0x668] sm:$0xff] }
 0x211   :  { %5019 = vmatprep.subr.bf16.mxu1 %v9702_v57  ;;  %v9782_v57 = vcombine.high %v1895_v32, %v1899_v3  ;;  %v1943_v1 = vld [vmem:[#allocation8 + $0x808] sm:$0xff] }
 0x212   :  { %4995 = vmatpush2.bf16.msra.mxu0 %v9637_v14  ;;  %v9845_v14 = vcombine.low %v1959_v51, %v1963_v31  ;;  %v1947_v21 = vld [vmem:[#allocation8 + $0x828] sm:$0xff] }
 0x213   :  { %5046 = vmatprep.subr.bf16.mxu0 %v9886_v20  ;;  %v9838_v20 = vcombine.high %v1951_v9, %v1955_v11  ;;  %v1879_v25 = vld [vmem:[#allocation8 + $0x608] sm:$0xff] }
 0x214   :  { %5020 = vmatpush1.bf16.msra.mxu1 %v9701_v15  ;;  %v9781_v15 = vcombine.low %v1895_v32, %v1899_v3  ;;  %v1883_v26 = vld [vmem:[#allocation8 + $0x628] sm:$0xff] }
 0x215   :  { %5021 = vmatprep.subr.bf16.mxu1 %v9822_v19  ;;  %4997 = vmatmul.mubr.bf16.vlgmr.msra.gmra.mxu0 %v10918_v56  ;;  %v9774_v19 = vcombine.high %v1887_v12, %v1891_v13  ;;  %v2063_v34 = vld [vmem:[#allocation8 + $0xbc8] sm:$0xff] }
 0x216   :  { %5047 = vmatpush1.bf16.msra.mxu0 %v9885_v27  ;;  %5078 = vmatprep.mubr.bf16.mxu0 %v10968_v0  ;;  %v9837_v27 = vcombine.low %v1951_v9, %v1955_v11  ;;  %v2067_v36 = vld [vmem:[#allocation8 + $0xbe8] sm:$0xff] }
 0x217   :  { %5048 = vmatprep.subr.bf16.mxu0 %v9878_v29  ;;  %v9830_v29 = vcombine.high %v1943_v1, %v1947_v21  ;;  %v2127_v37 = vld [vmem:[#allocation8 + $0xdc8] sm:$0xff] }
 0x218   :  { %5022 = vmatpush2.bf16.msra.mxu1 %v9821_v28  ;;  %v9773_v28 = vcombine.low %v1887_v12, %v1891_v13  ;;  %v2131_v39 = vld [vmem:[#allocation8 + $0xde8] sm:$0xff] }
 0x219   :  { %5023 = vmatprep.subr.bf16.mxu1 %v9814_v30  ;;  %v9766_v30 = vcombine.high %v1879_v25, %v1883_v26  ;;  %v2055_v45 = vld [vmem:[#allocation8 + $0xb88] sm:$0xff] }
 0x21a   :  { %5049 = vmatpush1.bf16.msra.mxu0 %v9877_v40  ;;  %v9829_v40 = vcombine.low %v1943_v1, %v1947_v21  ;;  %v2059_v46 = vld [vmem:[#allocation8 + $0xba8] sm:$0xff] }
 0x21b   :  { %5050 = vmatprep.subr.bf16.mxu0 %v9870_v24  ;;  %v9950_v24 = vcombine.high %v2063_v34, %v2067_v36  ;;  %v2119_v48 = vld [vmem:[#allocation8 + $0xd88] sm:$0xff] }
 0x21c   :  { %5024 = vmatpush2.bf16.msra.mxu1 %v9813_v41  ;;  %v9765_v41 = vcombine.low %v1879_v25, %v1883_v26  ;;  %v2123_v49 = vld [vmem:[#allocation8 + $0xda8] sm:$0xff] }
 0x21d   :  { %5025 = vmatprep.subr.bf16.mxu1 %v9806_v42  ;;  %v10014_v42 = vcombine.high %v2127_v37, %v2131_v39  ;;  %v2047_v58 = vld [vmem:[#allocation8 + $0xb48] sm:$0xff] }
 0x21e   :  { %5051 = vmatpush1.bf16.msra.mxu0 %v9869_v50  ;;  %v9949_v50 = vcombine.low %v2063_v34, %v2067_v36  ;;  %v2051_v35 = vld [vmem:[#allocation8 + $0xb68] sm:$0xff] }
 0x21f   :  { %5052 = vmatprep.subr.bf16.mxu0 %v9862_v52  ;;  %v9942_v52 = vcombine.high %v2055_v45, %v2059_v46  ;;  %v2111_v60 = vld [vmem:[#allocation8 + $0xd48] sm:$0xff]  ;;  %v9934_v51 = vcombine.high %v2047_v58, %v2051_v35 }
 0x220   :  { %5026 = vmatpush2.bf16.msra.mxu1 %v9805_v16  ;;  %v10013_v16 = vcombine.low %v2127_v37, %v2131_v39  ;;  %v2039_v32 = vld [vmem:[#allocation8 + $0xb08] sm:$0xff] }
 0x221   :  { %5027 = vmatprep.subr.bf16.mxu1 %v9798_v53  ;;  %v10006_v53 = vcombine.high %v2119_v48, %v2123_v49  ;;  %v2043_v3 = vld [vmem:[#allocation8 + $0xb28] sm:$0xff] }
 0x222   :  { %5053 = vmatpush1.bf16.msra.mxu0 %v9861_v61  ;;  %v2115_v61 = vld [vmem:[#allocation8 + $0xd68] sm:$0xff]  ;;  %v9926_v12 = vcombine.high %v2039_v32, %v2043_v3  ;;  %v9925_v1 = vcombine.low %v2039_v32, %v2043_v3  ;;  %v2198_v32 = vld [vmem:[#allocation10] sm:$0xff] }
 0x223   :  { %5054 = vmatprep.subr.bf16.mxu0 %v9854_v62  ;;  %v9998_v31 = vcombine.high %v2111_v60, %v2115_v61  ;;  %v9997_v11 = vcombine.low %v2111_v60, %v2115_v61 }
 0x224   :  { %5028 = vmatpush2.bf16.msra.mxu1 %v9797_v44  ;;  %v9941_v44 = vcombine.low %v2055_v45, %v2059_v46 }
 0x225   :  { %5029 = vmatprep.subr.bf16.mxu1 %v9790_v63  ;;  %v10005_v63 = vcombine.low %v2119_v48, %v2123_v49 }
 0x226   :  { %5055 = vmatpush1.bf16.msra.mxu0 %v9853_v4 }
 0x227   :  { %5056 = vmatprep.subr.bf16.mxu0 %v9846_v59  ;;  %v2107_v59 = vld [vmem:[#allocation8 + $0xd28] sm:$0xff] }
 0x228   :  { %5030 = vmatpush2.bf16.msra.mxu1 %v9789_v6  ;;  %v2103_v6 = vld [vmem:[#allocation8 + $0xd08] sm:$0xff] }
 0x229   :  { %5031 = vmatprep.subr.bf16.mxu1 %v9782_v57  ;;  %v9933_v57 = vcombine.low %v2047_v58, %v2051_v35  ;;  %v9990_v13 = vcombine.high %v2103_v6, %v2107_v59  ;;  %v9989_v21 = vcombine.low %v2103_v6, %v2107_v59 }
 0x22a   :  { %5057 = vmatpush1.bf16.msra.mxu0 %v9845_v14  ;;  %v2031_v14 = vld [vmem:[#allocation8 + $0xac8] sm:$0xff] }
 0x22b   :  { %5058 = vmatprep.subr.bf16.mxu0 %v9838_v20  ;;  %v2095_v20 = vld [vmem:[#allocation8 + $0xcc8] sm:$0xff] }
 0x22c   :  { %5032 = vmatpush2.bf16.msra.mxu1 %v9781_v15  ;;  %v2035_v15 = vld [vmem:[#allocation8 + $0xae8] sm:$0xff] }
 0x22d   :  { %5033 = vmatprep.subr.bf16.mxu1 %v9774_v19  ;;  %v2099_v19 = vld [vmem:[#allocation8 + $0xce8] sm:$0xff]  ;;  %v9918_v25 = vcombine.high %v2031_v14, %v2035_v15  ;;  %v9917_v34 = vcombine.low %v2031_v14, %v2035_v15  ;;  %v2207_v15 = vrot.slane %v2198_v32, %v10906_v38 }
 0x22e   :  { %5059 = vmatpush1.bf16.msra.mxu0 %v9837_v27  ;;  %v9982_v26 = vcombine.high %v2095_v20, %v2099_v19  ;;  %v2023_v27 = vld [vmem:[#allocation8 + $0xa88] sm:$0xff]  ;;  %v9981_v36 = vcombine.low %v2095_v20, %v2099_v19 }
 0x22f   :  { %5060 = vmatprep.subr.bf16.mxu0 %v9830_v29  ;;  %v2087_v29 = vld [vmem:[#allocation8 + $0xc88] sm:$0xff] }
 0x230   :  { %5034 = vmatpush2.bf16.msra.mxu1 %v9773_v28  ;;  %v2027_v28 = vld [vmem:[#allocation8 + $0xaa8] sm:$0xff] }
 0x231   :  { %5035 = vmatprep.subr.bf16.mxu1 %v9766_v30  ;;  %v2091_v30 = vld [vmem:[#allocation8 + $0xca8] sm:$0xff]  ;;  %v9910_v37 = vcombine.high %v2023_v27, %v2027_v28  ;;  %v9909_v45 = vcombine.low %v2023_v27, %v2027_v28 }
 0x232   :  { %5061 = vmatpush1.bf16.msra.mxu0 %v9829_v40  ;;  %v9974_v39 = vcombine.high %v2087_v29, %v2091_v30  ;;  %v2015_v40 = vld [vmem:[#allocation8 + $0xa48] sm:$0xff]  ;;  %v9973_v46 = vcombine.low %v2087_v29, %v2091_v30 }
 0x233   :  { %5062 = vmatprep.subr.bf16.mxu0 %v9950_v24  ;;  %v2079_v24 = vld [vmem:[#allocation8 + $0xc48] sm:$0xff] }
 0x234   :  { %5036 = vmatpush2.bf16.msra.mxu1 %v9765_v41  ;;  %v2019_v41 = vld [vmem:[#allocation8 + $0xa68] sm:$0xff] }
 0x235   :  { %5087 = vmatprep.subr.bf16.mxu1 %v10014_v42  ;;  %v10998_v47 = vpop.f32.mrf.mxu0  ;;  %v2083_v42 = vld [vmem:[#allocation8 + $0xc68] sm:$0xff]  ;;  %v9902_v48 = vcombine.high %v2015_v40, %v2019_v41  ;;  %v9901_v58 = vcombine.low %v2015_v40, %v2019_v41  ;;  %v1720_v41 = vld [vmem:[#allocation8 + $0x110] sm:$0xff] }
 0x236   :  { %5063 = vmatpush2.bf16.msra.mxu0 %v9949_v50  ;;  %v9966_v49 = vcombine.high %v2079_v24, %v2083_v42  ;;  %v2007_v50 = vld [vmem:[#allocation8 + $0xa08] sm:$0xff]  ;;  %v9965_v35 = vcombine.low %v2079_v24, %v2083_v42  ;;  %v1724_v24 = vld [vmem:[#allocation8 + $0x130] sm:$0xff] }
 0x237   :  { %5038 = vmatmul.mubr.bf16.vlgmr.msra.gmra.mxu1 %v10936_v43  ;;  %v11002_v62 = vpop.f32.mrf.mxu0  ;;  %5064 = vmatprep.subr.bf16.mxu0 %v9942_v52  ;;  %v2071_v52 = vld [vmem:[#allocation8 + $0xc08] sm:$0xff] }
 0x238   :  { %5088 = vmatpush1.bf16.msra.mxu1 %v10013_v16  ;;  %5119 = vmatprep.mubr.bf16.mxu1 %v10987_v5  ;;  %v2011_v16 = vld [vmem:[#allocation8 + $0xa28] sm:$0xff] }
 0x239   :  { %5089 = vmatprep.subr.bf16.mxu1 %v10006_v53  ;;  %v4838_v4 = vpop.f32.mrf.mxu0  ;;  %v2075_v53 = vld [vmem:[#allocation8 + $0xc28] sm:$0xff]  ;;  %v9894_v60 = vcombine.high %v2007_v50, %v2011_v16  ;;  %v9893_v3 = vcombine.low %v2007_v50, %v2011_v16 }
 0x23a   :  { %5065 = vmatpush2.bf16.msra.mxu0 %v9941_v44  ;;  %v9958_v61 = vcombine.high %v2071_v52, %v2075_v53  ;;  %v1744_v44 = vld [vmem:[#allocation8 + $0x1d0] sm:$0xff]  ;;  %v9957_v4 = vcombine.low %v2071_v52, %v2075_v53  ;;  %v2175_v27 = vld [vmem:[#allocation8 + $0xf48] sm:$0xff] }
 0x23b   :  { %v4839_v9 = vpop.f32.mrf.mxu0  ;;  %5066 = vmatprep.subr.bf16.mxu0 %v9934_v51  ;;  %v2191_v51 = vld [vmem:[#allocation8 + $0xfc8] sm:$0xff]  ;;  %v1712_v53 = vld [vmem:[#allocation8 + $0xd0] sm:$0xff] }
 0x23c   :  { %5090 = vmatpush1.bf16.msra.mxu1 %v10005_v63  ;;  %v1748_v63 = vld [vmem:[#allocation8 + $0x1f0] sm:$0xff]  ;;  %v2179_v28 = vld [vmem:[#allocation8 + $0xf68] sm:$0xff] }
 0x23d   :  { %5091 = vmatprep.subr.bf16.mxu1 %v9998_v31  ;;  %v2195_v31 = vld [vmem:[#allocation8 + $0xfe8] sm:$0xff]  ;;  %v9632_v6 = vcombine.high %v1744_v44, %v1748_v63  ;;  %v1740_v9 = vld [vmem:[#allocation8 + $0x1b0] sm:$0xff]  ;;  %v9631_v14 = vcombine.low %v1744_v44, %v1748_v63  ;;  %v10061_v50 = vcombine.low %v2175_v27, %v2179_v28 }
 0x23e   :  { %5067 = vmatpush2.bf16.msra.mxu0 %v9933_v57  ;;  %v10078_v59 = vcombine.high %v2191_v51, %v2195_v31  ;;  %v1736_v57 = vld [vmem:[#allocation8 + $0x190] sm:$0xff]  ;;  %v10077_v20 = vcombine.low %v2191_v51, %v2195_v31 }
 0x23f   :  { %5068 = vmatprep.subr.bf16.mxu0 %v9926_v12  ;;  %v2183_v12 = vld [vmem:[#allocation8 + $0xf88] sm:$0xff]  ;;  %v9624_v19 = vcombine.high %v1736_v57, %v1740_v9  ;;  %v1704_v31 = vld [vmem:[#allocation8 + $0x90] sm:$0xff] }
 0x240   :  { %5092 = vmatpush1.bf16.msra.mxu1 %v9997_v11  ;;  %v2203_v11 = vrot.slane %v2198_v32, %v10901_v33  ;;  %v1708_v32 = vld [vmem:[#allocation8 + $0xb0] sm:$0xff] }
 0x241   :  { %5093 = vmatprep.subr.bf16.mxu1 %v9990_v13  ;;  %v2187_v13 = vld [vmem:[#allocation8 + $0xfa8] sm:$0xff] }
 0x242   :  { %5069 = vmatpush2.bf16.msra.mxu0 %v9925_v1  ;;  %v10070_v1 = vcombine.high %v2183_v12, %v2187_v13  ;;  %v10069_v30 = vcombine.low %v2183_v12, %v2187_v13  ;;  %v1700_v12 = vld [vmem:[#allocation8 + $0x70] sm:$0xff]  ;;  %v2143_v13 = vld [vmem:[#allocation8 + $0xe48] sm:$0xff] }
 0x243   :  { %5070 = vmatprep.subr.bf16.mxu0 %v9918_v25  ;;  %v1732_v25 = vld [vmem:[#allocation8 + $0x170] sm:$0xff] }
 0x244   :  { %5094 = vmatpush1.bf16.msra.mxu1 %v9989_v21  ;;  %v1728_v21 = vld [vmem:[#allocation8 + $0x150] sm:$0xff] }
 0x245   :  { %5095 = vmatprep.subr.bf16.mxu1 %v9982_v26  ;;  %v4835_v26 = vadd.f32 %v10998_v47, %v2203_v11  ;;  %v10062_v47 = vcombine.high %v2175_v27, %v2179_v28  ;;  %v1696_v11 = vld [vmem:[#allocation8 + $0x50] sm:$0xff]  ;;  %v2139_v27 = vld [vmem:[#allocation8 + $0xe28] sm:$0xff] }
 0x246   :  { %5071 = vmatpush2.bf16.msra.mxu0 %v9917_v34  ;;  %v9623_v34 = vcombine.low %v1736_v57, %v1740_v9  ;;  %v9592_v57 = vcombine.high %v1704_v31, %v1708_v32  ;;  %v9583_v28 = vcombine.low %v1696_v11, %v1700_v12 }
 0x247   :  { %5072 = vmatprep.subr.bf16.mxu0 %v9910_v37 }
 0x248   :  { %5096 = vmatpush1.bf16.msra.mxu1 %v9981_v36  ;;  %v4837_v36 = vadd.f32 %v11002_v62, %v2207_v15  ;;  %v9608_v62 = vcombine.high %v1720_v41, %v1724_v24  ;;  %v9591_v15 = vcombine.low %v1704_v31, %v1708_v32 }
 0x249   :  { %5097 = vmatprep.subr.bf16.mxu1 %v9974_v39  ;;  %v9616_v39 = vcombine.high %v1728_v21, %v1732_v25 }
 0x24a   :  { %5073 = vmatpush2.bf16.msra.mxu0 %v9909_v45  ;;  %v2167_v45 = vld [vmem:[#allocation8 + $0xf08] sm:$0xff] }
 0x24b   :  { %5074 = vmatprep.subr.bf16.mxu0 %v9902_v48 }
 0x24c   :  { %5098 = vmatpush1.bf16.msra.mxu1 %v9973_v46  ;;  %v2171_v46 = vld [vmem:[#allocation8 + $0xf28] sm:$0xff] }
 0x24d   :  { %5099 = vmatprep.subr.bf16.mxu1 %v9966_v49  ;;  %v9615_v49 = vcombine.low %v1728_v21, %v1732_v25  ;;  %v10054_v52 = vcombine.high %v2167_v45, %v2171_v46  ;;  %v10053_v44 = vcombine.low %v2167_v45, %v2171_v46  ;;  %v1688_v21 = vld [vmem:[#allocation8 + $0x10] sm:$0xff] }
 0x24e   :  { %5075 = vmatpush2.bf16.msra.mxu0 %v9901_v58  ;;  %v1716_v58 = vld [vmem:[#allocation8 + $0xf0] sm:$0xff] }
 0x24f   :  { %5076 = vmatprep.subr.bf16.mxu0 %v9894_v60  ;;  %v2163_v60 = vld [vmem:[#allocation8 + $0xee8] sm:$0xff]  ;;  %v9600_v63 = vcombine.high %v1712_v53, %v1716_v58  ;;  %v1692_v25 = vld [vmem:[#allocation8 + $0x30] sm:$0xff] }
 0x250   :  { %5100 = vmatpush1.bf16.msra.mxu1 %v9965_v35  ;;  %v2159_v35 = vld [vmem:[#allocation8 + $0xec8] sm:$0xff] }
 0x251   :  { %5101 = vmatprep.subr.bf16.mxu1 %v9958_v61  ;;  %v9607_v61 = vcombine.low %v1720_v41, %v1724_v24  ;;  %v10046_v51 = vcombine.high %v2159_v35, %v2163_v60  ;;  %v9575_v41 = vcombine.low %v1688_v21, %v1692_v25 }
 0x252   :  { %5077 = vmatpush2.bf16.msra.mxu0 %v9893_v3  ;;  %v2151_v3 = vld [vmem:[#allocation8 + $0xe88] sm:$0xff] }
 0x253   :  { %5128 = vmatprep.subr.bf16.mxu0 %v9632_v6  ;;  %v9599_v6 = vcombine.low %v1712_v53, %v1716_v58 }
 0x254   :  { %5102 = vmatpush1.bf16.msra.mxu1 %v9957_v4  ;;  %v2155_v4 = vld [vmem:[#allocation8 + $0xea8] sm:$0xff] }
 0x255   :  { %5103 = vmatprep.subr.bf16.mxu1 %v10078_v59  ;;  %5079 = vmatmul.mubr.bf16.vlgmr.msra.gmra.mxu0 %v10972_v2  ;;  %v10045_v59 = vcombine.low %v2159_v35, %v2163_v60  ;;  %v10038_v9 = vcombine.high %v2151_v3, %v2155_v4  ;;  %v1792_v35 = vld [vmem:[#allocation8 + $0x350] sm:$0xff] }
 0x256   :  { %5129 = vmatpush1.bf16.msra.mxu0 %v9631_v14  ;;  %5160 = vmatprep.mubr.bf16.mxu0 %v10916_v55  ;;  %v2147_v14 = vld [vmem:[#allocation8 + $0xe68] sm:$0xff]  ;;  %v1796_v60 = vld [vmem:[#allocation8 + $0x370] sm:$0xff] }
 0x257   :  { %v4875_v29 = vpop.f32.mrf.mxu1  ;;  %5130 = vmatprep.subr.bf16.mxu0 %v9624_v19  ;;  %v9584_v19 = vcombine.high %v1696_v11, %v1700_v12  ;;  %v9680_v31 = vcombine.high %v1792_v35, %v1796_v60 }
 0x258   :  { %v11010_v37 = vadd.f32 %v4875_v29, %v4835_v26  ;;  %5104 = vmatpush2.bf16.msra.mxu1 %v10077_v20  ;;  %v10037_v20 = vcombine.low %v2151_v3, %v2155_v4  ;;  %v2135_v26 = vld [vmem:[#allocation8 + $0xe08] sm:$0xff]  ;;  %v10029_v29 = vcombine.low %v2143_v13, %v2147_v14  ;;  %v1784_v3 = vld [vmem:[#allocation8 + $0x310] sm:$0xff] }
 0x259   :  { %v4877_v40 = vpop.f32.mrf.mxu1  ;;  %5105 = vmatprep.subr.bf16.mxu1 %v10070_v1  ;;  %v10030_v1 = vcombine.high %v2143_v13, %v2147_v14  ;;  %v10021_v24 = vcombine.low %v2135_v26, %v2139_v27  ;;  %v1788_v4 = vld [vmem:[#allocation8 + $0x330] sm:$0xff] }
 0x25a   :  { %v11012_v42 = vadd.f32 %v4877_v40, %v4837_v36  ;;  %5131 = vmatpush1.bf16.msra.mxu0 %v9623_v34  ;;  %v10022_v34 = vcombine.high %v2135_v26, %v2139_v27  ;;  %v1808_v36 = vld [vmem:[#allocation8 + $0x3d0] sm:$0xff]  ;;  %v9672_v11 = vcombine.high %v1784_v3, %v1788_v4 }
 0x25b   :  { %v4879_v48 = vpop.f32.mrf.mxu1  ;;  %5132 = vmatprep.subr.bf16.mxu0 %v9616_v39  ;;  %v1812_v39 = vld [vmem:[#allocation8 + $0x3f0] sm:$0xff] }
 0x25c   :  { %5106 = vmatpush2.bf16.msra.mxu1 %v10069_v30  ;;  %v9576_v30 = vcombine.high %v1688_v21, %v1692_v25  ;;  %v1872_v40 = vld [vmem:[#allocation8 + $0x5d0] sm:$0xff]  ;;  %v9696_v45 = vcombine.high %v1808_v36, %v1812_v39 }
 0x25d   :  { %v4880_v16 = vpop.f32.mrf.mxu1  ;;  %5107 = vmatprep.subr.bf16.mxu1 %v10062_v47  ;;  %v1876_v47 = vld [vmem:[#allocation8 + $0x5f0] sm:$0xff] }
 0x25e   :  { %5133 = vmatpush1.bf16.msra.mxu0 %v9615_v49  ;;  %v9760_v46 = vcombine.high %v1872_v40, %v1876_v47  ;;  %v1800_v48 = vld [vmem:[#allocation8 + $0x390] sm:$0xff]  ;;  %v9695_v16 = vcombine.low %v1808_v36, %v1812_v39 }
 0x25f   :  { %5134 = vmatprep.subr.bf16.mxu0 %v9608_v62  ;;  %v1804_v49 = vld [vmem:[#allocation8 + $0x3b0] sm:$0xff] }
 0x260   :  { %5108 = vmatpush2.bf16.msra.mxu1 %v10061_v50  ;;  %v1864_v50 = vld [vmem:[#allocation8 + $0x590] sm:$0xff]  ;;  %v9688_v53 = vcombine.high %v1800_v48, %v1804_v49 }
 0x261   :  { %5109 = vmatprep.subr.bf16.mxu1 %v10054_v52  ;;  %v1868_v62 = vld [vmem:[#allocation8 + $0x5b0] sm:$0xff]  ;;  %v9759_v52 = vcombine.low %v1872_v40, %v1876_v47 }
 0x262   :  { %5135 = vmatpush1.bf16.msra.mxu0 %v9607_v61  ;;  %v9752_v58 = vcombine.high %v1864_v50, %v1868_v62  ;;  %v1856_v61 = vld [vmem:[#allocation8 + $0x550] sm:$0xff] }
 0x263   :  { %5136 = vmatprep.subr.bf16.mxu0 %v9600_v63  ;;  %v9687_v63 = vcombine.low %v1800_v48, %v1804_v49  ;;  %v1776_v13 = vld [vmem:[#allocation8 + $0x2d0] sm:$0xff] }
 0x264   :  { %5110 = vmatpush2.bf16.msra.mxu1 %v10053_v44  ;;  %v1860_v44 = vld [vmem:[#allocation8 + $0x570] sm:$0xff] }
 0x265   :  { %5111 = vmatprep.subr.bf16.mxu1 %v10046_v51  ;;  %v9751_v51 = vcombine.low %v1864_v50, %v1868_v62  ;;  %v9744_v32 = vcombine.high %v1856_v61, %v1860_v44  ;;  %v1780_v14 = vld [vmem:[#allocation8 + $0x2f0] sm:$0xff] }
 0x266   :  { %5137 = vmatpush1.bf16.msra.mxu0 %v9599_v6  ;;  %v1848_v6 = vld [vmem:[#allocation8 + $0x510] sm:$0xff]  ;;  %v9664_v21 = vcombine.high %v1776_v13, %v1780_v14 }
 0x267   :  { %5138 = vmatprep.subr.bf16.mxu0 %v9592_v57  ;;  %v9679_v57 = vcombine.low %v1792_v35, %v1796_v60  ;;  %v1768_v26 = vld [vmem:[#allocation8 + $0x290] sm:$0xff] }
 0x268   :  { %5112 = vmatpush2.bf16.msra.mxu1 %v10045_v59  ;;  %v1852_v59 = vld [vmem:[#allocation8 + $0x530] sm:$0xff] }
 0x269   :  { %5113 = vmatprep.subr.bf16.mxu1 %v10038_v9  ;;  %v9743_v9 = vcombine.low %v1856_v61, %v1860_v44  ;;  %v9736_v12 = vcombine.high %v1848_v6, %v1852_v59  ;;  %v1772_v27 = vld [vmem:[#allocation8 + $0x2b0] sm:$0xff] }
 0x26a   :  { %5139 = vmatpush1.bf16.msra.mxu0 %v9591_v15  ;;  %v1840_v15 = vld [vmem:[#allocation8 + $0x4d0] sm:$0xff]  ;;  %v9656_v36 = vcombine.high %v1768_v26, %v1772_v27 }
 0x26b   :  { %5140 = vmatprep.subr.bf16.mxu0 %v9584_v19  ;;  %v9671_v19 = vcombine.low %v1784_v3, %v1788_v4  ;;  %v1760_v40 = vld [vmem:[#allocation8 + $0x250] sm:$0xff] }
 0x26c   :  { %5114 = vmatpush2.bf16.msra.mxu1 %v10037_v20  ;;  %v1844_v20 = vld [vmem:[#allocation8 + $0x4f0] sm:$0xff] }
 0x26d   :  { %5115 = vmatprep.subr.bf16.mxu1 %v10030_v1  ;;  %v9735_v1 = vcombine.low %v1848_v6, %v1852_v59  ;;  %v9728_v25 = vcombine.high %v1840_v15, %v1844_v20  ;;  %v1764_v47 = vld [vmem:[#allocation8 + $0x270] sm:$0xff] }
 0x26e   :  { %5141 = vmatpush1.bf16.msra.mxu0 %v9583_v28  ;;  %v1832_v28 = vld [vmem:[#allocation8 + $0x490] sm:$0xff]  ;;  %v9648_v48 = vcombine.high %v1760_v40, %v1764_v47 }
 0x26f   :  { %5142 = vmatprep.subr.bf16.mxu0 %v9576_v30  ;;  %v9663_v30 = vcombine.low %v1776_v13, %v1780_v14  ;;  %v1752_v50 = vld [vmem:[#allocation8 + $0x210] sm:$0xff] }
 0x270   :  { %5116 = vmatpush2.bf16.msra.mxu1 %v10029_v29  ;;  %v1836_v29 = vld [vmem:[#allocation8 + $0x4b0] sm:$0xff] }
 0x271   :  { %5117 = vmatprep.subr.bf16.mxu1 %v10022_v34  ;;  %v9727_v34 = vcombine.low %v1840_v15, %v1844_v20  ;;  %v9720_v39 = vcombine.high %v1832_v28, %v1836_v29  ;;  %v1756_v62 = vld [vmem:[#allocation8 + $0x230] sm:$0xff] }
 0x272   :  { %5143 = vmatpush1.bf16.msra.mxu0 %v9575_v41  ;;  %v1824_v41 = vld [vmem:[#allocation8 + $0x450] sm:$0xff]  ;;  %v9640_v35 = vcombine.high %v1752_v50, %v1756_v62 }
 0x273   :  { %5144 = vmatprep.subr.bf16.mxu0 %v9696_v45  ;;  %v9655_v45 = vcombine.low %v1768_v26, %v1772_v27  ;;  %v2000_v61 = vld [vmem:[#allocation8 + $0x9d0] sm:$0xff] }
 0x274   :  { %5118 = vmatpush2.bf16.msra.mxu1 %v10021_v24  ;;  %v1828_v24 = vld [vmem:[#allocation8 + $0x470] sm:$0xff] }
 0x275   :  { %5169 = vmatprep.subr.bf16.mxu1 %v9760_v46  ;;  %v9719_v46 = vcombine.low %v1832_v28, %v1836_v29  ;;  %v9712_v49 = vcombine.high %v1824_v41, %v1828_v24  ;;  %v2004_v44 = vld [vmem:[#allocation8 + $0x9f0] sm:$0xff] }
 0x276   :  { %5145 = vmatpush2.bf16.msra.mxu0 %v9695_v16  ;;  %v1816_v16 = vld [vmem:[#allocation8 + $0x410] sm:$0xff]  ;;  %v9888_v3 = vcombine.high %v2000_v61, %v2004_v44 }
 0x277   :  { %5120 = vmatmul.mubr.bf16.vlgmr.msra.gmra.mxu1 %v10991_v7  ;;  %5146 = vmatprep.subr.bf16.mxu0 %v9688_v53  ;;  %v9647_v53 = vcombine.low %v1760_v40, %v1764_v47  ;;  %v1992_v6 = vld [vmem:[#allocation8 + $0x990] sm:$0xff] }
 0x278   :  { %5170 = vmatpush1.bf16.msra.mxu1 %v9759_v52  ;;  %5201 = vmatprep.mubr.bf16.mxu1 %v10932_v54  ;;  %v1820_v52 = vld [vmem:[#allocation8 + $0x430] sm:$0xff] }
 0x279   :  { %5171 = vmatprep.subr.bf16.mxu1 %v9752_v58  ;;  %v9711_v58 = vcombine.low %v1824_v41, %v1828_v24  ;;  %v9704_v60 = vcombine.high %v1816_v16, %v1820_v52  ;;  %v1996_v59 = vld [vmem:[#allocation8 + $0x9b0] sm:$0xff] }
 0x27a   :  { %5147 = vmatpush2.bf16.msra.mxu0 %v9687_v63  ;;  %v1936_v63 = vld [vmem:[#allocation8 + $0x7d0] sm:$0xff]  ;;  %v9880_v13 = vcombine.high %v1992_v6, %v1996_v59  ;;  %v9879_v26 = vcombine.low %v1992_v6, %v1996_v59 }
 0x27b   :  { %5148 = vmatprep.subr.bf16.mxu0 %v9680_v31  ;;  %v9639_v31 = vcombine.low %v1752_v50, %v1756_v62  ;;  %v1984_v15 = vld [vmem:[#allocation8 + $0x950] sm:$0xff] }
 0x27c   :  { %5172 = vmatpush1.bf16.msra.mxu1 %v9751_v51  ;;  %v1940_v51 = vld [vmem:[#allocation8 + $0x7f0] sm:$0xff] }
 0x27d   :  { %5173 = vmatprep.subr.bf16.mxu1 %v9744_v32  ;;  %v9703_v32 = vcombine.low %v1816_v16, %v1820_v52  ;;  %v9824_v4 = vcombine.high %v1936_v63, %v1940_v51  ;;  %v1988_v20 = vld [vmem:[#allocation8 + $0x970] sm:$0xff] }
 0x27e   :  { %5149 = vmatpush2.bf16.msra.mxu0 %v9679_v57  ;;  %v1928_v57 = vld [vmem:[#allocation8 + $0x790] sm:$0xff]  ;;  %v9872_v29 = vcombine.high %v1984_v15, %v1988_v20  ;;  %v9871_v41 = vcombine.low %v1984_v15, %v1988_v20 }
 0x27f   :  { %5150 = vmatprep.subr.bf16.mxu0 %v9672_v11  ;;  %v9887_v11 = vcombine.low %v2000_v61, %v2004_v44  ;;  %v1912_v47 = vld [vmem:[#allocation8 + $0x710] sm:$0xff] }
 0x280   :  { %5174 = vmatpush1.bf16.msra.mxu1 %v9743_v9  ;;  %v1932_v9 = vld [vmem:[#allocation8 + $0x7b0] sm:$0xff] }
 0x281   :  { %5175 = vmatprep.subr.bf16.mxu1 %v9736_v12  ;;  %v9823_v12 = vcombine.low %v1936_v63, %v1940_v51  ;;  %v9816_v14 = vcombine.high %v1928_v57, %v1932_v9  ;;  %v9815_v28 = vcombine.low %v1928_v57, %v1932_v9  ;;  %v1972_v50 = vld [vmem:[#allocation8 + $0x8f0] sm:$0xff] }
 0x282   :  { %5151 = vmatpush2.bf16.msra.mxu0 %v9671_v19  ;;  %v1908_v62 = vld [vmem:[#allocation8 + $0x6f0] sm:$0xff] }
 0x283   :  { %5152 = vmatprep.subr.bf16.mxu0 %v9664_v21  ;;  %v1924_v21 = vld [vmem:[#allocation8 + $0x770] sm:$0xff] }
 0x284   :  { %5176 = vmatpush1.bf16.msra.mxu1 %v9735_v1  ;;  %v1920_v1 = vld [vmem:[#allocation8 + $0x750] sm:$0xff] }
 0x285   :  { %5177 = vmatprep.subr.bf16.mxu1 %v9728_v25  ;;  %v1896_v61 = vld [vmem:[#allocation8 + $0x690] sm:$0xff] }
 0x286   :  { %5153 = vmatpush2.bf16.msra.mxu0 %v9663_v30  ;;  %v1900_v44 = vld [vmem:[#allocation8 + $0x6b0] sm:$0xff] }
 0x287   :  { %5154 = vmatprep.subr.bf16.mxu0 %v9656_v36  ;;  %v1976_v36 = vld [vmem:[#allocation8 + $0x910] sm:$0xff]  ;;  %v9783_v9 = vcombine.low %v1896_v61, %v1900_v44 }
 0x288   :  { %5178 = vmatpush1.bf16.msra.mxu1 %v9727_v34  ;;  %v9808_v34 = vcombine.high %v1920_v1, %v1924_v21  ;;  %v1888_v6 = vld [vmem:[#allocation8 + $0x650] sm:$0xff] }
 0x289   :  { %5179 = vmatprep.subr.bf16.mxu1 %v9720_v39  ;;  %v1980_v39 = vld [vmem:[#allocation8 + $0x930] sm:$0xff] }
 0x28a   :  { %5155 = vmatpush2.bf16.msra.mxu0 %v9655_v45  ;;  %v9807_v45 = vcombine.low %v1920_v1, %v1924_v21  ;;  %v9863_v16 = vcombine.low %v1976_v36, %v1980_v39  ;;  %v1892_v59 = vld [vmem:[#allocation8 + $0x670] sm:$0xff] }
 0x28b   :  { %5156 = vmatprep.subr.bf16.mxu0 %v9648_v48  ;;  %v1880_v15 = vld [vmem:[#allocation8 + $0x610] sm:$0xff]  ;;  %v9775_v1 = vcombine.low %v1888_v6, %v1892_v59 }
 0x28c   :  { %5180 = vmatpush1.bf16.msra.mxu1 %v9719_v46  ;;  %v9864_v46 = vcombine.high %v1976_v36, %v1980_v39  ;;  %v1884_v20 = vld [vmem:[#allocation8 + $0x630] sm:$0xff] }
 0x28d   :  { %5181 = vmatprep.subr.bf16.mxu1 %v9712_v49  ;;  %v1968_v49 = vld [vmem:[#allocation8 + $0x8d0] sm:$0xff]  ;;  %v9767_v39 = vcombine.low %v1880_v15, %v1884_v20 }
 0x28e   :  { %5157 = vmatpush2.bf16.msra.mxu0 %v9647_v53  ;;  %v9856_v53 = vcombine.high %v1968_v49, %v1972_v50  ;;  %v9855_v63 = vcombine.low %v1968_v49, %v1972_v50 }
 0x28f   :  { %5158 = vmatprep.subr.bf16.mxu0 %v9640_v35  ;;  %v1960_v35 = vld [vmem:[#allocation8 + $0x890] sm:$0xff] }
 0x290   :  { %5182 = vmatpush1.bf16.msra.mxu1 %v9711_v58 }
 0x291   :  { %5183 = vmatprep.subr.bf16.mxu1 %v9704_v60  ;;  %v1964_v60 = vld [vmem:[#allocation8 + $0x8b0] sm:$0xff] }
 0x292   :  { %5159 = vmatpush2.bf16.msra.mxu0 %v9639_v31  ;;  %v9848_v31 = vcombine.high %v1960_v35, %v1964_v60  ;;  %v9847_v57 = vcombine.low %v1960_v35, %v1964_v60 }
 0x293   :  { %5210 = vmatprep.subr.bf16.mxu0 %v9888_v3  ;;  %v1952_v3 = vld [vmem:[#allocation8 + $0x850] sm:$0xff] }
 0x294   :  { %5184 = vmatpush1.bf16.msra.mxu1 %v9703_v32  ;;  %v9784_v32 = vcombine.high %v1896_v61, %v1900_v44 }
 0x295   :  { %5185 = vmatprep.subr.bf16.mxu1 %v9824_v4  ;;  %5161 = vmatmul.mubr.bf16.vlgmr.msra.gmra.mxu0 %v10918_v56  ;;  %v4916_v19 = vpop.f32.mrf.mxu0  ;;  %v1956_v4 = vld [vmem:[#allocation8 + $0x870] sm:$0xff] }
 0x296   :  { %v11018_v25 = vadd.f32 %v4916_v19, %v11010_v37  ;;  %5211 = vmatpush1.bf16.msra.mxu0 %v9887_v11  ;;  %5242 = vmatprep.mubr.bf16.mxu0 %v10968_v0  ;;  %v1916_v37 = vld [vmem:[#allocation8 + $0x730] sm:$0xff]  ;;  %v9840_v11 = vcombine.high %v1952_v3, %v1956_v4  ;;  %v9839_v19 = vcombine.low %v1952_v3, %v1956_v4 }
 0x297   :  { %v4918_v27 = vpop.f32.mrf.mxu0  ;;  %5212 = vmatprep.subr.bf16.mxu0 %v9880_v13  ;;  %v9800_v48 = vcombine.high %v1912_v47, %v1916_v37  ;;  %v9799_v52 = vcombine.low %v1912_v47, %v1916_v37  ;;  %v1944_v13 = vld [vmem:[#allocation8 + $0x810] sm:$0xff] }
 0x298   :  { %5186 = vmatpush2.bf16.msra.mxu1 %v9823_v12  ;;  %v11022_v30 = vadd.f32 %v4918_v27, %v11012_v42  ;;  %v1904_v42 = vld [vmem:[#allocation8 + $0x6d0] sm:$0xff]  ;;  %v9776_v12 = vcombine.high %v1888_v6, %v1892_v59 }
 0x299   :  { %5187 = vmatprep.subr.bf16.mxu1 %v9816_v14  ;;  %v4920_v40 = vpop.f32.mrf.mxu0  ;;  %v9792_v58 = vcombine.high %v1904_v42, %v1908_v62  ;;  %v9791_v51 = vcombine.low %v1904_v42, %v1908_v62  ;;  %v1948_v14 = vld [vmem:[#allocation8 + $0x830] sm:$0xff] }
 0x29a   :  { %5213 = vmatpush1.bf16.msra.mxu0 %v9879_v26  ;;  %v9832_v21 = vcombine.high %v1944_v13, %v1948_v14  ;;  %v9768_v26 = vcombine.high %v1880_v15, %v1884_v20  ;;  %v2064_v27 = vld [vmem:[#allocation8 + $0xbd0] sm:$0xff]  ;;  %v9831_v36 = vcombine.low %v1944_v13, %v1948_v14 }
 0x29b   :  { %v4921_v24 = vpop.f32.mrf.mxu0  ;;  %5214 = vmatprep.subr.bf16.mxu0 %v9872_v29  ;;  %v2128_v29 = vld [vmem:[#allocation8 + $0xdd0] sm:$0xff] }
 0x29c   :  { %5188 = vmatpush2.bf16.msra.mxu1 %v9815_v28  ;;  %v2068_v28 = vld [vmem:[#allocation8 + $0xbf0] sm:$0xff] }
 0x29d   :  { %5189 = vmatprep.subr.bf16.mxu1 %v9808_v34  ;;  %v2132_v34 = vld [vmem:[#allocation8 + $0xdf0] sm:$0xff]  ;;  %v9952_v40 = vcombine.high %v2064_v27, %v2068_v28 }
 0x29e   :  { %5215 = vmatpush1.bf16.msra.mxu0 %v9871_v41  ;;  %v10016_v47 = vcombine.high %v2128_v29, %v2132_v34  ;;  %v2056_v37 = vld [vmem:[#allocation8 + $0xb90] sm:$0xff] }
 0x29f   :  { %5216 = vmatprep.subr.bf16.mxu0 %v9864_v46  ;;  %v2060_v41 = vld [vmem:[#allocation8 + $0xbb0] sm:$0xff]  ;;  %v9951_v46 = vcombine.low %v2064_v27, %v2068_v28 }
 0x2a0   :  { %5190 = vmatpush2.bf16.msra.mxu1 %v9807_v45  ;;  %v2120_v24 = vld [vmem:[#allocation8 + $0xd90] sm:$0xff]  ;;  %v9944_v49 = vcombine.high %v2056_v37, %v2060_v41 }
 0x2a1   :  { %5191 = vmatprep.subr.bf16.mxu1 %v9800_v48  ;;  %v2124_v45 = vld [vmem:[#allocation8 + $0xdb0] sm:$0xff]  ;;  %v10015_v48 = vcombine.low %v2128_v29, %v2132_v34 }
 0x2a2   :  { %5217 = vmatpush1.bf16.msra.mxu0 %v9863_v16  ;;  %v10008_v50 = vcombine.high %v2120_v24, %v2124_v45  ;;  %v2048_v42 = vld [vmem:[#allocation8 + $0xb50] sm:$0xff]  ;;  %v10007_v60 = vcombine.low %v2120_v24, %v2124_v45 }
 0x2a3   :  { %5218 = vmatprep.subr.bf16.mxu0 %v9856_v53  ;;  %v2052_v62 = vld [vmem:[#allocation8 + $0xb70] sm:$0xff] }
 0x2a4   :  { %5192 = vmatpush2.bf16.msra.mxu1 %v9799_v52  ;;  %v2112_v16 = vld [vmem:[#allocation8 + $0xd50] sm:$0xff]  ;;  %v9936_v61 = vcombine.high %v2048_v42, %v2052_v62 }
 0x2a5   :  { %5193 = vmatprep.subr.bf16.mxu1 %v9792_v58  ;;  %v2116_v52 = vld [vmem:[#allocation8 + $0xd70] sm:$0xff]  ;;  %v9943_v58 = vcombine.low %v2056_v37, %v2060_v41 }
 0x2a6   :  { %5219 = vmatpush1.bf16.msra.mxu0 %v9855_v63  ;;  %v10000_v63 = vcombine.high %v2112_v16, %v2116_v52  ;;  %v2104_v3 = vld [vmem:[#allocation8 + $0xd10] sm:$0xff]  ;;  %v9999_v59 = vcombine.low %v2112_v16, %v2116_v52 }
 0x2a7   :  { %5220 = vmatprep.subr.bf16.mxu0 %v9848_v31  ;;  %v2044_v31 = vld [vmem:[#allocation8 + $0xb30] sm:$0xff] }
 0x2a8   :  { %5194 = vmatpush2.bf16.msra.mxu1 %v9791_v51  ;;  %v2040_v51 = vld [vmem:[#allocation8 + $0xb10] sm:$0xff] }
 0x2a9   :  { %5195 = vmatprep.subr.bf16.mxu1 %v9784_v32  ;;  %v2108_v4 = vld [vmem:[#allocation8 + $0xd30] sm:$0xff]  ;;  %v9927_v20 = vcombine.low %v2040_v51, %v2044_v31 }
 0x2aa   :  { %5221 = vmatpush1.bf16.msra.mxu0 %v9847_v57  ;;  %v9928_v57 = vcombine.high %v2040_v51, %v2044_v31  ;;  %v2036_v13 = vld [vmem:[#allocation8 + $0xaf0] sm:$0xff] }
 0x2ab   :  { %5222 = vmatprep.subr.bf16.mxu0 %v9840_v11  ;;  %v9992_v11 = vcombine.high %v2104_v3, %v2108_v4  ;;  %v2096_v14 = vld [vmem:[#allocation8 + $0xcd0] sm:$0xff] }
 0x2ac   :  { %5196 = vmatpush2.bf16.msra.mxu1 %v9783_v9  ;;  %v2100_v15 = vld [vmem:[#allocation8 + $0xcf0] sm:$0xff] }
 0x2ad   :  { %5197 = vmatprep.subr.bf16.mxu1 %v9776_v12  ;;  %v2032_v12 = vld [vmem:[#allocation8 + $0xad0] sm:$0xff]  ;;  %v9983_v34 = vcombine.low %v2096_v14, %v2100_v15 }
 0x2ae   :  { %5223 = vmatpush1.bf16.msra.mxu0 %v9839_v19  ;;  %v9920_v19 = vcombine.high %v2032_v12, %v2036_v13  ;;  %v2088_v27 = vld [vmem:[#allocation8 + $0xc90] sm:$0xff]  ;;  %v9919_v29 = vcombine.low %v2032_v12, %v2036_v13 }
 0x2af   :  { %5224 = vmatprep.subr.bf16.mxu0 %v9832_v21  ;;  %v2024_v21 = vld [vmem:[#allocation8 + $0xa90] sm:$0xff] }
 0x2b0   :  { %5198 = vmatpush2.bf16.msra.mxu1 %v9775_v1  ;;  %v9984_v1 = vcombine.high %v2096_v14, %v2100_v15  ;;  %v2092_v28 = vld [vmem:[#allocation8 + $0xcb0] sm:$0xff]  ;;  %v1729_v14 = vld [vmem:[#allocation8 + $0x158] sm:$0xff] }
 0x2b1   :  { %5199 = vmatprep.subr.bf16.mxu1 %v9768_v26  ;;  %v2028_v26 = vld [vmem:[#allocation8 + $0xab0] sm:$0xff]  ;;  %v9975_v45 = vcombine.low %v2088_v27, %v2092_v28  ;;  %v1733_v15 = vld [vmem:[#allocation8 + $0x178] sm:$0xff] }
 0x2b2   :  { %5225 = vmatpush1.bf16.msra.mxu0 %v9831_v36  ;;  %v9912_v36 = vcombine.high %v2024_v21, %v2028_v26  ;;  %v2080_v37 = vld [vmem:[#allocation8 + $0xc50] sm:$0xff]  ;;  %v9911_v24 = vcombine.low %v2024_v21, %v2028_v26 }
 0x2b3   :  { %5226 = vmatprep.subr.bf16.mxu0 %v9952_v40  ;;  %v2016_v40 = vld [vmem:[#allocation8 + $0xa50] sm:$0xff] }
 0x2b4   :  { %5200 = vmatpush2.bf16.msra.mxu1 %v9767_v39  ;;  %v9976_v39 = vcombine.high %v2088_v27, %v2092_v28  ;;  %v2084_v41 = vld [vmem:[#allocation8 + $0xc70] sm:$0xff]  ;;  %v9618_v27 = vcombine.high %v1729_v14, %v1733_v15 }
 0x2b5   :  { %5251 = vmatprep.subr.bf16.mxu1 %v10016_v47  ;;  %v2020_v47 = vld [vmem:[#allocation8 + $0xa70] sm:$0xff]  ;;  %v9967_v52 = vcombine.low %v2080_v37, %v2084_v41 }
 0x2b6   :  { %5227 = vmatpush2.bf16.msra.mxu0 %v9951_v46  ;;  %v9904_v46 = vcombine.high %v2016_v40, %v2020_v47  ;;  %v9903_v16 = vcombine.low %v2016_v40, %v2020_v47  ;;  %v2172_v40 = vld [vmem:[#allocation8 + $0xf30] sm:$0xff]  ;;  %v9617_v47 = vcombine.low %v1729_v14, %v1733_v15 }
 0x2b7   :  { %5202 = vmatmul.mubr.bf16.vlgmr.msra.gmra.mxu1 %v10936_v43  ;;  %v4957_v53 = vpop.f32.mrf.mxu1  ;;  %5228 = vmatprep.subr.bf16.mxu0 %v9944_v49  ;;  %v2008_v49 = vld [vmem:[#allocation8 + $0xa10] sm:$0xff] }
 0x2b8   :  { %v11026_v35 = vadd.f32 %v4957_v53, %v11018_v25  ;;  %5252 = vmatpush1.bf16.msra.mxu1 %v10015_v48  ;;  %5283 = vmatprep.mubr.bf16.mxu1 %v10987_v5  ;;  %v9935_v25 = vcombine.low %v2048_v42, %v2052_v62  ;;  %v9968_v48 = vcombine.high %v2080_v37, %v2084_v41  ;;  %v2072_v42 = vld [vmem:[#allocation8 + $0xc10] sm:$0xff] }
 0x2b9   :  { %v4959_v44 = vpop.f32.mrf.mxu1  ;;  %5253 = vmatprep.subr.bf16.mxu1 %v10008_v50  ;;  %v2012_v50 = vld [vmem:[#allocation8 + $0xa30] sm:$0xff] }
 0x2ba   :  { %v11030_v32 = vadd.f32 %v4959_v44, %v11022_v30  ;;  %5229 = vmatpush2.bf16.msra.mxu0 %v9943_v58  ;;  %v9991_v30 = vcombine.low %v2104_v3, %v2108_v4  ;;  %v2076_v62 = vld [vmem:[#allocation8 + $0xc30] sm:$0xff]  ;;  %v9896_v53 = vcombine.high %v2008_v49, %v2012_v50  ;;  %v9895_v51 = vcombine.low %v2008_v49, %v2012_v50 }
 0x2bb   :  { %v4961_v6 = vpop.f32.mrf.mxu1  ;;  %5230 = vmatprep.subr.bf16.mxu0 %v9936_v61  ;;  %v9960_v58 = vcombine.high %v2072_v42, %v2076_v62  ;;  %v1749_v61 = vld [vmem:[#allocation8 + $0x1f8] sm:$0xff]  ;;  %v2192_v44 = vld [vmem:[#allocation8 + $0xfd0] sm:$0xff]  ;;  %v9959_v31 = vcombine.low %v2072_v42, %v2076_v62 }
 0x2bc   :  { %5254 = vmatpush1.bf16.msra.mxu1 %v10007_v60  ;;  %v1745_v60 = vld [vmem:[#allocation8 + $0x1d8] sm:$0xff]  ;;  %v2164_v49 = vld [vmem:[#allocation8 + $0xef0] sm:$0xff] }
 0x2bd   :  { %v4962_v9 = vpop.f32.mrf.mxu1  ;;  %5255 = vmatprep.subr.bf16.mxu1 %v10000_v63  ;;  %v2196_v63 = vld [vmem:[#allocation8 + $0xff0] sm:$0xff]  ;;  %v9634_v3 = vcombine.high %v1745_v60, %v1749_v61  ;;  %v1737_v6 = vld [vmem:[#allocation8 + $0x198] sm:$0xff] }
 0x2be   :  { %5231 = vmatpush2.bf16.msra.mxu0 %v9935_v25  ;;  %v10080_v4 = vcombine.high %v2192_v44, %v2196_v63  ;;  %v1741_v25 = vld [vmem:[#allocation8 + $0x1b8] sm:$0xff]  ;;  %v9633_v9 = vcombine.low %v1745_v60, %v1749_v61  ;;  %v2156_v60 = vld [vmem:[#allocation8 + $0xeb0] sm:$0xff] }
 0x2bf   :  { %5232 = vmatprep.subr.bf16.mxu0 %v9928_v57  ;;  %v2188_v57 = vld [vmem:[#allocation8 + $0xfb0] sm:$0xff]  ;;  %v9626_v12 = vcombine.high %v1737_v6, %v1741_v25 }
 0x2c0   :  { %5256 = vmatpush1.bf16.msra.mxu1 %v9999_v59  ;;  %v2184_v59 = vld [vmem:[#allocation8 + $0xf90] sm:$0xff] }
 0x2c1   :  { %5257 = vmatprep.subr.bf16.mxu1 %v9992_v11  ;;  %v10079_v11 = vcombine.low %v2192_v44, %v2196_v63  ;;  %v10072_v13 = vcombine.high %v2184_v59, %v2188_v57  ;;  %v10071_v26 = vcombine.low %v2184_v59, %v2188_v57  ;;  %v2140_v14 = vld [vmem:[#allocation8 + $0xe30] sm:$0xff] }
 0x2c2   :  { %5233 = vmatpush2.bf16.msra.mxu0 %v9927_v20 }
 0x2c3   :  { %5234 = vmatprep.subr.bf16.mxu0 %v9920_v19  ;;  %v2180_v19 = vld [vmem:[#allocation8 + $0xf70] sm:$0xff] }
 0x2c4   :  { %5258 = vmatpush1.bf16.msra.mxu1 %v9991_v30  ;;  %v2176_v30 = vld [vmem:[#allocation8 + $0xf50] sm:$0xff] }
 0x2c5   :  { %5259 = vmatprep.subr.bf16.mxu1 %v9984_v1  ;;  %v9625_v1 = vcombine.low %v1737_v6, %v1741_v25  ;;  %v10064_v28 = vcombine.high %v2176_v30, %v2180_v19  ;;  %v10063_v41 = vcombine.low %v2176_v30, %v2180_v19  ;;  %v2148_v6 = vld [vmem:[#allocation8 + $0xe70] sm:$0xff] }
 0x2c6   :  { %5235 = vmatpush2.bf16.msra.mxu0 %v9919_v29  ;;  %v1721_v29 = vld [vmem:[#allocation8 + $0x118] sm:$0xff] }
 0x2c7   :  { %5236 = vmatprep.subr.bf16.mxu0 %v9912_v36 }
 0x2c8   :  { %5260 = vmatpush1.bf16.msra.mxu1 %v9983_v34  ;;  %v1725_v34 = vld [vmem:[#allocation8 + $0x138] sm:$0xff] }
 0x2c9   :  { %5261 = vmatprep.subr.bf16.mxu1 %v9976_v39  ;;  %v2168_v39 = vld [vmem:[#allocation8 + $0xf10] sm:$0xff]  ;;  %v9609_v50 = vcombine.low %v1721_v29, %v1725_v34 }
 0x2ca   :  { %5237 = vmatpush2.bf16.msra.mxu0 %v9911_v24  ;;  %v10056_v24 = vcombine.high %v2168_v39, %v2172_v40  ;;  %v10055_v42 = vcombine.low %v2168_v39, %v2172_v40 }
 0x2cb   :  { %5238 = vmatprep.subr.bf16.mxu0 %v9904_v46  ;;  %v1717_v46 = vld [vmem:[#allocation8 + $0xf8] sm:$0xff] }
 0x2cc   :  { %5262 = vmatpush1.bf16.msra.mxu1 %v9975_v45  ;;  %v1713_v45 = vld [vmem:[#allocation8 + $0xd8] sm:$0xff] }
 0x2cd   :  { %5263 = vmatprep.subr.bf16.mxu1 %v9968_v48  ;;  %v2160_v48 = vld [vmem:[#allocation8 + $0xed0] sm:$0xff]  ;;  %v9602_v62 = vcombine.high %v1713_v45, %v1717_v46  ;;  %v9601_v61 = vcombine.low %v1713_v45, %v1717_v46  ;;  %v1869_v45 = vld [vmem:[#allocation8 + $0x5b8] sm:$0xff] }
 0x2ce   :  { %5239 = vmatpush2.bf16.msra.mxu0 %v9903_v16  ;;  %v10048_v16 = vcombine.high %v2160_v48, %v2164_v49  ;;  %v10047_v44 = vcombine.low %v2160_v48, %v2164_v49 }
 0x2cf   :  { %5240 = vmatprep.subr.bf16.mxu0 %v9896_v53  ;;  %v1709_v53 = vld [vmem:[#allocation8 + $0xb8] sm:$0xff] }
 0x2d0   :  { %5264 = vmatpush1.bf16.msra.mxu1 %v9967_v52  ;;  %v1705_v52 = vld [vmem:[#allocation8 + $0x98] sm:$0xff] }
 0x2d1   :  { %5265 = vmatprep.subr.bf16.mxu1 %v9960_v58  ;;  %v2152_v58 = vld [vmem:[#allocation8 + $0xe90] sm:$0xff]  ;;  %v9594_v63 = vcombine.high %v1705_v52, %v1709_v53  ;;  %v9593_v25 = vcombine.low %v1705_v52, %v1709_v53  ;;  %v1857_v53 = vld [vmem:[#allocation8 + $0x558] sm:$0xff] }
 0x2d2   :  { %5241 = vmatpush2.bf16.msra.mxu0 %v9895_v51  ;;  %v10040_v51 = vcombine.high %v2152_v58, %v2156_v60  ;;  %v10039_v59 = vcombine.low %v2152_v58, %v2156_v60  ;;  %v1861_v58 = vld [vmem:[#allocation8 + $0x578] sm:$0xff] }
 0x2d3   :  { %5292 = vmatprep.subr.bf16.mxu0 %v9634_v3  ;;  %v1701_v3 = vld [vmem:[#allocation8 + $0x78] sm:$0xff] }
 0x2d4   :  { %5266 = vmatpush1.bf16.msra.mxu1 %v9959_v31  ;;  %v1697_v31 = vld [vmem:[#allocation8 + $0x58] sm:$0xff] }
 0x2d5   :  { %5267 = vmatprep.subr.bf16.mxu1 %v10080_v4  ;;  %v11032_v20 = vpop.f32.mrf.mxu0  ;;  %5243 = vmatmul.mubr.bf16.vlgmr.msra.gmra.mxu0 %v10972_v2  ;;  %v2144_v4 = vld [vmem:[#allocation8 + $0xe50] sm:$0xff]  ;;  %v9586_v57 = vcombine.high %v1697_v31, %v1701_v3  ;;  %v9585_v15 = vcombine.low %v1697_v31, %v1701_v3 }
 0x2d6   :  { %5293 = vmatpush1.bf16.msra.mxu0 %v9633_v9  ;;  %5324 = vmatprep.mubr.bf16.mxu0 %v10916_v55  ;;  %v9610_v55 = vcombine.high %v1721_v29, %v1725_v34  ;;  %v10032_v9 = vcombine.high %v2144_v4, %v2148_v6  ;;  %v10031_v30 = vcombine.low %v2144_v4, %v2148_v6  ;;  %v1877_v29 = vld [vmem:[#allocation8 + $0x5f8] sm:$0xff] }
 0x2d7   :  { %v11036_v21 = vpop.f32.mrf.mxu0  ;;  %5294 = vmatprep.subr.bf16.mxu0 %v9626_v12  ;;  %v1693_v12 = vld [vmem:[#allocation8 + $0x38] sm:$0xff] }
 0x2d8   :  { %5268 = vmatpush2.bf16.msra.mxu1 %v10079_v11  ;;  %v1689_v11 = vld [vmem:[#allocation8 + $0x18] sm:$0xff] }
 0x2d9   :  { %5269 = vmatprep.subr.bf16.mxu1 %v10072_v13  ;;  %v5002_v36 = vpop.f32.mrf.mxu0  ;;  %v2136_v13 = vld [vmem:[#allocation8 + $0xe10] sm:$0xff]  ;;  %v9578_v19 = vcombine.high %v1689_v11, %v1693_v12  ;;  %v9577_v34 = vcombine.low %v1689_v11, %v1693_v12  ;;  %v1785_v4 = vld [vmem:[#allocation8 + $0x318] sm:$0xff] }
 0x2da   :  { %5295 = vmatpush1.bf16.msra.mxu0 %v9625_v1  ;;  %v10024_v1 = vcombine.high %v2136_v13, %v2140_v14  ;;  %v10023_v36 = vcombine.low %v2136_v13, %v2140_v14  ;;  %v1789_v6 = vld [vmem:[#allocation8 + $0x338] sm:$0xff] }
 0x2db   :  { %v5003_v37 = vpop.f32.mrf.mxu0  ;;  %5296 = vmatprep.subr.bf16.mxu0 %v9618_v27  ;;  %v1813_v27 = vld [vmem:[#allocation8 + $0x3f8] sm:$0xff]  ;;  %v9674_v12 = vcombine.high %v1785_v4, %v1789_v6 }
 0x2dc   :  { %5270 = vmatpush2.bf16.msra.mxu1 %v10071_v26  ;;  %v1809_v26 = vld [vmem:[#allocation8 + $0x3d8] sm:$0xff]  ;;  %v11038_v37 = vld [vmem:[#allocation10] sm:$0xff] }
 0x2dd   :  { %5271 = vmatprep.subr.bf16.mxu1 %v10064_v28  ;;  %v1873_v28 = vld [vmem:[#allocation8 + $0x5d8] sm:$0xff]  ;;  %v9698_v39 = vcombine.high %v1809_v26, %v1813_v27  ;;  %v9697_v46 = vcombine.low %v1809_v26, %v1813_v27  ;;  %v2215_v48 = vrot.slane %v11038_v37, %v10926_v10 }
 0x2de   :  { %5297 = vmatpush1.bf16.msra.mxu0 %v9617_v47  ;;  %v9762_v40 = vcombine.high %v1873_v28, %v1877_v29  ;;  %v1801_v47 = vld [vmem:[#allocation8 + $0x398] sm:$0xff]  ;;  %v9761_v49 = vcombine.low %v1873_v28, %v1877_v29 }
 0x2df   :  { %5298 = vmatprep.subr.bf16.mxu0 %v9610_v55  ;;  %v1805_v55 = vld [vmem:[#allocation8 + $0x3b8] sm:$0xff] }
 0x2e0   :  { %5272 = vmatpush2.bf16.msra.mxu1 %v10063_v41  ;;  %v2211_v41 = vrot.slane %v11038_v37, %v10923_v8  ;;  %v1777_v14 = vld [vmem:[#allocation8 + $0x2d8] sm:$0xff] }
 0x2e1   :  { %5273 = vmatprep.subr.bf16.mxu1 %v10056_v24  ;;  %v1865_v24 = vld [vmem:[#allocation8 + $0x598] sm:$0xff] }
 0x2e2   :  { %5299 = vmatpush1.bf16.msra.mxu0 %v9609_v50  ;;  %v9690_v50 = vcombine.high %v1801_v47, %v1805_v55  ;;  %v4999_v52 = vadd.f32 %v11032_v20, %v2211_v41  ;;  %v9746_v20 = vcombine.high %v1857_v53, %v1861_v58  ;;  %v1769_v29 = vld [vmem:[#allocation8 + $0x298] sm:$0xff] }
 0x2e3   :  { %5300 = vmatprep.subr.bf16.mxu0 %v9602_v62  ;;  %v1793_v62 = vld [vmem:[#allocation8 + $0x358] sm:$0xff] }
 0x2e4   :  { %5274 = vmatpush2.bf16.msra.mxu1 %v10055_v42  ;;  %v9754_v42 = vcombine.high %v1865_v24, %v1869_v45 }
 0x2e5   :  { %5275 = vmatprep.subr.bf16.mxu1 %v10048_v16  ;;  %v1797_v16 = vld [vmem:[#allocation8 + $0x378] sm:$0xff] }
 0x2e6   :  { %5301 = vmatpush1.bf16.msra.mxu0 %v9601_v61  ;;  %v9689_v61 = vcombine.low %v1801_v47, %v1805_v55  ;;  %v9682_v31 = vcombine.high %v1793_v62, %v1797_v16  ;;  %v9681_v11 = vcombine.low %v1793_v62, %v1797_v16  ;;  %v1753_v16 = vld [vmem:[#allocation8 + $0x218] sm:$0xff] }
 0x2e7   :  { %5302 = vmatprep.subr.bf16.mxu0 %v9594_v63  ;;  %v5001_v63 = vadd.f32 %v11036_v21, %v2215_v48  ;;  %v9745_v21 = vcombine.low %v1857_v53, %v1861_v58  ;;  %v1829_v48 = vld [vmem:[#allocation8 + $0x478] sm:$0xff] }
 0x2e8   :  { %5276 = vmatpush2.bf16.msra.mxu1 %v10047_v44  ;;  %v9753_v44 = vcombine.low %v1865_v24, %v1869_v45  ;;  %v1761_v24 = vld [vmem:[#allocation8 + $0x258] sm:$0xff] }
 0x2e9   :  { %5277 = vmatprep.subr.bf16.mxu1 %v10040_v51  ;;  %v1765_v45 = vld [vmem:[#allocation8 + $0x278] sm:$0xff] }
 0x2ea   :  { %5303 = vmatpush1.bf16.msra.mxu0 %v9593_v25  ;;  %v1817_v53 = vld [vmem:[#allocation8 + $0x418] sm:$0xff] }
 0x2eb   :  { %5304 = vmatprep.subr.bf16.mxu0 %v9586_v57  ;;  %v1853_v57 = vld [vmem:[#allocation8 + $0x538] sm:$0xff] }
 0x2ec   :  { %5278 = vmatpush2.bf16.msra.mxu1 %v10039_v59  ;;  %v1849_v59 = vld [vmem:[#allocation8 + $0x518] sm:$0xff] }
 0x2ed   :  { %5279 = vmatprep.subr.bf16.mxu1 %v10032_v9  ;;  %v9737_v26 = vcombine.low %v1849_v59, %v1853_v57  ;;  %v1821_v58 = vld [vmem:[#allocation8 + $0x438] sm:$0xff] }
 0x2ee   :  { %5305 = vmatpush1.bf16.msra.mxu0 %v9585_v15  ;;  %v1781_v15 = vld [vmem:[#allocation8 + $0x2f8] sm:$0xff] }
 0x2ef   :  { %5306 = vmatprep.subr.bf16.mxu0 %v9578_v19  ;;  %v1845_v19 = vld [vmem:[#allocation8 + $0x4f8] sm:$0xff]  ;;  %v9666_v27 = vcombine.high %v1777_v14, %v1781_v15 }
 0x2f0   :  { %5280 = vmatpush2.bf16.msra.mxu1 %v10031_v30  ;;  %v1841_v30 = vld [vmem:[#allocation8 + $0x4d8] sm:$0xff] }
 0x2f1   :  { %5281 = vmatprep.subr.bf16.mxu1 %v10024_v1  ;;  %v9673_v1 = vcombine.low %v1785_v4, %v1789_v6  ;;  %v9730_v28 = vcombine.high %v1841_v30, %v1845_v19  ;;  %v9729_v47 = vcombine.low %v1841_v30, %v1845_v19  ;;  %v1941_v4 = vld [vmem:[#allocation8 + $0x7f8] sm:$0xff] }
 0x2f2   :  { %5307 = vmatpush1.bf16.msra.mxu0 %v9577_v34  ;;  %v1773_v34 = vld [vmem:[#allocation8 + $0x2b8] sm:$0xff] }
 0x2f3   :  { %5308 = vmatprep.subr.bf16.mxu0 %v9698_v39  ;;  %v1837_v39 = vld [vmem:[#allocation8 + $0x4b8] sm:$0xff]  ;;  %v9658_v41 = vcombine.high %v1769_v29, %v1773_v34 }
 0x2f4   :  { %5282 = vmatpush2.bf16.msra.mxu1 %v10023_v36  ;;  %v1833_v36 = vld [vmem:[#allocation8 + $0x498] sm:$0xff] }
 0x2f5   :  { %5333 = vmatprep.subr.bf16.mxu1 %v9762_v40  ;;  %v9665_v40 = vcombine.low %v1777_v14, %v1781_v15  ;;  %v9722_v55 = vcombine.high %v1833_v36, %v1837_v39  ;;  %v1985_v19 = vld [vmem:[#allocation8 + $0x958] sm:$0xff] }
 0x2f6   :  { %5309 = vmatpush2.bf16.msra.mxu0 %v9697_v46  ;;  %v1825_v46 = vld [vmem:[#allocation8 + $0x458] sm:$0xff] }
 0x2f7   :  { %v5039_v60 = vpop.f32.mrf.mxu1  ;;  %5284 = vmatmul.mubr.bf16.vlgmr.msra.gmra.mxu1 %v10991_v7  ;;  %5310 = vmatprep.subr.bf16.mxu0 %v9690_v50  ;;  %v9721_v50 = vcombine.low %v1833_v36, %v1837_v39  ;;  %v9714_v62 = vcombine.high %v1825_v46, %v1829_v48 }
 0x2f8   :  { %v11047_v51 = vadd.f32 %v5039_v60, %v4999_v52  ;;  %5334 = vmatpush1.bf16.msra.mxu1 %v9761_v49  ;;  %5365 = vmatprep.mubr.bf16.mxu1 %v10932_v54  ;;  %v9738_v54 = vcombine.high %v1849_v59, %v1853_v57  ;;  %v9657_v49 = vcombine.low %v1769_v29, %v1773_v34  ;;  %v1757_v52 = vld [vmem:[#allocation8 + $0x238] sm:$0xff] }
 0x2f9   :  { %v5041_v3 = vpop.f32.mrf.mxu1  ;;  %5335 = vmatprep.subr.bf16.mxu1 %v9754_v42  ;;  %v9650_v42 = vcombine.high %v1761_v24, %v1765_v45  ;;  %v9649_v60 = vcombine.low %v1761_v24, %v1765_v45  ;;  %v9641_v6 = vcombine.low %v1753_v16, %v1757_v52  ;;  %v9705_v59 = vcombine.low %v1817_v53, %v1821_v58  ;;  %v1913_v45 = vld [vmem:[#allocation8 + $0x718] sm:$0xff] }
 0x2fa   :  { %v11050_v25 = vadd.f32 %v5041_v3, %v5001_v63  ;;  %5311 = vmatpush2.bf16.msra.mxu0 %v9689_v61  ;;  %v9713_v61 = vcombine.low %v1825_v46, %v1829_v48  ;;  %v9706_v63 = vcombine.high %v1817_v53, %v1821_v58  ;;  %v2005_v3 = vld [vmem:[#allocation8 + $0x9f8] sm:$0xff] }
 0x2fb   :  { %v5043_v9 = vpop.f32.mrf.mxu1  ;;  %5312 = vmatprep.subr.bf16.mxu0 %v9682_v31  ;;  %v2001_v31 = vld [vmem:[#allocation8 + $0x9d8] sm:$0xff] }
 0x2fc   :  { %5336 = vmatpush1.bf16.msra.mxu1 %v9753_v44  ;;  %v9642_v44 = vcombine.high %v1753_v16, %v1757_v52  ;;  %v9890_v57 = vcombine.high %v2001_v31, %v2005_v3  ;;  %v1909_v16 = vld [vmem:[#allocation8 + $0x6f8] sm:$0xff] }
 0x2fd   :  { %v5044_v13 = vpop.f32.mrf.mxu1  ;;  %5337 = vmatprep.subr.bf16.mxu1 %v9746_v20  ;;  %v1937_v20 = vld [vmem:[#allocation8 + $0x7d8] sm:$0xff] }
 0x2fe   :  { %5313 = vmatpush2.bf16.msra.mxu0 %v9681_v11  ;;  %v9826_v9 = vcombine.high %v1937_v20, %v1941_v4  ;;  %v1993_v11 = vld [vmem:[#allocation8 + $0x998] sm:$0xff]  ;;  %v9825_v14 = vcombine.low %v1937_v20, %v1941_v4 }
 0x2ff   :  { %5314 = vmatprep.subr.bf16.mxu0 %v9674_v12  ;;  %v1929_v12 = vld [vmem:[#allocation8 + $0x798] sm:$0xff] }
 0x300   :  { %5338 = vmatpush1.bf16.msra.mxu1 %v9745_v21  ;;  %v1997_v21 = vld [vmem:[#allocation8 + $0x9b8] sm:$0xff] }
 0x301   :  { %5339 = vmatprep.subr.bf16.mxu1 %v9738_v54  ;;  %v1933_v13 = vld [vmem:[#allocation8 + $0x7b8] sm:$0xff]  ;;  %v9889_v54 = vcombine.low %v2001_v31, %v2005_v3  ;;  %v9882_v15 = vcombine.high %v1993_v11, %v1997_v21  ;;  %v9881_v34 = vcombine.low %v1993_v11, %v1997_v21 }
 0x302   :  { %5315 = vmatpush2.bf16.msra.mxu0 %v9673_v1  ;;  %v9818_v30 = vcombine.high %v1929_v12, %v1933_v13  ;;  %v1989_v1 = vld [vmem:[#allocation8 + $0x978] sm:$0xff]  ;;  %v9817_v39 = vcombine.low %v1929_v12, %v1933_v13 }
 0x303   :  { %5316 = vmatprep.subr.bf16.mxu0 %v9666_v27  ;;  %v1921_v27 = vld [vmem:[#allocation8 + $0x758] sm:$0xff]  ;;  %v9873_v46 = vcombine.low %v1985_v19, %v1989_v1 }
 0x304   :  { %5340 = vmatpush1.bf16.msra.mxu1 %v9737_v26  ;;  %v1901_v31 = vld [vmem:[#allocation8 + $0x6b8] sm:$0xff] }
 0x305   :  { %5341 = vmatprep.subr.bf16.mxu1 %v9730_v28  ;;  %v1925_v28 = vld [vmem:[#allocation8 + $0x778] sm:$0xff] }
 0x306   :  { %5317 = vmatpush2.bf16.msra.mxu0 %v9665_v40  ;;  %v9874_v40 = vcombine.high %v1985_v19, %v1989_v1  ;;  %v9809_v48 = vcombine.low %v1921_v27, %v1925_v28  ;;  %v1893_v11 = vld [vmem:[#allocation8 + $0x678] sm:$0xff] }
 0x307   :  { %5318 = vmatprep.subr.bf16.mxu0 %v9658_v41  ;;  %v9810_v41 = vcombine.high %v1921_v27, %v1925_v28  ;;  %v1885_v19 = vld [vmem:[#allocation8 + $0x638] sm:$0xff] }
 0x308   :  { %5342 = vmatpush1.bf16.msra.mxu1 %v9729_v47 }
 0x309   :  { %5343 = vmatprep.subr.bf16.mxu1 %v9722_v55  ;;  %v1981_v55 = vld [vmem:[#allocation8 + $0x938] sm:$0xff] }
 0x30a   :  { %5319 = vmatpush2.bf16.msra.mxu0 %v9657_v49 }
 0x30b   :  { %5320 = vmatprep.subr.bf16.mxu0 %v9650_v42  ;;  %v1969_v42 = vld [vmem:[#allocation8 + $0x8d8] sm:$0xff] }
 0x30c   :  { %5344 = vmatpush1.bf16.msra.mxu1 %v9721_v50 }
 0x30d   :  { %5345 = vmatprep.subr.bf16.mxu1 %v9714_v62  ;;  %v1973_v62 = vld [vmem:[#allocation8 + $0x8f8] sm:$0xff] }
 0x30e   :  { %5321 = vmatpush2.bf16.msra.mxu0 %v9649_v60  ;;  %v9858_v58 = vcombine.high %v1969_v42, %v1973_v62  ;;  %v9857_v3 = vcombine.low %v1969_v42, %v1973_v62  ;;  %v2049_v62 = vld [vmem:[#allocation8 + $0xb58] sm:$0xff] }
 0x30f   :  { %5322 = vmatprep.subr.bf16.mxu0 %v9642_v44  ;;  %v1965_v44 = vld [vmem:[#allocation8 + $0x8b8] sm:$0xff] }
 0x310   :  { %5346 = vmatpush1.bf16.msra.mxu1 %v9713_v61  ;;  %v1961_v61 = vld [vmem:[#allocation8 + $0x898] sm:$0xff] }
 0x311   :  { %5347 = vmatprep.subr.bf16.mxu1 %v9706_v63  ;;  %v1897_v63 = vld [vmem:[#allocation8 + $0x698] sm:$0xff]  ;;  %v9850_v4 = vcombine.high %v1961_v61, %v1965_v44  ;;  %v9849_v21 = vcombine.low %v1961_v61, %v1965_v44 }
 0x312   :  { %5323 = vmatpush2.bf16.msra.mxu0 %v9641_v6  ;;  %v9786_v6 = vcombine.high %v1897_v63, %v1901_v31  ;;  %v9785_v12 = vcombine.low %v1897_v63, %v1901_v31 }
 0x313   :  { %5374 = vmatprep.subr.bf16.mxu0 %v9890_v57  ;;  %v1957_v57 = vld [vmem:[#allocation8 + $0x878] sm:$0xff] }
 0x314   :  { %5348 = vmatpush1.bf16.msra.mxu1 %v9705_v59  ;;  %v1953_v59 = vld [vmem:[#allocation8 + $0x858] sm:$0xff] }
 0x315   :  { %5349 = vmatprep.subr.bf16.mxu1 %v9826_v9  ;;  %v5080_v26 = vpop.f32.mrf.mxu0  ;;  %5325 = vmatmul.mubr.bf16.vlgmr.msra.gmra.mxu0 %v10918_v56  ;;  %v1977_v56 = vld [vmem:[#allocation8 + $0x918] sm:$0xff]  ;;  %v9842_v13 = vcombine.high %v1953_v59, %v1957_v57  ;;  %v9841_v1 = vcombine.low %v1953_v59, %v1957_v57 }
 0x316   :  { %v11054_v29 = vadd.f32 %v5080_v26, %v11047_v51  ;;  %5375 = vmatpush1.bf16.msra.mxu0 %v9889_v54  ;;  %5406 = vmatprep.mubr.bf16.mxu0 %v10968_v0  ;;  %v1917_v51 = vld [vmem:[#allocation8 + $0x738] sm:$0xff]  ;;  %v9866_v49 = vcombine.high %v1977_v56, %v1981_v55  ;;  %v9865_v52 = vcombine.low %v1977_v56, %v1981_v55 }
 0x317   :  { %v5082_v36 = vpop.f32.mrf.mxu0  ;;  %5376 = vmatprep.subr.bf16.mxu0 %v9882_v15  ;;  %v9802_v50 = vcombine.high %v1913_v45, %v1917_v51  ;;  %v9801_v53 = vcombine.low %v1913_v45, %v1917_v51  ;;  %v1889_v9 = vld [vmem:[#allocation8 + $0x658] sm:$0xff] }
 0x318   :  { %5350 = vmatpush2.bf16.msra.mxu1 %v9825_v14  ;;  %v11058_v47 = vadd.f32 %v5082_v36, %v11050_v25  ;;  %v1905_v25 = vld [vmem:[#allocation8 + $0x6d8] sm:$0xff]  ;;  %v9778_v54 = vcombine.high %v1889_v9, %v1893_v11  ;;  %v9777_v26 = vcombine.low %v1889_v9, %v1893_v11 }
 0x319   :  { %5351 = vmatprep.subr.bf16.mxu1 %v9818_v30  ;;  %v5084_v24 = vpop.f32.mrf.mxu0  ;;  %v9794_v60 = vcombine.high %v1905_v25, %v1909_v16  ;;  %v9793_v20 = vcombine.low %v1905_v25, %v1909_v16  ;;  %v1945_v14 = vld [vmem:[#allocation8 + $0x818] sm:$0xff] }
 0x31a   :  { %5377 = vmatpush1.bf16.msra.mxu0 %v9881_v34  ;;  %v1949_v15 = vld [vmem:[#allocation8 + $0x838] sm:$0xff] }
 0x31b   :  { %v5085_v0 = vpop.f32.mrf.mxu0  ;;  %5378 = vmatprep.subr.bf16.mxu0 %v9874_v40  ;;  %v1881_v30 = vld [vmem:[#allocation8 + $0x618] sm:$0xff]  ;;  %v9834_v27 = vcombine.high %v1945_v14, %v1949_v15 }
 0x31c   :  { %5352 = vmatpush2.bf16.msra.mxu1 %v9817_v39  ;;  %v9770_v28 = vcombine.high %v1881_v30, %v1885_v19  ;;  %v2065_v34 = vld [vmem:[#allocation8 + $0xbd8] sm:$0xff]  ;;  %v9769_v56 = vcombine.low %v1881_v30, %v1885_v19 }
 0x31d   :  { %5353 = vmatprep.subr.bf16.mxu1 %v9810_v41  ;;  %v2069_v36 = vld [vmem:[#allocation8 + $0xbf8] sm:$0xff]  ;;  %v9833_v41 = vcombine.low %v1945_v14, %v1949_v15 }
 0x31e   :  { %5379 = vmatpush1.bf16.msra.mxu0 %v9873_v46  ;;  %v2129_v39 = vld [vmem:[#allocation8 + $0xdd8] sm:$0xff]  ;;  %v9954_v55 = vcombine.high %v2065_v34, %v2069_v36 }
 0x31f   :  { %5380 = vmatprep.subr.bf16.mxu0 %v9866_v49  ;;  %v2133_v40 = vld [vmem:[#allocation8 + $0xdf8] sm:$0xff] }
 0x320   :  { %5354 = vmatpush2.bf16.msra.mxu1 %v9809_v48  ;;  %v10018_v24 = vcombine.high %v2129_v39, %v2133_v40  ;;  %v2057_v45 = vld [vmem:[#allocation8 + $0xb98] sm:$0xff]  ;;  %v9953_v48 = vcombine.low %v2065_v34, %v2069_v36  ;;  %v10017_v49 = vcombine.low %v2129_v39, %v2133_v40 }
 0x321   :  { %5355 = vmatprep.subr.bf16.mxu1 %v9802_v50  ;;  %v2061_v51 = vld [vmem:[#allocation8 + $0xbb8] sm:$0xff] }
 0x322   :  { %5381 = vmatpush1.bf16.msra.mxu0 %v9865_v52  ;;  %v2121_v46 = vld [vmem:[#allocation8 + $0xd98] sm:$0xff]  ;;  %v9946_v50 = vcombine.high %v2057_v45, %v2061_v51 }
 0x323   :  { %5382 = vmatprep.subr.bf16.mxu0 %v9858_v58  ;;  %v2125_v0 = vld [vmem:[#allocation8 + $0xdb8] sm:$0xff]  ;;  %v9945_v58 = vcombine.low %v2057_v45, %v2061_v51 }
 0x324   :  { %5356 = vmatpush2.bf16.msra.mxu1 %v9801_v53  ;;  %v10010_v42 = vcombine.high %v2121_v46, %v2125_v0  ;;  %v2053_v25 = vld [vmem:[#allocation8 + $0xb78] sm:$0xff]  ;;  %v10009_v61 = vcombine.low %v2121_v46, %v2125_v0 }
 0x325   :  { %5357 = vmatprep.subr.bf16.mxu1 %v9794_v60  ;;  %v2113_v16 = vld [vmem:[#allocation8 + $0xd58] sm:$0xff]  ;;  %v9938_v44 = vcombine.high %v2049_v62, %v2053_v25  ;;  %v9937_v59 = vcombine.low %v2049_v62, %v2053_v25 }
 0x326   :  { %5383 = vmatpush1.bf16.msra.mxu0 %v9857_v3  ;;  %v2117_v52 = vld [vmem:[#allocation8 + $0xd78] sm:$0xff] }
 0x327   :  { %5384 = vmatprep.subr.bf16.mxu0 %v9850_v4  ;;  %v10002_v31 = vcombine.high %v2113_v16, %v2117_v52  ;;  %v2041_v3 = vld [vmem:[#allocation8 + $0xb18] sm:$0xff] }
 0x328   :  { %5358 = vmatpush2.bf16.msra.mxu1 %v9793_v20  ;;  %v2045_v20 = vld [vmem:[#allocation8 + $0xb38] sm:$0xff] }
 0x329   :  { %5359 = vmatprep.subr.bf16.mxu1 %v9786_v6  ;;  %v2105_v4 = vld [vmem:[#allocation8 + $0xd18] sm:$0xff]  ;;  %v9930_v57 = vcombine.high %v2041_v3, %v2045_v20 }
 0x32a   :  { %5385 = vmatpush1.bf16.msra.mxu0 %v9849_v21  ;;  %v2109_v6 = vld [vmem:[#allocation8 + $0xd38] sm:$0xff] }
 0x32b   :  { %5386 = vmatprep.subr.bf16.mxu0 %v9842_v13  ;;  %v2033_v11 = vld [vmem:[#allocation8 + $0xad8] sm:$0xff]  ;;  %v9993_v14 = vcombine.low %v2105_v4, %v2109_v6 }
 0x32c   :  { %5360 = vmatpush2.bf16.msra.mxu1 %v9785_v12  ;;  %v2037_v21 = vld [vmem:[#allocation8 + $0xaf8] sm:$0xff] }
 0x32d   :  { %5361 = vmatprep.subr.bf16.mxu1 %v9778_v54  ;;  %v2097_v12 = vld [vmem:[#allocation8 + $0xcd8] sm:$0xff]  ;;  %v9929_v54 = vcombine.low %v2041_v3, %v2045_v20  ;;  %v9922_v15 = vcombine.high %v2033_v11, %v2037_v21 }
 0x32e   :  { %5387 = vmatpush1.bf16.msra.mxu0 %v9841_v1  ;;  %v2101_v13 = vld [vmem:[#allocation8 + $0xcf8] sm:$0xff] }
 0x32f   :  { %5388 = vmatprep.subr.bf16.mxu0 %v9834_v27  ;;  %v9986_v30 = vcombine.high %v2097_v12, %v2101_v13  ;;  %v2025_v19 = vld [vmem:[#allocation8 + $0xa98] sm:$0xff]  ;;  %v9985_v34 = vcombine.low %v2097_v12, %v2101_v13  ;;  %v5520_v13 = vld [vmem:[#allocation11 + $0x140] sm:$0xff] }
 0x330   :  { %5362 = vmatpush2.bf16.msra.mxu1 %v9777_v26  ;;  %v2029_v1 = vld [vmem:[#allocation8 + $0xab8] sm:$0xff] }
 0x331   :  { %5363 = vmatprep.subr.bf16.mxu1 %v9770_v28  ;;  %v2089_v26 = vld [vmem:[#allocation8 + $0xc98] sm:$0xff]  ;;  %v9921_v28 = vcombine.low %v2033_v11, %v2037_v21  ;;  %v9914_v36 = vcombine.high %v2025_v19, %v2029_v1 }
 0x332   :  { %5389 = vmatpush1.bf16.msra.mxu0 %v9833_v41  ;;  %v2093_v27 = vld [vmem:[#allocation8 + $0xcb8] sm:$0xff] }
 0x333   :  { %5390 = vmatprep.subr.bf16.mxu0 %v9954_v55  ;;  %v9978_v39 = vcombine.high %v2089_v26, %v2093_v27  ;;  %v2017_v40 = vld [vmem:[#allocation8 + $0xa58] sm:$0xff]  ;;  %v9977_v45 = vcombine.low %v2089_v26, %v2093_v27 }
 0x334   :  { %5364 = vmatpush2.bf16.msra.mxu1 %v9769_v56  ;;  %v2021_v41 = vld [vmem:[#allocation8 + $0xa78] sm:$0xff] }
 0x335   :  { %5415 = vmatprep.subr.bf16.mxu1 %v10018_v24  ;;  %v2081_v56 = vld [vmem:[#allocation8 + $0xc58] sm:$0xff]  ;;  %v9913_v24 = vcombine.low %v2025_v19, %v2029_v1  ;;  %v9906_v51 = vcombine.high %v2017_v40, %v2021_v41 }
 0x336   :  { %5391 = vmatpush2.bf16.msra.mxu0 %v9953_v48  ;;  %v2085_v55 = vld [vmem:[#allocation8 + $0xc78] sm:$0xff] }
 0x337   :  { %v5121_v53 = vpop.f32.mrf.mxu1  ;;  %5366 = vmatmul.mubr.bf16.vlgmr.msra.gmra.mxu1 %v10936_v43  ;;  %5392 = vmatprep.subr.bf16.mxu0 %v9946_v50  ;;  %v9970_v46 = vcombine.high %v2081_v56, %v2085_v55  ;;  %v2009_v0 = vld [vmem:[#allocation8 + $0xa18] sm:$0xff]  ;;  %v9969_v62 = vcombine.low %v2081_v56, %v2085_v55 }
 0x338   :  { %v11062_v60 = vadd.f32 %v5121_v53, %v11054_v29  ;;  %5416 = vmatpush1.bf16.msra.mxu1 %v10017_v49  ;;  %5447 = vmatprep.mubr.bf16.mxu1 %v10987_v5  ;;  %v10001_v29 = vcombine.low %v2113_v16, %v2117_v52  ;;  %v9994_v5 = vcombine.high %v2105_v4, %v2109_v6  ;;  %v2013_v48 = vld [vmem:[#allocation8 + $0xa38] sm:$0xff]  ;;  %v5457_v16 = vmul.f32 0.2, %v11030_v32  ;;  %v5536_v53 = vld [vmem:[#allocation11 + $0x1c0] sm:$0xff] }
 0x339   :  { %v11065_v63 = vpop.f32.mrf.mxu1  ;;  %5417 = vmatprep.subr.bf16.mxu1 %v10010_v42  ;;  %v2073_v49 = vld [vmem:[#allocation8 + $0xc18] sm:$0xff]  ;;  %v9905_v42 = vcombine.low %v2017_v40, %v2021_v41  ;;  %v9898_v25 = vcombine.high %v2009_v0, %v2013_v48 }
 0x33a   :  { %5393 = vmatpush2.bf16.msra.mxu0 %v9945_v58  ;;  %v2077_v50 = vld [vmem:[#allocation8 + $0xc38] sm:$0xff]  ;;  %v5540_v58 = vld [vmem:[#allocation11 + $0x1e0] sm:$0xff]  ;;  %v5465_v4 = vmax.f32 %v11030_v32, %v5457_v16 }
 0x33b   :  { %v5125_v43 = vpop.f32.mrf.mxu1  ;;  %5394 = vmatprep.subr.bf16.mxu0 %v9938_v44  ;;  %v9962_v52 = vcombine.high %v2073_v49, %v2077_v50  ;;  %v2197_v44 = vld [vmem:[#allocation8 + $0xff8] sm:$0xff]  ;;  %v9961_v3 = vcombine.low %v2073_v49, %v2077_v50  ;;  %v10140_v20 = vcombine.high %v5536_v53, %v5540_v58 }
 0x33c   :  { %5418 = vmatpush1.bf16.msra.mxu1 %v10009_v61  ;;  %v2193_v61 = vld [vmem:[#allocation8 + $0xfd8] sm:$0xff]  ;;  %v5528_v43 = vld [vmem:[#allocation11 + $0x180] sm:$0xff]  ;;  %v11069_v21 = vpack.c.bf16 %v5465_v4, %v5465_v4 }
 0x33d   :  { %v5126_v9 = vpop.f32.mrf.mxu1  ;;  %5419 = vmatprep.subr.bf16.mxu1 %v10002_v31  ;;  %v9897_v31 = vcombine.low %v2009_v0, %v2013_v48  ;;  %v10082_v6 = vcombine.high %v2193_v61, %v2197_v44  ;;  %v2177_v32 = vld [vmem:[#allocation8 + $0xf58] sm:$0xff] }
 0x33e   :  { %5395 = vmatpush2.bf16.msra.mxu0 %v9937_v59  ;;  %v5532_v59 = vld [vmem:[#allocation11 + $0x1a0] sm:$0xff]  ;;  %v10139_v9 = vcombine.low %v5536_v53, %v5540_v58  ;;  %v2173_v40 = vld [vmem:[#allocation8 + $0xf38] sm:$0xff] }
 0x33f   :  { %5396 = vmatprep.subr.bf16.mxu0 %v9930_v57  ;;  %v2189_v57 = vld [vmem:[#allocation8 + $0xfb8] sm:$0xff]  ;;  %v10132_v11 = vcombine.high %v5528_v43, %v5532_v59 }
 0x340   :  { %5420 = vmatpush1.bf16.msra.mxu1 %v10001_v29  ;;  %v2185_v29 = vld [vmem:[#allocation8 + $0xf98] sm:$0xff] }
 0x341   :  { %5421 = vmatprep.subr.bf16.mxu1 %v9994_v5  ;;  %v10081_v5 = vcombine.low %v2193_v61, %v2197_v44  ;;  %v10074_v12 = vcombine.high %v2185_v29, %v2189_v57  ;;  %v10073_v1 = vcombine.low %v2185_v29, %v2189_v57  ;;  %v2165_v0 = vld [vmem:[#allocation8 + $0xef8] sm:$0xff]  ;;  %v5480_v57 = vld [vmem:[#allocation11] sm:$0xff] }
 0x342   :  { %5397 = vmatpush2.bf16.msra.mxu0 %v9929_v54  ;;  %v5524_v54 = vld [vmem:[#allocation11 + $0x160] sm:$0xff]  ;;  %v2153_v16 = vld [vmem:[#allocation8 + $0xe98] sm:$0xff] }
 0x343   :  { %5398 = vmatprep.subr.bf16.mxu0 %v9922_v15  ;;  %v2181_v15 = vld [vmem:[#allocation8 + $0xf78] sm:$0xff]  ;;  %v10124_v26 = vcombine.high %v5520_v13, %v5524_v54 }
 0x344   :  { %5422 = vmatpush1.bf16.msra.mxu1 %v9993_v14  ;;  %v10066_v27 = vcombine.high %v2177_v32, %v2181_v15  ;;  %v10065_v56 = vcombine.low %v2177_v32, %v2181_v15  ;;  %v2149_v4 = vld [vmem:[#allocation8 + $0xe78] sm:$0xff] }
 0x345   :  { %5423 = vmatprep.subr.bf16.mxu1 %v9986_v30  ;;  %v10131_v30 = vcombine.low %v5528_v43, %v5532_v59 }
 0x346   :  { %5399 = vmatpush2.bf16.msra.mxu0 %v9921_v28  ;;  %v5512_v28 = vld [vmem:[#allocation11 + $0x100] sm:$0xff] }
 0x347   :  { %5400 = vmatprep.subr.bf16.mxu0 %v9914_v36 }
 0x348   :  { %5424 = vmatpush1.bf16.msra.mxu1 %v9985_v34  ;;  %v5516_v34 = vld [vmem:[#allocation11 + $0x120] sm:$0xff] }
 0x349   :  { %5425 = vmatprep.subr.bf16.mxu1 %v9978_v39  ;;  %v2169_v39 = vld [vmem:[#allocation8 + $0xf18] sm:$0xff]  ;;  %v10116_v55 = vcombine.high %v5512_v28, %v5516_v34  ;;  %v10115_v48 = vcombine.low %v5512_v28, %v5516_v34  ;;  %v5668_v28 = vld [vmem:[#allocation11 + $0x5e0] sm:$0xff] }
 0x34a   :  { %5401 = vmatpush2.bf16.msra.mxu0 %v9913_v24  ;;  %v10058_v24 = vcombine.high %v2169_v39, %v2173_v40  ;;  %v10057_v49 = vcombine.low %v2169_v39, %v2173_v40  ;;  %v5592_v39 = vld [vmem:[#allocation11 + $0x380] sm:$0xff] }
 0x34b   :  { %5402 = vmatprep.subr.bf16.mxu0 %v9906_v51  ;;  %v5508_v51 = vld [vmem:[#allocation11 + $0xe0] sm:$0xff] }
 0x34c   :  { %5426 = vmatpush1.bf16.msra.mxu1 %v9977_v45  ;;  %v5504_v45 = vld [vmem:[#allocation11 + $0xc0] sm:$0xff] }
 0x34d   :  { %5427 = vmatprep.subr.bf16.mxu1 %v9970_v46  ;;  %v2161_v46 = vld [vmem:[#allocation8 + $0xed8] sm:$0xff]  ;;  %v10108_v50 = vcombine.high %v5504_v45, %v5508_v51  ;;  %v10107_v53 = vcombine.low %v5504_v45, %v5508_v51 }
 0x34e   :  { %5403 = vmatpush2.bf16.msra.mxu0 %v9905_v42  ;;  %v10050_v42 = vcombine.high %v2161_v46, %v2165_v0  ;;  %v10049_v58 = vcombine.low %v2161_v46, %v2165_v0  ;;  %v5584_v0 = vld [vmem:[#allocation11 + $0x340] sm:$0xff] }
 0x34f   :  { %5404 = vmatprep.subr.bf16.mxu0 %v9898_v25  ;;  %v5500_v25 = vld [vmem:[#allocation11 + $0xa0] sm:$0xff] }
 0x350   :  { %5428 = vmatpush1.bf16.msra.mxu1 %v9969_v62  ;;  %v5496_v62 = vld [vmem:[#allocation11 + $0x80] sm:$0xff] }
 0x351   :  { %5429 = vmatprep.subr.bf16.mxu1 %v9962_v52  ;;  %v2157_v52 = vld [vmem:[#allocation8 + $0xeb8] sm:$0xff]  ;;  %v10100_v61 = vcombine.high %v5496_v62, %v5500_v25 }
 0x352   :  { %5405 = vmatpush2.bf16.msra.mxu0 %v9897_v31  ;;  %v10042_v44 = vcombine.high %v2153_v16, %v2157_v52  ;;  %v5488_v31 = vld [vmem:[#allocation11 + $0x40] sm:$0xff]  ;;  %v10041_v43 = vcombine.low %v2153_v16, %v2157_v52 }
 0x353   :  { %8594 = vmatprep.subr.bf16.mxu0 %v10140_v20  ;;  %v2145_v20 = vld [vmem:[#allocation8 + $0xe58] sm:$0xff] }
 0x354   :  { %5430 = vmatpush1.bf16.msra.mxu1 %v9961_v3  ;;  %v5492_v3 = vld [vmem:[#allocation11 + $0x60] sm:$0xff]  ;;  %v10034_v29 = vcombine.high %v2145_v20, %v2149_v4 }
 0x355   :  { %5431 = vmatprep.subr.bf16.mxu1 %v10082_v6  ;;  %v11071_v14 = vpop.f32.mrf.mxu0  ;;  %5407 = vmatmul.mubr.bf16.vlgmr.msra.gmra.mxu0 %v10972_v2  ;;  %v10123_v2 = vcombine.low %v5520_v13, %v5524_v54  ;;  %v10099_v6 = vcombine.low %v5496_v62, %v5500_v25  ;;  %v10092_v59 = vcombine.high %v5488_v31, %v5492_v3  ;;  %v5652_v62 = vld [vmem:[#allocation11 + $0x560] sm:$0xff] }
 0x356   :  { %8595 = vmatpush1.bf16.msra.mxu0 %v10139_v9  ;;  %8626 = vmatprep.mubr.bf16.mxu0 %v11069_v21  ;;  %v5484_v9 = vld [vmem:[#allocation11 + $0x20] sm:$0xff]  ;;  %v10091_v13 = vcombine.low %v5488_v31, %v5492_v3  ;;  %v10033_v54 = vcombine.low %v2145_v20, %v2149_v4 }
 0x357   :  { %v11075_v19 = vpop.f32.mrf.mxu0  ;;  %8596 = vmatprep.subr.bf16.mxu0 %v10132_v11  ;;  %v2137_v11 = vld [vmem:[#allocation8 + $0xe18] sm:$0xff]  ;;  %v10084_v32 = vcombine.high %v5480_v57, %v5484_v9  ;;  %v10083_v34 = vcombine.low %v5480_v57, %v5484_v9  ;;  %v5640_v31 = vld [vmem:[#allocation11 + $0x500] sm:$0xff] }
 0x358   :  { %5432 = vmatpush2.bf16.msra.mxu1 %v10081_v5  ;;  %v5124_v5 = vadd.f32 %v11065_v63, %v11058_v47  ;;  %v5644_v3 = vld [vmem:[#allocation11 + $0x520] sm:$0xff] }
 0x359   :  { %5433 = vmatprep.subr.bf16.mxu1 %v10074_v12  ;;  %v5166_v36 = vpop.f32.mrf.mxu0  ;;  %v2141_v12 = vld [vmem:[#allocation8 + $0xe38] sm:$0xff]  ;;  %v5572_v57 = vld [vmem:[#allocation11 + $0x2e0] sm:$0xff] }
 0x35a   :  { %8597 = vmatpush1.bf16.msra.mxu0 %v10131_v30  ;;  %v10026_v15 = vcombine.high %v2137_v11, %v2141_v12  ;;  %v5600_v30 = vld [vmem:[#allocation11 + $0x3c0] sm:$0xff]  ;;  %v10025_v36 = vcombine.low %v2137_v11, %v2141_v12  ;;  %v10243_v12 = vcombine.low %v5640_v31, %v5644_v3 }
 0x35b   :  { %v5167_v41 = vpop.f32.mrf.mxu0  ;;  %8598 = vmatprep.subr.bf16.mxu0 %v10124_v26  ;;  %v5459_v26 = vmul.f32 0.2, %v5124_v5  ;;  %v5632_v9 = vld [vmem:[#allocation11 + $0x4c0] sm:$0xff] }
 0x35c   :  { %5434 = vmatpush2.bf16.msra.mxu1 %v10073_v1  ;;  %v5604_v1 = vld [vmem:[#allocation11 + $0x3e0] sm:$0xff] }
 0x35d   :  { %5435 = vmatprep.subr.bf16.mxu1 %v10066_v27  ;;  %v5664_v27 = vld [vmem:[#allocation11 + $0x5c0] sm:$0xff]  ;;  %v10204_v47 = vcombine.high %v5600_v30, %v5604_v1  ;;  %v5467_v40 = vmax.f32 %v5124_v5, %v5459_v26 }
 0x35e   :  { %8599 = vmatpush1.bf16.msra.mxu0 %v10123_v2  ;;  %v10268_v63 = vcombine.high %v5664_v27, %v5668_v28  ;;  %v2219_v2 = vrot.slane %v11038_v37, %v10951_v18  ;;  %v5596_v41 = vld [vmem:[#allocation11 + $0x3a0] sm:$0xff]  ;;  %v10267_v45 = vcombine.low %v5664_v27, %v5668_v28 }
 0x35f   :  { %8600 = vmatprep.subr.bf16.mxu0 %v10116_v55  ;;  %v5660_v55 = vld [vmem:[#allocation11 + $0x5a0] sm:$0xff]  ;;  %v10196_v51 = vcombine.high %v5592_v39, %v5596_v41  ;;  %v10195_v25 = vcombine.low %v5592_v39, %v5596_v41 }
 0x360   :  { %5436 = vmatpush2.bf16.msra.mxu1 %v10065_v56  ;;  %v5656_v56 = vld [vmem:[#allocation11 + $0x580] sm:$0xff] }
 0x361   :  { %5437 = vmatprep.subr.bf16.mxu1 %v10058_v24  ;;  %v10203_v24 = vcombine.low %v5600_v30, %v5604_v1  ;;  %v10260_v46 = vcombine.high %v5656_v56, %v5660_v55  ;;  %v10259_v52 = vcombine.low %v5656_v56, %v5660_v55  ;;  %v5636_v5 = vld [vmem:[#allocation11 + $0x4e0] sm:$0xff] }
 0x362   :  { %8601 = vmatpush1.bf16.msra.mxu0 %v10115_v48  ;;  %v5588_v48 = vld [vmem:[#allocation11 + $0x360] sm:$0xff]  ;;  %v10235_v27 = vcombine.low %v5632_v9, %v5636_v5 }
 0x363   :  { %8602 = vmatprep.subr.bf16.mxu0 %v10108_v50  ;;  %v5163_v50 = vadd.f32 %v11071_v14, %v2219_v2  ;;  %v5576_v14 = vld [vmem:[#allocation11 + $0x300] sm:$0xff] }
 0x364   :  { %5438 = vmatpush2.bf16.msra.mxu1 %v10057_v49  ;;  %v11081_v49 = vpack.c.bf16 %v5467_v40, %v5467_v40  ;;  %v5624_v30 = vld [vmem:[#allocation11 + $0x480] sm:$0xff] }
 0x365   :  { %5439 = vmatprep.subr.bf16.mxu1 %v10050_v42  ;;  %v5648_v42 = vld [vmem:[#allocation11 + $0x540] sm:$0xff] }
 0x366   :  { %8603 = vmatpush1.bf16.msra.mxu0 %v10107_v53  ;;  %v10188_v53 = vcombine.high %v5584_v0, %v5588_v48  ;;  %v10251_v4 = vcombine.low %v5648_v42, %v5652_v62  ;;  %v5628_v1 = vld [vmem:[#allocation11 + $0x4a0] sm:$0xff] }
 0x367   :  { %8604 = vmatprep.subr.bf16.mxu0 %v10100_v61  ;;  %v10252_v61 = vcombine.high %v5648_v42, %v5652_v62  ;;  %v5620_v39 = vld [vmem:[#allocation11 + $0x460] sm:$0xff]  ;;  %v10227_v2 = vcombine.low %v5624_v30, %v5628_v1 }
 0x368   :  { %5440 = vmatpush2.bf16.msra.mxu1 %v10049_v58  ;;  %v5544_v55 = vld [vmem:[#allocation11 + $0x200] sm:$0xff] }
 0x369   :  { %5441 = vmatprep.subr.bf16.mxu1 %v10042_v44  ;;  %v5580_v44 = vld [vmem:[#allocation11 + $0x320] sm:$0xff] }
 0x36a   :  { %8605 = vmatpush1.bf16.msra.mxu0 %v10099_v6  ;;  %v10180_v6 = vcombine.high %v5576_v14, %v5580_v44  ;;  %v10179_v11 = vcombine.low %v5576_v14, %v5580_v44  ;;  %v5792_v62 = vld [vmem:[#allocation11 + $0x9c0] sm:$0xff] }
 0x36b   :  { %8606 = vmatprep.subr.bf16.mxu0 %v10092_v59  ;;  %v10244_v59 = vcombine.high %v5640_v31, %v5644_v3  ;;  %v5784_v3 = vld [vmem:[#allocation11 + $0x980] sm:$0xff] }
 0x36c   :  { %5442 = vmatpush2.bf16.msra.mxu1 %v10041_v43 }
 0x36d   :  { %5443 = vmatprep.subr.bf16.mxu1 %v10034_v29  ;;  %v5568_v29 = vld [vmem:[#allocation11 + $0x2c0] sm:$0xff] }
 0x36e   :  { %8607 = vmatpush1.bf16.msra.mxu0 %v10091_v13  ;;  %v10172_v13 = vcombine.high %v5568_v29, %v5572_v57  ;;  %v10171_v26 = vcombine.low %v5568_v29, %v5572_v57  ;;  %v5776_v57 = vld [vmem:[#allocation11 + $0x940] sm:$0xff] }
 0x36f   :  { %8608 = vmatprep.subr.bf16.mxu0 %v10084_v32  ;;  %v5560_v32 = vld [vmem:[#allocation11 + $0x280] sm:$0xff] }
 0x370   :  { %5444 = vmatpush2.bf16.msra.mxu1 %v10033_v54  ;;  %v10236_v54 = vcombine.high %v5632_v9, %v5636_v5  ;;  %v5780_v9 = vld [vmem:[#allocation11 + $0x960] sm:$0xff] }
 0x371   :  { %5445 = vmatprep.subr.bf16.mxu1 %v10026_v15  ;;  %v5564_v15 = vld [vmem:[#allocation11 + $0x2a0] sm:$0xff] }
 0x372   :  { %8609 = vmatpush1.bf16.msra.mxu0 %v10083_v34  ;;  %v10164_v28 = vcombine.high %v5560_v32, %v5564_v15  ;;  %v10228_v34 = vcombine.high %v5624_v30, %v5628_v1  ;;  %v10163_v40 = vcombine.low %v5560_v32, %v5564_v15  ;;  %v10380_v15 = vcombine.high %v5776_v57, %v5780_v9  ;;  %v5768_v1 = vld [vmem:[#allocation11 + $0x900] sm:$0xff] }
 0x373   :  { %8610 = vmatprep.subr.bf16.mxu0 %v10204_v47  ;;  %v5556_v47 = vld [vmem:[#allocation11 + $0x260] sm:$0xff] }
 0x374   :  { %5446 = vmatpush2.bf16.msra.mxu1 %v10025_v36  ;;  %v5552_v36 = vld [vmem:[#allocation11 + $0x240] sm:$0xff] }
 0x375   :  { %8635 = vmatprep.subr.bf16.mxu1 %v10268_v63  ;;  %v5616_v63 = vld [vmem:[#allocation11 + $0x440] sm:$0xff]  ;;  %v10156_v41 = vcombine.high %v5552_v36, %v5556_v47 }
 0x376   :  { %8611 = vmatpush2.bf16.msra.mxu0 %v10203_v24  ;;  %v10220_v56 = vcombine.high %v5616_v63, %v5620_v39  ;;  %v5548_v24 = vld [vmem:[#allocation11 + $0x220] sm:$0xff] }
 0x377   :  { %v5203_v37 = vpop.f32.mrf.mxu1  ;;  %5448 = vmatmul.mubr.bf16.vlgmr.msra.gmra.mxu1 %v10991_v7  ;;  %8612 = vmatprep.subr.bf16.mxu0 %v10196_v51  ;;  %v10187_v7 = vcombine.low %v5584_v0, %v5588_v48  ;;  %v5612_v51 = vld [vmem:[#allocation11 + $0x420] sm:$0xff]  ;;  %v5456_v0 = vmul.f32 0.2, %v11026_v35  ;;  %v10219_v48 = vcombine.low %v5616_v63, %v5620_v39 }
 0x378   :  { %v11085_v16 = vadd.f32 %v5203_v37, %v5163_v50  ;;  %8636 = vmatpush1.bf16.msra.mxu1 %v10267_v45  ;;  %8667 = vmatprep.mubr.bf16.mxu1 %v11081_v49  ;;  %v5608_v45 = vld [vmem:[#allocation11 + $0x400] sm:$0xff]  ;;  %v10148_v50 = vcombine.high %v5544_v55, %v5548_v24 }
 0x379   :  { %v11088_v58 = vpop.f32.mrf.mxu1  ;;  %8637 = vmatprep.subr.bf16.mxu1 %v10260_v46  ;;  %v10155_v46 = vcombine.low %v5552_v36, %v5556_v47  ;;  %v10212_v42 = vcombine.high %v5608_v45, %v5612_v51  ;;  %v5796_v37 = vld [vmem:[#allocation11 + $0x9e0] sm:$0xff]  ;;  %v10211_v14 = vcombine.low %v5608_v45, %v5612_v51  ;;  %v10379_v36 = vcombine.low %v5776_v57, %v5780_v9 }
 0x37a   :  { %8613 = vmatpush2.bf16.msra.mxu0 %v10195_v25  ;;  %v5728_v25 = vld [vmem:[#allocation11 + $0x7c0] sm:$0xff]  ;;  %v10396_v44 = vcombine.high %v5792_v62, %v5796_v37 }
 0x37b   :  { %v5207_v20 = vpop.f32.mrf.mxu1  ;;  %8614 = vmatprep.subr.bf16.mxu0 %v10188_v53  ;;  %v10147_v53 = vcombine.low %v5544_v55, %v5548_v24  ;;  %v5700_v55 = vld [vmem:[#allocation11 + $0x6e0] sm:$0xff] }
 0x37c   :  { %8638 = vmatpush1.bf16.msra.mxu1 %v10259_v52  ;;  %v5732_v52 = vld [vmem:[#allocation11 + $0x7e0] sm:$0xff] }
 0x37d   :  { %v5208_v43 = vpop.f32.mrf.mxu1  ;;  %8639 = vmatprep.subr.bf16.mxu1 %v10252_v61  ;;  %v5464_v61 = vmax.f32 %v11026_v35, %v5456_v0  ;;  %v10332_v31 = vcombine.high %v5728_v25, %v5732_v52  ;;  %v5788_v20 = vld [vmem:[#allocation11 + $0x9a0] sm:$0xff] }
 0x37e   :  { %8615 = vmatpush2.bf16.msra.mxu0 %v10187_v7  ;;  %v5720_v7 = vld [vmem:[#allocation11 + $0x780] sm:$0xff]  ;;  %v10388_v29 = vcombine.high %v5784_v3, %v5788_v20 }
 0x37f   :  { %8616 = vmatprep.subr.bf16.mxu0 %v10180_v6  ;;  %v10395_v6 = vcombine.low %v5792_v62, %v5796_v37  ;;  %v11092_v43 = vpack.c.bf16 %v5464_v61, %v5464_v61  ;;  %v5752_v0 = vld [vmem:[#allocation11 + $0x880] sm:$0xff] }
 0x380   :  { %8640 = vmatpush1.bf16.msra.mxu1 %v10251_v4  ;;  %v5724_v4 = vld [vmem:[#allocation11 + $0x7a0] sm:$0xff] }
 0x381   :  { %8641 = vmatprep.subr.bf16.mxu1 %v10244_v59  ;;  %v10331_v59 = vcombine.low %v5728_v25, %v5732_v52  ;;  %v10324_v35 = vcombine.high %v5720_v7, %v5724_v4  ;;  %v10323_v32 = vcombine.low %v5720_v7, %v5724_v4  ;;  %v5748_v61 = vld [vmem:[#allocation11 + $0x860] sm:$0xff] }
 0x382   :  { %8617 = vmatpush2.bf16.msra.mxu0 %v10179_v11  ;;  %v5712_v11 = vld [vmem:[#allocation11 + $0x740] sm:$0xff] }
 0x383   :  { %8618 = vmatprep.subr.bf16.mxu0 %v10172_v13  ;;  %v10387_v13 = vcombine.low %v5784_v3, %v5788_v20  ;;  %v5736_v4 = vld [vmem:[#allocation11 + $0x800] sm:$0xff] }
 0x384   :  { %8642 = vmatpush1.bf16.msra.mxu1 %v10243_v12  ;;  %v5716_v12 = vld [vmem:[#allocation11 + $0x760] sm:$0xff] }
 0x385   :  { %8643 = vmatprep.subr.bf16.mxu1 %v10236_v54  ;;  %v10316_v30 = vcombine.high %v5712_v11, %v5716_v12  ;;  %v10315_v63 = vcombine.low %v5712_v11, %v5716_v12  ;;  %v5458_v11 = vmul.f32 0.2, %v11062_v60 }
 0x386   :  { %8619 = vmatpush2.bf16.msra.mxu0 %v10171_v26  ;;  %v5772_v26 = vld [vmem:[#allocation11 + $0x920] sm:$0xff] }
 0x387   :  { %8620 = vmatprep.subr.bf16.mxu0 %v10164_v28  ;;  %v5704_v28 = vld [vmem:[#allocation11 + $0x700] sm:$0xff]  ;;  %v10372_v39 = vcombine.high %v5768_v1, %v5772_v26  ;;  %v10371_v24 = vcombine.low %v5768_v1, %v5772_v26  ;;  %v11100_v26 = vld [vmem:[#allocation10] sm:$0xff] }
 0x388   :  { %8644 = vmatpush1.bf16.msra.mxu1 %v10235_v27 }
 0x389   :  { %8645 = vmatprep.subr.bf16.mxu1 %v10228_v34  ;;  %v5708_v34 = vld [vmem:[#allocation11 + $0x720] sm:$0xff] }
 0x38a   :  { %8621 = vmatpush2.bf16.msra.mxu0 %v10163_v40  ;;  %v10308_v40 = vcombine.high %v5704_v28, %v5708_v34  ;;  %v10307_v45 = vcombine.low %v5704_v28, %v5708_v34 }
 0x38b   :  { %8622 = vmatprep.subr.bf16.mxu0 %v10156_v41  ;;  %v5764_v41 = vld [vmem:[#allocation11 + $0x8e0] sm:$0xff] }
 0x38c   :  { %8646 = vmatpush1.bf16.msra.mxu1 %v10227_v2  ;;  %v5760_v2 = vld [vmem:[#allocation11 + $0x8c0] sm:$0xff] }
 0x38d   :  { %8647 = vmatprep.subr.bf16.mxu1 %v10220_v56  ;;  %v5696_v56 = vld [vmem:[#allocation11 + $0x6c0] sm:$0xff]  ;;  %v10364_v51 = vcombine.high %v5760_v2, %v5764_v41  ;;  %v10363_v62 = vcombine.low %v5760_v2, %v5764_v41 }
 0x38e   :  { %8623 = vmatpush2.bf16.msra.mxu0 %v10155_v46  ;;  %v10300_v46 = vcombine.high %v5696_v56, %v5700_v55  ;;  %v10299_v37 = vcombine.low %v5696_v56, %v5700_v55  ;;  %v5916_v2 = vld [vmem:[#allocation11 + $0xda0] sm:$0xff] }
 0x38f   :  { %8624 = vmatprep.subr.bf16.mxu0 %v10148_v50  ;;  %v5688_v50 = vld [vmem:[#allocation11 + $0x680] sm:$0xff] }
 0x390   :  { %8648 = vmatpush1.bf16.msra.mxu1 %v10219_v48  ;;  %v5756_v48 = vld [vmem:[#allocation11 + $0x8a0] sm:$0xff] }
 0x391   :  { %8649 = vmatprep.subr.bf16.mxu1 %v10212_v42  ;;  %v5692_v42 = vld [vmem:[#allocation11 + $0x6a0] sm:$0xff]  ;;  %v10356_v25 = vcombine.high %v5752_v0, %v5756_v48 }
 0x392   :  { %8625 = vmatpush2.bf16.msra.mxu0 %v10147_v53  ;;  %v10292_v52 = vcombine.high %v5688_v50, %v5692_v42  ;;  %v5744_v53 = vld [vmem:[#allocation11 + $0x840] sm:$0xff]  ;;  %v10291_v3 = vcombine.low %v5688_v50, %v5692_v42 }
 0x393   :  { %8676 = vmatprep.subr.bf16.mxu0 %v10396_v44  ;;  %v5684_v44 = vld [vmem:[#allocation11 + $0x660] sm:$0xff]  ;;  %v10348_v20 = vcombine.high %v5744_v53, %v5748_v61 }
 0x394   :  { %8650 = vmatpush1.bf16.msra.mxu1 %v10211_v14  ;;  %v5680_v14 = vld [vmem:[#allocation11 + $0x640] sm:$0xff] }
 0x395   :  { %8651 = vmatprep.subr.bf16.mxu1 %v10332_v31  ;;  %v11094_v5 = vpop.f32.mrf.mxu0  ;;  %8627 = vmatmul.mubr.bf16.vlgmr.msra.gmra.mxu0 %v11092_v43  ;;  %v10355_v31 = vcombine.low %v5752_v0, %v5756_v48  ;;  %v10284_v7 = vcombine.high %v5680_v14, %v5684_v44  ;;  %v10283_v57 = vcombine.low %v5680_v14, %v5684_v44  ;;  %v5904_v48 = vld [vmem:[#allocation11 + $0xd40] sm:$0xff] }
 0x396   :  { %8677 = vmatpush1.bf16.msra.mxu0 %v10395_v6  ;;  %v5740_v6 = vld [vmem:[#allocation11 + $0x820] sm:$0xff] }
 0x397   :  { %v11097_v54 = vpop.f32.mrf.mxu0  ;;  %8678 = vmatprep.subr.bf16.mxu0 %v10388_v29  ;;  %v5676_v29 = vld [vmem:[#allocation11 + $0x620] sm:$0xff]  ;;  %v10340_v9 = vcombine.high %v5736_v4, %v5740_v6  ;;  %v10339_v1 = vcombine.low %v5736_v4, %v5740_v6 }
 0x398   :  { %8652 = vmatpush2.bf16.msra.mxu1 %v10331_v59  ;;  %v5672_v59 = vld [vmem:[#allocation11 + $0x600] sm:$0xff] }
 0x399   :  { %8653 = vmatprep.subr.bf16.mxu1 %v10324_v35  ;;  %v5248_v27 = vpop.f32.mrf.mxu0  ;;  %v10347_v35 = vcombine.low %v5744_v53, %v5748_v61  ;;  %v10276_v12 = vcombine.high %v5672_v59, %v5676_v29  ;;  %v10275_v28 = vcombine.low %v5672_v59, %v5676_v29  ;;  %v5908_v50 = vld [vmem:[#allocation11 + $0xd60] sm:$0xff] }
 0x39a   :  { %8679 = vmatpush1.bf16.msra.mxu0 %v10387_v13  ;;  %v5856_v13 = vld [vmem:[#allocation11 + $0xbc0] sm:$0xff]  ;;  %v2223_v27 = vrot.slane %v11100_v26, %v10954_v23  ;;  %v10508_v14 = vcombine.high %v5904_v48, %v5908_v50 }
 0x39b   :  { %v5249_v47 = vpop.f32.mrf.mxu0  ;;  %8680 = vmatprep.subr.bf16.mxu0 %v10380_v15  ;;  %v5920_v15 = vld [vmem:[#allocation11 + $0xdc0] sm:$0xff] }
 0x39c   :  { %8654 = vmatpush2.bf16.msra.mxu1 %v10323_v32  ;;  %v5860_v32 = vld [vmem:[#allocation11 + $0xbe0] sm:$0xff]  ;;  %v5165_v56 = vadd.f32 %v11075_v19, %v2223_v27 }
 0x39d   :  { %8655 = vmatprep.subr.bf16.mxu1 %v10316_v30  ;;  %v5924_v30 = vld [vmem:[#allocation11 + $0xde0] sm:$0xff]  ;;  %v10460_v34 = vcombine.high %v5856_v13, %v5860_v32  ;;  %v10459_v41 = vcombine.low %v5856_v13, %v5860_v32  ;;  %v11113_v13 = vld [vmem:[#allocation11 + $0x5c8] sm:$0xff] }
 0x39e   :  { %8681 = vmatpush1.bf16.msra.mxu0 %v10379_v36  ;;  %v5466_v36 = vmax.f32 %v11062_v60, %v5458_v11  ;;  %v5848_v47 = vld [vmem:[#allocation11 + $0xb80] sm:$0xff]  ;;  %v5206_v0 = vadd.f32 %v11088_v58, %v5165_v56  ;;  %v11115_v32 = vld [vmem:[#allocation11 + $0x5e8] sm:$0xff] }
 0x39f   :  { %8682 = vmatprep.subr.bf16.mxu0 %v10372_v39  ;;  %v10524_v39 = vcombine.high %v5920_v15, %v5924_v30  ;;  %v5832_v53 = vld [vmem:[#allocation11 + $0xb00] sm:$0xff] }
 0x3a0   :  { %8656 = vmatpush2.bf16.msra.mxu1 %v10315_v63  ;;  %v5852_v63 = vld [vmem:[#allocation11 + $0xba0] sm:$0xff] }
 0x3a1   :  { %8657 = vmatprep.subr.bf16.mxu1 %v10308_v40  ;;  %v5912_v40 = vld [vmem:[#allocation11 + $0xd80] sm:$0xff]  ;;  %v10452_v55 = vcombine.high %v5848_v47, %v5852_v63  ;;  %v10451_v19 = vcombine.low %v5848_v47, %v5852_v63 }
 0x3a2   :  { %8683 = vmatpush1.bf16.msra.mxu0 %v10371_v24  ;;  %v10523_v24 = vcombine.low %v5920_v15, %v5924_v30  ;;  %v10516_v60 = vcombine.high %v5912_v40, %v5916_v2  ;;  %v5836_v61 = vld [vmem:[#allocation11 + $0xb20] sm:$0xff] }
 0x3a3   :  { %8684 = vmatprep.subr.bf16.mxu0 %v10364_v51  ;;  %v5840_v51 = vld [vmem:[#allocation11 + $0xb40] sm:$0xff]  ;;  %v10436_v4 = vcombine.high %v5832_v53, %v5836_v61 }
 0x3a4   :  { %8658 = vmatpush2.bf16.msra.mxu1 %v10307_v45  ;;  %v11106_v45 = vpack.c.bf16 %v5466_v36, %v5466_v36  ;;  %v5896_v44 = vld [vmem:[#allocation11 + $0xd00] sm:$0xff]  ;;  %v10269_v36 = vcombine.low %v11113_v13, %v11115_v32 }
 0x3a5   :  { %8659 = vmatprep.subr.bf16.mxu1 %v10300_v46  ;;  %v5844_v46 = vld [vmem:[#allocation11 + $0xb60] sm:$0xff] }
 0x3a6   :  { %8685 = vmatpush1.bf16.msra.mxu0 %v10363_v62  ;;  %v5247_v62 = vadd.f32 %v11097_v54, %v5206_v0  ;;  %v10507_v54 = vcombine.low %v5904_v48, %v5908_v50  ;;  %v5824_v59 = vld [vmem:[#allocation11 + $0xac0] sm:$0xff] }
 0x3a7   :  { %8686 = vmatprep.subr.bf16.mxu0 %v10356_v25  ;;  %v10515_v25 = vcombine.low %v5912_v40, %v5916_v2  ;;  %v5828_v29 = vld [vmem:[#allocation11 + $0xae0] sm:$0xff] }
 0x3a8   :  { %8660 = vmatpush2.bf16.msra.mxu1 %v10299_v37  ;;  %v10444_v37 = vcombine.high %v5840_v51, %v5844_v46  ;;  %v5892_v11 = vld [vmem:[#allocation11 + $0xce0] sm:$0xff]  ;;  %v10428_v30 = vcombine.high %v5824_v59, %v5828_v29 }
 0x3a9   :  { %8661 = vmatprep.subr.bf16.mxu1 %v10292_v52  ;;  %v5816_v27 = vld [vmem:[#allocation11 + $0xa80] sm:$0xff] }
 0x3aa   :  { %8687 = vmatpush1.bf16.msra.mxu0 %v10355_v31  ;;  %v5900_v31 = vld [vmem:[#allocation11 + $0xd20] sm:$0xff] }
 0x3ab   :  { %8688 = vmatprep.subr.bf16.mxu0 %v10348_v20  ;;  %v10443_v20 = vcombine.low %v5840_v51, %v5844_v46  ;;  %v5880_v47 = vld [vmem:[#allocation11 + $0xc80] sm:$0xff] }
 0x3ac   :  { %8662 = vmatpush2.bf16.msra.mxu1 %v10291_v3  ;;  %v5884_v63 = vld [vmem:[#allocation11 + $0xca0] sm:$0xff] }
 0x3ad   :  { %8663 = vmatprep.subr.bf16.mxu1 %v10284_v7  ;;  %v5812_v56 = vld [vmem:[#allocation11 + $0xa60] sm:$0xff]  ;;  %v10483_v50 = vcombine.low %v5880_v47, %v5884_v63 }
 0x3ae   :  { %8689 = vmatpush1.bf16.msra.mxu0 %v10347_v35  ;;  %v10500_v35 = vcombine.high %v5896_v44, %v5900_v31  ;;  %v5872_v51 = vld [vmem:[#allocation11 + $0xc40] sm:$0xff] }
 0x3af   :  { %8690 = vmatprep.subr.bf16.mxu0 %v10340_v9  ;;  %v5888_v9 = vld [vmem:[#allocation11 + $0xcc0] sm:$0xff] }
 0x3b0   :  { %8664 = vmatpush2.bf16.msra.mxu1 %v10283_v57  ;;  %v10491_v2 = vcombine.low %v5888_v9, %v5892_v11  ;;  %v5876_v46 = vld [vmem:[#allocation11 + $0xc60] sm:$0xff] }
 0x3b1   :  { %8665 = vmatprep.subr.bf16.mxu1 %v10276_v12  ;;  %v10435_v12 = vcombine.low %v5832_v53, %v5836_v61 }
 0x3b2   :  { %8691 = vmatpush1.bf16.msra.mxu0 %v10339_v1  ;;  %v10499_v1 = vcombine.low %v5896_v44, %v5900_v31  ;;  %v5984_v44 = vld [vmem:[#allocation11 + $0xfc0] sm:$0xff] }
 0x3b3   :  { %8692 = vmatprep.subr.bf16.mxu0 %v10460_v34  ;;  %v10492_v34 = vcombine.high %v5888_v9, %v5892_v11  ;;  %v5988_v31 = vld [vmem:[#allocation11 + $0xfe0] sm:$0xff] }
 0x3b4   :  { %8666 = vmatpush2.bf16.msra.mxu1 %v10275_v28  ;;  %v5820_v28 = vld [vmem:[#allocation11 + $0xaa0] sm:$0xff] }
 0x3b5   :  { %8717 = vmatprep.subr.bf16.mxu1 %v10524_v39  ;;  %v10427_v39 = vcombine.low %v5824_v59, %v5828_v29  ;;  %v10420_v40 = vcombine.high %v5816_v27, %v5820_v28  ;;  %v10588_v59 = vcombine.high %v5984_v44, %v5988_v31  ;;  %v5976_v29 = vld [vmem:[#allocation11 + $0xf80] sm:$0xff] }
 0x3b6   :  { %8693 = vmatpush2.bf16.msra.mxu0 %v10459_v41  ;;  %v5808_v41 = vld [vmem:[#allocation11 + $0xa40] sm:$0xff] }
 0x3b7   :  { %v11109_v42 = vpop.f32.mrf.mxu1  ;;  %8668 = vmatmul.mubr.bf16.vlgmr.msra.gmra.mxu1 %v11106_v45  ;;  %8694 = vmatprep.subr.bf16.mxu0 %v10452_v55  ;;  %v10484_v55 = vcombine.high %v5880_v47, %v5884_v63  ;;  %v10412_v48 = vcombine.high %v5808_v41, %v5812_v56  ;;  %v10411_v53 = vcombine.low %v5808_v41, %v5812_v56  ;;  %v5972_v47 = vld [vmem:[#allocation11 + $0xf60] sm:$0xff]  ;;  %v5513_v41 = vld [vmem:[#allocation11 + $0x108] sm:$0xff] }
 0x3b8   :  { %8718 = vmatpush1.bf16.msra.mxu1 %v10523_v24  ;;  %v5245_v24 = vadd.f32 %v11094_v5, %v11085_v16  ;;  %v10475_v5 = vcombine.low %v5872_v51, %v5876_v46  ;;  %v5517_v56 = vld [vmem:[#allocation11 + $0x128] sm:$0xff] }
 0x3b9   :  { %v5287_v52 = vpop.f32.mrf.mxu1  ;;  %8719 = vmatprep.subr.bf16.mxu1 %v10516_v60  ;;  %v10419_v60 = vcombine.low %v5816_v27, %v5820_v28 }
 0x3ba   :  { %v5288_v58 = vadd.f32 %v5287_v52, %v5247_v62  ;;  %8695 = vmatpush2.bf16.msra.mxu0 %v10451_v19  ;;  %v5286_v0 = vadd.f32 %v11109_v42, %v5245_v24  ;;  %v5800_v19 = vld [vmem:[#allocation11 + $0xa00] sm:$0xff] }
 0x3bb   :  { %v5289_v3 = vpop.f32.mrf.mxu1  ;;  %8696 = vmatprep.subr.bf16.mxu0 %v10444_v37  ;;  %v5804_v62 = vld [vmem:[#allocation11 + $0xa20] sm:$0xff]  ;;  %v10476_v37 = vcombine.high %v5872_v51, %v5876_v46 }
 0x3bc   :  { %v5461_v7 = vmul.f32 0.2, %v5288_v58  ;;  %8720 = vmatpush1.bf16.msra.mxu1 %v10515_v25  ;;  %v5864_v25 = vld [vmem:[#allocation11 + $0xc00] sm:$0xff]  ;;  %v5460_v61 = vmul.f32 0.2, %v5286_v0  ;;  %v10404_v16 = vcombine.high %v5800_v19, %v5804_v62  ;;  %v10403_v3 = vcombine.low %v5800_v19, %v5804_v62  ;;  %v5505_v19 = vld [vmem:[#allocation11 + $0xc8] sm:$0xff] }
 0x3bd   :  { %v5290_v6 = vpop.f32.mrf.mxu1  ;;  %8721 = vmatprep.subr.bf16.mxu1 %v10508_v14  ;;  %v5868_v52 = vld [vmem:[#allocation11 + $0xc20] sm:$0xff]  ;;  %v5537_v14 = vld [vmem:[#allocation11 + $0x1c8] sm:$0xff] }
 0x3be   :  { %v5469_v57 = vmax.f32 %v5288_v58, %v5461_v7  ;;  %8697 = vmatpush2.bf16.msra.mxu0 %v10443_v20  ;;  %v5541_v58 = vld [vmem:[#allocation11 + $0x1e8] sm:$0xff]  ;;  %v10468_v42 = vcombine.high %v5864_v25, %v5868_v52  ;;  %v5468_v20 = vmax.f32 %v5286_v0, %v5460_v61  ;;  %v5960_v51 = vld [vmem:[#allocation11 + $0xf00] sm:$0xff] }
 0x3bf   :  { %8698 = vmatprep.subr.bf16.mxu0 %v10436_v4  ;;  %v10142_v7 = vcombine.high %v5537_v14, %v5541_v58  ;;  %v10467_v4 = vcombine.low %v5864_v25, %v5868_v52  ;;  %v5533_v6 = vld [vmem:[#allocation11 + $0x1a8] sm:$0xff]  ;;  %v5964_v46 = vld [vmem:[#allocation11 + $0xf20] sm:$0xff] }
 0x3c0   :  { %v11117_v15 = vpack.c.bf16 %v5469_v57, %v5469_v57  ;;  %8722 = vmatpush1.bf16.msra.mxu1 %v10507_v54  ;;  %v5529_v54 = vld [vmem:[#allocation11 + $0x188] sm:$0xff]  ;;  %v10141_v57 = vcombine.low %v5537_v14, %v5541_v58  ;;  %v11125_v9 = vpack.c.bf16 %v5468_v20, %v5468_v20  ;;  %v5952_v25 = vld [vmem:[#allocation11 + $0xec0] sm:$0xff] }
 0x3c1   :  { %8723 = vmatprep.subr.bf16.mxu1 %v10500_v35  ;;  %v5980_v35 = vld [vmem:[#allocation11 + $0xfa0] sm:$0xff]  ;;  %v10134_v11 = vcombine.high %v5529_v54, %v5533_v6  ;;  %v10133_v63 = vcombine.low %v5529_v54, %v5533_v6  ;;  %v5509_v62 = vld [vmem:[#allocation11 + $0xe8] sm:$0xff] }
 0x3c2   :  { %8708 = vmatprep.mubr.bf16.mxu0 %v11117_v15  ;;  %8699 = vmatpush2.bf16.msra.mxu0 %v10435_v12  ;;  %v10587_v12 = vcombine.low %v5984_v44, %v5988_v31  ;;  %v10580_v27 = vcombine.high %v5976_v29, %v5980_v35  ;;  %v5956_v52 = vld [vmem:[#allocation11 + $0xee0] sm:$0xff]  ;;  %v10110_v61 = vcombine.high %v5505_v19, %v5509_v62  ;;  %v5501_v14 = vld [vmem:[#allocation11 + $0xa8] sm:$0xff] }
 0x3c3   :  { %8700 = vmatprep.subr.bf16.mxu0 %v10428_v30  ;;  %v5521_v30 = vld [vmem:[#allocation11 + $0x148] sm:$0xff]  ;;  %v10556_v58 = vcombine.high %v5952_v25, %v5956_v52  ;;  %v5948_v44 = vld [vmem:[#allocation11 + $0xea0] sm:$0xff]  ;;  %v10109_v31 = vcombine.low %v5505_v19, %v5509_v62  ;;  %v10555_v20 = vcombine.low %v5952_v25, %v5956_v52 }
 0x3c4   :  { %8724 = vmatpush1.bf16.msra.mxu1 %v10499_v1  ;;  %v5525_v1 = vld [vmem:[#allocation11 + $0x168] sm:$0xff]  ;;  %v5936_v6 = vld [vmem:[#allocation11 + $0xe40] sm:$0xff] }
 0x3c5   :  { %8725 = vmatprep.subr.bf16.mxu1 %v10492_v34  ;;  %v5968_v34 = vld [vmem:[#allocation11 + $0xf40] sm:$0xff]  ;;  %v5589_v19 = vld [vmem:[#allocation11 + $0x368] sm:$0xff] }
 0x3c6   :  { %8701 = vmatpush2.bf16.msra.mxu0 %v10427_v39 }
 0x3c7   :  { %8702 = vmatprep.subr.bf16.mxu0 %v10420_v40  ;;  %v10126_v40 = vcombine.high %v5521_v30, %v5525_v1 }
 0x3c8   :  { %8726 = vmatpush1.bf16.msra.mxu1 %v10491_v2  ;;  %v10579_v2 = vcombine.low %v5976_v29, %v5980_v35 }
 0x3c9   :  { %8727 = vmatprep.subr.bf16.mxu1 %v10484_v55  ;;  %v10572_v55 = vcombine.high %v5968_v34, %v5972_v47 }
 0x3ca   :  { %8703 = vmatpush2.bf16.msra.mxu0 %v10419_v60  ;;  %v10125_v60 = vcombine.low %v5521_v30, %v5525_v1  ;;  %v5928_v1 = vld [vmem:[#allocation11 + $0xe00] sm:$0xff] }
 0x3cb   :  { %8704 = vmatprep.subr.bf16.mxu0 %v10412_v48  ;;  %v10118_v48 = vcombine.high %v5513_v41, %v5517_v56 }
 0x3cc   :  { %8728 = vmatpush1.bf16.msra.mxu1 %v10483_v50  ;;  %v10571_v50 = vcombine.low %v5968_v34, %v5972_v47 }
 0x3cd   :  { %8729 = vmatprep.subr.bf16.mxu1 %v10476_v37  ;;  %v10564_v37 = vcombine.high %v5960_v51, %v5964_v46 }
 0x3ce   :  { %8705 = vmatpush2.bf16.msra.mxu0 %v10411_v53  ;;  %v10117_v53 = vcombine.low %v5513_v41, %v5517_v56 }
 0x3cf   :  { %8706 = vmatprep.subr.bf16.mxu0 %v10404_v16  ;;  %v10563_v16 = vcombine.low %v5960_v51, %v5964_v46  ;;  %v5593_v51 = vld [vmem:[#allocation11 + $0x388] sm:$0xff] }
 0x3d0   :  { %8730 = vmatpush1.bf16.msra.mxu1 %v10475_v5  ;;  %v5497_v5 = vld [vmem:[#allocation11 + $0x88] sm:$0xff] }
 0x3d1   :  { %8731 = vmatprep.subr.bf16.mxu1 %v10468_v42  ;;  %v5944_v42 = vld [vmem:[#allocation11 + $0xe80] sm:$0xff]  ;;  %v10101_v29 = vcombine.low %v5497_v5, %v5501_v14  ;;  %v5597_v46 = vld [vmem:[#allocation11 + $0x3a8] sm:$0xff] }
 0x3d2   :  { %8707 = vmatpush2.bf16.msra.mxu0 %v10403_v3  ;;  %v10102_v3 = vcombine.high %v5497_v5, %v5501_v14  ;;  %v10548_v54 = vcombine.high %v5944_v42, %v5948_v44 }
 0x3d3   :  { %8758 = vmatprep.subr.bf16.mxu0 %v10142_v7  ;;  %v5489_v7 = vld [vmem:[#allocation11 + $0x48] sm:$0xff] }
 0x3d4   :  { %8732 = vmatpush1.bf16.msra.mxu1 %v10467_v4  ;;  %v5493_v4 = vld [vmem:[#allocation11 + $0x68] sm:$0xff] }
 0x3d5   :  { %8733 = vmatprep.subr.bf16.mxu1 %v10588_v59  ;;  %v11127_v28 = vpop.f32.mrf.mxu0  ;;  %8709 = vmatmul.mubr.bf16.vlgmr.msra.gmra.mxu0 %v11125_v9  ;;  %v5940_v59 = vld [vmem:[#allocation11 + $0xe60] sm:$0xff]  ;;  %v10094_v35 = vcombine.high %v5489_v7, %v5493_v4  ;;  %v10093_v34 = vcombine.low %v5489_v7, %v5493_v4  ;;  %v5565_v7 = vld [vmem:[#allocation11 + $0x2a8] sm:$0xff] }
 0x3d6   :  { %8759 = vmatpush1.bf16.msra.mxu0 %v10141_v57  ;;  %8790 = vmatprep.mubr.bf16.mxu0 %v11069_v21  ;;  %v10547_v57 = vcombine.low %v5944_v42, %v5948_v44  ;;  %v10540_v30 = vcombine.high %v5936_v6, %v5940_v59  ;;  %v5569_v42 = vld [vmem:[#allocation11 + $0x2c8] sm:$0xff] }
 0x3d7   :  { %v11131_v39 = vpop.f32.mrf.mxu0  ;;  %8760 = vmatprep.subr.bf16.mxu0 %v10134_v11  ;;  %v5481_v11 = vld [vmem:[#allocation11 + $0x8] sm:$0xff] }
 0x3d8   :  { %8734 = vmatpush2.bf16.msra.mxu1 %v10587_v12  ;;  %v5485_v12 = vld [vmem:[#allocation11 + $0x28] sm:$0xff] }
 0x3d9   :  { %8735 = vmatprep.subr.bf16.mxu1 %v10580_v27  ;;  %v5330_v24 = vpop.f32.mrf.mxu0  ;;  %v5932_v27 = vld [vmem:[#allocation11 + $0xe20] sm:$0xff]  ;;  %v10086_v47 = vcombine.high %v5481_v11, %v5485_v12  ;;  %v10085_v56 = vcombine.low %v5481_v11, %v5485_v12  ;;  %v5573_v44 = vld [vmem:[#allocation11 + $0x2e8] sm:$0xff] }
 0x3da   :  { %8761 = vmatpush1.bf16.msra.mxu0 %v10133_v63  ;;  %v10539_v63 = vcombine.low %v5936_v6, %v5940_v59  ;;  %v10532_v41 = vcombine.high %v5928_v1, %v5932_v27  ;;  %v10531_v24 = vcombine.low %v5928_v1, %v5932_v27  ;;  %v10173_v4 = vcombine.low %v5569_v42, %v5573_v44  ;;  %v5553_v6 = vld [vmem:[#allocation11 + $0x248] sm:$0xff] }
 0x3db   :  { %v5331_v0 = vpop.f32.mrf.mxu0  ;;  %8762 = vmatprep.subr.bf16.mxu0 %v10126_v40  ;;  %v5601_v40 = vld [vmem:[#allocation11 + $0x3c8] sm:$0xff] }
 0x3dc   :  { %8736 = vmatpush2.bf16.msra.mxu1 %v10579_v2  ;;  %v5605_v2 = vld [vmem:[#allocation11 + $0x3e8] sm:$0xff] }
 0x3dd   :  { %8737 = vmatprep.subr.bf16.mxu1 %v10572_v55  ;;  %v10206_v55 = vcombine.high %v5601_v40, %v5605_v2  ;;  %v10205_v0 = vcombine.low %v5601_v40, %v5605_v2  ;;  %v5557_v59 = vld [vmem:[#allocation11 + $0x268] sm:$0xff] }
 0x3de   :  { %8763 = vmatpush1.bf16.msra.mxu0 %v10125_v60  ;;  %v10270_v60 = vcombine.high %v11113_v13, %v11115_v32  ;;  %v5549_v11 = vld [vmem:[#allocation11 + $0x228] sm:$0xff]  ;;  %v10157_v12 = vcombine.low %v5553_v6, %v5557_v59 }
 0x3df   :  { %8764 = vmatprep.subr.bf16.mxu0 %v10118_v48  ;;  %v10198_v48 = vcombine.high %v5593_v51, %v5597_v46  ;;  %v5793_v1 = vld [vmem:[#allocation11 + $0x9c8] sm:$0xff] }
 0x3e0   :  { %8738 = vmatpush2.bf16.msra.mxu1 %v10571_v50  ;;  %v5585_v50 = vld [vmem:[#allocation11 + $0x348] sm:$0xff] }
 0x3e1   :  { %8739 = vmatprep.subr.bf16.mxu1 %v10564_v37  ;;  %v10197_v37 = vcombine.low %v5593_v51, %v5597_v46  ;;  %v10190_v25 = vcombine.high %v5585_v50, %v5589_v19  ;;  %v10189_v5 = vcombine.low %v5585_v50, %v5589_v19  ;;  %v5797_v27 = vld [vmem:[#allocation11 + $0x9e8] sm:$0xff] }
 0x3e2   :  { %8765 = vmatpush1.bf16.msra.mxu0 %v10117_v53  ;;  %v5577_v53 = vld [vmem:[#allocation11 + $0x308] sm:$0xff]  ;;  %v10397_v2 = vcombine.low %v5793_v1, %v5797_v27 }
 0x3e3   :  { %8766 = vmatprep.subr.bf16.mxu0 %v10110_v61  ;;  %v5581_v61 = vld [vmem:[#allocation11 + $0x328] sm:$0xff] }
 0x3e4   :  { %8740 = vmatpush2.bf16.msra.mxu1 %v10563_v16  ;;  %v10182_v14 = vcombine.high %v5577_v53, %v5581_v61  ;;  %v5789_v40 = vld [vmem:[#allocation11 + $0x9a8] sm:$0xff] }
 0x3e5   :  { %8741 = vmatprep.subr.bf16.mxu1 %v10556_v58  ;;  %v5801_v32 = vld [vmem:[#allocation11 + $0xa08] sm:$0xff] }
 0x3e6   :  { %8767 = vmatpush1.bf16.msra.mxu0 %v10109_v31  ;;  %v10181_v31 = vcombine.low %v5577_v53, %v5581_v61  ;;  %v5761_v53 = vld [vmem:[#allocation11 + $0x8c8] sm:$0xff] }
 0x3e7   :  { %8768 = vmatprep.subr.bf16.mxu0 %v10102_v3  ;;  %v10174_v3 = vcombine.high %v5569_v42, %v5573_v44  ;;  %v5765_v61 = vld [vmem:[#allocation11 + $0x8e8] sm:$0xff] }
 0x3e8   :  { %8742 = vmatpush2.bf16.msra.mxu1 %v10555_v20  ;;  %v5561_v20 = vld [vmem:[#allocation11 + $0x288] sm:$0xff]  ;;  %v10365_v42 = vcombine.low %v5761_v53, %v5765_v61 }
 0x3e9   :  { %8743 = vmatprep.subr.bf16.mxu1 %v10548_v54  ;;  %v10166_v54 = vcombine.high %v5561_v20, %v5565_v7 }
 0x3ea   :  { %8769 = vmatpush1.bf16.msra.mxu0 %v10101_v29  ;;  %v10165_v29 = vcombine.low %v5561_v20, %v5565_v7 }
 0x3eb   :  { %8770 = vmatprep.subr.bf16.mxu0 %v10094_v35  ;;  %v10158_v35 = vcombine.high %v5553_v6, %v5557_v59 }
 0x3ec   :  { %8744 = vmatpush2.bf16.msra.mxu1 %v10547_v57  ;;  %v5545_v57 = vld [vmem:[#allocation11 + $0x208] sm:$0xff] }
 0x3ed   :  { %8745 = vmatprep.subr.bf16.mxu1 %v10540_v30  ;;  %v10150_v30 = vcombine.high %v5545_v57, %v5549_v11 }
 0x3ee   :  { %8771 = vmatpush1.bf16.msra.mxu0 %v10093_v34  ;;  %v10149_v34 = vcombine.low %v5545_v57, %v5549_v11  ;;  %v2227_v57 = vrot.slane %v11100_v26, %v10978_v17 }
 0x3ef   :  { %8772 = vmatprep.subr.bf16.mxu0 %v10086_v47  ;;  %v10398_v47 = vcombine.high %v5793_v1, %v5797_v27  ;;  %v5849_v1 = vld [vmem:[#allocation11 + $0xb88] sm:$0xff] }
 0x3f0   :  { %8746 = vmatpush2.bf16.msra.mxu1 %v10539_v63  ;;  %v5785_v63 = vld [vmem:[#allocation11 + $0x988] sm:$0xff] }
 0x3f1   :  { %8747 = vmatprep.subr.bf16.mxu1 %v10532_v41  ;;  %v10390_v41 = vcombine.high %v5785_v63, %v5789_v40  ;;  %v10389_v51 = vcombine.low %v5785_v63, %v5789_v40  ;;  %v5853_v27 = vld [vmem:[#allocation11 + $0xba8] sm:$0xff] }
 0x3f2   :  { %8773 = vmatpush1.bf16.msra.mxu0 %v10085_v56  ;;  %v5777_v56 = vld [vmem:[#allocation11 + $0x948] sm:$0xff] }
 0x3f3   :  { %8774 = vmatprep.subr.bf16.mxu0 %v10206_v55  ;;  %v5781_v55 = vld [vmem:[#allocation11 + $0x968] sm:$0xff] }
 0x3f4   :  { %8748 = vmatpush2.bf16.msra.mxu1 %v10531_v24  ;;  %v10381_v19 = vcombine.low %v5777_v56, %v5781_v55 }
 0x3f5   :  { %8799 = vmatprep.subr.bf16.mxu1 %v10270_v60  ;;  %v10382_v60 = vcombine.high %v5777_v56, %v5781_v55  ;;  %v5845_v56 = vld [vmem:[#allocation11 + $0xb68] sm:$0xff] }
 0x3f6   :  { %8775 = vmatpush2.bf16.msra.mxu0 %v10205_v0  ;;  %v5769_v0 = vld [vmem:[#allocation11 + $0x908] sm:$0xff] }
 0x3f7   :  { %v11135_v62 = vpop.f32.mrf.mxu1  ;;  %8776 = vmatprep.subr.bf16.mxu0 %v10198_v48  ;;  %v5773_v48 = vld [vmem:[#allocation11 + $0x928] sm:$0xff] }
 0x3f9   :  { %v11137_v52 = vpop.f32.mrf.mxu1 }
 0x3fa   :  { %8777 = vmatpush2.bf16.msra.mxu0 %v10197_v37 }
 0x3fb   :  { %v5371_v16 = vpop.f32.mrf.mxu1  ;;  %8778 = vmatprep.subr.bf16.mxu0 %v10190_v25  ;;  %v10374_v25 = vcombine.high %v5769_v0, %v5773_v48 }
 0x3fc   :  { %v10373_v16 = vcombine.low %v5769_v0, %v5773_v48 }
 0x3fd   :  { %v5372_v58 = vpop.f32.mrf.mxu1 }
 0x3fe   :  { %8779 = vmatpush2.bf16.msra.mxu0 %v10189_v5  ;;  %v10366_v5 = vcombine.high %v5761_v53, %v5765_v61  ;;  %v5757_v58 = vld [vmem:[#allocation11 + $0x8a8] sm:$0xff] }
 0x3ff   :  { %8780 = vmatprep.subr.bf16.mxu0 %v10182_v14  ;;  %v5753_v14 = vld [vmem:[#allocation11 + $0x888] sm:$0xff] }
 0x400   :  { %v10358_v44 = vcombine.high %v5753_v14, %v5757_v58  ;;  %v10357_v20 = vcombine.low %v5753_v14, %v5757_v58  ;;  %v5661_v58 = vld [vmem:[#allocation11 + $0x5a8] sm:$0xff] }
 0x402   :  { %8781 = vmatpush2.bf16.msra.mxu0 %v10181_v31  ;;  %v5745_v31 = vld [vmem:[#allocation11 + $0x848] sm:$0xff] }
 0x403   :  { %8782 = vmatprep.subr.bf16.mxu0 %v10174_v3  ;;  %v5749_v3 = vld [vmem:[#allocation11 + $0x868] sm:$0xff] }
 0x404   :  { %v10350_v7 = vcombine.high %v5745_v31, %v5749_v3  ;;  %v10349_v6 = vcombine.low %v5745_v31, %v5749_v3 }
 0x406   :  { %8783 = vmatpush2.bf16.msra.mxu0 %v10173_v4  ;;  %v5737_v4 = vld [vmem:[#allocation11 + $0x808] sm:$0xff] }
 0x407   :  { %8784 = vmatprep.subr.bf16.mxu0 %v10166_v54  ;;  %v5741_v54 = vld [vmem:[#allocation11 + $0x828] sm:$0xff] }
 0x408   :  { %v10342_v59 = vcombine.high %v5737_v4, %v5741_v54  ;;  %v10341_v11 = vcombine.low %v5737_v4, %v5741_v54  ;;  %v5817_v4 = vld [vmem:[#allocation11 + $0xa88] sm:$0xff] }
 0x409   :  { %v5821_v54 = vld [vmem:[#allocation11 + $0xaa8] sm:$0xff] }
 0x40a   :  { %8785 = vmatpush2.bf16.msra.mxu0 %v10165_v29  ;;  %v5857_v29 = vld [vmem:[#allocation11 + $0xbc8] sm:$0xff] }
 0x40b   :  { %8786 = vmatprep.subr.bf16.mxu0 %v10158_v35  ;;  %v5861_v35 = vld [vmem:[#allocation11 + $0xbe8] sm:$0xff] }
 0x40e   :  { %8787 = vmatpush2.bf16.msra.mxu0 %v10157_v12  ;;  %v2231_v12 = vrot.slane %v11100_v26, %v10981_v22 }
 0x40f   :  { %8788 = vmatprep.subr.bf16.mxu0 %v10150_v30  ;;  %v10462_v30 = vcombine.high %v5857_v29, %v5861_v35 }
 0x410   :  { %v5329_v63 = vadd.f32 %v11131_v39, %v2231_v12  ;;  %v5809_v12 = vld [vmem:[#allocation11 + $0xa48] sm:$0xff] }
 0x412   :  { %8789 = vmatpush2.bf16.msra.mxu0 %v10149_v34  ;;  %v5327_v34 = vadd.f32 %v11127_v28, %v2227_v57  ;;  %v5370_v55 = vadd.f32 %v11137_v52, %v5329_v63  ;;  %v10422_v57 = vcombine.high %v5817_v4, %v5821_v54 }
 0x413   :  { %8840 = vmatprep.subr.bf16.mxu0 %v10398_v47  ;;  %v10461_v47 = vcombine.low %v5857_v29, %v5861_v35 }
 0x414   :  { %v5368_v40 = vadd.f32 %v11135_v62, %v5327_v34  ;;  %v10421_v34 = vcombine.low %v5817_v4, %v5821_v54 }
 0x415   :  { %v5408_v24 = vpop.f32.mrf.mxu0  ;;  %8791 = vmatmul.mubr.bf16.vlgmr.msra.gmra.mxu0 %v11092_v43 }
 0x416   :  { %8841 = vmatpush1.bf16.msra.mxu0 %v10397_v2  ;;  %8872 = vmatprep.mubr.bf16.mxu0 %v11117_v15  ;;  %v10454_v2 = vcombine.high %v5849_v1, %v5853_v27 }
 0x417   :  { %v5410_v46 = vpop.f32.mrf.mxu0  ;;  %8842 = vmatprep.subr.bf16.mxu0 %v10390_v41  ;;  %v5841_v41 = vld [vmem:[#allocation11 + $0xb48] sm:$0xff] }
 0x418   :  { %v5411_v0 = vadd.f32 %v5410_v46, %v5370_v55  ;;  %v10446_v28 = vcombine.high %v5841_v41, %v5845_v56  ;;  %v10445_v53 = vcombine.low %v5841_v41, %v5845_v56  ;;  %v5825_v46 = vld [vmem:[#allocation11 + $0xac8] sm:$0xff] }
 0x419   :  { %v5412_v50 = vpop.f32.mrf.mxu0 }
 0x41a   :  { %8843 = vmatpush1.bf16.msra.mxu0 %v10389_v51  ;;  %v5409_v51 = vadd.f32 %v5408_v24, %v5368_v40  ;;  %v5633_v40 = vld [vmem:[#allocation11 + $0x4c8] sm:$0xff] }
 0x41b   :  { %v5413_v37 = vpop.f32.mrf.mxu0  ;;  %8844 = vmatprep.subr.bf16.mxu0 %v10382_v60  ;;  %v10453_v60 = vcombine.low %v5849_v1, %v5853_v27  ;;  %v5641_v1 = vld [vmem:[#allocation11 + $0x508] sm:$0xff] }
 0x41c   :  { %v5837_v37 = vld [vmem:[#allocation11 + $0xb28] sm:$0xff] }
 0x41d   :  { %v5645_v27 = vld [vmem:[#allocation11 + $0x528] sm:$0xff] }
 0x41e   :  { %8845 = vmatpush1.bf16.msra.mxu0 %v10381_v19  ;;  %v5833_v19 = vld [vmem:[#allocation11 + $0xb08] sm:$0xff]  ;;  %v10246_v13 = vcombine.high %v5641_v1, %v5645_v27  ;;  %v10245_v56 = vcombine.low %v5641_v1, %v5645_v27 }
 0x41f   :  { %8846 = vmatprep.subr.bf16.mxu0 %v10374_v25 }
 0x422   :  { %8847 = vmatpush1.bf16.msra.mxu0 %v10373_v16  ;;  %v10438_v16 = vcombine.high %v5833_v19, %v5837_v37 }
 0x423   :  { %8848 = vmatprep.subr.bf16.mxu0 %v10366_v5  ;;  %v5657_v5 = vld [vmem:[#allocation11 + $0x588] sm:$0xff] }
 0x424   :  { %v10261_v35 = vcombine.low %v5657_v5, %v5661_v58 }
 0x426   :  { %8849 = vmatpush1.bf16.msra.mxu0 %v10365_v42  ;;  %v5829_v42 = vld [vmem:[#allocation11 + $0xae8] sm:$0xff] }
 0x427   :  { %8850 = vmatprep.subr.bf16.mxu0 %v10358_v44  ;;  %v10437_v44 = vcombine.low %v5833_v19, %v5837_v37  ;;  %v10429_v29 = vcombine.low %v5825_v46, %v5829_v42 }
 0x42a   :  { %8851 = vmatpush1.bf16.msra.mxu0 %v10357_v20  ;;  %v10262_v20 = vcombine.high %v5657_v5, %v5661_v58  ;;  %v5522_v5 = vld [vmem:[#allocation11 + $0x150] sm:$0xff] }
 0x42b   :  { %8852 = vmatprep.subr.bf16.mxu0 %v10350_v7  ;;  %v10430_v7 = vcombine.high %v5825_v46, %v5829_v42  ;;  %v5609_v46 = vld [vmem:[#allocation11 + $0x408] sm:$0xff] }
 0x42c   :  { %v5613_v42 = vld [vmem:[#allocation11 + $0x428] sm:$0xff] }
 0x42d   :  { %v10214_v54 = vcombine.high %v5609_v46, %v5613_v42 }
 0x42e   :  { %8853 = vmatpush1.bf16.msra.mxu0 %v10349_v6  ;;  %v5649_v6 = vld [vmem:[#allocation11 + $0x548] sm:$0xff] }
 0x42f   :  { %8854 = vmatprep.subr.bf16.mxu0 %v10342_v59  ;;  %v5653_v59 = vld [vmem:[#allocation11 + $0x568] sm:$0xff] }
 0x432   :  { %8855 = vmatpush1.bf16.msra.mxu0 %v10341_v11  ;;  %v10254_v11 = vcombine.high %v5649_v6, %v5653_v59 }
 0x433   :  { %8856 = vmatprep.subr.bf16.mxu0 %v10462_v30  ;;  %v5813_v30 = vld [vmem:[#allocation11 + $0xa68] sm:$0xff] }
 0x434   :  { %v10414_v63 = vcombine.high %v5809_v12, %v5813_v30  ;;  %v10413_v41 = vcombine.low %v5809_v12, %v5813_v30  ;;  %v10213_v30 = vcombine.low %v5609_v46, %v5613_v42 }
 0x436   :  { %8857 = vmatpush2.bf16.msra.mxu0 %v10461_v47  ;;  %v10253_v47 = vcombine.low %v5649_v6, %v5653_v59  ;;  %v5514_v6 = vld [vmem:[#allocation11 + $0x110] sm:$0xff] }
 0x437   :  { %v5449_v26 = vpop.f32.mrf.mxu1  ;;  %8858 = vmatprep.subr.bf16.mxu0 %v10454_v2  ;;  %v5637_v2 = vld [vmem:[#allocation11 + $0x4e8] sm:$0xff]  ;;  %v5518_v59 = vld [vmem:[#allocation11 + $0x130] sm:$0xff] }
 0x438   :  { %v5450_v48 = vadd.f32 %v5449_v26, %v5409_v51  ;;  %v10238_v51 = vcombine.high %v5633_v40, %v5637_v2  ;;  %v5538_v26 = vld [vmem:[#allocation11 + $0x1d0] sm:$0xff]  ;;  %v10120_v1 = vcombine.high %v5514_v6, %v5518_v59 }
 0x439   :  { %v5451_v50 = vpop.f32.mrf.mxu1 }
 0x43a   :  { %v5462_v39 = vmul.f32 0.2, %v5450_v48  ;;  %v5452_v25 = vadd.f32 %v5451_v50, %v5411_v0  ;;  %8859 = vmatpush2.bf16.msra.mxu0 %v10453_v60  ;;  %v5542_v60 = vld [vmem:[#allocation11 + $0x1f0] sm:$0xff]  ;;  %v5625_v0 = vld [vmem:[#allocation11 + $0x488] sm:$0xff]  ;;  %v10237_v50 = vcombine.low %v5633_v40, %v5637_v2 }
 0x43b   :  { %v5453_v62 = vpop.f32.mrf.mxu1  ;;  %8860 = vmatprep.subr.bf16.mxu0 %v10446_v28  ;;  %v10144_v19 = vcombine.high %v5538_v26, %v5542_v60 }
 0x43c   :  { %v5463_v61 = vmul.f32 0.2, %v5452_v25  ;;  %v5470_v52 = vmax.f32 %v5450_v48, %v5462_v39  ;;  %v5629_v48 = vld [vmem:[#allocation11 + $0x4a8] sm:$0xff]  ;;  %v5530_v39 = vld [vmem:[#allocation11 + $0x190] sm:$0xff] }
 0x43d   :  { %v5454_v24 = vpop.f32.mrf.mxu1  ;;  %v10230_v37 = vcombine.high %v5625_v0, %v5629_v48  ;;  %v5617_v62 = vld [vmem:[#allocation11 + $0x448] sm:$0xff] }
 0x43e   :  { %v5471_v14 = vmax.f32 %v5452_v25, %v5463_v61  ;;  %8861 = vmatpush2.bf16.msra.mxu0 %v10445_v53  ;;  %v11151_v3 = vpack.c.bf16 %v5470_v52, %v5470_v52  ;;  %v5534_v25 = vld [vmem:[#allocation11 + $0x1b0] sm:$0xff]  ;;  %v5621_v53 = vld [vmem:[#allocation11 + $0x468] sm:$0xff]  ;;  %v10143_v61 = vcombine.low %v5538_v26, %v5542_v60 }
 0x43f   :  { %8862 = vmatprep.subr.bf16.mxu0 %v10438_v16  ;;  %v10229_v16 = vcombine.low %v5625_v0, %v5629_v48  ;;  %v10136_v52 = vcombine.high %v5530_v39, %v5534_v25  ;;  %v10222_v24 = vcombine.high %v5617_v62, %v5621_v53 }
 0x440   :  { %v11149_v31 = vpack.c.bf16 %v5471_v14, %v5471_v14  ;;  %v5526_v14 = vld [vmem:[#allocation11 + $0x170] sm:$0xff] }
 0x441   :  { %v10128_v4 = vcombine.high %v5522_v5, %v5526_v14 }
 0x442   :  { %8749 = vmatprep.mubr.bf16.mxu1 %v11149_v31  ;;  %8863 = vmatpush2.bf16.msra.mxu0 %v10437_v44  ;;  %v10135_v44 = vcombine.low %v5530_v39, %v5534_v25 }
 0x443   :  { %8750 = vmatmul.mubr.bf16.vlgmr.msra.gmra.mxu1 %v11151_v3  ;;  %8864 = vmatprep.subr.bf16.mxu0 %v10430_v7  ;;  %v10221_v7 = vcombine.low %v5617_v62, %v5621_v53 }
 0x444   :  { %8800 = vmatpush1.bf16.msra.mxu1 %v10269_v36  ;;  %8831 = vmatprep.mubr.bf16.mxu1 %v11081_v49  ;;  %v5805_v36 = vld [vmem:[#allocation11 + $0xa28] sm:$0xff] }
 0x445   :  { %8801 = vmatprep.subr.bf16.mxu1 %v10262_v20  ;;  %v10406_v55 = vcombine.high %v5801_v32, %v5805_v36  ;;  %v10405_v28 = vcombine.low %v5801_v32, %v5805_v36  ;;  %v10119_v32 = vcombine.low %v5514_v6, %v5518_v59  ;;  %v5992_v6 = vld [vmem:[#allocation13] sm:$0xff] }
 0x446   :  { %8865 = vmatpush2.bf16.msra.mxu0 %v10429_v29 }
 0x447   :  { %8866 = vmatprep.subr.bf16.mxu0 %v10422_v57  ;;  %v5733_v57 = vld [vmem:[#allocation11 + $0x7e8] sm:$0xff] }
 0x448   :  { %8802 = vmatpush1.bf16.msra.mxu1 %v10261_v35  ;;  %v5729_v35 = vld [vmem:[#allocation11 + $0x7c8] sm:$0xff] }
 0x449   :  { %8803 = vmatprep.subr.bf16.mxu1 %v10254_v11  ;;  %v10127_v11 = vcombine.low %v5522_v5, %v5526_v14  ;;  %v10334_v27 = vcombine.high %v5729_v35, %v5733_v57  ;;  %v10333_v36 = vcombine.low %v5729_v35, %v5733_v57 }
 0x44a   :  { %8867 = vmatpush2.bf16.msra.mxu0 %v10421_v34  ;;  %v5506_v34 = vld [vmem:[#allocation11 + $0xd0] sm:$0xff] }
 0x44b   :  { %8868 = vmatprep.subr.bf16.mxu0 %v10414_v63  ;;  %v5721_v63 = vld [vmem:[#allocation11 + $0x788] sm:$0xff] }
 0x44c   :  { %8804 = vmatpush1.bf16.msra.mxu1 %v10253_v47  ;;  %v5510_v47 = vld [vmem:[#allocation11 + $0xf0] sm:$0xff] }
 0x44d   :  { %8805 = vmatprep.subr.bf16.mxu1 %v10246_v13  ;;  %v5725_v13 = vld [vmem:[#allocation11 + $0x7a8] sm:$0xff]  ;;  %v10112_v40 = vcombine.high %v5506_v34, %v5510_v47  ;;  %v10111_v26 = vcombine.low %v5506_v34, %v5510_v47  ;;  %v6001_v47 = vrot.slane %v5992_v6, %v10906_v38 }
 0x44e   :  { %8869 = vmatpush2.bf16.msra.mxu0 %v10413_v41  ;;  %v10326_v2 = vcombine.high %v5721_v63, %v5725_v13  ;;  %v5498_v41 = vld [vmem:[#allocation11 + $0x90] sm:$0xff]  ;;  %v10325_v60 = vcombine.low %v5721_v63, %v5725_v13 }
 0x44f   :  { %8870 = vmatprep.subr.bf16.mxu0 %v10406_v55  ;;  %v5713_v55 = vld [vmem:[#allocation11 + $0x748] sm:$0xff] }
 0x450   :  { %8806 = vmatpush1.bf16.msra.mxu1 %v10245_v56  ;;  %v5502_v56 = vld [vmem:[#allocation11 + $0xb0] sm:$0xff] }
 0x451   :  { %8807 = vmatprep.subr.bf16.mxu1 %v10238_v51  ;;  %v5717_v51 = vld [vmem:[#allocation11 + $0x768] sm:$0xff]  ;;  %v10104_v0 = vcombine.high %v5498_v41, %v5502_v56  ;;  %v10103_v39 = vcombine.low %v5498_v41, %v5502_v56 }
 0x452   :  { %8871 = vmatpush2.bf16.msra.mxu0 %v10405_v28  ;;  %v10318_v48 = vcombine.high %v5713_v55, %v5717_v51  ;;  %v5490_v28 = vld [vmem:[#allocation11 + $0x50] sm:$0xff]  ;;  %v10317_v25 = vcombine.low %v5713_v55, %v5717_v51  ;;  %v5673_v41 = vld [vmem:[#allocation11 + $0x608] sm:$0xff] }
 0x453   :  { %8922 = vmatprep.subr.bf16.mxu0 %v10144_v19  ;;  %v5705_v19 = vld [vmem:[#allocation11 + $0x708] sm:$0xff] }
 0x454   :  { %8808 = vmatpush1.bf16.msra.mxu1 %v10237_v50  ;;  %v5494_v50 = vld [vmem:[#allocation11 + $0x70] sm:$0xff]  ;;  %v5677_v56 = vld [vmem:[#allocation11 + $0x628] sm:$0xff] }
 0x455   :  { %8809 = vmatprep.subr.bf16.mxu1 %v10230_v37  ;;  %v11159_v58 = vpop.f32.mrf.mxu0  ;;  %8873 = vmatmul.mubr.bf16.vlgmr.msra.gmra.mxu0 %v11125_v9  ;;  %v5709_v37 = vld [vmem:[#allocation11 + $0x728] sm:$0xff]  ;;  %v10096_v62 = vcombine.high %v5490_v28, %v5494_v50  ;;  %v10095_v5 = vcombine.low %v5490_v28, %v5494_v50  ;;  %v10278_v28 = vcombine.high %v5673_v41, %v5677_v56  ;;  %v5578_v50 = vld [vmem:[#allocation11 + $0x310] sm:$0xff] }
 0x456   :  { %8923 = vmatpush1.bf16.msra.mxu0 %v10143_v61  ;;  %8954 = vmatprep.mubr.bf16.mxu0 %v11069_v21  ;;  %v10310_v53 = vcombine.high %v5705_v19, %v5709_v37  ;;  %v5482_v61 = vld [vmem:[#allocation11 + $0x10] sm:$0xff]  ;;  %v10309_v14 = vcombine.low %v5705_v19, %v5709_v37 }
 0x457   :  { %v11163_v20 = vpop.f32.mrf.mxu0  ;;  %8924 = vmatprep.subr.bf16.mxu0 %v10136_v52  ;;  %v5697_v52 = vld [vmem:[#allocation11 + $0x6c8] sm:$0xff]  ;;  %v5582_v19 = vld [vmem:[#allocation11 + $0x330] sm:$0xff] }
 0x458   :  { %8810 = vmatpush1.bf16.msra.mxu1 %v10229_v16  ;;  %v5486_v16 = vld [vmem:[#allocation11 + $0x30] sm:$0xff] }
 0x459   :  { %8811 = vmatprep.subr.bf16.mxu1 %v10222_v24  ;;  %v8632_v29 = vpop.f32.mrf.mxu0  ;;  %v5701_v24 = vld [vmem:[#allocation11 + $0x6e8] sm:$0xff]  ;;  %v10088_v46 = vcombine.high %v5482_v61, %v5486_v16  ;;  %v10087_v59 = vcombine.low %v5482_v61, %v5486_v16 }
 0x45a   :  { %8925 = vmatpush1.bf16.msra.mxu0 %v10135_v44  ;;  %v10302_v42 = vcombine.high %v5697_v52, %v5701_v24  ;;  %v5602_v44 = vld [vmem:[#allocation11 + $0x3d0] sm:$0xff]  ;;  %v10301_v29 = vcombine.low %v5697_v52, %v5701_v24  ;;  %v5913_v52 = vld [vmem:[#allocation11 + $0xd88] sm:$0xff] }
 0x45b   :  { %v8633_v12 = vpop.f32.mrf.mxu0  ;;  %8926 = vmatprep.subr.bf16.mxu0 %v10128_v4  ;;  %v5689_v4 = vld [vmem:[#allocation11 + $0x688] sm:$0xff] }
 0x45c   :  { %8812 = vmatpush1.bf16.msra.mxu1 %v10221_v7  ;;  %v5606_v7 = vld [vmem:[#allocation11 + $0x3f0] sm:$0xff]  ;;  %v5917_v24 = vld [vmem:[#allocation11 + $0xda8] sm:$0xff] }
 0x45d   :  { %8813 = vmatprep.subr.bf16.mxu1 %v10214_v54  ;;  %v5693_v54 = vld [vmem:[#allocation11 + $0x6a8] sm:$0xff]  ;;  %v10208_v35 = vcombine.high %v5602_v44, %v5606_v7  ;;  %v5598_v12 = vld [vmem:[#allocation11 + $0x3b0] sm:$0xff]  ;;  %v10207_v34 = vcombine.low %v5602_v44, %v5606_v7  ;;  %v10518_v44 = vcombine.high %v5913_v52, %v5917_v24 }
 0x45e   :  { %8927 = vmatpush1.bf16.msra.mxu0 %v10127_v11  ;;  %v10294_v57 = vcombine.high %v5689_v4, %v5693_v54  ;;  %v5594_v11 = vld [vmem:[#allocation11 + $0x390] sm:$0xff]  ;;  %v10293_v63 = vcombine.low %v5689_v4, %v5693_v54 }
 0x45f   :  { %8928 = vmatprep.subr.bf16.mxu0 %v10120_v1  ;;  %v5681_v1 = vld [vmem:[#allocation11 + $0x648] sm:$0xff]  ;;  %v10200_v13 = vcombine.high %v5594_v11, %v5598_v12  ;;  %v5562_v4 = vld [vmem:[#allocation11 + $0x290] sm:$0xff] }
 0x460   :  { %8814 = vmatpush1.bf16.msra.mxu1 %v10213_v30  ;;  %v5997_v30 = vrot.slane %v5992_v6, %v10901_v33  ;;  %v5566_v54 = vld [vmem:[#allocation11 + $0x2b0] sm:$0xff]  ;;  %v5905_v6 = vld [vmem:[#allocation11 + $0xd48] sm:$0xff] }
 0x461   :  { %8815 = vmatprep.subr.bf16.mxu1 %v10334_v27  ;;  %v5685_v27 = vld [vmem:[#allocation11 + $0x668] sm:$0xff] }
 0x462   :  { %8929 = vmatpush1.bf16.msra.mxu0 %v10119_v32  ;;  %v10286_v32 = vcombine.high %v5681_v1, %v5685_v27  ;;  %v10285_v51 = vcombine.low %v5681_v1, %v5685_v27  ;;  %v5897_v1 = vld [vmem:[#allocation11 + $0xd08] sm:$0xff] }
 0x463   :  { %8930 = vmatprep.subr.bf16.mxu0 %v10112_v40  ;;  %v5590_v40 = vld [vmem:[#allocation11 + $0x370] sm:$0xff]  ;;  %v5901_v27 = vld [vmem:[#allocation11 + $0xd28] sm:$0xff] }
 0x464   :  { %8816 = vmatpush2.bf16.msra.mxu1 %v10333_v36  ;;  %v5586_v36 = vld [vmem:[#allocation11 + $0x350] sm:$0xff] }
 0x465   :  { %8817 = vmatprep.subr.bf16.mxu1 %v10326_v2  ;;  %v8629_v2 = vadd.f32 %v11159_v58, %v5997_v30  ;;  %v10192_v38 = vcombine.high %v5586_v36, %v5590_v40  ;;  %v5921_v58 = vld [vmem:[#allocation11 + $0xdc8] sm:$0xff]  ;;  %v5558_v30 = vld [vmem:[#allocation11 + $0x270] sm:$0xff] }
 0x466   :  { %8931 = vmatpush1.bf16.msra.mxu0 %v10111_v26  ;;  %v10199_v26 = vcombine.low %v5594_v11, %v5598_v12  ;;  %v5554_v12 = vld [vmem:[#allocation11 + $0x250] sm:$0xff] }
 0x467   :  { %8932 = vmatprep.subr.bf16.mxu0 %v10104_v0 }
 0x468   :  { %8818 = vmatpush2.bf16.msra.mxu1 %v10325_v60  ;;  %v8631_v60 = vadd.f32 %v11163_v20, %v6001_v47  ;;  %v10184_v20 = vcombine.high %v5578_v50, %v5582_v19 }
 0x469   :  { %8819 = vmatprep.subr.bf16.mxu1 %v10318_v48 }
 0x46a   :  { %8933 = vmatpush1.bf16.msra.mxu0 %v10103_v39  ;;  %v5925_v39 = vld [vmem:[#allocation11 + $0xde8] sm:$0xff] }
 0x46b   :  { %8934 = vmatprep.subr.bf16.mxu0 %v10096_v62  ;;  %v10191_v62 = vcombine.low %v5586_v36, %v5590_v40  ;;  %v10526_v16 = vcombine.high %v5921_v58, %v5925_v39  ;;  %v5550_v36 = vld [vmem:[#allocation11 + $0x230] sm:$0xff]  ;;  %v5889_v40 = vld [vmem:[#allocation11 + $0xcc8] sm:$0xff] }
 0x46c   :  { %8820 = vmatpush2.bf16.msra.mxu1 %v10317_v25 }
 0x46d   :  { %8821 = vmatprep.subr.bf16.mxu1 %v10310_v53  ;;  %v10277_v53 = vcombine.low %v5673_v41, %v5677_v56  ;;  %v10159_v41 = vcombine.low %v5554_v12, %v5558_v30  ;;  %v10501_v56 = vcombine.low %v5897_v1, %v5901_v27 }
 0x46e   :  { %8935 = vmatpush1.bf16.msra.mxu0 %v10095_v5  ;;  %v5570_v5 = vld [vmem:[#allocation11 + $0x2d0] sm:$0xff] }
 0x46f   :  { %8936 = vmatprep.subr.bf16.mxu0 %v10088_v46  ;;  %v10183_v46 = vcombine.low %v5578_v50, %v5582_v19 }
 0x470   :  { %8822 = vmatpush2.bf16.msra.mxu1 %v10309_v14  ;;  %v5574_v14 = vld [vmem:[#allocation11 + $0x2f0] sm:$0xff] }
 0x471   :  { %8823 = vmatprep.subr.bf16.mxu1 %v10302_v42  ;;  %v10525_v42 = vcombine.low %v5921_v58, %v5925_v39  ;;  %v10176_v7 = vcombine.high %v5570_v5, %v5574_v14  ;;  %v5786_v39 = vld [vmem:[#allocation11 + $0x990] sm:$0xff] }
 0x472   :  { %8937 = vmatpush1.bf16.msra.mxu0 %v10087_v59  ;;  %v5909_v59 = vld [vmem:[#allocation11 + $0xd68] sm:$0xff] }
 0x473   :  { %8938 = vmatprep.subr.bf16.mxu0 %v10208_v35  ;;  %v10517_v35 = vcombine.low %v5913_v52, %v5917_v24  ;;  %v10510_v11 = vcombine.high %v5905_v6, %v5909_v59  ;;  %v10509_v47 = vcombine.low %v5905_v6, %v5909_v59  ;;  %v5778_v24 = vld [vmem:[#allocation11 + $0x950] sm:$0xff] }
 0x474   :  { %8824 = vmatpush2.bf16.msra.mxu1 %v10301_v29  ;;  %v10175_v29 = vcombine.low %v5570_v5, %v5574_v14  ;;  %v5782_v5 = vld [vmem:[#allocation11 + $0x970] sm:$0xff] }
 0x475   :  { %8825 = vmatprep.subr.bf16.mxu1 %v10294_v57  ;;  %v10168_v57 = vcombine.high %v5562_v4, %v5566_v54  ;;  %v10384_v6 = vcombine.high %v5778_v24, %v5782_v5 }
 0x476   :  { %8939 = vmatpush2.bf16.msra.mxu0 %v10207_v34  ;;  %v10167_v34 = vcombine.low %v5562_v4, %v5566_v54 }
 0x477   :  { %v8669_v55 = vpop.f32.mrf.mxu1  ;;  %8940 = vmatprep.subr.bf16.mxu0 %v10200_v13  ;;  %v10502_v13 = vcombine.high %v5897_v1, %v5901_v27 }
 0x478   :  { %v11169_v0 = vadd.f32 %v8669_v55, %v8629_v2  ;;  %8826 = vmatpush2.bf16.msra.mxu1 %v10293_v63  ;;  %v10160_v63 = vcombine.high %v5554_v12, %v5558_v30  ;;  %v5893_v2 = vld [vmem:[#allocation11 + $0xce8] sm:$0xff]  ;;  %v10383_v30 = vcombine.low %v5778_v24, %v5782_v5 }
 0x479   :  { %v8671_v48 = vpop.f32.mrf.mxu1  ;;  %8827 = vmatprep.subr.bf16.mxu1 %v10286_v32  ;;  %v5546_v32 = vld [vmem:[#allocation11 + $0x210] sm:$0xff]  ;;  %v10493_v50 = vcombine.low %v5889_v40, %v5893_v2  ;;  %v5985_v12 = vld [vmem:[#allocation11 + $0xfc8] sm:$0xff] }
 0x47a   :  { %v11171_v37 = vadd.f32 %v8671_v48, %v8631_v60  ;;  %8941 = vmatpush2.bf16.msra.mxu0 %v10199_v26  ;;  %v10152_v55 = vcombine.high %v5546_v32, %v5550_v36  ;;  %v5794_v26 = vld [vmem:[#allocation11 + $0x9d0] sm:$0xff]  ;;  %v5885_v48 = vld [vmem:[#allocation11 + $0xca8] sm:$0xff] }
 0x47b   :  { %v8673_v25 = vpop.f32.mrf.mxu1  ;;  %8942 = vmatprep.subr.bf16.mxu0 %v10192_v38  ;;  %v5798_v60 = vld [vmem:[#allocation11 + $0x9f0] sm:$0xff]  ;;  %v5881_v38 = vld [vmem:[#allocation11 + $0xc88] sm:$0xff] }
 0x47c   :  { %8828 = vmatpush2.bf16.msra.mxu1 %v10285_v51  ;;  %v10494_v51 = vcombine.high %v5889_v40, %v5893_v2  ;;  %v10400_v19 = vcombine.high %v5794_v26, %v5798_v60  ;;  %v10486_v58 = vcombine.high %v5881_v38, %v5885_v48  ;;  %v5790_v25 = vld [vmem:[#allocation11 + $0x9b0] sm:$0xff]  ;;  %v5957_v24 = vld [vmem:[#allocation11 + $0xee8] sm:$0xff] }
 0x47d   :  { %v8674_v61 = vpop.f32.mrf.mxu1  ;;  %8829 = vmatprep.subr.bf16.mxu1 %v10278_v28  ;;  %v10151_v28 = vcombine.low %v5546_v32, %v5550_v36  ;;  %v5981_v32 = vld [vmem:[#allocation11 + $0xfa8] sm:$0xff] }
 0x47e   :  { %8943 = vmatpush2.bf16.msra.mxu0 %v10191_v62  ;;  %v5873_v62 = vld [vmem:[#allocation11 + $0xc48] sm:$0xff]  ;;  %v10485_v61 = vcombine.low %v5881_v38, %v5885_v48 }
 0x47f   :  { %8944 = vmatprep.subr.bf16.mxu0 %v10184_v20  ;;  %v10399_v20 = vcombine.low %v5794_v26, %v5798_v60  ;;  %v5973_v26 = vld [vmem:[#allocation11 + $0xf68] sm:$0xff] }
 0x480   :  { %8830 = vmatpush2.bf16.msra.mxu1 %v10277_v53  ;;  %v5877_v53 = vld [vmem:[#allocation11 + $0xc68] sm:$0xff] }
 0x481   :  { %8881 = vmatprep.subr.bf16.mxu1 %v10526_v16  ;;  %v10392_v16 = vcombine.high %v5786_v39, %v5790_v25  ;;  %v10478_v52 = vcombine.high %v5873_v62, %v5877_v53  ;;  %v10477_v54 = vcombine.low %v5873_v62, %v5877_v53 }
 0x482   :  { %8945 = vmatpush2.bf16.msra.mxu0 %v10183_v46  ;;  %v5865_v46 = vld [vmem:[#allocation11 + $0xc08] sm:$0xff] }
 0x483   :  { %8832 = vmatmul.mubr.bf16.vlgmr.msra.gmra.mxu1 %v11106_v45  ;;  %8946 = vmatprep.subr.bf16.mxu0 %v10176_v7  ;;  %v10391_v7 = vcombine.low %v5786_v39, %v5790_v25  ;;  %v5965_v39 = vld [vmem:[#allocation11 + $0xf28] sm:$0xff] }
 0x484   :  { %8882 = vmatpush1.bf16.msra.mxu1 %v10525_v42  ;;  %8913 = vmatprep.mubr.bf16.mxu1 %v11149_v31  ;;  %v5869_v42 = vld [vmem:[#allocation11 + $0xc28] sm:$0xff] }
 0x485   :  { %8883 = vmatprep.subr.bf16.mxu1 %v10518_v44  ;;  %v10469_v27 = vcombine.low %v5865_v46, %v5869_v42 }
 0x486   :  { %8947 = vmatpush2.bf16.msra.mxu0 %v10175_v29  ;;  %v10470_v29 = vcombine.high %v5865_v46, %v5869_v42 }
 0x487   :  { %8948 = vmatprep.subr.bf16.mxu0 %v10168_v57  ;;  %v5774_v57 = vld [vmem:[#allocation11 + $0x930] sm:$0xff] }
 0x488   :  { %8884 = vmatpush1.bf16.msra.mxu1 %v10517_v35  ;;  %v5770_v35 = vld [vmem:[#allocation11 + $0x910] sm:$0xff] }
 0x489   :  { %8885 = vmatprep.subr.bf16.mxu1 %v10510_v11  ;;  %v10375_v36 = vcombine.low %v5770_v35, %v5774_v57 }
 0x48a   :  { %8949 = vmatpush2.bf16.msra.mxu0 %v10167_v34  ;;  %v10376_v34 = vcombine.high %v5770_v35, %v5774_v57 }
 0x48b   :  { %8950 = vmatprep.subr.bf16.mxu0 %v10160_v63  ;;  %v5762_v63 = vld [vmem:[#allocation11 + $0x8d0] sm:$0xff] }
 0x48c   :  { %8886 = vmatpush1.bf16.msra.mxu1 %v10509_v47 }
 0x48d   :  { %8887 = vmatprep.subr.bf16.mxu1 %v10502_v13  ;;  %v5766_v13 = vld [vmem:[#allocation11 + $0x8f0] sm:$0xff] }
 0x48e   :  { %8951 = vmatpush2.bf16.msra.mxu0 %v10159_v41  ;;  %v10368_v2 = vcombine.high %v5762_v63, %v5766_v13  ;;  %v10367_v60 = vcombine.low %v5762_v63, %v5766_v13  ;;  %v5842_v13 = vld [vmem:[#allocation11 + $0xb50] sm:$0xff] }
 0x48f   :  { %8952 = vmatprep.subr.bf16.mxu0 %v10152_v55  ;;  %v5758_v55 = vld [vmem:[#allocation11 + $0x8b0] sm:$0xff] }
 0x490   :  { %8888 = vmatpush1.bf16.msra.mxu1 %v10501_v56  ;;  %v5754_v56 = vld [vmem:[#allocation11 + $0x890] sm:$0xff] }
 0x491   :  { %8889 = vmatprep.subr.bf16.mxu1 %v10494_v51  ;;  %v5969_v51 = vld [vmem:[#allocation11 + $0xf48] sm:$0xff]  ;;  %v10360_v48 = vcombine.high %v5754_v56, %v5758_v55  ;;  %v10359_v25 = vcombine.low %v5754_v56, %v5758_v55  ;;  %v5834_v55 = vld [vmem:[#allocation11 + $0xb10] sm:$0xff] }
 0x492   :  { %8953 = vmatpush2.bf16.msra.mxu0 %v10151_v28  ;;  %v10574_v28 = vcombine.high %v5969_v51, %v5973_v26  ;;  %v10573_v62 = vcombine.low %v5969_v51, %v5973_v26  ;;  %v5838_v51 = vld [vmem:[#allocation11 + $0xb30] sm:$0xff] }
 0x493   :  { %9004 = vmatprep.subr.bf16.mxu0 %v10400_v19  ;;  %v5750_v19 = vld [vmem:[#allocation11 + $0x870] sm:$0xff] }
 0x494   :  { %8890 = vmatpush1.bf16.msra.mxu1 %v10493_v50  ;;  %v5746_v50 = vld [vmem:[#allocation11 + $0x850] sm:$0xff] }
 0x495   :  { %8891 = vmatprep.subr.bf16.mxu1 %v10486_v58  ;;  %v8710_v14 = vpop.f32.mrf.mxu0  ;;  %8955 = vmatmul.mubr.bf16.vlgmr.msra.gmra.mxu0 %v11092_v43  ;;  %v5961_v58 = vld [vmem:[#allocation11 + $0xf08] sm:$0xff]  ;;  %v10352_v53 = vcombine.high %v5746_v50, %v5750_v19  ;;  %v10351_v5 = vcombine.low %v5746_v50, %v5750_v19  ;;  %v5666_v26 = vld [vmem:[#allocation11 + $0x5d0] sm:$0xff] }
 0x496   :  { %v11177_v44 = vadd.f32 %v8710_v14, %v11169_v0  ;;  %9005 = vmatpush1.bf16.msra.mxu0 %v10399_v20  ;;  %9036 = vmatprep.mubr.bf16.mxu0 %v11117_v15  ;;  %v5989_v0 = vld [vmem:[#allocation11 + $0xfe8] sm:$0xff]  ;;  %v10566_v20 = vcombine.high %v5961_v58, %v5965_v39  ;;  %v10565_v14 = vcombine.low %v5961_v58, %v5965_v39  ;;  %v5658_v19 = vld [vmem:[#allocation11 + $0x590] sm:$0xff] }
 0x497   :  { %v8712_v4 = vpop.f32.mrf.mxu0  ;;  %9006 = vmatprep.subr.bf16.mxu0 %v10392_v16  ;;  %v10590_v47 = vcombine.high %v5985_v12, %v5989_v0  ;;  %v10589_v40 = vcombine.low %v5985_v12, %v5989_v0  ;;  %v5742_v16 = vld [vmem:[#allocation11 + $0x830] sm:$0xff] }
 0x498   :  { %8892 = vmatpush1.bf16.msra.mxu1 %v10485_v61  ;;  %v11181_v59 = vadd.f32 %v8712_v4, %v11171_v37  ;;  %v5977_v37 = vld [vmem:[#allocation11 + $0xf88] sm:$0xff]  ;;  %v5738_v61 = vld [vmem:[#allocation11 + $0x810] sm:$0xff] }
 0x499   :  { %8893 = vmatprep.subr.bf16.mxu1 %v10478_v52  ;;  %v8714_v11 = vpop.f32.mrf.mxu0  ;;  %v10582_v41 = vcombine.high %v5977_v37, %v5981_v32  ;;  %v10581_v38 = vcombine.low %v5977_v37, %v5981_v32  ;;  %v5953_v52 = vld [vmem:[#allocation11 + $0xec8] sm:$0xff]  ;;  %v10344_v46 = vcombine.high %v5738_v61, %v5742_v16  ;;  %v5862_v4 = vld [vmem:[#allocation11 + $0xbf0] sm:$0xff] }
 0x49a   :  { %9007 = vmatpush1.bf16.msra.mxu0 %v10391_v7  ;;  %v10558_v42 = vcombine.high %v5953_v52, %v5957_v24  ;;  %v5858_v7 = vld [vmem:[#allocation11 + $0xbd0] sm:$0xff]  ;;  %v10557_v35 = vcombine.low %v5953_v52, %v5957_v24  ;;  %v5929_v32 = vld [vmem:[#allocation11 + $0xe08] sm:$0xff] }
 0x49b   :  { %v8715_v1 = vpop.f32.mrf.mxu0  ;;  %9008 = vmatprep.subr.bf16.mxu0 %v10384_v6  ;;  %v5949_v6 = vld [vmem:[#allocation11 + $0xea8] sm:$0xff]  ;;  %v10464_v57 = vcombine.high %v5858_v7, %v5862_v4  ;;  %v5850_v12 = vld [vmem:[#allocation11 + $0xb90] sm:$0xff] }
 0x49c   :  { %8894 = vmatpush1.bf16.msra.mxu1 %v10477_v54  ;;  %v5945_v54 = vld [vmem:[#allocation11 + $0xe88] sm:$0xff]  ;;  %v5854_v0 = vld [vmem:[#allocation11 + $0xbb0] sm:$0xff] }
 0x49d   :  { %8895 = vmatprep.subr.bf16.mxu1 %v10470_v29  ;;  %v10343_v29 = vcombine.low %v5738_v61, %v5742_v16  ;;  %v10550_v11 = vcombine.high %v5945_v54, %v5949_v6  ;;  %v5941_v1 = vld [vmem:[#allocation11 + $0xe68] sm:$0xff]  ;;  %v5846_v37 = vld [vmem:[#allocation11 + $0xb70] sm:$0xff] }
 0x49e   :  { %9009 = vmatpush1.bf16.msra.mxu0 %v10383_v30  ;;  %v5937_v30 = vld [vmem:[#allocation11 + $0xe48] sm:$0xff]  ;;  %v5662_v58 = vld [vmem:[#allocation11 + $0x5b0] sm:$0xff] }
 0x49f   :  { %9010 = vmatprep.subr.bf16.mxu0 %v10376_v34  ;;  %v10549_v34 = vcombine.low %v5945_v54, %v5949_v6  ;;  %v10542_v63 = vcombine.high %v5937_v30, %v5941_v1  ;;  %v5826_v39 = vld [vmem:[#allocation11 + $0xad0] sm:$0xff] }
 0x4a0   :  { %8896 = vmatpush1.bf16.msra.mxu1 %v10469_v27  ;;  %v10463_v27 = vcombine.low %v5858_v7, %v5862_v4  ;;  %v5818_v16 = vld [vmem:[#allocation11 + $0xa90] sm:$0xff] }
 0x4a1   :  { %8897 = vmatprep.subr.bf16.mxu1 %v10590_v47  ;;  %v10456_v47 = vcombine.high %v5850_v12, %v5854_v0  ;;  %v5822_v52 = vld [vmem:[#allocation11 + $0xab0] sm:$0xff] }
 0x4a2   :  { %9011 = vmatpush1.bf16.msra.mxu0 %v10375_v36  ;;  %v5933_v36 = vld [vmem:[#allocation11 + $0xe28] sm:$0xff]  ;;  %v5650_v24 = vld [vmem:[#allocation11 + $0x550] sm:$0xff] }
 0x4a3   :  { %9012 = vmatprep.subr.bf16.mxu0 %v10368_v2  ;;  %v10541_v2 = vcombine.low %v5937_v30, %v5941_v1  ;;  %v10534_v56 = vcombine.high %v5929_v32, %v5933_v36  ;;  %v5810_v4 = vld [vmem:[#allocation11 + $0xa50] sm:$0xff] }
 0x4a4   :  { %8898 = vmatpush2.bf16.msra.mxu1 %v10589_v40  ;;  %v10455_v40 = vcombine.low %v5850_v12, %v5854_v0  ;;  %v5814_v54 = vld [vmem:[#allocation11 + $0xa70] sm:$0xff] }
 0x4a5   :  { %8899 = vmatprep.subr.bf16.mxu1 %v10582_v41  ;;  %v10448_v41 = vcombine.high %v5842_v13, %v5846_v37  ;;  %v5642_v6 = vld [vmem:[#allocation11 + $0x510] sm:$0xff] }
 0x4a6   :  { %9013 = vmatpush1.bf16.msra.mxu0 %v10367_v60  ;;  %v5670_v60 = vld [vmem:[#allocation11 + $0x5f0] sm:$0xff] }
 0x4a7   :  { %9014 = vmatprep.subr.bf16.mxu0 %v10360_v48  ;;  %v10533_v48 = vcombine.low %v5929_v32, %v5933_v36  ;;  %v10272_v50 = vcombine.high %v5666_v26, %v5670_v60  ;;  %v5802_v0 = vld [vmem:[#allocation11 + $0xa10] sm:$0xff]  ;;  %v5543_v32 = vld [vmem:[#allocation11 + $0x1f8] sm:$0xff] }
 0x4a8   :  { %8900 = vmatpush2.bf16.msra.mxu1 %v10581_v38  ;;  %v10447_v38 = vcombine.low %v5842_v13, %v5846_v37  ;;  %v5806_v30 = vld [vmem:[#allocation11 + $0xa30] sm:$0xff]  ;;  %v5539_v37 = vld [vmem:[#allocation11 + $0x1d8] sm:$0xff] }
 0x4a9   :  { %8901 = vmatprep.subr.bf16.mxu1 %v10574_v28  ;;  %v10440_v28 = vcombine.high %v5834_v55, %v5838_v51  ;;  %v5634_v1 = vld [vmem:[#allocation11 + $0x4d0] sm:$0xff] }
 0x4aa   :  { %9015 = vmatpush1.bf16.msra.mxu0 %v10359_v25  ;;  %v5830_v25 = vld [vmem:[#allocation11 + $0xaf0] sm:$0xff] }
 0x4ab   :  { %9016 = vmatprep.subr.bf16.mxu0 %v10352_v53  ;;  %v10271_v53 = vcombine.low %v5666_v26, %v5670_v60  ;;  %v10432_v61 = vcombine.high %v5826_v39, %v5830_v25  ;;  %v5626_v36 = vld [vmem:[#allocation11 + $0x490] sm:$0xff]  ;;  %v5535_v26 = vld [vmem:[#allocation11 + $0x1b8] sm:$0xff] }
 0x4ac   :  { %8902 = vmatpush2.bf16.msra.mxu1 %v10573_v62  ;;  %v10439_v62 = vcombine.low %v5834_v55, %v5838_v51  ;;  %v5531_v51 = vld [vmem:[#allocation11 + $0x198] sm:$0xff]  ;;  %v5618_v60 = vld [vmem:[#allocation11 + $0x450] sm:$0xff] }
 0x4ad   :  { %8903 = vmatprep.subr.bf16.mxu1 %v10566_v20  ;;  %v10264_v20 = vcombine.high %v5658_v19, %v5662_v58 }
 0x4ae   :  { %9017 = vmatpush1.bf16.msra.mxu0 %v10351_v5  ;;  %v5654_v5 = vld [vmem:[#allocation11 + $0x570] sm:$0xff] }
 0x4af   :  { %9018 = vmatprep.subr.bf16.mxu0 %v10344_v46  ;;  %v10263_v46 = vcombine.low %v5658_v19, %v5662_v58  ;;  %v10256_v7 = vcombine.high %v5650_v24, %v5654_v5  ;;  %v5523_v58 = vld [vmem:[#allocation11 + $0x158] sm:$0xff] }
 0x4b0   :  { %8904 = vmatpush2.bf16.msra.mxu1 %v10565_v14  ;;  %v10431_v14 = vcombine.low %v5826_v39, %v5830_v25  ;;  %v5527_v39 = vld [vmem:[#allocation11 + $0x178] sm:$0xff] }
 0x4b1   :  { %8905 = vmatprep.subr.bf16.mxu1 %v10558_v42  ;;  %v10424_v42 = vcombine.high %v5818_v16, %v5822_v52 }
 0x4b2   :  { %9019 = vmatpush1.bf16.msra.mxu0 %v10343_v29  ;;  %v5646_v29 = vld [vmem:[#allocation11 + $0x530] sm:$0xff] }
 0x4b3   :  { %9020 = vmatprep.subr.bf16.mxu0 %v10464_v57  ;;  %v10255_v57 = vcombine.low %v5650_v24, %v5654_v5  ;;  %v10248_v12 = vcombine.high %v5642_v6, %v5646_v29  ;;  %v5515_v5 = vld [vmem:[#allocation11 + $0x118] sm:$0xff] }
 0x4b4   :  { %8906 = vmatpush2.bf16.msra.mxu1 %v10557_v35  ;;  %v10423_v35 = vcombine.low %v5818_v16, %v5822_v52  ;;  %v10130_v52 = vcombine.high %v5523_v58, %v5527_v39 }
 0x4b5   :  { %8907 = vmatprep.subr.bf16.mxu1 %v10550_v11  ;;  %v10416_v11 = vcombine.high %v5810_v4, %v5814_v54 }
 0x4b6   :  { %9021 = vmatpush2.bf16.msra.mxu0 %v10463_v27  ;;  %v5638_v27 = vld [vmem:[#allocation11 + $0x4f0] sm:$0xff] }
 0x4b7   :  { %9022 = vmatprep.subr.bf16.mxu0 %v10456_v47  ;;  %v10247_v47 = vcombine.low %v5642_v6, %v5646_v29  ;;  %v10240_v13 = vcombine.high %v5634_v1, %v5638_v27 }
 0x4b8   :  { %8908 = vmatpush2.bf16.msra.mxu1 %v10549_v34  ;;  %v10415_v34 = vcombine.low %v5810_v4, %v5814_v54  ;;  %v10129_v4 = vcombine.low %v5523_v58, %v5527_v39 }
 0x4b9   :  { %8909 = vmatprep.subr.bf16.mxu1 %v10542_v63  ;;  %v10408_v63 = vcombine.high %v5802_v0, %v5806_v30 }
 0x4ba   :  { %9023 = vmatpush2.bf16.msra.mxu0 %v10455_v40  ;;  %v5630_v40 = vld [vmem:[#allocation11 + $0x4b0] sm:$0xff] }
 0x4bb   :  { %9024 = vmatprep.subr.bf16.mxu0 %v10448_v41  ;;  %v10239_v41 = vcombine.low %v5634_v1, %v5638_v27  ;;  %v10232_v55 = vcombine.high %v5626_v36, %v5630_v40 }
 0x4bc   :  { %8910 = vmatpush2.bf16.msra.mxu1 %v10541_v2  ;;  %v10407_v2 = vcombine.low %v5802_v0, %v5806_v30 }
 0x4bd   :  { %8911 = vmatprep.subr.bf16.mxu1 %v10534_v56  ;;  %v10146_v56 = vcombine.high %v5539_v37, %v5543_v32 }
 0x4be   :  { %9025 = vmatpush2.bf16.msra.mxu0 %v10447_v38  ;;  %v5622_v38 = vld [vmem:[#allocation11 + $0x470] sm:$0xff] }
 0x4bf   :  { %9026 = vmatprep.subr.bf16.mxu0 %v10440_v28  ;;  %v10231_v28 = vcombine.low %v5626_v36, %v5630_v40  ;;  %v10224_v19 = vcombine.high %v5618_v60, %v5622_v38  ;;  %v10223_v16 = vcombine.low %v5618_v60, %v5622_v38 }
 0x4c0   :  { %8912 = vmatpush2.bf16.msra.mxu1 %v10533_v48  ;;  %v10145_v48 = vcombine.low %v5539_v37, %v5543_v32 }
 0x4c1   :  { %8963 = vmatprep.subr.bf16.mxu1 %v10272_v50  ;;  %v10138_v50 = vcombine.high %v5531_v51, %v5535_v26 }
 0x4c2   :  { %9027 = vmatpush2.bf16.msra.mxu0 %v10439_v62  ;;  %v5610_v62 = vld [vmem:[#allocation11 + $0x410] sm:$0xff] }
 0x4c3   :  { %8914 = vmatmul.mubr.bf16.vlgmr.msra.gmra.mxu1 %v11151_v3  ;;  %9028 = vmatprep.subr.bf16.mxu0 %v10432_v61 }
 0x4c4   :  { %8964 = vmatpush1.bf16.msra.mxu1 %v10271_v53  ;;  %8995 = vmatprep.mubr.bf16.mxu1 %v11081_v49  ;;  %v5614_v53 = vld [vmem:[#allocation11 + $0x430] sm:$0xff] }
 0x4c5   :  { %8965 = vmatprep.subr.bf16.mxu1 %v10264_v20  ;;  %v10137_v20 = vcombine.low %v5531_v51, %v5535_v26  ;;  %v10216_v24 = vcombine.high %v5610_v62, %v5614_v53  ;;  %v10215_v6 = vcombine.low %v5610_v62, %v5614_v53 }
 0x4c6   :  { %9029 = vmatpush2.bf16.msra.mxu0 %v10431_v14  ;;  %v5519_v14 = vld [vmem:[#allocation11 + $0x138] sm:$0xff] }
 0x4c7   :  { %9030 = vmatprep.subr.bf16.mxu0 %v10424_v42  ;;  %v5730_v42 = vld [vmem:[#allocation11 + $0x7d0] sm:$0xff]  ;;  %v10121_v0 = vcombine.low %v5515_v5, %v5519_v14 }
 0x4c8   :  { %8966 = vmatpush1.bf16.msra.mxu1 %v10263_v46 }
 0x4c9   :  { %8967 = vmatprep.subr.bf16.mxu1 %v10256_v7  ;;  %v5734_v7 = vld [vmem:[#allocation11 + $0x7f0] sm:$0xff] }
 0x4ca   :  { %9031 = vmatpush2.bf16.msra.mxu0 %v10423_v35  ;;  %v10336_v29 = vcombine.high %v5730_v42, %v5734_v7  ;;  %v5507_v35 = vld [vmem:[#allocation11 + $0xd8] sm:$0xff]  ;;  %v10335_v30 = vcombine.low %v5730_v42, %v5734_v7 }
 0x4cb   :  { %9032 = vmatprep.subr.bf16.mxu0 %v10416_v11  ;;  %v5722_v11 = vld [vmem:[#allocation11 + $0x790] sm:$0xff]  ;;  %v5595_v7 = vld [vmem:[#allocation11 + $0x398] sm:$0xff] }
 0x4cc   :  { %8968 = vmatpush1.bf16.msra.mxu1 %v10255_v57  ;;  %v5511_v57 = vld [vmem:[#allocation11 + $0xf8] sm:$0xff] }
 0x4cd   :  { %8969 = vmatprep.subr.bf16.mxu1 %v10248_v12  ;;  %v5726_v12 = vld [vmem:[#allocation11 + $0x7b0] sm:$0xff]  ;;  %v10114_v1 = vcombine.high %v5507_v35, %v5511_v57  ;;  %v10113_v37 = vcombine.low %v5507_v35, %v5511_v57 }
 0x4ce   :  { %9033 = vmatpush2.bf16.msra.mxu0 %v10415_v34  ;;  %v10328_v27 = vcombine.high %v5722_v11, %v5726_v12  ;;  %v5499_v34 = vld [vmem:[#allocation11 + $0x98] sm:$0xff]  ;;  %v10327_v32 = vcombine.low %v5722_v11, %v5726_v12 }
 0x4cf   :  { %9034 = vmatprep.subr.bf16.mxu0 %v10408_v63  ;;  %v5714_v63 = vld [vmem:[#allocation11 + $0x750] sm:$0xff]  ;;  %v5587_v11 = vld [vmem:[#allocation11 + $0x358] sm:$0xff] }
 0x4d0   :  { %8970 = vmatpush1.bf16.msra.mxu1 %v10247_v47  ;;  %v5503_v47 = vld [vmem:[#allocation11 + $0xb8] sm:$0xff] }
 0x4d1   :  { %8971 = vmatprep.subr.bf16.mxu1 %v10240_v13  ;;  %v5718_v13 = vld [vmem:[#allocation11 + $0x770] sm:$0xff]  ;;  %v10106_v36 = vcombine.high %v5499_v34, %v5503_v47  ;;  %v10105_v51 = vcombine.low %v5499_v34, %v5503_v47  ;;  %v5591_v12 = vld [vmem:[#allocation11 + $0x378] sm:$0xff] }
 0x4d2   :  { %9035 = vmatpush2.bf16.msra.mxu0 %v10407_v2  ;;  %v10320_v40 = vcombine.high %v5714_v63, %v5718_v13  ;;  %v5491_v2 = vld [vmem:[#allocation11 + $0x58] sm:$0xff]  ;;  %v10319_v26 = vcombine.low %v5714_v63, %v5718_v13  ;;  %v10194_v34 = vcombine.high %v5587_v11, %v5591_v12 }
 0x4d3   :  { %9086 = vmatprep.subr.bf16.mxu0 %v10146_v56  ;;  %v5706_v56 = vld [vmem:[#allocation11 + $0x710] sm:$0xff]  ;;  %v5579_v63 = vld [vmem:[#allocation11 + $0x318] sm:$0xff] }
 0x4d4   :  { %8972 = vmatpush1.bf16.msra.mxu1 %v10239_v41  ;;  %v5495_v41 = vld [vmem:[#allocation11 + $0x78] sm:$0xff] }
 0x4d5   :  { %8973 = vmatprep.subr.bf16.mxu1 %v10232_v55  ;;  %v11185_v25 = vpop.f32.mrf.mxu0  ;;  %9037 = vmatmul.mubr.bf16.vlgmr.msra.gmra.mxu0 %v11125_v9  ;;  %v5710_v55 = vld [vmem:[#allocation11 + $0x730] sm:$0xff]  ;;  %v10098_v60 = vcombine.high %v5491_v2, %v5495_v41  ;;  %v10097_v58 = vcombine.low %v5491_v2, %v5495_v41  ;;  %v5583_v13 = vld [vmem:[#allocation11 + $0x338] sm:$0xff]  ;;  %v11191_v2 = vld [vmem:[#allocation14] sm:$0xff] }
 0x4d6   :  { %9087 = vmatpush1.bf16.msra.mxu0 %v10145_v48  ;;  %9118 = vmatprep.mubr.bf16.mxu0 %v11069_v21  ;;  %v10122_v21 = vcombine.high %v5515_v5, %v5519_v14  ;;  %v10312_v38 = vcombine.high %v5706_v56, %v5710_v55  ;;  %v5483_v48 = vld [vmem:[#allocation11 + $0x18] sm:$0xff]  ;;  %v10311_v39 = vcombine.low %v5706_v56, %v5710_v55  ;;  %v5914_v55 = vld [vmem:[#allocation11 + $0xd90] sm:$0xff] }
 0x4d7   :  { %v11189_v61 = vpop.f32.mrf.mxu0  ;;  %9088 = vmatprep.subr.bf16.mxu0 %v10138_v50  ;;  %v5698_v50 = vld [vmem:[#allocation11 + $0x6d0] sm:$0xff]  ;;  %v10186_v41 = vcombine.high %v5579_v63, %v5583_v13 }
 0x4d8   :  { %8974 = vmatpush1.bf16.msra.mxu1 %v10231_v28  ;;  %v5487_v28 = vld [vmem:[#allocation11 + $0x38] sm:$0xff] }
 0x4d9   :  { %8975 = vmatprep.subr.bf16.mxu1 %v10224_v19  ;;  %v8796_v46 = vpop.f32.mrf.mxu0  ;;  %v5702_v19 = vld [vmem:[#allocation11 + $0x6f0] sm:$0xff]  ;;  %v10090_v62 = vcombine.high %v5483_v48, %v5487_v28  ;;  %v10089_v5 = vcombine.low %v5483_v48, %v5487_v28  ;;  %v10185_v48 = vcombine.low %v5579_v63, %v5583_v13  ;;  %v5547_v63 = vld [vmem:[#allocation11 + $0x218] sm:$0xff] }
 0x4da   :  { %9089 = vmatpush1.bf16.msra.mxu0 %v10137_v20  ;;  %v10304_v53 = vcombine.high %v5698_v50, %v5702_v19  ;;  %v5603_v20 = vld [vmem:[#allocation11 + $0x3d8] sm:$0xff]  ;;  %v10303_v14 = vcombine.low %v5698_v50, %v5702_v19 }
 0x4db   :  { %v8797_v54 = vpop.f32.mrf.mxu0  ;;  %9090 = vmatprep.subr.bf16.mxu0 %v10130_v52  ;;  %v5690_v52 = vld [vmem:[#allocation11 + $0x690] sm:$0xff] }
 0x4dc   :  { %8976 = vmatpush1.bf16.msra.mxu1 %v10223_v16  ;;  %v5607_v16 = vld [vmem:[#allocation11 + $0x3f8] sm:$0xff]  ;;  %v5682_v54 = vld [vmem:[#allocation11 + $0x650] sm:$0xff] }
 0x4dd   :  { %8977 = vmatprep.subr.bf16.mxu1 %v10216_v24  ;;  %v5694_v24 = vld [vmem:[#allocation11 + $0x6b0] sm:$0xff]  ;;  %v10210_v46 = vcombine.high %v5603_v20, %v5607_v16 }
 0x4de   :  { %9091 = vmatpush1.bf16.msra.mxu0 %v10129_v4  ;;  %v10296_v42 = vcombine.high %v5690_v52, %v5694_v24  ;;  %v5599_v4 = vld [vmem:[#allocation11 + $0x3b8] sm:$0xff] }
 0x4df   :  { %9092 = vmatprep.subr.bf16.mxu0 %v10122_v21  ;;  %v10209_v21 = vcombine.low %v5603_v20, %v5607_v16  ;;  %v10202_v35 = vcombine.high %v5595_v7, %v5599_v4 }
 0x4e0   :  { %8978 = vmatpush1.bf16.msra.mxu1 %v10215_v6  ;;  %v5686_v6 = vld [vmem:[#allocation11 + $0x670] sm:$0xff] }
 0x4e1   :  { %8979 = vmatprep.subr.bf16.mxu1 %v10336_v29  ;;  %v10295_v29 = vcombine.low %v5690_v52, %v5694_v24  ;;  %v10288_v57 = vcombine.high %v5682_v54, %v5686_v6 }
 0x4e2   :  { %9093 = vmatpush1.bf16.msra.mxu0 %v10121_v0  ;;  %v5674_v0 = vld [vmem:[#allocation11 + $0x610] sm:$0xff] }
 0x4e3   :  { %9094 = vmatprep.subr.bf16.mxu0 %v10114_v1  ;;  %v10201_v1 = vcombine.low %v5595_v7, %v5599_v4  ;;  %v5555_v4 = vld [vmem:[#allocation11 + $0x258] sm:$0xff] }
 0x4e4   :  { %8980 = vmatpush2.bf16.msra.mxu1 %v10335_v30  ;;  %v5678_v30 = vld [vmem:[#allocation11 + $0x630] sm:$0xff] }
 0x4e5   :  { %8981 = vmatprep.subr.bf16.mxu1 %v10328_v27  ;;  %v10287_v27 = vcombine.low %v5682_v54, %v5686_v6  ;;  %v10280_v47 = vcombine.high %v5674_v0, %v5678_v30  ;;  %v5559_v54 = vld [vmem:[#allocation11 + $0x278] sm:$0xff] }
 0x4e6   :  { %9095 = vmatpush1.bf16.msra.mxu0 %v10113_v37  ;;  %v5922_v37 = vld [vmem:[#allocation11 + $0xdd0] sm:$0xff] }
 0x4e7   :  { %9096 = vmatprep.subr.bf16.mxu0 %v10106_v36  ;;  %v10193_v36 = vcombine.low %v5587_v11, %v5591_v12 }
 0x4e8   :  { %8982 = vmatpush2.bf16.msra.mxu1 %v10327_v32  ;;  %v5926_v32 = vld [vmem:[#allocation11 + $0xdf0] sm:$0xff] }
 0x4e9   :  { %8983 = vmatprep.subr.bf16.mxu1 %v10320_v40  ;;  %v10279_v40 = vcombine.low %v5674_v0, %v5678_v30  ;;  %v10528_v56 = vcombine.high %v5922_v37, %v5926_v32  ;;  %v10527_v28 = vcombine.low %v5922_v37, %v5926_v32  ;;  %v5890_v37 = vld [vmem:[#allocation11 + $0xcd0] sm:$0xff] }
 0x4ea   :  { %9097 = vmatpush1.bf16.msra.mxu0 %v10105_v51  ;;  %v5918_v51 = vld [vmem:[#allocation11 + $0xdb0] sm:$0xff] }
 0x4eb   :  { %9098 = vmatprep.subr.bf16.mxu0 %v10098_v60  ;;  %v5575_v60 = vld [vmem:[#allocation11 + $0x2f8] sm:$0xff]  ;;  %v10520_v50 = vcombine.high %v5914_v55, %v5918_v51  ;;  %v10519_v52 = vcombine.low %v5914_v55, %v5918_v51  ;;  %v5894_v32 = vld [vmem:[#allocation11 + $0xcf0] sm:$0xff] }
 0x4ec   :  { %8984 = vmatpush2.bf16.msra.mxu1 %v10319_v26  ;;  %v5571_v26 = vld [vmem:[#allocation11 + $0x2d8] sm:$0xff]  ;;  %v10496_v51 = vcombine.high %v5890_v37, %v5894_v32 }
 0x4ed   :  { %8985 = vmatprep.subr.bf16.mxu1 %v10312_v38  ;;  %v11194_v38 = vunpack.c.l.bf16 %v11191_v2  ;;  %v10178_v19 = vcombine.high %v5571_v26, %v5575_v60  ;;  %v10177_v24 = vcombine.low %v5571_v26, %v5575_v60  ;;  %v5795_v26 = vld [vmem:[#allocation11 + $0x9d8] sm:$0xff] }
 0x4ee   :  { %9099 = vmatpush1.bf16.msra.mxu0 %v10097_v58  ;;  %v5563_v58 = vld [vmem:[#allocation11 + $0x298] sm:$0xff] }
 0x4ef   :  { %9100 = vmatprep.subr.bf16.mxu0 %v10090_v62  ;;  %v5906_v62 = vld [vmem:[#allocation11 + $0xd50] sm:$0xff]  ;;  %v9274_v16 = vrot.slane %v11194_v38, %v10901_v33  ;;  %v5799_v60 = vld [vmem:[#allocation11 + $0x9f8] sm:$0xff] }
 0x4f0   :  { %8986 = vmatpush2.bf16.msra.mxu1 %v10311_v39  ;;  %v5567_v39 = vld [vmem:[#allocation11 + $0x2b8] sm:$0xff] }
 0x4f1   :  { %8987 = vmatprep.subr.bf16.mxu1 %v10304_v53  ;;  %v5910_v53 = vld [vmem:[#allocation11 + $0xd70] sm:$0xff]  ;;  %v10169_v12 = vcombine.low %v5563_v58, %v5567_v39 }
 0x4f2   :  { %9101 = vmatpush1.bf16.msra.mxu0 %v10089_v5  ;;  %v10512_v7 = vcombine.high %v5906_v62, %v5910_v53  ;;  %v10511_v11 = vcombine.low %v5906_v62, %v5910_v53  ;;  %v5787_v53 = vld [vmem:[#allocation11 + $0x998] sm:$0xff] }
 0x4f3   :  { %9102 = vmatprep.subr.bf16.mxu0 %v10210_v46  ;;  %v10170_v46 = vcombine.high %v5563_v58, %v5567_v39  ;;  %v10495_v58 = vcombine.low %v5890_v37, %v5894_v32  ;;  %v10402_v39 = vcombine.high %v5795_v26, %v5799_v60  ;;  %v5982_v37 = vld [vmem:[#allocation11 + $0xfb0] sm:$0xff] }
 0x4f4   :  { %8988 = vmatpush2.bf16.msra.mxu1 %v10303_v14  ;;  %v9278_v14 = vrot.slane %v11194_v38, %v10923_v8 }
 0x4f5   :  { %8989 = vmatprep.subr.bf16.mxu1 %v10296_v42 }
 0x4f6   :  { %9103 = vmatpush2.bf16.msra.mxu0 %v10209_v21 }
 0x4f7   :  { %9104 = vmatprep.subr.bf16.mxu0 %v10202_v35  ;;  %v5902_v35 = vld [vmem:[#allocation11 + $0xd30] sm:$0xff] }
 0x4f8   :  { %8990 = vmatpush2.bf16.msra.mxu1 %v10295_v29  ;;  %v5898_v29 = vld [vmem:[#allocation11 + $0xd10] sm:$0xff] }
 0x4f9   :  { %8991 = vmatprep.subr.bf16.mxu1 %v10288_v57 }
 0x4fa   :  { %9105 = vmatpush2.bf16.msra.mxu0 %v10201_v1  ;;  %v9318_v1 = vrot.slane %v9278_v14, %v10901_v33 }
 0x4fb   :  { %9106 = vmatprep.subr.bf16.mxu0 %v10194_v34 }
 0x4fc   :  { %8992 = vmatpush2.bf16.msra.mxu1 %v10287_v27  ;;  %v10162_v27 = vcombine.high %v5555_v4, %v5559_v54 }
 0x4fd   :  { %8993 = vmatprep.subr.bf16.mxu1 %v10280_v47  ;;  %v10504_v47 = vcombine.high %v5898_v29, %v5902_v35 }
 0x4fe   :  { %9107 = vmatpush2.bf16.msra.mxu0 %v10193_v36  ;;  %v10503_v36 = vcombine.low %v5898_v29, %v5902_v35 }
 0x4ff   :  { %9108 = vmatprep.subr.bf16.mxu0 %v10186_v41 }
 0x500   :  { %8994 = vmatpush2.bf16.msra.mxu1 %v10279_v40  ;;  %v10161_v40 = vcombine.low %v5555_v4, %v5559_v54  ;;  %v5866_v54 = vld [vmem:[#allocation11 + $0xc10] sm:$0xff] }
 0x501   :  { %9045 = vmatprep.subr.bf16.mxu1 %v10528_v56 }
 0x502   :  { %9109 = vmatpush2.bf16.msra.mxu0 %v10185_v48 }
 0x503   :  { %8996 = vmatmul.mubr.bf16.vlgmr.msra.gmra.mxu1 %v11106_v45  ;;  %v8751_v20 = vpop.f32.mrf.mxu1  ;;  %9110 = vmatprep.subr.bf16.mxu0 %v10178_v19 }
 0x504   :  { %v8752_v5 = vadd.f32 %v8751_v20, %v11177_v44  ;;  %9046 = vmatpush1.bf16.msra.mxu1 %v10527_v28  ;;  %9077 = vmatprep.mubr.bf16.mxu1 %v11149_v31  ;;  %v9314_v44 = vrot.slane %v9274_v16, %v10901_v33  ;;  %v5882_v28 = vld [vmem:[#allocation11 + $0xc90] sm:$0xff]  ;;  %v5791_v20 = vld [vmem:[#allocation11 + $0x9b8] sm:$0xff] }
 0x505   :  { %v8753_v42 = vpop.f32.mrf.mxu1  ;;  %9047 = vmatprep.subr.bf16.mxu1 %v10520_v50  ;;  %v5886_v50 = vld [vmem:[#allocation11 + $0xcb0] sm:$0xff]  ;;  %v10394_v14 = vcombine.high %v5787_v53, %v5791_v20 }
 0x506   :  { %v9250_v6 = vmul.f32 0.2, %v8752_v5  ;;  %v8754_v21 = vadd.f32 %v8753_v42, %v11181_v59  ;;  %9111 = vmatpush2.bf16.msra.mxu0 %v10177_v24  ;;  %v5551_v59 = vld [vmem:[#allocation11 + $0x238] sm:$0xff]  ;;  %v10488_v62 = vcombine.high %v5882_v28, %v5886_v50  ;;  %v5874_v16 = vld [vmem:[#allocation11 + $0xc50] sm:$0xff]  ;;  %v10401_v24 = vcombine.low %v5795_v26, %v5799_v60 }
 0x507   :  { %v8755_v57 = vpop.f32.mrf.mxu1  ;;  %9112 = vmatprep.subr.bf16.mxu0 %v10170_v46  ;;  %v10154_v55 = vcombine.high %v5547_v63, %v5551_v59  ;;  %v10153_v19 = vcombine.low %v5547_v63, %v5551_v59  ;;  %v5779_v42 = vld [vmem:[#allocation11 + $0x958] sm:$0xff]  ;;  %v5974_v26 = vld [vmem:[#allocation11 + $0xf70] sm:$0xff] }
 0x508   :  { %v9258_v0 = vmax.f32 %v8752_v5, %v9250_v6  ;;  %v9251_v30 = vmul.f32 0.2, %v8754_v21  ;;  %9048 = vmatpush1.bf16.msra.mxu1 %v10519_v52  ;;  %v5878_v52 = vld [vmem:[#allocation11 + $0xc70] sm:$0xff]  ;;  %v10487_v5 = vcombine.low %v5882_v28, %v5886_v50  ;;  %v5763_v63 = vld [vmem:[#allocation11 + $0x8d8] sm:$0xff] }
 0x509   :  { %v8756_v34 = vpop.f32.mrf.mxu1  ;;  %9049 = vmatprep.subr.bf16.mxu1 %v10512_v7  ;;  %v10480_v46 = vcombine.high %v5874_v16, %v5878_v52  ;;  %v5783_v7 = vld [vmem:[#allocation11 + $0x978] sm:$0xff]  ;;  %v5870_v6 = vld [vmem:[#allocation11 + $0xc30] sm:$0xff]  ;;  %v10479_v35 = vcombine.low %v5874_v16, %v5878_v52 }
 0x50a   :  { %v9259_v13 = vmax.f32 %v8754_v21, %v9251_v30  ;;  %9113 = vmatpush2.bf16.msra.mxu0 %v10169_v12  ;;  %v9343_v41 = vmul.f32 %v9314_v44, %v9258_v0  ;;  %v10393_v21 = vcombine.low %v5787_v53, %v5791_v20  ;;  %v10386_v44 = vcombine.high %v5779_v42, %v5783_v7  ;;  %v5775_v12 = vld [vmem:[#allocation11 + $0x938] sm:$0xff]  ;;  %v5986_v30 = vld [vmem:[#allocation11 + $0xfd0] sm:$0xff] }
 0x50b   :  { %9114 = vmatprep.subr.bf16.mxu0 %v10162_v27  ;;  %v10472_v57 = vcombine.high %v5866_v54, %v5870_v6  ;;  %v10471_v34 = vcombine.low %v5866_v54, %v5870_v6  ;;  %v5767_v59 = vld [vmem:[#allocation11 + $0x8f8] sm:$0xff]  ;;  %v5966_v53 = vld [vmem:[#allocation11 + $0xf30] sm:$0xff] }
 0x50c   :  { %v9344_v56 = vmul.f32 %v9318_v1, %v9259_v13  ;;  %9050 = vmatpush1.bf16.msra.mxu1 %v10511_v11  ;;  %v5771_v11 = vld [vmem:[#allocation11 + $0x918] sm:$0xff]  ;;  %v5990_v1 = vld [vmem:[#allocation11 + $0xff0] sm:$0xff]  ;;  %v10369_v60 = vcombine.low %v5763_v63, %v5767_v59 }
 0x50d   :  { %9051 = vmatprep.subr.bf16.mxu1 %v10504_v47  ;;  %v10592_v47 = vcombine.high %v5986_v30, %v5990_v1  ;;  %v5978_v13 = vld [vmem:[#allocation11 + $0xf90] sm:$0xff]  ;;  %v10377_v32 = vcombine.low %v5771_v11, %v5775_v12 }
 0x50e   :  { %v11206_v48 = vadd.f32 %v9344_v56, %v9343_v41  ;;  %9115 = vmatpush2.bf16.msra.mxu0 %v10161_v40  ;;  %v10370_v40 = vcombine.high %v5763_v63, %v5767_v59  ;;  %v10584_v41 = vcombine.high %v5978_v13, %v5982_v37  ;;  %v5755_v56 = vld [vmem:[#allocation11 + $0x898] sm:$0xff]  ;;  %v10583_v28 = vcombine.low %v5978_v13, %v5982_v37 }
 0x50f   :  { %9116 = vmatprep.subr.bf16.mxu0 %v10154_v55  ;;  %v5759_v55 = vld [vmem:[#allocation11 + $0x8b8] sm:$0xff] }
 0x510   :  { %9052 = vmatpush1.bf16.msra.mxu1 %v10503_v36  ;;  %v10591_v36 = vcombine.low %v5986_v30, %v5990_v1  ;;  %v10362_v50 = vcombine.high %v5755_v56, %v5759_v55  ;;  %v10361_v20 = vcombine.low %v5755_v56, %v5759_v55  ;;  %v5843_v37 = vld [vmem:[#allocation11 + $0xb58] sm:$0xff] }
 0x511   :  { %9053 = vmatprep.subr.bf16.mxu1 %v10496_v51  ;;  %v5970_v51 = vld [vmem:[#allocation11 + $0xf50] sm:$0xff] }
 0x512   :  { %9117 = vmatpush2.bf16.msra.mxu0 %v10153_v19  ;;  %v10576_v19 = vcombine.high %v5970_v51, %v5974_v26  ;;  %v10575_v16 = vcombine.low %v5970_v51, %v5974_v26  ;;  %v5835_v26 = vld [vmem:[#allocation11 + $0xb18] sm:$0xff] }
 0x513   :  { %9168 = vmatprep.subr.bf16.mxu0 %v10402_v39  ;;  %v5751_v39 = vld [vmem:[#allocation11 + $0x878] sm:$0xff] }
 0x514   :  { %9054 = vmatpush1.bf16.msra.mxu1 %v10495_v58  ;;  %v5747_v58 = vld [vmem:[#allocation11 + $0x858] sm:$0xff] }
 0x515   :  { %9055 = vmatprep.subr.bf16.mxu1 %v10488_v62  ;;  %v11208_v4 = vpop.f32.mrf.mxu0  ;;  %9119 = vmatmul.mubr.bf16.vlgmr.msra.gmra.mxu0 %v11092_v43  ;;  %v10385_v43 = vcombine.low %v5779_v42, %v5783_v7  ;;  %v5962_v62 = vld [vmem:[#allocation11 + $0xf10] sm:$0xff]  ;;  %v10354_v52 = vcombine.high %v5747_v58, %v5751_v39  ;;  %v10353_v7 = vcombine.low %v5747_v58, %v5751_v39 }
 0x516   :  { %9169 = vmatpush1.bf16.msra.mxu0 %v10401_v24  ;;  %9200 = vmatprep.mubr.bf16.mxu0 %v11117_v15  ;;  %v10378_v15 = vcombine.high %v5771_v11, %v5775_v12  ;;  %v10568_v24 = vcombine.high %v5962_v62, %v5966_v53  ;;  %v5958_v42 = vld [vmem:[#allocation11 + $0xef0] sm:$0xff]  ;;  %v10567_v54 = vcombine.low %v5962_v62, %v5966_v53  ;;  %v5659_v53 = vld [vmem:[#allocation11 + $0x598] sm:$0xff] }
 0x517   :  { %v11212_v29 = vpop.f32.mrf.mxu0  ;;  %9170 = vmatprep.subr.bf16.mxu0 %v10394_v14  ;;  %v5743_v14 = vld [vmem:[#allocation11 + $0x838] sm:$0xff]  ;;  %v5950_v11 = vld [vmem:[#allocation11 + $0xeb0] sm:$0xff] }
 0x518   :  { %9056 = vmatpush1.bf16.msra.mxu1 %v10487_v5  ;;  %v5739_v5 = vld [vmem:[#allocation11 + $0x818] sm:$0xff] }
 0x519   :  { %9057 = vmatprep.subr.bf16.mxu1 %v10480_v46  ;;  %v8878_v0 = vpop.f32.mrf.mxu0  ;;  %v5954_v46 = vld [vmem:[#allocation11 + $0xed0] sm:$0xff]  ;;  %v10346_v6 = vcombine.high %v5739_v5, %v5743_v14  ;;  %v10345_v12 = vcombine.low %v5739_v5, %v5743_v14  ;;  %v5831_v5 = vld [vmem:[#allocation11 + $0xaf8] sm:$0xff] }
 0x51a   :  { %9171 = vmatpush1.bf16.msra.mxu0 %v10393_v21  ;;  %v10560_v21 = vcombine.high %v5954_v46, %v5958_v42  ;;  %v10559_v0 = vcombine.low %v5954_v46, %v5958_v42 }
 0x51b   :  { %v8879_v27 = vpop.f32.mrf.mxu0  ;;  %9172 = vmatprep.subr.bf16.mxu0 %v10386_v44  ;;  %v5863_v44 = vld [vmem:[#allocation11 + $0xbf8] sm:$0xff] }
 0x51c   :  { %9058 = vmatpush1.bf16.msra.mxu1 %v10479_v35  ;;  %v5859_v35 = vld [vmem:[#allocation11 + $0xbd8] sm:$0xff] }
 0x51d   :  { %9059 = vmatprep.subr.bf16.mxu1 %v10472_v57  ;;  %v5946_v57 = vld [vmem:[#allocation11 + $0xe90] sm:$0xff]  ;;  %v10466_v30 = vcombine.high %v5859_v35, %v5863_v44  ;;  %v5855_v27 = vld [vmem:[#allocation11 + $0xbb8] sm:$0xff] }
 0x51e   :  { %9173 = vmatpush1.bf16.msra.mxu0 %v10385_v43  ;;  %v10552_v1 = vcombine.high %v5946_v57, %v5950_v11  ;;  %v5851_v43 = vld [vmem:[#allocation11 + $0xb98] sm:$0xff]  ;;  %v10551_v63 = vcombine.low %v5946_v57, %v5950_v11 }
 0x51f   :  { %9174 = vmatprep.subr.bf16.mxu0 %v10378_v15  ;;  %v5942_v15 = vld [vmem:[#allocation11 + $0xe70] sm:$0xff]  ;;  %v10458_v59 = vcombine.high %v5851_v43, %v5855_v27  ;;  %v5655_v57 = vld [vmem:[#allocation11 + $0x578] sm:$0xff] }
 0x520   :  { %9060 = vmatpush1.bf16.msra.mxu1 %v10471_v34  ;;  %v5938_v34 = vld [vmem:[#allocation11 + $0xe50] sm:$0xff] }
 0x521   :  { %9061 = vmatprep.subr.bf16.mxu1 %v10592_v47  ;;  %v10465_v47 = vcombine.low %v5859_v35, %v5863_v44  ;;  %v10544_v13 = vcombine.high %v5938_v34, %v5942_v15  ;;  %v10543_v56 = vcombine.low %v5938_v34, %v5942_v15  ;;  %v5651_v44 = vld [vmem:[#allocation11 + $0x558] sm:$0xff] }
 0x522   :  { %9175 = vmatpush1.bf16.msra.mxu0 %v10377_v32  ;;  %v5847_v32 = vld [vmem:[#allocation11 + $0xb78] sm:$0xff] }
 0x523   :  { %9176 = vmatprep.subr.bf16.mxu0 %v10370_v40  ;;  %v5934_v40 = vld [vmem:[#allocation11 + $0xe30] sm:$0xff]  ;;  %v10450_v55 = vcombine.high %v5843_v37, %v5847_v32  ;;  %v5815_v34 = vld [vmem:[#allocation11 + $0xa78] sm:$0xff] }
 0x524   :  { %9062 = vmatpush2.bf16.msra.mxu1 %v10591_v36  ;;  %v5930_v36 = vld [vmem:[#allocation11 + $0xe10] sm:$0xff] }
 0x525   :  { %9063 = vmatprep.subr.bf16.mxu1 %v10584_v41  ;;  %v10457_v41 = vcombine.low %v5851_v43, %v5855_v27  ;;  %v10536_v51 = vcombine.high %v5930_v36, %v5934_v40  ;;  %v10535_v58 = vcombine.low %v5930_v36, %v5934_v40  ;;  %v10258_v27 = vcombine.high %v5651_v44, %v5655_v57 }
 0x526   :  { %9177 = vmatpush1.bf16.msra.mxu0 %v10369_v60  ;;  %v5839_v60 = vld [vmem:[#allocation11 + $0xb38] sm:$0xff] }
 0x527   :  { %9178 = vmatprep.subr.bf16.mxu0 %v10362_v50  ;;  %v5671_v50 = vld [vmem:[#allocation11 + $0x5f8] sm:$0xff]  ;;  %v10442_v39 = vcombine.high %v5835_v26, %v5839_v60  ;;  %v10441_v14 = vcombine.low %v5835_v26, %v5839_v60 }
 0x528   :  { %9064 = vmatpush2.bf16.msra.mxu1 %v10583_v28  ;;  %v5667_v28 = vld [vmem:[#allocation11 + $0x5d8] sm:$0xff] }
 0x529   :  { %9065 = vmatprep.subr.bf16.mxu1 %v10576_v19  ;;  %v10449_v19 = vcombine.low %v5843_v37, %v5847_v32  ;;  %v10274_v62 = vcombine.high %v5667_v28, %v5671_v50  ;;  %v10273_v42 = vcombine.low %v5667_v28, %v5671_v50  ;;  %v10257_v37 = vcombine.low %v5651_v44, %v5655_v57  ;;  %v5627_v50 = vld [vmem:[#allocation11 + $0x498] sm:$0xff] }
 0x52a   :  { %9179 = vmatpush1.bf16.msra.mxu0 %v10361_v20  ;;  %v11214_v20 = vld [vmem:[#allocation13] sm:$0xff] }
 0x52b   :  { %9180 = vmatprep.subr.bf16.mxu0 %v10354_v52  ;;  %v5663_v52 = vld [vmem:[#allocation11 + $0x5b8] sm:$0xff]  ;;  %v6009_v46 = vrot.slane %v11214_v20, %v10926_v10 }
 0x52c   :  { %9066 = vmatpush2.bf16.msra.mxu1 %v10575_v16  ;;  %v6005_v16 = vrot.slane %v11214_v20, %v10923_v8 }
 0x52d   :  { %9067 = vmatprep.subr.bf16.mxu1 %v10568_v24  ;;  %v5827_v24 = vld [vmem:[#allocation11 + $0xad8] sm:$0xff]  ;;  %v8795_v10 = vadd.f32 %v11189_v61, %v6009_v46 }
 0x52e   :  { %9181 = vmatpush1.bf16.msra.mxu0 %v10353_v7  ;;  %v10266_v7 = vcombine.high %v5659_v53, %v5663_v52  ;;  %v8793_v35 = vadd.f32 %v11185_v25, %v6005_v16  ;;  %v5811_v25 = vld [vmem:[#allocation11 + $0xa58] sm:$0xff] }
 0x52f   :  { %9182 = vmatprep.subr.bf16.mxu0 %v10346_v6  ;;  %v5819_v6 = vld [vmem:[#allocation11 + $0xa98] sm:$0xff] }
 0x530   :  { %9068 = vmatpush2.bf16.msra.mxu1 %v10567_v54  ;;  %v10434_v54 = vcombine.high %v5827_v24, %v5831_v5 }
 0x531   :  { %9069 = vmatprep.subr.bf16.mxu1 %v10560_v21  ;;  %v5823_v21 = vld [vmem:[#allocation11 + $0xab8] sm:$0xff] }
 0x532   :  { %9183 = vmatpush1.bf16.msra.mxu0 %v10345_v12  ;;  %v10265_v12 = vcombine.low %v5659_v53, %v5663_v52  ;;  %v10425_v61 = vcombine.low %v5819_v6, %v5823_v21  ;;  %v5623_v53 = vld [vmem:[#allocation11 + $0x478] sm:$0xff] }
 0x533   :  { %9184 = vmatprep.subr.bf16.mxu0 %v10466_v30 }
 0x534   :  { %9070 = vmatpush2.bf16.msra.mxu1 %v10559_v0  ;;  %v10433_v0 = vcombine.low %v5827_v24, %v5831_v5  ;;  %v5611_v5 = vld [vmem:[#allocation11 + $0x418] sm:$0xff] }
 0x535   :  { %9071 = vmatprep.subr.bf16.mxu1 %v10552_v1  ;;  %v10426_v1 = vcombine.high %v5819_v6, %v5823_v21  ;;  %v5731_v6 = vld [vmem:[#allocation11 + $0x7d8] sm:$0xff] }
 0x536   :  { %9185 = vmatpush2.bf16.msra.mxu0 %v10465_v47  ;;  %v5643_v47 = vld [vmem:[#allocation11 + $0x518] sm:$0xff] }
 0x537   :  { %9186 = vmatprep.subr.bf16.mxu0 %v10458_v59  ;;  %v5735_v21 = vld [vmem:[#allocation11 + $0x7f8] sm:$0xff] }
 0x538   :  { %9072 = vmatpush2.bf16.msra.mxu1 %v10551_v63  ;;  %v5647_v63 = vld [vmem:[#allocation11 + $0x538] sm:$0xff]  ;;  %v10338_v57 = vcombine.high %v5731_v6, %v5735_v21 }
 0x539   :  { %9073 = vmatprep.subr.bf16.mxu1 %v10544_v13  ;;  %v10250_v40 = vcombine.high %v5643_v47, %v5647_v63  ;;  %v10249_v26 = vcombine.low %v5643_v47, %v5647_v63  ;;  %v5699_v47 = vld [vmem:[#allocation11 + $0x6d8] sm:$0xff] }
 0x53a   :  { %9187 = vmatpush2.bf16.msra.mxu0 %v10457_v41  ;;  %v5803_v41 = vld [vmem:[#allocation11 + $0xa18] sm:$0xff] }
 0x53b   :  { %9188 = vmatprep.subr.bf16.mxu0 %v10450_v55  ;;  %v5635_v55 = vld [vmem:[#allocation11 + $0x4d8] sm:$0xff] }
 0x53c   :  { %9074 = vmatpush2.bf16.msra.mxu1 %v10543_v56  ;;  %v5807_v56 = vld [vmem:[#allocation11 + $0xa38] sm:$0xff] }
 0x53d   :  { %9075 = vmatprep.subr.bf16.mxu1 %v10536_v51  ;;  %v5639_v51 = vld [vmem:[#allocation11 + $0x4f8] sm:$0xff]  ;;  %v10410_v60 = vcombine.high %v5803_v41, %v5807_v56 }
 0x53e   :  { %9189 = vmatpush2.bf16.msra.mxu0 %v10449_v19  ;;  %v10242_v28 = vcombine.high %v5635_v55, %v5639_v51  ;;  %v5631_v19 = vld [vmem:[#allocation11 + $0x4b8] sm:$0xff] }
 0x53f   :  { %9190 = vmatprep.subr.bf16.mxu0 %v10442_v39  ;;  %v10234_v39 = vcombine.high %v5627_v50, %v5631_v19  ;;  %v10233_v16 = vcombine.low %v5627_v50, %v5631_v19  ;;  %v5703_v63 = vld [vmem:[#allocation11 + $0x6f8] sm:$0xff] }
 0x540   :  { %9076 = vmatpush2.bf16.msra.mxu1 %v10535_v58  ;;  %v10241_v58 = vcombine.low %v5635_v55, %v5639_v51  ;;  %v5923_v50 = vld [vmem:[#allocation11 + $0xdd8] sm:$0xff] }
 0x541   :  { %9127 = vmatprep.subr.bf16.mxu1 %v10274_v62  ;;  %v5619_v62 = vld [vmem:[#allocation11 + $0x458] sm:$0xff] }
 0x542   :  { %9191 = vmatpush2.bf16.msra.mxu0 %v10441_v14  ;;  %v10226_v52 = vcombine.high %v5619_v62, %v5623_v53  ;;  %v5615_v14 = vld [vmem:[#allocation11 + $0x438] sm:$0xff] }
 0x543   :  { %v8833_v11 = vpop.f32.mrf.mxu1  ;;  %9078 = vmatmul.mubr.bf16.vlgmr.msra.gmra.mxu1 %v11151_v3  ;;  %9192 = vmatprep.subr.bf16.mxu0 %v10434_v54  ;;  %v10217_v44 = vcombine.low %v5611_v5, %v5615_v14  ;;  %v5927_v19 = vld [vmem:[#allocation11 + $0xdf8] sm:$0xff] }
 0x544   :  { %v8834_v30 = vadd.f32 %v8833_v11, %v8793_v35  ;;  %9128 = vmatpush1.bf16.msra.mxu1 %v10273_v42  ;;  %9159 = vmatprep.mubr.bf16.mxu1 %v11081_v49  ;;  %v10418_v49 = vcombine.high %v5811_v25, %v5815_v34  ;;  %v10225_v42 = vcombine.low %v5619_v62, %v5623_v53  ;;  %v5723_v11 = vld [vmem:[#allocation11 + $0x798] sm:$0xff] }
 0x545   :  { %v8835_v43 = vpop.f32.mrf.mxu1  ;;  %9129 = vmatprep.subr.bf16.mxu1 %v10266_v7  ;;  %v10218_v7 = vcombine.high %v5611_v5, %v5615_v14  ;;  %v5919_v62 = vld [vmem:[#allocation11 + $0xdb8] sm:$0xff]  ;;  %v10529_v53 = vcombine.low %v5923_v50, %v5927_v19 }
 0x546   :  { %v8836_v15 = vadd.f32 %v8835_v43, %v8795_v10  ;;  %v11225_v59 = vadd.f32 %v11208_v4, %v8834_v30  ;;  %9193 = vmatpush2.bf16.msra.mxu0 %v10433_v0  ;;  %v10417_v4 = vcombine.low %v5811_v25, %v5815_v34  ;;  %v5715_v10 = vld [vmem:[#allocation11 + $0x758] sm:$0xff] }
 0x547   :  { %v8837_v13 = vpop.f32.mrf.mxu1  ;;  %9194 = vmatprep.subr.bf16.mxu0 %v10426_v1  ;;  %v5719_v30 = vld [vmem:[#allocation11 + $0x778] sm:$0xff] }
 0x548   :  { %9130 = vmatpush1.bf16.msra.mxu1 %v10265_v12  ;;  %v11228_v32 = vadd.f32 %v11212_v29, %v8836_v15  ;;  %v10409_v29 = vcombine.low %v5803_v41, %v5807_v56  ;;  %v5727_v12 = vld [vmem:[#allocation11 + $0x7b8] sm:$0xff]  ;;  %v10322_v43 = vcombine.high %v5715_v10, %v5719_v30  ;;  %v10321_v34 = vcombine.low %v5715_v10, %v5719_v30 }
 0x549   :  { %v8838_v36 = vpop.f32.mrf.mxu1  ;;  %9131 = vmatprep.subr.bf16.mxu1 %v10258_v27  ;;  %v10330_v0 = vcombine.high %v5723_v11, %v5727_v12  ;;  %v10329_v1 = vcombine.low %v5723_v11, %v5727_v12  ;;  %v5707_v27 = vld [vmem:[#allocation11 + $0x718] sm:$0xff] }
 0x54a   :  { %9195 = vmatpush2.bf16.msra.mxu0 %v10425_v61  ;;  %v5711_v25 = vld [vmem:[#allocation11 + $0x738] sm:$0xff]  ;;  %v10306_v61 = vcombine.high %v5699_v47, %v5703_v63  ;;  %v10305_v36 = vcombine.low %v5699_v47, %v5703_v63 }
 0x54b   :  { %9196 = vmatprep.subr.bf16.mxu0 %v10418_v49  ;;  %v10314_v15 = vcombine.high %v5707_v27, %v5711_v25  ;;  %v10313_v13 = vcombine.low %v5707_v27, %v5711_v25  ;;  %v5695_v49 = vld [vmem:[#allocation11 + $0x6b8] sm:$0xff] }
 0x54c   :  { %9132 = vmatpush1.bf16.msra.mxu1 %v10257_v37  ;;  %v5691_v37 = vld [vmem:[#allocation11 + $0x698] sm:$0xff] }
 0x54d   :  { %9133 = vmatprep.subr.bf16.mxu1 %v10250_v40  ;;  %v10298_v40 = vcombine.high %v5691_v37, %v5695_v49  ;;  %v5683_v41 = vld [vmem:[#allocation11 + $0x658] sm:$0xff]  ;;  %v10297_v55 = vcombine.low %v5691_v37, %v5695_v49 }
 0x54e   :  { %9197 = vmatpush2.bf16.msra.mxu0 %v10417_v4  ;;  %v5687_v56 = vld [vmem:[#allocation11 + $0x678] sm:$0xff] }
 0x54f   :  { %9198 = vmatprep.subr.bf16.mxu0 %v10410_v60  ;;  %v10290_v51 = vcombine.high %v5683_v41, %v5687_v56  ;;  %v5675_v4 = vld [vmem:[#allocation11 + $0x618] sm:$0xff]  ;;  %v10289_v60 = vcombine.low %v5683_v41, %v5687_v56 }
 0x550   :  { %9134 = vmatpush1.bf16.msra.mxu1 %v10249_v26  ;;  %v5679_v26 = vld [vmem:[#allocation11 + $0x638] sm:$0xff] }
 0x551   :  { %9135 = vmatprep.subr.bf16.mxu1 %v10242_v28  ;;  %v10282_v28 = vcombine.high %v5675_v4, %v5679_v26  ;;  %v5907_v5 = vld [vmem:[#allocation11 + $0xd58] sm:$0xff] }
 0x552   :  { %9199 = vmatpush2.bf16.msra.mxu0 %v10409_v29  ;;  %v10281_v29 = vcombine.low %v5675_v4, %v5679_v26  ;;  %v5911_v14 = vld [vmem:[#allocation11 + $0xd78] sm:$0xff] }
 0x553   :  { %v5899_v12 = vld [vmem:[#allocation11 + $0xd18] sm:$0xff] }
 0x554   :  { %9136 = vmatpush1.bf16.msra.mxu1 %v10241_v58  ;;  %v10530_v58 = vcombine.high %v5923_v50, %v5927_v19  ;;  %v5891_v27 = vld [vmem:[#allocation11 + $0xcd8] sm:$0xff] }
 0x555   :  { %9137 = vmatprep.subr.bf16.mxu1 %v10234_v39  ;;  %v11230_v24 = vpop.f32.mrf.mxu0  ;;  %9201 = vmatmul.mubr.bf16.vlgmr.msra.gmra.mxu0 %v11125_v9  ;;  %v10337_v9 = vcombine.low %v5731_v6, %v5735_v21  ;;  %v5915_v39 = vld [vmem:[#allocation11 + $0xd98] sm:$0xff] }
 0x556   :  { %v10521_v6 = vcombine.low %v5915_v39, %v5919_v62  ;;  %v5895_v25 = vld [vmem:[#allocation11 + $0xcf8] sm:$0xff] }
 0x557   :  { %v11233_v46 = vpop.f32.mrf.mxu0  ;;  %v10498_v47 = vcombine.high %v5891_v27, %v5895_v25  ;;  %v10497_v37 = vcombine.low %v5891_v27, %v5895_v25  ;;  %v5987_v50 = vld [vmem:[#allocation11 + $0xfd8] sm:$0xff] }
 0x558   :  { %9138 = vmatpush1.bf16.msra.mxu1 %v10233_v16  ;;  %v10522_v16 = vcombine.high %v5915_v39, %v5919_v62  ;;  %v5991_v19 = vld [vmem:[#allocation11 + $0xff8] sm:$0xff] }
 0x559   :  { %9139 = vmatprep.subr.bf16.mxu1 %v10226_v52  ;;  %v8960_v54 = vpop.f32.mrf.mxu0  ;;  %v9282_v52 = vrot.slane %v11194_v38, %v10951_v18  ;;  %v10594_v39 = vcombine.high %v5987_v50, %v5991_v19  ;;  %v5979_v62 = vld [vmem:[#allocation11 + $0xf98] sm:$0xff] }
 0x55a   :  { %v9286_v54 = vrot.slane %v11194_v38, %v10978_v17 }
 0x55b   :  { %v8961_v35 = vpop.f32.mrf.mxu0 }
 0x55c   :  { %9140 = vmatpush1.bf16.msra.mxu1 %v10225_v42  ;;  %v10514_v35 = vcombine.high %v5907_v5, %v5911_v14  ;;  %v9326_v10 = vrot.slane %v9286_v54, %v10901_v33  ;;  %v5963_v54 = vld [vmem:[#allocation11 + $0xf18] sm:$0xff] }
 0x55d   :  { %9141 = vmatprep.subr.bf16.mxu1 %v10218_v7 }
 0x560   :  { %9142 = vmatpush1.bf16.msra.mxu1 %v10217_v44 }
 0x561   :  { %9143 = vmatprep.subr.bf16.mxu1 %v10338_v57  ;;  %v9322_v57 = vrot.slane %v9282_v52, %v10901_v33 }
 0x564   :  { %9144 = vmatpush2.bf16.msra.mxu1 %v10337_v9  ;;  %v5903_v9 = vld [vmem:[#allocation11 + $0xd38] sm:$0xff] }
 0x565   :  { %9145 = vmatprep.subr.bf16.mxu1 %v10330_v0  ;;  %v10506_v38 = vcombine.high %v5899_v12, %v5903_v9 }
 0x568   :  { %9146 = vmatpush2.bf16.msra.mxu1 %v10329_v1 }
 0x569   :  { %9147 = vmatprep.subr.bf16.mxu1 %v10322_v43 }
 0x56c   :  { %9148 = vmatpush2.bf16.msra.mxu1 %v10321_v34 }
 0x56d   :  { %9149 = vmatprep.subr.bf16.mxu1 %v10314_v15 }
 0x570   :  { %9150 = vmatpush2.bf16.msra.mxu1 %v10313_v13  ;;  %v5883_v13 = vld [vmem:[#allocation11 + $0xc98] sm:$0xff] }
 0x571   :  { %9151 = vmatprep.subr.bf16.mxu1 %v10306_v61  ;;  %v5887_v61 = vld [vmem:[#allocation11 + $0xcb8] sm:$0xff] }
 0x572   :  { %v10490_v49 = vcombine.high %v5883_v13, %v5887_v61  ;;  %v10489_v41 = vcombine.low %v5883_v13, %v5887_v61 }
 0x574   :  { %9152 = vmatpush2.bf16.msra.mxu1 %v10305_v36  ;;  %v5875_v36 = vld [vmem:[#allocation11 + $0xc58] sm:$0xff] }
 0x575   :  { %9153 = vmatprep.subr.bf16.mxu1 %v10298_v40  ;;  %v5879_v40 = vld [vmem:[#allocation11 + $0xc78] sm:$0xff] }
 0x576   :  { %v10482_v56 = vcombine.high %v5875_v36, %v5879_v40  ;;  %v10481_v26 = vcombine.low %v5875_v36, %v5879_v40 }
 0x578   :  { %9154 = vmatpush2.bf16.msra.mxu1 %v10297_v55  ;;  %v5867_v55 = vld [vmem:[#allocation11 + $0xc18] sm:$0xff] }
 0x579   :  { %9155 = vmatprep.subr.bf16.mxu1 %v10290_v51  ;;  %v5871_v51 = vld [vmem:[#allocation11 + $0xc38] sm:$0xff] }
 0x57c   :  { %9156 = vmatpush2.bf16.msra.mxu1 %v10289_v60  ;;  %v10474_v60 = vcombine.high %v5867_v55, %v5871_v51 }
 0x57d   :  { %9157 = vmatprep.subr.bf16.mxu1 %v10282_v28 }
 0x580   :  { %9158 = vmatpush2.bf16.msra.mxu1 %v10281_v29 }
 0x581   :  { %9209 = vmatprep.subr.bf16.mxu1 %v10530_v58  ;;  %v10473_v58 = vcombine.low %v5867_v55, %v5871_v51 }
 0x583   :  { %v8915_v42 = vpop.f32.mrf.mxu1  ;;  %9160 = vmatmul.mubr.bf16.vlgmr.msra.gmra.mxu1 %v11106_v45 }
 0x584   :  { %v8916_v7 = vadd.f32 %v8915_v42, %v11225_v59  ;;  %9210 = vmatpush1.bf16.msra.mxu1 %v10529_v53  ;;  %9241 = vmatprep.mubr.bf16.mxu1 %v11149_v31  ;;  %v10513_v31 = vcombine.low %v5907_v5, %v5911_v14  ;;  %v5983_v53 = vld [vmem:[#allocation11 + $0xfb8] sm:$0xff] }
 0x585   :  { %v8917_v21 = vpop.f32.mrf.mxu1  ;;  %9211 = vmatprep.subr.bf16.mxu1 %v10522_v16  ;;  %v10593_v16 = vcombine.low %v5987_v50, %v5991_v19  ;;  %v10586_v52 = vcombine.high %v5979_v62, %v5983_v53  ;;  %v5971_v5 = vld [vmem:[#allocation11 + $0xf58] sm:$0xff]  ;;  %v10585_v42 = vcombine.low %v5979_v62, %v5983_v53 }
 0x586   :  { %v9252_v44 = vmul.f32 0.2, %v8916_v7  ;;  %v8918_v11 = vadd.f32 %v8917_v21, %v11228_v32  ;;  %v10505_v32 = vcombine.low %v5899_v12, %v5903_v9  ;;  %v5975_v14 = vld [vmem:[#allocation11 + $0xf78] sm:$0xff] }
 0x587   :  { %v8919_v45 = vpop.f32.mrf.mxu1  ;;  %v10577_v21 = vcombine.low %v5971_v5, %v5975_v14  ;;  %v5947_v9 = vld [vmem:[#allocation11 + $0xe98] sm:$0xff] }
 0x588   :  { %v9260_v0 = vmax.f32 %v8916_v7, %v9252_v44  ;;  %v9253_v59 = vmul.f32 0.2, %v8918_v11  ;;  %9212 = vmatpush1.bf16.msra.mxu1 %v10521_v6  ;;  %v10578_v7 = vcombine.high %v5971_v5, %v5975_v14  ;;  %v5967_v6 = vld [vmem:[#allocation11 + $0xf38] sm:$0xff] }
 0x589   :  { %v8920_v30 = vpop.f32.mrf.mxu1  ;;  %9213 = vmatprep.subr.bf16.mxu1 %v10514_v35  ;;  %v10570_v35 = vcombine.high %v5963_v54, %v5967_v6  ;;  %v5955_v44 = vld [vmem:[#allocation11 + $0xed8] sm:$0xff] }
 0x58a   :  { %v9345_v1 = vmul.f32 %v9322_v57, %v9260_v0  ;;  %v9261_v43 = vmax.f32 %v8918_v11, %v9253_v59  ;;  %v5959_v57 = vld [vmem:[#allocation11 + $0xef8] sm:$0xff]  ;;  %v10569_v11 = vcombine.low %v5963_v54, %v5967_v6 }
 0x58b   :  { %v10562_v12 = vcombine.high %v5955_v44, %v5959_v57  ;;  %v5951_v45 = vld [vmem:[#allocation11 + $0xeb8] sm:$0xff]  ;;  %v10561_v0 = vcombine.low %v5955_v44, %v5959_v57 }
 0x58c   :  { %v9352_v34 = vadd.f32 %v11206_v48, %v9345_v1  ;;  %v9346_v15 = vmul.f32 %v9326_v10, %v9261_v43  ;;  %9214 = vmatpush1.bf16.msra.mxu1 %v10513_v31  ;;  %v10554_v59 = vcombine.high %v5947_v9, %v5951_v45  ;;  %v5939_v10 = vld [vmem:[#allocation11 + $0xe58] sm:$0xff]  ;;  %v10553_v30 = vcombine.low %v5947_v9, %v5951_v45 }
 0x58d   :  { %9215 = vmatprep.subr.bf16.mxu1 %v10506_v38  ;;  %v5943_v31 = vld [vmem:[#allocation11 + $0xe78] sm:$0xff] }
 0x58e   :  { %v11246_v63 = vadd.f32 %v9352_v34, %v9346_v15  ;;  %v10546_v38 = vcombine.high %v5939_v10, %v5943_v31  ;;  %v5931_v1 = vld [vmem:[#allocation11 + $0xe18] sm:$0xff]  ;;  %v10545_v27 = vcombine.low %v5939_v10, %v5943_v31  ;;  %v6013_v15 = vrot.slane %v11214_v20, %v10951_v18 }
 0x58f   :  { %v5935_v43 = vld [vmem:[#allocation11 + $0xe38] sm:$0xff] }
 0x590   :  { %9216 = vmatpush1.bf16.msra.mxu1 %v10505_v32  ;;  %v10538_v25 = vcombine.high %v5931_v1, %v5935_v43  ;;  %v10537_v34 = vcombine.low %v5931_v1, %v5935_v43  ;;  %v6017_v32 = vrot.slane %v11214_v20, %v10954_v23 }
 0x591   :  { %9217 = vmatprep.subr.bf16.mxu1 %v10498_v47  ;;  %v8957_v47 = vadd.f32 %v11230_v24, %v6013_v15  ;;  %v9268_v24 = vunpack.c.h.bf16 %v11191_v2 }
 0x592   :  { %v8959_v61 = vadd.f32 %v11233_v46, %v6017_v32 }
 0x593   :  { %v9294_v46 = vrot.slane %v9268_v24, %v10923_v8  ;;  %v9298_v31 = vrot.slane %v9268_v24, %v10951_v18  ;;  %v9302_v1 = vrot.slane %v9268_v24, %v10978_v17 }
 0x594   :  { %9218 = vmatpush1.bf16.msra.mxu1 %v10497_v37 }
 0x595   :  { %9219 = vmatprep.subr.bf16.mxu1 %v10490_v49  ;;  %v11248_v48 = vpop.f32.mrf.mxu0  ;;  %v9334_v53 = vrot.slane %v9294_v46, %v10901_v33  ;;  %v9342_v32 = vrot.slane %v9302_v1, %v10901_v33 }
 0x597   :  { %v11250_v4 = vpop.f32.mrf.mxu0 }
 0x598   :  { %9220 = vmatpush1.bf16.msra.mxu1 %v10489_v41 }
 0x599   :  { %9221 = vmatprep.subr.bf16.mxu1 %v10482_v56  ;;  %v9042_v28 = vpop.f32.mrf.mxu0 }
 0x59a   :  { %v9290_v28 = vrot.slane %v9268_v24, %v10901_v33 }
 0x59b   :  { %v9043_v29 = vpop.f32.mrf.mxu0 }
 0x59c   :  { %9222 = vmatpush1.bf16.msra.mxu1 %v10481_v26 }
 0x59d   :  { %9223 = vmatprep.subr.bf16.mxu1 %v10474_v60 }
 0x5a0   :  { %9224 = vmatpush1.bf16.msra.mxu1 %v10473_v58 }
 0x5a1   :  { %9225 = vmatprep.subr.bf16.mxu1 %v10594_v39 }
 0x5a4   :  { %9226 = vmatpush2.bf16.msra.mxu1 %v10593_v16 }
 0x5a5   :  { %9227 = vmatprep.subr.bf16.mxu1 %v10586_v52 }
 0x5a8   :  { %9228 = vmatpush2.bf16.msra.mxu1 %v10585_v42 }
 0x5a9   :  { %9229 = vmatprep.subr.bf16.mxu1 %v10578_v7 }
 0x5ac   :  { %9230 = vmatpush2.bf16.msra.mxu1 %v10577_v21  ;;  %v6021_v21 = vrot.slane %v11214_v20, %v10978_v17 }
 0x5ad   :  { %9231 = vmatprep.subr.bf16.mxu1 %v10570_v35  ;;  %v6025_v35 = vrot.slane %v11214_v20, %v10981_v22  ;;  %v9338_v22 = vrot.slane %v9298_v31, %v10901_v33 }
 0x5b0   :  { %9232 = vmatpush2.bf16.msra.mxu1 %v10569_v11 }
 0x5b1   :  { %9233 = vmatprep.subr.bf16.mxu1 %v10562_v12 }
 0x5b4   :  { %9234 = vmatpush2.bf16.msra.mxu1 %v10561_v0 }
 0x5b5   :  { %9235 = vmatprep.subr.bf16.mxu1 %v10554_v59 }
 0x5b8   :  { %9236 = vmatpush2.bf16.msra.mxu1 %v10553_v30 }
 0x5b9   :  { %9237 = vmatprep.subr.bf16.mxu1 %v10546_v38 }
 0x5bc   :  { %9238 = vmatpush2.bf16.msra.mxu1 %v10545_v27 }
 0x5bd   :  { %9239 = vmatprep.subr.bf16.mxu1 %v10538_v25 }
 0x5c0   :  { %9240 = vmatpush2.bf16.msra.mxu1 %v10537_v34 }
 0x5c3   :  { %v8997_v13 = vpop.f32.mrf.mxu1  ;;  %9242 = vmatmul.mubr.bf16.vlgmr.msra.gmra.mxu1 %v11151_v3 }
 0x5c4   :  { %v8998_v37 = vadd.f32 %v8997_v13, %v8957_v47 }
 0x5c5   :  { %v8999_v49 = vpop.f32.mrf.mxu1 }
 0x5c6   :  { %v9000_v36 = vadd.f32 %v8999_v49, %v8959_v61  ;;  %v9039_v40 = vadd.f32 %v11248_v48, %v8998_v37  ;;  %v9330_v48 = vrot.slane %v9290_v28, %v10901_v33 }
 0x5c7   :  { %v9001_v41 = vpop.f32.mrf.mxu1 }
 0x5c8   :  { %v9041_v56 = vadd.f32 %v11250_v4, %v9000_v36  ;;  %v10595_v36 = vld [vmem:[#allocation2] ss:$0 sm:$0xff] }
 0x5c9   :  { %v9002_v55 = vpop.f32.mrf.mxu1 }
 0x5d5   :  { %v9120_v51 = vpop.f32.mrf.mxu0 }
 0x5d6   :  { %v9121_v44 = vadd.f32 %v9120_v51, %v6021_v21 }
 0x5d7   :  { %v9122_v26 = vpop.f32.mrf.mxu0 }
 0x5d8   :  { %v9123_v11 = vadd.f32 %v9122_v26, %v6025_v35 }
 0x5d9   :  { %v9124_v23 = vpop.f32.mrf.mxu0 }
 0x5db   :  { %v9125_v60 = vpop.f32.mrf.mxu0 }
 0x603   :  { %v9079_v3 = vpop.f32.mrf.mxu1 }
 0x604   :  { %v9080_v50 = vadd.f32 %v9079_v3, %v9039_v40 }
 0x605   :  { %v9081_v19 = vpop.f32.mrf.mxu1 }
 0x606   :  { %v9254_v29 = vmul.f32 0.2, %v9080_v50  ;;  %v9082_v58 = vadd.f32 %v9081_v19, %v9041_v56 }
 0x607   :  { %v9083_v39 = vpop.f32.mrf.mxu1 }
 0x608   :  { %v9262_v4 = vmax.f32 %v9080_v50, %v9254_v29  ;;  %v9255_v62 = vmul.f32 0.2, %v9082_v58 }
 0x609   :  { %v9084_v16 = vpop.f32.mrf.mxu1 }
 0x60a   :  { %v9347_v52 = vmul.f32 %v9330_v48, %v9262_v4  ;;  %v9263_v5 = vmax.f32 %v9082_v58, %v9255_v62 }
 0x60c   :  { %v9348_v2 = vmul.f32 %v9334_v53, %v9263_v5  ;;  %v9354_v14 = vadd.f32 %v11246_v63, %v9347_v52 }
 0x60e   :  { %v9355_v42 = vadd.f32 %v9354_v14, %v9348_v2 }
 0x615   :  { %v9202_v7 = vpop.f32.mrf.mxu0 }
 0x617   :  { %v9204_v54 = vpop.f32.mrf.mxu0 }
 0x619   :  { %v9206_v8 = vpop.f32.mrf.mxu0 }
 0x61b   :  { %v9207_v6 = vpop.f32.mrf.mxu0 }
 0x643   :  { %v9161_v57 = vpop.f32.mrf.mxu1 }
 0x644   :  { %v9162_v12 = vadd.f32 %v9161_v57, %v9121_v44 }
 0x645   :  { %v9163_v9 = vpop.f32.mrf.mxu1 }
 0x646   :  { %v9164_v45 = vadd.f32 %v9163_v9, %v9123_v11  ;;  %v9203_v0 = vadd.f32 %v9202_v7, %v9162_v12 }
 0x647   :  { %v9165_v59 = vpop.f32.mrf.mxu1 }
 0x648   :  { %v9205_v63 = vadd.f32 %v9204_v54, %v9164_v45 }
 0x649   :  { %v9166_v10 = vpop.f32.mrf.mxu1 }
 0x683   :  { %v9243_v30 = vpop.f32.mrf.mxu1 }
 0x684   :  { %v9244_v38 = vadd.f32 %v9243_v30, %v9203_v0 }
 0x685   :  { %v9245_v43 = vpop.f32.mrf.mxu1 }
 0x686   :  { %v9256_v27 = vmul.f32 0.2, %v9244_v38  ;;  %v9246_v25 = vadd.f32 %v9245_v43, %v9205_v63 }
 0x687   :  { %v9247_v20 = vpop.f32.mrf.mxu1 }
 0x688   :  { %v9264_v34 = vmax.f32 %v9244_v38, %v9256_v27  ;;  %v9257_v15 = vmul.f32 0.2, %v9246_v25 }
 0x689   :  { %v9248_v47 = vpop.f32.mrf.mxu1 }
 0x68a   :  { %v9265_v13 = vmax.f32 %v9246_v25, %v9257_v15  ;;  %v9349_v61 = vmul.f32 %v9338_v22, %v9264_v34 }
 0x68c   :  { %v9350_v37 = vmul.f32 %v9342_v32, %v9265_v13  ;;  %v9356_v49 = vadd.f32 %v9355_v42, %v9349_v61 }
 0x68e   :  { %v9357_v18 = vadd.f32 %v9356_v49, %v9350_v37 }
 0x690   :  { %9358 = vadd.xlane.f32.xlu0 %v9357_v18 }
 0x719   :  { %v9359_v40 = vpop.xlane.xlu0 %9358 }
 0x71a   :  { %v9367_v17 = vadd.f32 %v10595_v36, %v9359_v40 }
 0x71c   :  { %9369 = vst.msk [vmem:[%s11287_s9] sm:$0xff] %vm9368_vm0, %v9367_v17 }
 0x71d   :  { %9374 = vsyncpa [#allocation4], 1 }
 0x71e   :  { %9375 = vsyncpa [#allocation6], 1 }
 0x71f   :  { %9376 = vsyncpa [#allocation9], 1 }
 0x720   :  { %9377 = vsyncpa [#allocation12], 1 }
 0x721   :  { %9378 = vsyncpa [#allocation15], 1 }

</bundles_post_ra>
